<compile_context>
chip_gen: v5e
topology: v5e:2x2
jax: 0.10.0
libtpu: 0.0.40
codegen_flags: <defaults>
</compile_context>

<pallas_src>
import functools
import math

import jax
import jax.numpy as jnp
import numpy as np
from jax import lax
from jax.experimental import pallas as pl
from jax.experimental.pallas import tpu as pltpu


# --------------------------------------------------------------------------- #
# Fused FPN kernel: one grid step == one batch element.
# --------------------------------------------------------------------------- #
def _fpn_kernel(c3_ref, c4_ref, c5_ref, d6_ref, d7_ref,
                wp3_ref, bp3_ref, wp4_ref, bp4_ref, wp5_ref, bp5_ref,
                w3_ref, b3_ref, w4_ref, b4_ref, w5_ref, b5_ref,
                w6_ref, b6_ref, w7_ref, b7_ref,
                p3_ref, p4_ref, p5_ref, p6_ref, p7_ref,
                pad3_ref, pad4_ref, pad5_ref, pad6_ref,
                *, dims):
    (H3, W3), (H4, W4), (H5, W5), (H6, W6), _ = dims
    f32, bf16 = jnp.float32, jnp.bfloat16
    F = p3_ref.shape[-1]

    def conv1x1(x_ref, w_ref, b_ref):
        # (1, S, Ci) -> (S, F); bf16 MXU inputs, f32 accumulation, f32 bias.
        return jnp.dot(x_ref[0].astype(bf16), w_ref[...],
                       preferred_element_type=f32) + b_ref[...]

    def upsample2x(x_flat, h_in, w_in, h_out, w_out):
        # Nearest-neighbour upsample as pure broadcasts (no one-hot matmul,
        # no gather). Exact for the FPN size relation h_out in {2h-1, 2h},
        # where PyTorch's nearest index (i*h_in)//h_out == i//2.
        x = x_flat.reshape(h_in, 1, w_in, F)
        x = jnp.broadcast_to(x, (h_in, 2, w_in, F)).reshape(2 * h_in, w_in, F)
        x = x.reshape(2 * h_in, w_in, 1, F)
        x = jnp.broadcast_to(x, (2 * h_in, w_in, 2, F))
        x = x.reshape(2 * h_in, 2 * w_in, F)
        return x[:h_out, :w_out, :].reshape(h_out * w_out, F)

    def conv3x3_same(pad_ref, x_flat, H, W, w_ref, b_ref):
        # Zero only the 1-px halo ring every call (interior is fully
        # overwritten; scratch is per-core so a once-only init would be
        # unsafe under the "parallel" batch split on v7x).
        pad_ref[0:1, :, :] = jnp.zeros((1, W + 2, F), f32)
        pad_ref[H + 1:H + 2, :, :] = jnp.zeros((1, W + 2, F), f32)
        pad_ref[:, 0:1, :] = jnp.zeros((H + 2, 1, F), f32)
        pad_ref[:, W + 1:W + 2, :] = jnp.zeros((H + 2, 1, F), f32)
        pad_ref[1:H + 1, 1:W + 1, :] = x_flat.reshape(H, W, F)
        padv = pad_ref[...].astype(bf16)          # single bf16 cast per tile
        # 9-tap accumulation: nine (H*W, F) x (F, F) MXU matmuls, f32 acc.
        acc = None
        for dy in range(3):
            for dx in range(3):
                tap = padv[dy:dy + H, dx:dx + W, :].reshape(H * W, F)
                part = jnp.dot(tap, w_ref[dy * 3 + dx],
                               preferred_element_type=f32)
                acc = part if acc is None else acc + part
        return acc + b_ref[...]

    # Lateral 1x1 projections + top-down nearest merge, all VMEM-resident.
    p5_lat = conv1x1(c5_ref, wp5_ref, bp5_ref)                        # (S5, F)
    p4_lat = (conv1x1(c4_ref, wp4_ref, bp4_ref)
              + upsample2x(p5_lat, H5, W5, H4, W4))                   # (S4, F)
    p3_lat = (conv1x1(c3_ref, wp3_ref, bp3_ref)
              + upsample2x(p4_lat, H4, W4, H3, W3))                   # (S3, F)

    # Output 3x3 convs (stride 1, SAME).
    p3 = conv3x3_same(pad3_ref, p3_lat, H3, W3, w3_ref, b3_ref)
    p4 = conv3x3_same(pad4_ref, p4_lat, H4, W4, w4_ref, b4_ref)
    p5 = conv3x3_same(pad5_ref, p5_lat, H5, W5, w5_ref, b5_ref)

    # conv(stride=2, pad=1) == stride-1 SAME conv sampled at even positions;
    # the sampling is a tiny one-hot pick matmul (exact, <2% of total FLOPs).
    # pad5_ref is intentionally reused by conv_5 and conv_out6 (sequential).
    # TODO(synk): compute P6/P7 directly at stride 2 via strided taps
    # (pad_ref[pl.ds(dy, H6, 2), pl.ds(dx, W6, 2), :]) to drop d6/d7 and the
    # remaining ~4x extra conv_out6/7 MXU work.
    p6 = jnp.dot(d6_ref[...],
                 conv3x3_same(pad5_ref, p5, H5, W5, w6_ref, b6_ref),
                 preferred_element_type=f32)                          # (S6, F)
    p7 = jnp.dot(d7_ref[...],
                 conv3x3_same(pad6_ref, jnp.maximum(p6, 0.0), H6, W6,
                              w7_ref, b7_ref),
                 preferred_element_type=f32)                          # (S7, F)

    p3_ref[0] = p3
    p4_ref[0] = p4
    p5_ref[0] = p5
    p6_ref[0] = p6
    p7_ref[0] = p7


# --------------------------------------------------------------------------- #
# Host-precomputed one-hot matrices for the (tiny) stride-2 output sampling.
# --------------------------------------------------------------------------- #
def _stride2_pick_matrix(h_in, w_in):
    # Pick the (2*oh, 2*ow) rows of a stride-1 SAME conv result.
    h_out = (h_in - 1) // 2 + 1
    w_out = (w_in - 1) // 2 + 1
    m = np.zeros((h_out * w_out, h_in * w_in), np.float32)
    for oh in range(h_out):
        for ow in range(w_out):
            m[oh * w_out + ow, (2 * oh) * w_in + 2 * ow] = 1.0
    return m


# --------------------------------------------------------------------------- #
# Wrapper: builds (and caches) one fused pallas_call per input-shape set.
# --------------------------------------------------------------------------- #
_FPN_CACHE = {}


def _vmem_limit_bytes():
    cap = 64 * 1024 * 1024
    try:
        cap = int(getattr(pltpu.get_tpu_info(), "vmem_capacity_bytes", cap))
    except Exception:
        pass
    # ~96 MiB on v5e/v6e (128 MiB physical), ~48 MiB on v7x (64 MiB physical).
    return min(cap * 3 // 4, 100 * 1024 * 1024)


def _build_fpn_fn(N, H3, W3, C3, H4, W4, C4, H5, W5, C5, F):
    H6, W6 = (H5 - 1) // 2 + 1, (W5 - 1) // 2 + 1
    H7, W7 = (H6 - 1) // 2 + 1, (W6 - 1) // 2 + 1
    hw = ((H3, W3), (H4, W4), (H5, W5), (H6, W6), (H7, W7))

    # The broadcast-based nearest upsample is exact for the usual FPN
    # (stride 8/16/32) size relation.
    assert H3 in (2 * H4 - 1, 2 * H4) and W3 in (2 * W4 - 1, 2 * W4), (hw,)
    assert H4 in (2 * H5 - 1, 2 * H5) and W4 in (2 * W5 - 1, 2 * W5), (hw,)
    # TODO(synk): general (non ~2x) nearest ratios would need a gather or
    # one-hot fallback for the top-down merge.

    d6 = jnp.asarray(_stride2_pick_matrix(H5, W5))
    d7 = jnp.asarray(_stride2_pick_matrix(H6, W6))

    def full(shape):
        # TODO(synk): pipeline_mode=pl.Buffered(1) on these constant-index
        # blocks would halve their (double-buffered) VMEM footprint.
        return pl.BlockSpec(shape, lambda n: (0,) * len(shape))

    def per_image(S, C):
        return pl.BlockSpec((1, S, C), lambda n: (n, 0, 0))

    in_specs = [
        per_image(H3 * W3, C3), per_image(H4 * W4, C4), per_image(H5 * W5, C5),
        full(d6.shape), full(d7.shape),
        full((C3, F)), full((1, F)),
        full((C4, F)), full((1, F)),
        full((C5, F)), full((1, F)),
    ] + [spec for _ in range(5)
         for spec in (full((9, F, F)), full((1, F)))]
    out_specs = [per_image(h * w, F) for h, w in hw]
    out_shape = [jax.ShapeDtypeStruct((N, h * w, F), jnp.float32)
                 for h, w in hw]
    # f32 halo buffers for the 3x3 convs; pad5 shared by conv_5 / conv_out6.
    scratch_shapes = [pltpu.VMEM((h + 2, w + 2, F), jnp.float32)
                      for h, w in ((H3, W3), (H4, W4), (H5, W5), (H6, W6))]

    call = pl.pallas_call(
        functools.partial(_fpn_kernel, dims=hw),
        out_shape=out_shape,
        grid=(N,),
        in_specs=in_specs,
        out_specs=out_specs,
        scratch_shapes=scratch_shapes,
        compiler_params=pltpu.CompilerParams(
            dimension_semantics=("parallel",),           # batch across TCs
            vmem_limit_bytes=_vmem_limit_bytes()),
    )
    # TODO(synk): at real FCOS resolutions (P3 ~ 100x152x256) tile the P3/P4
    # levels into row strips with a 1-row halo (extra "parallel" grid axis)
    # so whole-frame blocks fit v7x's 64 MiB VMEM and both TCs stay busy
    # even when N == 1.

    def fn(c3_nchw, c4_nchw, c5_nchw, params):
        bf16 = jnp.bfloat16

        def to_flat(x):                       # NCHW -> (N, H*W, C), lane dense
            n, c, h, w = x.shape
            return jnp.transpose(x, (0, 2, 3, 1)).reshape(n, h * w, c)

        def w1(p, ci):                        # (1,1,Ci,F) -> (Ci,F) bf16
            return p["w"].reshape(ci, F).astype(bf16)

        def w9(p):                            # (3,3,F,F) -> (9,F,F) bf16
            return p["w"].reshape(9, F, F).astype(bf16)

        def b2(p):
            return p["b"].reshape(1, F)

        args = [
            to_flat(c3_nchw), to_flat(c4_nchw), to_flat(c5_nchw),
            d6, d7,
            w1(params["prj_3"], C3), b2(params["prj_3"]),
            w1(params["prj_4"], C4), b2(params["prj_4"]),
            w1(params["prj_5"], C5), b2(params["prj_5"]),
            w9(params["conv_3"]), b2(params["conv_3"]),
            w9(params["conv_4"]), b2(params["conv_4"]),
            w9(params["conv_5"]), b2(params["conv_5"]),
            w9(params["conv_out6"]), b2(params["conv_out6"]),
            w9(params["conv_out7"]), b2(params["conv_out7"]),
        ]
        outs = call(*args)
        return [jnp.transpose(o.reshape(o.shape[0], h, w, F), (0, 3, 1, 2))
                for o, (h, w) in zip(outs, hw)]

    return jax.jit(fn)


def fpn_forward(params, x):
    """x = [C3, C4, C5] in NCHW; returns [P3, P4, P5, P6, P7] in NCHW."""
    c3, c4, c5 = x
    F = params["prj_3"]["w"].shape[-1]
    key = (c3.shape, c4.shape, c5.shape, F)
    if key not in _FPN_CACHE:
        N, C3c, H3, W3 = c3.shape
        _, C4c, H4, W4 = c4.shape
        _, C5c, H5, W5 = c5.shape
        _FPN_CACHE[key] = _build_fpn_fn(N, H3, W3, C3c, H4, W4, C4c,
                                        H5, W5, C5c, F)
    return _FPN_CACHE[key](c3, c4, c5, params)


# --------------------------------------------------------------------------- #
# Deterministic init mirroring FPN.init_conv_kaiming (kaiming_uniform_, a=1).
# Weights stored HWIO; biases zero.
# --------------------------------------------------------------------------- #
def init_params(key, c3_in=512, c4_in=1024, c5_in=2048, features=256):
    def conv(k, ksize, ci, co):
        fan_in = ksize * ksize * ci
        bound = math.sqrt(6.0 / (2.0 * fan_in))     # gain(a=1) * sqrt(3/fan_in)
        w = jax.random.uniform(k, (ksize, ksize, ci, co), jnp.float32,
                               -bound, bound)
        return {"w": w, "b": jnp.zeros((co,), jnp.float32)}

    ks = jax.random.split(key, 8)
    return {
        "prj_3": conv(ks[0], 1, c3_in, features),
        "prj_4": conv(ks[1], 1, c4_in, features),
        "prj_5": conv(ks[2], 1, c5_in, features),
        "conv_3": conv(ks[3], 3, features, features),
        "conv_4": conv(ks[4], 3, features, features),
        "conv_5": conv(ks[5], 3, features, features),
        "conv_out6": conv(ks[6], 3, features, features),
        "conv_out7": conv(ks[7], 3, features, features),
    }


# --------------------------------------------------------------------------- #
# Pure-JAX references (correctness checks only).
#   mixed=True mirrors the kernel's precision policy: bf16 MXU inputs,
#   f32 accumulation.  mixed=False is the exact f32 module semantics.
# --------------------------------------------------------------------------- #
def _conv_ref(x, w, b, stride=1, mixed=False):
    pad = (w.shape[0] - 1) // 2
    if mixed:
        x = x.astype(jnp.bfloat16)
        w = w.astype(jnp.bfloat16)
        prec = lax.Precision.DEFAULT
    else:
        prec = lax.Precision.HIGHEST
    return lax.conv_general_dilated(
        x, w, window_strides=(stride, stride),
        padding=((pad, pad), (pad, pad)),
        dimension_numbers=("NHWC", "HWIO", "NHWC"),
        preferred_element_type=jnp.float32,
        precision=prec) + b


def _upsample_nearest_ref(x, h_out, w_out):
    _, h, w, _ = x.shape
    ih = (np.arange(h_out) * h) // h_out
    iw = (np.arange(w_out) * w) // w_out
    return x[:, ih][:, :, iw]


def fpn_ref(params, x, mixed=False):
    c3, c4, c5 = [jnp.transpose(t, (0, 2, 3, 1)) for t in x]
    cv = functools.partial(_conv_ref, mixed=mixed)
    p3 = cv(c3, params["prj_3"]["w"], params["prj_3"]["b"])
    p4 = cv(c4, params["prj_4"]["w"], params["prj_4"]["b"])
    p5 = cv(c5, params["prj_5"]["w"], params["prj_5"]["b"])
    p4 = p4 + _upsample_nearest_ref(p5, c4.shape[1], c4.shape[2])
    p3 = p3 + _upsample_nearest_ref(p4, c3.shape[1], c3.shape[2])
    p3 = cv(p3, params["conv_3"]["w"], params["conv_3"]["b"])
    p4 = cv(p4, params["conv_4"]["w"], params["conv_4"]["b"])
    p5 = cv(p5, params["conv_5"]["w"], params["conv_5"]["b"])
    p6 = cv(p5, params["conv_out6"]["w"], params["conv_out6"]["b"], stride=2)
    p7 = cv(jnp.maximum(p6, 0.0), params["conv_out7"]["w"],
            params["conv_out7"]["b"], stride=2)
    return [jnp.transpose(t, (0, 3, 1, 2)) for t in (p3, p4, p5, p6, p7)]


if __name__ == "__main__":
    # Small, shape-consistent stand-in for the real FPN:
    #   C3: 64ch 16x16, C4: 128ch 8x8, C5: 256ch 4x4 (strides 8/16/32),
    #   features=128 keeps the channel axis lane-dense (real module uses 256,
    #   which also exactly fills the 256-wide MXU on v6e/v7x).
    batch = 2
    features = 128
    chans = (64, 128, 256)
    sizes = ((16, 16), (8, 8), (4, 4))

    key = jax.random.PRNGKey(0)
    pkey, k3, k4, k5 = jax.random.split(key, 4)
    params = init_params(pkey, *chans, features=features)
    C3 = jax.random.normal(k3, (batch, chans[0]) + sizes[0], jnp.float32)
    C4 = jax.random.normal(k4, (batch, chans[1]) + sizes[1], jnp.float32)
    C5 = jax.random.normal(k5, (batch, chans[2]) + sizes[2], jnp.float32)

    outs = fpn_forward(params, [C3, C4, C5])
    jax.block_until_ready(outs)

    # Tight check vs a reference using the same mixed precision (bf16 MXU
    # inputs, f32 accumulation) -> verifies taps/weights/structure exactly.
    refs_mixed = fpn_ref(params, [C3, C4, C5], mixed=True)
    for got, want in zip(outs, refs_mixed):
        np.testing.assert_allclose(np.asarray(got), np.asarray(want),
                                   rtol=5e-3, atol=5e-3)

    # Loose sanity check vs exact f32 module semantics (the only difference
    # is bf16 rounding of the MXU inputs).
    refs_f32 = fpn_ref(params, [C3, C4, C5], mixed=False)
    for got, want in zip(outs, refs_f32):
        np.testing.assert_allclose(np.asarray(got), np.asarray(want),
                                   rtol=3e-2, atol=1e-1)

    print("KERNEL_OK")
</pallas_src>

<mosaic_0001>
module attributes {stable_mosaic.version = 11 : i64} {
  func.func @_fpn_kernel(%arg0: i32, %arg1: memref<1x256x64xf32, #tpu.memory_space<vmem>>, %arg2: memref<1x64x128xf32, #tpu.memory_space<vmem>>, %arg3: memref<1x16x256xf32, #tpu.memory_space<vmem>>, %arg4: memref<4x16xf32, #tpu.memory_space<vmem>>, %arg5: memref<1x4xf32, #tpu.memory_space<vmem>>, %arg6: memref<64x128xbf16, #tpu.memory_space<vmem>>, %arg7: memref<1x128xf32, #tpu.memory_space<vmem>>, %arg8: memref<128x128xbf16, #tpu.memory_space<vmem>>, %arg9: memref<1x128xf32, #tpu.memory_space<vmem>>, %arg10: memref<256x128xbf16, #tpu.memory_space<vmem>>, %arg11: memref<1x128xf32, #tpu.memory_space<vmem>>, %arg12: memref<9x128x128xbf16, #tpu.memory_space<vmem>>, %arg13: memref<1x128xf32, #tpu.memory_space<vmem>>, %arg14: memref<9x128x128xbf16, #tpu.memory_space<vmem>>, %arg15: memref<1x128xf32, #tpu.memory_space<vmem>>, %arg16: memref<9x128x128xbf16, #tpu.memory_space<vmem>>, %arg17: memref<1x128xf32, #tpu.memory_space<vmem>>, %arg18: memref<9x128x128xbf16, #tpu.memory_space<vmem>>, %arg19: memref<1x128xf32, #tpu.memory_space<vmem>>, %arg20: memref<9x128x128xbf16, #tpu.memory_space<vmem>>, %arg21: memref<1x128xf32, #tpu.memory_space<vmem>>, %arg22: memref<1x256x128xf32, #tpu.memory_space<vmem>>, %arg23: memref<1x64x128xf32, #tpu.memory_space<vmem>>, %arg24: memref<1x16x128xf32, #tpu.memory_space<vmem>>, %arg25: memref<1x4x128xf32, #tpu.memory_space<vmem>>, %arg26: memref<1x1x128xf32, #tpu.memory_space<vmem>>, %arg27: memref<18x18x128xf32, #tpu.memory_space<vmem>>, %arg28: memref<10x10x128xf32, #tpu.memory_space<vmem>>, %arg29: memref<6x6x128xf32, #tpu.memory_space<vmem>>, %arg30: memref<4x4x128xf32, #tpu.memory_space<vmem>>) attributes {dimension_semantics = [#tpu.dimension_semantics<parallel>], iteration_bounds = array<i64: 2>, scalar_prefetch = 0 : i64, scratch_operands = 4 : i64, tpu.core_type = #tpu.core_type<tc>, window_params = [{transform_indices = @transform_0, window_bounds = array<i64: 1, 256, 64>}, {transform_indices = @transform_1, window_bounds = array<i64: 1, 64, 128>}, {transform_indices = @transform_2, window_bounds = array<i64: 1, 16, 256>}, {pipeline_mode = #tpu.pipeline_mode<synchronous>, transform_indices = @transform_3, window_bounds = array<i64: 4, 16>}, {pipeline_mode = #tpu.pipeline_mode<synchronous>, transform_indices = @transform_4, window_bounds = array<i64: 1, 4>}, {pipeline_mode = #tpu.pipeline_mode<synchronous>, transform_indices = @transform_5, window_bounds = array<i64: 64, 128>}, {pipeline_mode = #tpu.pipeline_mode<synchronous>, transform_indices = @transform_6, window_bounds = array<i64: 1, 128>}, {pipeline_mode = #tpu.pipeline_mode<synchronous>, transform_indices = @transform_7, window_bounds = array<i64: 128, 128>}, {pipeline_mode = #tpu.pipeline_mode<synchronous>, transform_indices = @transform_8, window_bounds = array<i64: 1, 128>}, {pipeline_mode = #tpu.pipeline_mode<synchronous>, transform_indices = @transform_9, window_bounds = array<i64: 256, 128>}, {pipeline_mode = #tpu.pipeline_mode<synchronous>, transform_indices = @transform_10, window_bounds = array<i64: 1, 128>}, {pipeline_mode = #tpu.pipeline_mode<synchronous>, transform_indices = @transform_11, window_bounds = array<i64: 9, 128, 128>}, {pipeline_mode = #tpu.pipeline_mode<synchronous>, transform_indices = @transform_12, window_bounds = array<i64: 1, 128>}, {pipeline_mode = #tpu.pipeline_mode<synchronous>, transform_indices = @transform_13, window_bounds = array<i64: 9, 128, 128>}, {pipeline_mode = #tpu.pipeline_mode<synchronous>, transform_indices = @transform_14, window_bounds = array<i64: 1, 128>}, {pipeline_mode = #tpu.pipeline_mode<synchronous>, transform_indices = @transform_15, window_bounds = array<i64: 9, 128, 128>}, {pipeline_mode = #tpu.pipeline_mode<synchronous>, transform_indices = @transform_16, window_bounds = array<i64: 1, 128>}, {pipeline_mode = #tpu.pipeline_mode<synchronous>, transform_indices = @transform_17, window_bounds = array<i64: 9, 128, 128>}, {pipeline_mode = #tpu.pipeline_mode<synchronous>, transform_indices = @transform_18, window_bounds = array<i64: 1, 128>}, {pipeline_mode = #tpu.pipeline_mode<synchronous>, transform_indices = @transform_19, window_bounds = array<i64: 9, 128, 128>}, {pipeline_mode = #tpu.pipeline_mode<synchronous>, transform_indices = @transform_20, window_bounds = array<i64: 1, 128>}, {transform_indices = @transform_21, window_bounds = array<i64: 1, 256, 128>}, {transform_indices = @transform_22, window_bounds = array<i64: 1, 64, 128>}, {transform_indices = @transform_23, window_bounds = array<i64: 1, 16, 128>}, {transform_indices = @transform_24, window_bounds = array<i64: 1, 4, 128>}, {transform_indices = @transform_25, window_bounds = array<i64: 1, 1, 128>}]} {
    %c0 = arith.constant 0 : index
    %c0_0 = arith.constant 0 : index
    %c0_1 = arith.constant 0 : index
    %0 = vector.load %arg3[%c0, %c0_0, %c0_1] : memref<1x16x256xf32, #tpu.memory_space<vmem>>, vector<1x16x256xf32>
    %1 = vector.shape_cast %0 : vector<1x16x256xf32> to vector<16x256xf32>
    %2 = arith.truncf %1 : vector<16x256xf32> to vector<16x256xbf16>
    %c0_2 = arith.constant 0 : index
    %c0_3 = arith.constant 0 : index
    %3 = vector.load %arg10[%c0_2, %c0_3] : memref<256x128xbf16, #tpu.memory_space<vmem>>, vector<256x128xbf16>
    %cst = arith.constant dense<0.000000e+00> : vector<16x128xf32>
    %4 = tpu.matmul %2, %3, %cst {dimension_numbers = #tpu.dot_dimension_numbers<[1], [0], [0], [1], [0, 0, 1, 1], [], []>} : vector<16x256xbf16>, vector<256x128xbf16>, vector<16x128xf32> -> vector<16x128xf32>
    %c0_4 = arith.constant 0 : index
    %c0_5 = arith.constant 0 : index
    %5 = vector.load %arg11[%c0_4, %c0_5] : memref<1x128xf32, #tpu.memory_space<vmem>>, vector<1x128xf32>
    %6 = vector.broadcast %5 : vector<1x128xf32> to vector<16x128xf32>
    %7 = arith.addf %4, %6 : vector<16x128xf32>
    %c0_6 = arith.constant 0 : index
    %c0_7 = arith.constant 0 : index
    %c0_8 = arith.constant 0 : index
    %8 = vector.load %arg2[%c0_6, %c0_7, %c0_8] : memref<1x64x128xf32, #tpu.memory_space<vmem>>, vector<1x64x128xf32>
    %9 = vector.shape_cast %8 : vector<1x64x128xf32> to vector<64x128xf32>
    %10 = arith.truncf %9 : vector<64x128xf32> to vector<64x128xbf16>
    %c0_9 = arith.constant 0 : index
    %c0_10 = arith.constant 0 : index
    %11 = vector.load %arg8[%c0_9, %c0_10] : memref<128x128xbf16, #tpu.memory_space<vmem>>, vector<128x128xbf16>
    %cst_11 = arith.constant dense<0.000000e+00> : vector<64x128xf32>
    %12 = tpu.matmul %10, %11, %cst_11 {dimension_numbers = #tpu.dot_dimension_numbers<[1], [0], [0], [1], [0, 0, 1, 1], [], []>} : vector<64x128xbf16>, vector<128x128xbf16>, vector<64x128xf32> -> vector<64x128xf32>
    %c0_12 = arith.constant 0 : index
    %c0_13 = arith.constant 0 : index
    %13 = vector.load %arg9[%c0_12, %c0_13] : memref<1x128xf32, #tpu.memory_space<vmem>>, vector<1x128xf32>
    %14 = vector.broadcast %13 : vector<1x128xf32> to vector<64x128xf32>
    %15 = arith.addf %12, %14 : vector<64x128xf32>
    %16 = vector.shape_cast %7 : vector<16x128xf32> to vector<4x1x4x128xf32>
    %17 = vector.shape_cast %16 : vector<4x1x4x128xf32> to vector<4x1x4x128xf32>
    %18 = vector.broadcast %17 : vector<4x1x4x128xf32> to vector<4x2x4x128xf32>
    %19 = vector.shape_cast %18 : vector<4x2x4x128xf32> to vector<8x4x128xf32>
    %20 = vector.shape_cast %19 : vector<8x4x128xf32> to vector<8x4x1x128xf32>
    %21 = vector.shape_cast %20 : vector<8x4x1x128xf32> to vector<8x4x1x128xf32>
    %22 = vector.broadcast %21 : vector<8x4x1x128xf32> to vector<8x4x2x128xf32>
    %23 = vector.shape_cast %22 : vector<8x4x2x128xf32> to vector<8x8x128xf32>
    %24 = vector.shape_cast %23 : vector<8x8x128xf32> to vector<64x128xf32>
    %25 = arith.addf %15, %24 : vector<64x128xf32>
    %c0_14 = arith.constant 0 : index
    %c0_15 = arith.constant 0 : index
    %c0_16 = arith.constant 0 : index
    %26 = vector.load %arg1[%c0_14, %c0_15, %c0_16] : memref<1x256x64xf32, #tpu.memory_space<vmem>>, vector<1x256x64xf32>
    %27 = vector.shape_cast %26 : vector<1x256x64xf32> to vector<256x64xf32>
    %28 = arith.truncf %27 : vector<256x64xf32> to vector<256x64xbf16>
    %c0_17 = arith.constant 0 : index
    %c0_18 = arith.constant 0 : index
    %29 = vector.load %arg6[%c0_17, %c0_18] : memref<64x128xbf16, #tpu.memory_space<vmem>>, vector<64x128xbf16>
    %cst_19 = arith.constant dense<0.000000e+00> : vector<256x128xf32>
    %30 = tpu.matmul %28, %29, %cst_19 {dimension_numbers = #tpu.dot_dimension_numbers<[1], [0], [0], [1], [0, 0, 1, 1], [], []>} : vector<256x64xbf16>, vector<64x128xbf16>, vector<256x128xf32> -> vector<256x128xf32>
    %c0_20 = arith.constant 0 : index
    %c0_21 = arith.constant 0 : index
    %31 = vector.load %arg7[%c0_20, %c0_21] : memref<1x128xf32, #tpu.memory_space<vmem>>, vector<1x128xf32>
    %32 = vector.broadcast %31 : vector<1x128xf32> to vector<256x128xf32>
    %33 = arith.addf %30, %32 : vector<256x128xf32>
    %34 = vector.shape_cast %25 : vector<64x128xf32> to vector<8x1x8x128xf32>
    %35 = vector.shape_cast %34 : vector<8x1x8x128xf32> to vector<8x1x8x128xf32>
    %36 = vector.broadcast %35 : vector<8x1x8x128xf32> to vector<8x2x8x128xf32>
    %37 = vector.shape_cast %36 : vector<8x2x8x128xf32> to vector<16x8x128xf32>
    %38 = vector.shape_cast %37 : vector<16x8x128xf32> to vector<16x8x1x128xf32>
    %39 = vector.shape_cast %38 : vector<16x8x1x128xf32> to vector<16x8x1x128xf32>
    %40 = vector.broadcast %39 : vector<16x8x1x128xf32> to vector<16x8x2x128xf32>
    %41 = vector.shape_cast %40 : vector<16x8x2x128xf32> to vector<16x16x128xf32>
    %42 = vector.shape_cast %41 : vector<16x16x128xf32> to vector<256x128xf32>
    %43 = arith.addf %33, %42 : vector<256x128xf32>
    %cst_22 = arith.constant 0.000000e+00 : f32
    %44 = vector.broadcast %cst_22 : f32 to vector<1x18x128xf32>
    %c0_23 = arith.constant 0 : index
    %c0_24 = arith.constant 0 : index
    %c0_25 = arith.constant 0 : index
    %45 = vector.load %arg27[%c0_23, %c0_24, %c0_25] : memref<18x18x128xf32, #tpu.memory_space<vmem>>, vector<1x18x128xf32>
    tpu.vector_store %arg27[%c0_23, %c0_24, %c0_25], %44 {strides = array<i32>} : memref<18x18x128xf32, #tpu.memory_space<vmem>>, vector<1x18x128xf32>,
    %cst_26 = arith.constant 0.000000e+00 : f32
    %46 = vector.broadcast %cst_26 : f32 to vector<1x18x128xf32>
    %c17 = arith.constant 17 : index
    %c0_27 = arith.constant 0 : index
    %c0_28 = arith.constant 0 : index
    %47 = vector.load %arg27[%c17, %c0_27, %c0_28] : memref<18x18x128xf32, #tpu.memory_space<vmem>>, vector<1x18x128xf32>
    tpu.vector_store %arg27[%c17, %c0_27, %c0_28], %46 {strides = array<i32>} : memref<18x18x128xf32, #tpu.memory_space<vmem>>, vector<1x18x128xf32>,
    %cst_29 = arith.constant 0.000000e+00 : f32
    %48 = vector.broadcast %cst_29 : f32 to vector<18x1x128xf32>
    %c0_30 = arith.constant 0 : index
    %c0_31 = arith.constant 0 : index
    %c0_32 = arith.constant 0 : index
    %49 = vector.load %arg27[%c0_30, %c0_31, %c0_32] : memref<18x18x128xf32, #tpu.memory_space<vmem>>, vector<18x1x128xf32>
    tpu.vector_store %arg27[%c0_30, %c0_31, %c0_32], %48 {strides = array<i32>} : memref<18x18x128xf32, #tpu.memory_space<vmem>>, vector<18x1x128xf32>,
    %cst_33 = arith.constant 0.000000e+00 : f32
    %50 = vector.broadcast %cst_33 : f32 to vector<18x1x128xf32>
    %c0_34 = arith.constant 0 : index
    %c17_35 = arith.constant 17 : index
    %c0_36 = arith.constant 0 : index
    %51 = vector.load %arg27[%c0_34, %c17_35, %c0_36] : memref<18x18x128xf32, #tpu.memory_space<vmem>>, vector<18x1x128xf32>
    tpu.vector_store %arg27[%c0_34, %c17_35, %c0_36], %50 {strides = array<i32>} : memref<18x18x128xf32, #tpu.memory_space<vmem>>, vector<18x1x128xf32>,
    %52 = vector.shape_cast %43 : vector<256x128xf32> to vector<16x16x128xf32>
    %c1 = arith.constant 1 : index
    %c1_37 = arith.constant 1 : index
    %c0_38 = arith.constant 0 : index
    %53 = vector.load %arg27[%c1, %c1_37, %c0_38] : memref<18x18x128xf32, #tpu.memory_space<vmem>>, vector<16x16x128xf32>
    tpu.vector_store %arg27[%c1, %c1_37, %c0_38], %52 {strides = array<i32>} : memref<18x18x128xf32, #tpu.memory_space<vmem>>, vector<16x16x128xf32>,
    %c0_39 = arith.constant 0 : index
    %c0_40 = arith.constant 0 : index
    %c0_41 = arith.constant 0 : index
    %54 = vector.load %arg27[%c0_39, %c0_40, %c0_41] : memref<18x18x128xf32, #tpu.memory_space<vmem>>, vector<18x18x128xf32>
    %55 = arith.truncf %54 : vector<18x18x128xf32> to vector<18x18x128xbf16>
    %56 = vector.extract_strided_slice %55 {offsets = [0, 0, 0], sizes = [16, 16, 128], strides = [1, 1, 1]} : vector<18x18x128xbf16> to vector<16x16x128xbf16>
    %57 = vector.shape_cast %56 : vector<16x16x128xbf16> to vector<256x128xbf16>
    %c0_42 = arith.constant 0 : index
    %c0_43 = arith.constant 0 : index
    %c0_44 = arith.constant 0 : index
    %58 = vector.load %arg12[%c0_42, %c0_43, %c0_44] : memref<9x128x128xbf16, #tpu.memory_space<vmem>>, vector<1x128x128xbf16>
    %59 = vector.shape_cast %58 : vector<1x128x128xbf16> to vector<128x128xbf16>
    %cst_45 = arith.constant dense<0.000000e+00> : vector<256x128xf32>
    %60 = tpu.matmul %57, %59, %cst_45 {dimension_numbers = #tpu.dot_dimension_numbers<[1], [0], [0], [1], [0, 0, 1, 1], [], []>} : vector<256x128xbf16>, vector<128x128xbf16>, vector<256x128xf32> -> vector<256x128xf32>
    %61 = vector.extract_strided_slice %55 {offsets = [0, 1, 0], sizes = [16, 16, 128], strides = [1, 1, 1]} : vector<18x18x128xbf16> to vector<16x16x128xbf16>
    %62 = vector.shape_cast %61 : vector<16x16x128xbf16> to vector<256x128xbf16>
    %c1_46 = arith.constant 1 : index
    %c0_47 = arith.constant 0 : index
    %c0_48 = arith.constant 0 : index
    %63 = vector.load %arg12[%c1_46, %c0_47, %c0_48] : memref<9x128x128xbf16, #tpu.memory_space<vmem>>, vector<1x128x128xbf16>
    %64 = vector.shape_cast %63 : vector<1x128x128xbf16> to vector<128x128xbf16>
    %cst_49 = arith.constant dense<0.000000e+00> : vector<256x128xf32>
    %65 = tpu.matmul %62, %64, %cst_49 {dimension_numbers = #tpu.dot_dimension_numbers<[1], [0], [0], [1], [0, 0, 1, 1], [], []>} : vector<256x128xbf16>, vector<128x128xbf16>, vector<256x128xf32> -> vector<256x128xf32>
    %66 = arith.addf %60, %65 : vector<256x128xf32>
    %67 = vector.extract_strided_slice %55 {offsets = [0, 2, 0], sizes = [16, 16, 128], strides = [1, 1, 1]} : vector<18x18x128xbf16> to vector<16x16x128xbf16>
    %68 = vector.shape_cast %67 : vector<16x16x128xbf16> to vector<256x128xbf16>
    %c2 = arith.constant 2 : index
    %c0_50 = arith.constant 0 : index
    %c0_51 = arith.constant 0 : index
    %69 = vector.load %arg12[%c2, %c0_50, %c0_51] : memref<9x128x128xbf16, #tpu.memory_space<vmem>>, vector<1x128x128xbf16>
    %70 = vector.shape_cast %69 : vector<1x128x128xbf16> to vector<128x128xbf16>
    %cst_52 = arith.constant dense<0.000000e+00> : vector<256x128xf32>
    %71 = tpu.matmul %68, %70, %cst_52 {dimension_numbers = #tpu.dot_dimension_numbers<[1], [0], [0], [1], [0, 0, 1, 1], [], []>} : vector<256x128xbf16>, vector<128x128xbf16>, vector<256x128xf32> -> vector<256x128xf32>
    %72 = arith.addf %66, %71 : vector<256x128xf32>
    %73 = vector.extract_strided_slice %55 {offsets = [1, 0, 0], sizes = [16, 16, 128], strides = [1, 1, 1]} : vector<18x18x128xbf16> to vector<16x16x128xbf16>
    %74 = vector.shape_cast %73 : vector<16x16x128xbf16> to vector<256x128xbf16>
    %c3 = arith.constant 3 : index
    %c0_53 = arith.constant 0 : index
    %c0_54 = arith.constant 0 : index
    %75 = vector.load %arg12[%c3, %c0_53, %c0_54] : memref<9x128x128xbf16, #tpu.memory_space<vmem>>, vector<1x128x128xbf16>
    %76 = vector.shape_cast %75 : vector<1x128x128xbf16> to vector<128x128xbf16>
    %cst_55 = arith.constant dense<0.000000e+00> : vector<256x128xf32>
    %77 = tpu.matmul %74, %76, %cst_55 {dimension_numbers = #tpu.dot_dimension_numbers<[1], [0], [0], [1], [0, 0, 1, 1], [], []>} : vector<256x128xbf16>, vector<128x128xbf16>, vector<256x128xf32> -> vector<256x128xf32>
    %78 = arith.addf %72, %77 : vector<256x128xf32>
    %79 = vector.extract_strided_slice %55 {offsets = [1, 1, 0], sizes = [16, 16, 128], strides = [1, 1, 1]} : vector<18x18x128xbf16> to vector<16x16x128xbf16>
    %80 = vector.shape_cast %79 : vector<16x16x128xbf16> to vector<256x128xbf16>
    %c4 = arith.constant 4 : index
    %c0_56 = arith.constant 0 : index
    %c0_57 = arith.constant 0 : index
    %81 = vector.load %arg12[%c4, %c0_56, %c0_57] : memref<9x128x128xbf16, #tpu.memory_space<vmem>>, vector<1x128x128xbf16>
    %82 = vector.shape_cast %81 : vector<1x128x128xbf16> to vector<128x128xbf16>
    %cst_58 = arith.constant dense<0.000000e+00> : vector<256x128xf32>
    %83 = tpu.matmul %80, %82, %cst_58 {dimension_numbers = #tpu.dot_dimension_numbers<[1], [0], [0], [1], [0, 0, 1, 1], [], []>} : vector<256x128xbf16>, vector<128x128xbf16>, vector<256x128xf32> -> vector<256x128xf32>
    %84 = arith.addf %78, %83 : vector<256x128xf32>
    %85 = vector.extract_strided_slice %55 {offsets = [1, 2, 0], sizes = [16, 16, 128], strides = [1, 1, 1]} : vector<18x18x128xbf16> to vector<16x16x128xbf16>
    %86 = vector.shape_cast %85 : vector<16x16x128xbf16> to vector<256x128xbf16>
    %c5 = arith.constant 5 : index
    %c0_59 = arith.constant 0 : index
    %c0_60 = arith.constant 0 : index
    %87 = vector.load %arg12[%c5, %c0_59, %c0_60] : memref<9x128x128xbf16, #tpu.memory_space<vmem>>, vector<1x128x128xbf16>
    %88 = vector.shape_cast %87 : vector<1x128x128xbf16> to vector<128x128xbf16>
    %cst_61 = arith.constant dense<0.000000e+00> : vector<256x128xf32>
    %89 = tpu.matmul %86, %88, %cst_61 {dimension_numbers = #tpu.dot_dimension_numbers<[1], [0], [0], [1], [0, 0, 1, 1], [], []>} : vector<256x128xbf16>, vector<128x128xbf16>, vector<256x128xf32> -> vector<256x128xf32>
    %90 = arith.addf %84, %89 : vector<256x128xf32>
    %91 = vector.extract_strided_slice %55 {offsets = [2, 0, 0], sizes = [16, 16, 128], strides = [1, 1, 1]} : vector<18x18x128xbf16> to vector<16x16x128xbf16>
    %92 = vector.shape_cast %91 : vector<16x16x128xbf16> to vector<256x128xbf16>
    %c6 = arith.constant 6 : index
    %c0_62 = arith.constant 0 : index
    %c0_63 = arith.constant 0 : index
    %93 = vector.load %arg12[%c6, %c0_62, %c0_63] : memref<9x128x128xbf16, #tpu.memory_space<vmem>>, vector<1x128x128xbf16>
    %94 = vector.shape_cast %93 : vector<1x128x128xbf16> to vector<128x128xbf16>
    %cst_64 = arith.constant dense<0.000000e+00> : vector<256x128xf32>
    %95 = tpu.matmul %92, %94, %cst_64 {dimension_numbers = #tpu.dot_dimension_numbers<[1], [0], [0], [1], [0, 0, 1, 1], [], []>} : vector<256x128xbf16>, vector<128x128xbf16>, vector<256x128xf32> -> vector<256x128xf32>
    %96 = arith.addf %90, %95 : vector<256x128xf32>
    %97 = vector.extract_strided_slice %55 {offsets = [2, 1, 0], sizes = [16, 16, 128], strides = [1, 1, 1]} : vector<18x18x128xbf16> to vector<16x16x128xbf16>
    %98 = vector.shape_cast %97 : vector<16x16x128xbf16> to vector<256x128xbf16>
    %c7 = arith.constant 7 : index
    %c0_65 = arith.constant 0 : index
    %c0_66 = arith.constant 0 : index
    %99 = vector.load %arg12[%c7, %c0_65, %c0_66] : memref<9x128x128xbf16, #tpu.memory_space<vmem>>, vector<1x128x128xbf16>
    %100 = vector.shape_cast %99 : vector<1x128x128xbf16> to vector<128x128xbf16>
    %cst_67 = arith.constant dense<0.000000e+00> : vector<256x128xf32>
    %101 = tpu.matmul %98, %100, %cst_67 {dimension_numbers = #tpu.dot_dimension_numbers<[1], [0], [0], [1], [0, 0, 1, 1], [], []>} : vector<256x128xbf16>, vector<128x128xbf16>, vector<256x128xf32> -> vector<256x128xf32>
    %102 = arith.addf %96, %101 : vector<256x128xf32>
    %103 = vector.extract_strided_slice %55 {offsets = [2, 2, 0], sizes = [16, 16, 128], strides = [1, 1, 1]} : vector<18x18x128xbf16> to vector<16x16x128xbf16>
    %104 = vector.shape_cast %103 : vector<16x16x128xbf16> to vector<256x128xbf16>
    %c8 = arith.constant 8 : index
    %c0_68 = arith.constant 0 : index
    %c0_69 = arith.constant 0 : index
    %105 = vector.load %arg12[%c8, %c0_68, %c0_69] : memref<9x128x128xbf16, #tpu.memory_space<vmem>>, vector<1x128x128xbf16>
    %106 = vector.shape_cast %105 : vector<1x128x128xbf16> to vector<128x128xbf16>
    %cst_70 = arith.constant dense<0.000000e+00> : vector<256x128xf32>
    %107 = tpu.matmul %104, %106, %cst_70 {dimension_numbers = #tpu.dot_dimension_numbers<[1], [0], [0], [1], [0, 0, 1, 1], [], []>} : vector<256x128xbf16>, vector<128x128xbf16>, vector<256x128xf32> -> vector<256x128xf32>
    %108 = arith.addf %102, %107 : vector<256x128xf32>
    %c0_71 = arith.constant 0 : index
    %c0_72 = arith.constant 0 : index
    %109 = vector.load %arg13[%c0_71, %c0_72] : memref<1x128xf32, #tpu.memory_space<vmem>>, vector<1x128xf32>
    %110 = vector.broadcast %109 : vector<1x128xf32> to vector<256x128xf32>
    %111 = arith.addf %108, %110 : vector<256x128xf32>
    %cst_73 = arith.constant 0.000000e+00 : f32
    %112 = vector.broadcast %cst_73 : f32 to vector<1x10x128xf32>
    %c0_74 = arith.constant 0 : index
    %c0_75 = arith.constant 0 : index
    %c0_76 = arith.constant 0 : index
    %113 = vector.load %arg28[%c0_74, %c0_75, %c0_76] : memref<10x10x128xf32, #tpu.memory_space<vmem>>, vector<1x10x128xf32>
    tpu.vector_store %arg28[%c0_74, %c0_75, %c0_76], %112 {strides = array<i32>} : memref<10x10x128xf32, #tpu.memory_space<vmem>>, vector<1x10x128xf32>,
    %cst_77 = arith.constant 0.000000e+00 : f32
    %114 = vector.broadcast %cst_77 : f32 to vector<1x10x128xf32>
    %c9 = arith.constant 9 : index
    %c0_78 = arith.constant 0 : index
    %c0_79 = arith.constant 0 : index
    %115 = vector.load %arg28[%c9, %c0_78, %c0_79] : memref<10x10x128xf32, #tpu.memory_space<vmem>>, vector<1x10x128xf32>
    tpu.vector_store %arg28[%c9, %c0_78, %c0_79], %114 {strides = array<i32>} : memref<10x10x128xf32, #tpu.memory_space<vmem>>, vector<1x10x128xf32>,
    %cst_80 = arith.constant 0.000000e+00 : f32
    %116 = vector.broadcast %cst_80 : f32 to vector<10x1x128xf32>
    %c0_81 = arith.constant 0 : index
    %c0_82 = arith.constant 0 : index
    %c0_83 = arith.constant 0 : index
    %117 = vector.load %arg28[%c0_81, %c0_82, %c0_83] : memref<10x10x128xf32, #tpu.memory_space<vmem>>, vector<10x1x128xf32>
    tpu.vector_store %arg28[%c0_81, %c0_82, %c0_83], %116 {strides = array<i32>} : memref<10x10x128xf32, #tpu.memory_space<vmem>>, vector<10x1x128xf32>,
    %cst_84 = arith.constant 0.000000e+00 : f32
    %118 = vector.broadcast %cst_84 : f32 to vector<10x1x128xf32>
    %c0_85 = arith.constant 0 : index
    %c9_86 = arith.constant 9 : index
    %c0_87 = arith.constant 0 : index
    %119 = vector.load %arg28[%c0_85, %c9_86, %c0_87] : memref<10x10x128xf32, #tpu.memory_space<vmem>>, vector<10x1x128xf32>
    tpu.vector_store %arg28[%c0_85, %c9_86, %c0_87], %118 {strides = array<i32>} : memref<10x10x128xf32, #tpu.memory_space<vmem>>, vector<10x1x128xf32>,
    %120 = vector.shape_cast %25 : vector<64x128xf32> to vector<8x8x128xf32>
    %c1_88 = arith.constant 1 : index
    %c1_89 = arith.constant 1 : index
    %c0_90 = arith.constant 0 : index
    %121 = vector.load %arg28[%c1_88, %c1_89, %c0_90] : memref<10x10x128xf32, #tpu.memory_space<vmem>>, vector<8x8x128xf32>
    tpu.vector_store %arg28[%c1_88, %c1_89, %c0_90], %120 {strides = array<i32>} : memref<10x10x128xf32, #tpu.memory_space<vmem>>, vector<8x8x128xf32>,
    %c0_91 = arith.constant 0 : index
    %c0_92 = arith.constant 0 : index
    %c0_93 = arith.constant 0 : index
    %122 = vector.load %arg28[%c0_91, %c0_92, %c0_93] : memref<10x10x128xf32, #tpu.memory_space<vmem>>, vector<10x10x128xf32>
    %123 = arith.truncf %122 : vector<10x10x128xf32> to vector<10x10x128xbf16>
    %124 = vector.extract_strided_slice %123 {offsets = [0, 0, 0], sizes = [8, 8, 128], strides = [1, 1, 1]} : vector<10x10x128xbf16> to vector<8x8x128xbf16>
    %125 = vector.shape_cast %124 : vector<8x8x128xbf16> to vector<64x128xbf16>
    %c0_94 = arith.constant 0 : index
    %c0_95 = arith.constant 0 : index
    %c0_96 = arith.constant 0 : index
    %126 = vector.load %arg14[%c0_94, %c0_95, %c0_96] : memref<9x128x128xbf16, #tpu.memory_space<vmem>>, vector<1x128x128xbf16>
    %127 = vector.shape_cast %126 : vector<1x128x128xbf16> to vector<128x128xbf16>
    %cst_97 = arith.constant dense<0.000000e+00> : vector<64x128xf32>
    %128 = tpu.matmul %125, %127, %cst_97 {dimension_numbers = #tpu.dot_dimension_numbers<[1], [0], [0], [1], [0, 0, 1, 1], [], []>} : vector<64x128xbf16>, vector<128x128xbf16>, vector<64x128xf32> -> vector<64x128xf32>
    %129 = vector.extract_strided_slice %123 {offsets = [0, 1, 0], sizes = [8, 8, 128], strides = [1, 1, 1]} : vector<10x10x128xbf16> to vector<8x8x128xbf16>
    %130 = vector.shape_cast %129 : vector<8x8x128xbf16> to vector<64x128xbf16>
    %c1_98 = arith.constant 1 : index
    %c0_99 = arith.constant 0 : index
    %c0_100 = arith.constant 0 : index
    %131 = vector.load %arg14[%c1_98, %c0_99, %c0_100] : memref<9x128x128xbf16, #tpu.memory_space<vmem>>, vector<1x128x128xbf16>
    %132 = vector.shape_cast %131 : vector<1x128x128xbf16> to vector<128x128xbf16>
    %cst_101 = arith.constant dense<0.000000e+00> : vector<64x128xf32>
    %133 = tpu.matmul %130, %132, %cst_101 {dimension_numbers = #tpu.dot_dimension_numbers<[1], [0], [0], [1], [0, 0, 1, 1], [], []>} : vector<64x128xbf16>, vector<128x128xbf16>, vector<64x128xf32> -> vector<64x128xf32>
    %134 = arith.addf %128, %133 : vector<64x128xf32>
    %135 = vector.extract_strided_slice %123 {offsets = [0, 2, 0], sizes = [8, 8, 128], strides = [1, 1, 1]} : vector<10x10x128xbf16> to vector<8x8x128xbf16>
    %136 = vector.shape_cast %135 : vector<8x8x128xbf16> to vector<64x128xbf16>
    %c2_102 = arith.constant 2 : index
    %c0_103 = arith.constant 0 : index
    %c0_104 = arith.constant 0 : index
    %137 = vector.load %arg14[%c2_102, %c0_103, %c0_104] : memref<9x128x128xbf16, #tpu.memory_space<vmem>>, vector<1x128x128xbf16>
    %138 = vector.shape_cast %137 : vector<1x128x128xbf16> to vector<128x128xbf16>
    %cst_105 = arith.constant dense<0.000000e+00> : vector<64x128xf32>
    %139 = tpu.matmul %136, %138, %cst_105 {dimension_numbers = #tpu.dot_dimension_numbers<[1], [0], [0], [1], [0, 0, 1, 1], [], []>} : vector<64x128xbf16>, vector<128x128xbf16>, vector<64x128xf32> -> vector<64x128xf32>
    %140 = arith.addf %134, %139 : vector<64x128xf32>
    %141 = vector.extract_strided_slice %123 {offsets = [1, 0, 0], sizes = [8, 8, 128], strides = [1, 1, 1]} : vector<10x10x128xbf16> to vector<8x8x128xbf16>
    %142 = vector.shape_cast %141 : vector<8x8x128xbf16> to vector<64x128xbf16>
    %c3_106 = arith.constant 3 : index
    %c0_107 = arith.constant 0 : index
    %c0_108 = arith.constant 0 : index
    %143 = vector.load %arg14[%c3_106, %c0_107, %c0_108] : memref<9x128x128xbf16, #tpu.memory_space<vmem>>, vector<1x128x128xbf16>
    %144 = vector.shape_cast %143 : vector<1x128x128xbf16> to vector<128x128xbf16>
    %cst_109 = arith.constant dense<0.000000e+00> : vector<64x128xf32>
    %145 = tpu.matmul %142, %144, %cst_109 {dimension_numbers = #tpu.dot_dimension_numbers<[1], [0], [0], [1], [0, 0, 1, 1], [], []>} : vector<64x128xbf16>, vector<128x128xbf16>, vector<64x128xf32> -> vector<64x128xf32>
    %146 = arith.addf %140, %145 : vector<64x128xf32>
    %147 = vector.extract_strided_slice %123 {offsets = [1, 1, 0], sizes = [8, 8, 128], strides = [1, 1, 1]} : vector<10x10x128xbf16> to vector<8x8x128xbf16>
    %148 = vector.shape_cast %147 : vector<8x8x128xbf16> to vector<64x128xbf16>
    %c4_110 = arith.constant 4 : index
    %c0_111 = arith.constant 0 : index
    %c0_112 = arith.constant 0 : index
    %149 = vector.load %arg14[%c4_110, %c0_111, %c0_112] : memref<9x128x128xbf16, #tpu.memory_space<vmem>>, vector<1x128x128xbf16>
    %150 = vector.shape_cast %149 : vector<1x128x128xbf16> to vector<128x128xbf16>
    %cst_113 = arith.constant dense<0.000000e+00> : vector<64x128xf32>
    %151 = tpu.matmul %148, %150, %cst_113 {dimension_numbers = #tpu.dot_dimension_numbers<[1], [0], [0], [1], [0, 0, 1, 1], [], []>} : vector<64x128xbf16>, vector<128x128xbf16>, vector<64x128xf32> -> vector<64x128xf32>
    %152 = arith.addf %146, %151 : vector<64x128xf32>
    %153 = vector.extract_strided_slice %123 {offsets = [1, 2, 0], sizes = [8, 8, 128], strides = [1, 1, 1]} : vector<10x10x128xbf16> to vector<8x8x128xbf16>
    %154 = vector.shape_cast %153 : vector<8x8x128xbf16> to vector<64x128xbf16>
    %c5_114 = arith.constant 5 : index
    %c0_115 = arith.constant 0 : index
    %c0_116 = arith.constant 0 : index
    %155 = vector.load %arg14[%c5_114, %c0_115, %c0_116] : memref<9x128x128xbf16, #tpu.memory_space<vmem>>, vector<1x128x128xbf16>
    %156 = vector.shape_cast %155 : vector<1x128x128xbf16> to vector<128x128xbf16>
    %cst_117 = arith.constant dense<0.000000e+00> : vector<64x128xf32>
    %157 = tpu.matmul %154, %156, %cst_117 {dimension_numbers = #tpu.dot_dimension_numbers<[1], [0], [0], [1], [0, 0, 1, 1], [], []>} : vector<64x128xbf16>, vector<128x128xbf16>, vector<64x128xf32> -> vector<64x128xf32>
    %158 = arith.addf %152, %157 : vector<64x128xf32>
    %159 = vector.extract_strided_slice %123 {offsets = [2, 0, 0], sizes = [8, 8, 128], strides = [1, 1, 1]} : vector<10x10x128xbf16> to vector<8x8x128xbf16>
    %160 = vector.shape_cast %159 : vector<8x8x128xbf16> to vector<64x128xbf16>
    %c6_118 = arith.constant 6 : index
    %c0_119 = arith.constant 0 : index
    %c0_120 = arith.constant 0 : index
    %161 = vector.load %arg14[%c6_118, %c0_119, %c0_120] : memref<9x128x128xbf16, #tpu.memory_space<vmem>>, vector<1x128x128xbf16>
    %162 = vector.shape_cast %161 : vector<1x128x128xbf16> to vector<128x128xbf16>
    %cst_121 = arith.constant dense<0.000000e+00> : vector<64x128xf32>
    %163 = tpu.matmul %160, %162, %cst_121 {dimension_numbers = #tpu.dot_dimension_numbers<[1], [0], [0], [1], [0, 0, 1, 1], [], []>} : vector<64x128xbf16>, vector<128x128xbf16>, vector<64x128xf32> -> vector<64x128xf32>
    %164 = arith.addf %158, %163 : vector<64x128xf32>
    %165 = vector.extract_strided_slice %123 {offsets = [2, 1, 0], sizes = [8, 8, 128], strides = [1, 1, 1]} : vector<10x10x128xbf16> to vector<8x8x128xbf16>
    %166 = vector.shape_cast %165 : vector<8x8x128xbf16> to vector<64x128xbf16>
    %c7_122 = arith.constant 7 : index
    %c0_123 = arith.constant 0 : index
    %c0_124 = arith.constant 0 : index
    %167 = vector.load %arg14[%c7_122, %c0_123, %c0_124] : memref<9x128x128xbf16, #tpu.memory_space<vmem>>, vector<1x128x128xbf16>
    %168 = vector.shape_cast %167 : vector<1x128x128xbf16> to vector<128x128xbf16>
    %cst_125 = arith.constant dense<0.000000e+00> : vector<64x128xf32>
    %169 = tpu.matmul %166, %168, %cst_125 {dimension_numbers = #tpu.dot_dimension_numbers<[1], [0], [0], [1], [0, 0, 1, 1], [], []>} : vector<64x128xbf16>, vector<128x128xbf16>, vector<64x128xf32> -> vector<64x128xf32>
    %170 = arith.addf %164, %169 : vector<64x128xf32>
    %171 = vector.extract_strided_slice %123 {offsets = [2, 2, 0], sizes = [8, 8, 128], strides = [1, 1, 1]} : vector<10x10x128xbf16> to vector<8x8x128xbf16>
    %172 = vector.shape_cast %171 : vector<8x8x128xbf16> to vector<64x128xbf16>
    %c8_126 = arith.constant 8 : index
    %c0_127 = arith.constant 0 : index
    %c0_128 = arith.constant 0 : index
    %173 = vector.load %arg14[%c8_126, %c0_127, %c0_128] : memref<9x128x128xbf16, #tpu.memory_space<vmem>>, vector<1x128x128xbf16>
    %174 = vector.shape_cast %173 : vector<1x128x128xbf16> to vector<128x128xbf16>
    %cst_129 = arith.constant dense<0.000000e+00> : vector<64x128xf32>
    %175 = tpu.matmul %172, %174, %cst_129 {dimension_numbers = #tpu.dot_dimension_numbers<[1], [0], [0], [1], [0, 0, 1, 1], [], []>} : vector<64x128xbf16>, vector<128x128xbf16>, vector<64x128xf32> -> vector<64x128xf32>
    %176 = arith.addf %170, %175 : vector<64x128xf32>
    %c0_130 = arith.constant 0 : index
    %c0_131 = arith.constant 0 : index
    %177 = vector.load %arg15[%c0_130, %c0_131] : memref<1x128xf32, #tpu.memory_space<vmem>>, vector<1x128xf32>
    %178 = vector.broadcast %177 : vector<1x128xf32> to vector<64x128xf32>
    %179 = arith.addf %176, %178 : vector<64x128xf32>
    %cst_132 = arith.constant 0.000000e+00 : f32
    %180 = vector.broadcast %cst_132 : f32 to vector<1x6x128xf32>
    %c0_133 = arith.constant 0 : index
    %c0_134 = arith.constant 0 : index
    %c0_135 = arith.constant 0 : index
    %181 = vector.load %arg29[%c0_133, %c0_134, %c0_135] : memref<6x6x128xf32, #tpu.memory_space<vmem>>, vector<1x6x128xf32>
    tpu.vector_store %arg29[%c0_133, %c0_134, %c0_135], %180 {strides = array<i32>} : memref<6x6x128xf32, #tpu.memory_space<vmem>>, vector<1x6x128xf32>,
    %cst_136 = arith.constant 0.000000e+00 : f32
    %182 = vector.broadcast %cst_136 : f32 to vector<1x6x128xf32>
    %c5_137 = arith.constant 5 : index
    %c0_138 = arith.constant 0 : index
    %c0_139 = arith.constant 0 : index
    %183 = vector.load %arg29[%c5_137, %c0_138, %c0_139] : memref<6x6x128xf32, #tpu.memory_space<vmem>>, vector<1x6x128xf32>
    tpu.vector_store %arg29[%c5_137, %c0_138, %c0_139], %182 {strides = array<i32>} : memref<6x6x128xf32, #tpu.memory_space<vmem>>, vector<1x6x128xf32>,
    %cst_140 = arith.constant 0.000000e+00 : f32
    %184 = vector.broadcast %cst_140 : f32 to vector<6x1x128xf32>
    %c0_141 = arith.constant 0 : index
    %c0_142 = arith.constant 0 : index
    %c0_143 = arith.constant 0 : index
    %185 = vector.load %arg29[%c0_141, %c0_142, %c0_143] : memref<6x6x128xf32, #tpu.memory_space<vmem>>, vector<6x1x128xf32>
    tpu.vector_store %arg29[%c0_141, %c0_142, %c0_143], %184 {strides = array<i32>} : memref<6x6x128xf32, #tpu.memory_space<vmem>>, vector<6x1x128xf32>,
    %cst_144 = arith.constant 0.000000e+00 : f32
    %186 = vector.broadcast %cst_144 : f32 to vector<6x1x128xf32>
    %c0_145 = arith.constant 0 : index
    %c5_146 = arith.constant 5 : index
    %c0_147 = arith.constant 0 : index
    %187 = vector.load %arg29[%c0_145, %c5_146, %c0_147] : memref<6x6x128xf32, #tpu.memory_space<vmem>>, vector<6x1x128xf32>
    tpu.vector_store %arg29[%c0_145, %c5_146, %c0_147], %186 {strides = array<i32>} : memref<6x6x128xf32, #tpu.memory_space<vmem>>, vector<6x1x128xf32>,
    %188 = vector.shape_cast %7 : vector<16x128xf32> to vector<4x4x128xf32>
    %c1_148 = arith.constant 1 : index
    %c1_149 = arith.constant 1 : index
    %c0_150 = arith.constant 0 : index
    %189 = vector.load %arg29[%c1_148, %c1_149, %c0_150] : memref<6x6x128xf32, #tpu.memory_space<vmem>>, vector<4x4x128xf32>
    tpu.vector_store %arg29[%c1_148, %c1_149, %c0_150], %188 {strides = array<i32>} : memref<6x6x128xf32, #tpu.memory_space<vmem>>, vector<4x4x128xf32>,
    %c0_151 = arith.constant 0 : index
    %c0_152 = arith.constant 0 : index
    %c0_153 = arith.constant 0 : index
    %190 = vector.load %arg29[%c0_151, %c0_152, %c0_153] : memref<6x6x128xf32, #tpu.memory_space<vmem>>, vector<6x6x128xf32>
    %191 = arith.truncf %190 : vector<6x6x128xf32> to vector<6x6x128xbf16>
    %192 = vector.extract_strided_slice %191 {offsets = [0, 0, 0], sizes = [4, 4, 128], strides = [1, 1, 1]} : vector<6x6x128xbf16> to vector<4x4x128xbf16>
    %193 = vector.shape_cast %192 : vector<4x4x128xbf16> to vector<16x128xbf16>
    %c0_154 = arith.constant 0 : index
    %c0_155 = arith.constant 0 : index
    %c0_156 = arith.constant 0 : index
    %194 = vector.load %arg16[%c0_154, %c0_155, %c0_156] : memref<9x128x128xbf16, #tpu.memory_space<vmem>>, vector<1x128x128xbf16>
    %195 = vector.shape_cast %194 : vector<1x128x128xbf16> to vector<128x128xbf16>
    %cst_157 = arith.constant dense<0.000000e+00> : vector<16x128xf32>
    %196 = tpu.matmul %193, %195, %cst_157 {dimension_numbers = #tpu.dot_dimension_numbers<[1], [0], [0], [1], [0, 0, 1, 1], [], []>} : vector<16x128xbf16>, vector<128x128xbf16>, vector<16x128xf32> -> vector<16x128xf32>
    %197 = vector.extract_strided_slice %191 {offsets = [0, 1, 0], sizes = [4, 4, 128], strides = [1, 1, 1]} : vector<6x6x128xbf16> to vector<4x4x128xbf16>
    %198 = vector.shape_cast %197 : vector<4x4x128xbf16> to vector<16x128xbf16>
    %c1_158 = arith.constant 1 : index
    %c0_159 = arith.constant 0 : index
    %c0_160 = arith.constant 0 : index
    %199 = vector.load %arg16[%c1_158, %c0_159, %c0_160] : memref<9x128x128xbf16, #tpu.memory_space<vmem>>, vector<1x128x128xbf16>
    %200 = vector.shape_cast %199 : vector<1x128x128xbf16> to vector<128x128xbf16>
    %cst_161 = arith.constant dense<0.000000e+00> : vector<16x128xf32>
    %201 = tpu.matmul %198, %200, %cst_161 {dimension_numbers = #tpu.dot_dimension_numbers<[1], [0], [0], [1], [0, 0, 1, 1], [], []>} : vector<16x128xbf16>, vector<128x128xbf16>, vector<16x128xf32> -> vector<16x128xf32>
    %202 = arith.addf %196, %201 : vector<16x128xf32>
    %203 = vector.extract_strided_slice %191 {offsets = [0, 2, 0], sizes = [4, 4, 128], strides = [1, 1, 1]} : vector<6x6x128xbf16> to vector<4x4x128xbf16>
    %204 = vector.shape_cast %203 : vector<4x4x128xbf16> to vector<16x128xbf16>
    %c2_162 = arith.constant 2 : index
    %c0_163 = arith.constant 0 : index
    %c0_164 = arith.constant 0 : index
    %205 = vector.load %arg16[%c2_162, %c0_163, %c0_164] : memref<9x128x128xbf16, #tpu.memory_space<vmem>>, vector<1x128x128xbf16>
    %206 = vector.shape_cast %205 : vector<1x128x128xbf16> to vector<128x128xbf16>
    %cst_165 = arith.constant dense<0.000000e+00> : vector<16x128xf32>
    %207 = tpu.matmul %204, %206, %cst_165 {dimension_numbers = #tpu.dot_dimension_numbers<[1], [0], [0], [1], [0, 0, 1, 1], [], []>} : vector<16x128xbf16>, vector<128x128xbf16>, vector<16x128xf32> -> vector<16x128xf32>
    %208 = arith.addf %202, %207 : vector<16x128xf32>
    %209 = vector.extract_strided_slice %191 {offsets = [1, 0, 0], sizes = [4, 4, 128], strides = [1, 1, 1]} : vector<6x6x128xbf16> to vector<4x4x128xbf16>
    %210 = vector.shape_cast %209 : vector<4x4x128xbf16> to vector<16x128xbf16>
    %c3_166 = arith.constant 3 : index
    %c0_167 = arith.constant 0 : index
    %c0_168 = arith.constant 0 : index
    %211 = vector.load %arg16[%c3_166, %c0_167, %c0_168] : memref<9x128x128xbf16, #tpu.memory_space<vmem>>, vector<1x128x128xbf16>
    %212 = vector.shape_cast %211 : vector<1x128x128xbf16> to vector<128x128xbf16>
    %cst_169 = arith.constant dense<0.000000e+00> : vector<16x128xf32>
    %213 = tpu.matmul %210, %212, %cst_169 {dimension_numbers = #tpu.dot_dimension_numbers<[1], [0], [0], [1], [0, 0, 1, 1], [], []>} : vector<16x128xbf16>, vector<128x128xbf16>, vector<16x128xf32> -> vector<16x128xf32>
    %214 = arith.addf %208, %213 : vector<16x128xf32>
    %215 = vector.extract_strided_slice %191 {offsets = [1, 1, 0], sizes = [4, 4, 128], strides = [1, 1, 1]} : vector<6x6x128xbf16> to vector<4x4x128xbf16>
    %216 = vector.shape_cast %215 : vector<4x4x128xbf16> to vector<16x128xbf16>
    %c4_170 = arith.constant 4 : index
    %c0_171 = arith.constant 0 : index
    %c0_172 = arith.constant 0 : index
    %217 = vector.load %arg16[%c4_170, %c0_171, %c0_172] : memref<9x128x128xbf16, #tpu.memory_space<vmem>>, vector<1x128x128xbf16>
    %218 = vector.shape_cast %217 : vector<1x128x128xbf16> to vector<128x128xbf16>
    %cst_173 = arith.constant dense<0.000000e+00> : vector<16x128xf32>
    %219 = tpu.matmul %216, %218, %cst_173 {dimension_numbers = #tpu.dot_dimension_numbers<[1], [0], [0], [1], [0, 0, 1, 1], [], []>} : vector<16x128xbf16>, vector<128x128xbf16>, vector<16x128xf32> -> vector<16x128xf32>
    %220 = arith.addf %214, %219 : vector<16x128xf32>
    %221 = vector.extract_strided_slice %191 {offsets = [1, 2, 0], sizes = [4, 4, 128], strides = [1, 1, 1]} : vector<6x6x128xbf16> to vector<4x4x128xbf16>
    %222 = vector.shape_cast %221 : vector<4x4x128xbf16> to vector<16x128xbf16>
    %c5_174 = arith.constant 5 : index
    %c0_175 = arith.constant 0 : index
    %c0_176 = arith.constant 0 : index
    %223 = vector.load %arg16[%c5_174, %c0_175, %c0_176] : memref<9x128x128xbf16, #tpu.memory_space<vmem>>, vector<1x128x128xbf16>
    %224 = vector.shape_cast %223 : vector<1x128x128xbf16> to vector<128x128xbf16>
    %cst_177 = arith.constant dense<0.000000e+00> : vector<16x128xf32>
    %225 = tpu.matmul %222, %224, %cst_177 {dimension_numbers = #tpu.dot_dimension_numbers<[1], [0], [0], [1], [0, 0, 1, 1], [], []>} : vector<16x128xbf16>, vector<128x128xbf16>, vector<16x128xf32> -> vector<16x128xf32>
    %226 = arith.addf %220, %225 : vector<16x128xf32>
    %227 = vector.extract_strided_slice %191 {offsets = [2, 0, 0], sizes = [4, 4, 128], strides = [1, 1, 1]} : vector<6x6x128xbf16> to vector<4x4x128xbf16>
    %228 = vector.shape_cast %227 : vector<4x4x128xbf16> to vector<16x128xbf16>
    %c6_178 = arith.constant 6 : index
    %c0_179 = arith.constant 0 : index
    %c0_180 = arith.constant 0 : index
    %229 = vector.load %arg16[%c6_178, %c0_179, %c0_180] : memref<9x128x128xbf16, #tpu.memory_space<vmem>>, vector<1x128x128xbf16>
    %230 = vector.shape_cast %229 : vector<1x128x128xbf16> to vector<128x128xbf16>
    %cst_181 = arith.constant dense<0.000000e+00> : vector<16x128xf32>
    %231 = tpu.matmul %228, %230, %cst_181 {dimension_numbers = #tpu.dot_dimension_numbers<[1], [0], [0], [1], [0, 0, 1, 1], [], []>} : vector<16x128xbf16>, vector<128x128xbf16>, vector<16x128xf32> -> vector<16x128xf32>
    %232 = arith.addf %226, %231 : vector<16x128xf32>
    %233 = vector.extract_strided_slice %191 {offsets = [2, 1, 0], sizes = [4, 4, 128], strides = [1, 1, 1]} : vector<6x6x128xbf16> to vector<4x4x128xbf16>
    %234 = vector.shape_cast %233 : vector<4x4x128xbf16> to vector<16x128xbf16>
    %c7_182 = arith.constant 7 : index
    %c0_183 = arith.constant 0 : index
    %c0_184 = arith.constant 0 : index
    %235 = vector.load %arg16[%c7_182, %c0_183, %c0_184] : memref<9x128x128xbf16, #tpu.memory_space<vmem>>, vector<1x128x128xbf16>
    %236 = vector.shape_cast %235 : vector<1x128x128xbf16> to vector<128x128xbf16>
    %cst_185 = arith.constant dense<0.000000e+00> : vector<16x128xf32>
    %237 = tpu.matmul %234, %236, %cst_185 {dimension_numbers = #tpu.dot_dimension_numbers<[1], [0], [0], [1], [0, 0, 1, 1], [], []>} : vector<16x128xbf16>, vector<128x128xbf16>, vector<16x128xf32> -> vector<16x128xf32>
    %238 = arith.addf %232, %237 : vector<16x128xf32>
    %239 = vector.extract_strided_slice %191 {offsets = [2, 2, 0], sizes = [4, 4, 128], strides = [1, 1, 1]} : vector<6x6x128xbf16> to vector<4x4x128xbf16>
    %240 = vector.shape_cast %239 : vector<4x4x128xbf16> to vector<16x128xbf16>
    %c8_186 = arith.constant 8 : index
    %c0_187 = arith.constant 0 : index
    %c0_188 = arith.constant 0 : index
    %241 = vector.load %arg16[%c8_186, %c0_187, %c0_188] : memref<9x128x128xbf16, #tpu.memory_space<vmem>>, vector<1x128x128xbf16>
    %242 = vector.shape_cast %241 : vector<1x128x128xbf16> to vector<128x128xbf16>
    %cst_189 = arith.constant dense<0.000000e+00> : vector<16x128xf32>
    %243 = tpu.matmul %240, %242, %cst_189 {dimension_numbers = #tpu.dot_dimension_numbers<[1], [0], [0], [1], [0, 0, 1, 1], [], []>} : vector<16x128xbf16>, vector<128x128xbf16>, vector<16x128xf32> -> vector<16x128xf32>
    %244 = arith.addf %238, %243 : vector<16x128xf32>
    %c0_190 = arith.constant 0 : index
    %c0_191 = arith.constant 0 : index
    %245 = vector.load %arg17[%c0_190, %c0_191] : memref<1x128xf32, #tpu.memory_space<vmem>>, vector<1x128xf32>
    %246 = vector.broadcast %245 : vector<1x128xf32> to vector<16x128xf32>
    %247 = arith.addf %244, %246 : vector<16x128xf32>
    %c0_192 = arith.constant 0 : index
    %c0_193 = arith.constant 0 : index
    %248 = vector.load %arg4[%c0_192, %c0_193] : memref<4x16xf32, #tpu.memory_space<vmem>>, vector<4x16xf32>
    %cst_194 = arith.constant 0.000000e+00 : f32
    %249 = vector.broadcast %cst_194 : f32 to vector<1x6x128xf32>
    %c0_195 = arith.constant 0 : index
    %c0_196 = arith.constant 0 : index
    %c0_197 = arith.constant 0 : index
    %250 = vector.load %arg29[%c0_195, %c0_196, %c0_197] : memref<6x6x128xf32, #tpu.memory_space<vmem>>, vector<1x6x128xf32>
    tpu.vector_store %arg29[%c0_195, %c0_196, %c0_197], %249 {strides = array<i32>} : memref<6x6x128xf32, #tpu.memory_space<vmem>>, vector<1x6x128xf32>,
    %cst_198 = arith.constant 0.000000e+00 : f32
    %251 = vector.broadcast %cst_198 : f32 to vector<1x6x128xf32>
    %c5_199 = arith.constant 5 : index
    %c0_200 = arith.constant 0 : index
    %c0_201 = arith.constant 0 : index
    %252 = vector.load %arg29[%c5_199, %c0_200, %c0_201] : memref<6x6x128xf32, #tpu.memory_space<vmem>>, vector<1x6x128xf32>
    tpu.vector_store %arg29[%c5_199, %c0_200, %c0_201], %251 {strides = array<i32>} : memref<6x6x128xf32, #tpu.memory_space<vmem>>, vector<1x6x128xf32>,
    %cst_202 = arith.constant 0.000000e+00 : f32
    %253 = vector.broadcast %cst_202 : f32 to vector<6x1x128xf32>
    %c0_203 = arith.constant 0 : index
    %c0_204 = arith.constant 0 : index
    %c0_205 = arith.constant 0 : index
    %254 = vector.load %arg29[%c0_203, %c0_204, %c0_205] : memref<6x6x128xf32, #tpu.memory_space<vmem>>, vector<6x1x128xf32>
    tpu.vector_store %arg29[%c0_203, %c0_204, %c0_205], %253 {strides = array<i32>} : memref<6x6x128xf32, #tpu.memory_space<vmem>>, vector<6x1x128xf32>,
    %cst_206 = arith.constant 0.000000e+00 : f32
    %255 = vector.broadcast %cst_206 : f32 to vector<6x1x128xf32>
    %c0_207 = arith.constant 0 : index
    %c5_208 = arith.constant 5 : index
    %c0_209 = arith.constant 0 : index
    %256 = vector.load %arg29[%c0_207, %c5_208, %c0_209] : memref<6x6x128xf32, #tpu.memory_space<vmem>>, vector<6x1x128xf32>
    tpu.vector_store %arg29[%c0_207, %c5_208, %c0_209], %255 {strides = array<i32>} : memref<6x6x128xf32, #tpu.memory_space<vmem>>, vector<6x1x128xf32>,
    %257 = vector.shape_cast %247 : vector<16x128xf32> to vector<4x4x128xf32>
    %c1_210 = arith.constant 1 : index
    %c1_211 = arith.constant 1 : index
    %c0_212 = arith.constant 0 : index
    %258 = vector.load %arg29[%c1_210, %c1_211, %c0_212] : memref<6x6x128xf32, #tpu.memory_space<vmem>>, vector<4x4x128xf32>
    tpu.vector_store %arg29[%c1_210, %c1_211, %c0_212], %257 {strides = array<i32>} : memref<6x6x128xf32, #tpu.memory_space<vmem>>, vector<4x4x128xf32>,
    %c0_213 = arith.constant 0 : index
    %c0_214 = arith.constant 0 : index
    %c0_215 = arith.constant 0 : index
    %259 = vector.load %arg29[%c0_213, %c0_214, %c0_215] : memref<6x6x128xf32, #tpu.memory_space<vmem>>, vector<6x6x128xf32>
    %260 = arith.truncf %259 : vector<6x6x128xf32> to vector<6x6x128xbf16>
    %261 = vector.extract_strided_slice %260 {offsets = [0, 0, 0], sizes = [4, 4, 128], strides = [1, 1, 1]} : vector<6x6x128xbf16> to vector<4x4x128xbf16>
    %262 = vector.shape_cast %261 : vector<4x4x128xbf16> to vector<16x128xbf16>
    %c0_216 = arith.constant 0 : index
    %c0_217 = arith.constant 0 : index
    %c0_218 = arith.constant 0 : index
    %263 = vector.load %arg18[%c0_216, %c0_217, %c0_218] : memref<9x128x128xbf16, #tpu.memory_space<vmem>>, vector<1x128x128xbf16>
    %264 = vector.shape_cast %263 : vector<1x128x128xbf16> to vector<128x128xbf16>
    %cst_219 = arith.constant dense<0.000000e+00> : vector<16x128xf32>
    %265 = tpu.matmul %262, %264, %cst_219 {dimension_numbers = #tpu.dot_dimension_numbers<[1], [0], [0], [1], [0, 0, 1, 1], [], []>} : vector<16x128xbf16>, vector<128x128xbf16>, vector<16x128xf32> -> vector<16x128xf32>
    %266 = vector.extract_strided_slice %260 {offsets = [0, 1, 0], sizes = [4, 4, 128], strides = [1, 1, 1]} : vector<6x6x128xbf16> to vector<4x4x128xbf16>
    %267 = vector.shape_cast %266 : vector<4x4x128xbf16> to vector<16x128xbf16>
    %c1_220 = arith.constant 1 : index
    %c0_221 = arith.constant 0 : index
    %c0_222 = arith.constant 0 : index
    %268 = vector.load %arg18[%c1_220, %c0_221, %c0_222] : memref<9x128x128xbf16, #tpu.memory_space<vmem>>, vector<1x128x128xbf16>
    %269 = vector.shape_cast %268 : vector<1x128x128xbf16> to vector<128x128xbf16>
    %cst_223 = arith.constant dense<0.000000e+00> : vector<16x128xf32>
    %270 = tpu.matmul %267, %269, %cst_223 {dimension_numbers = #tpu.dot_dimension_numbers<[1], [0], [0], [1], [0, 0, 1, 1], [], []>} : vector<16x128xbf16>, vector<128x128xbf16>, vector<16x128xf32> -> vector<16x128xf32>
    %271 = arith.addf %265, %270 : vector<16x128xf32>
    %272 = vector.extract_strided_slice %260 {offsets = [0, 2, 0], sizes = [4, 4, 128], strides = [1, 1, 1]} : vector<6x6x128xbf16> to vector<4x4x128xbf16>
    %273 = vector.shape_cast %272 : vector<4x4x128xbf16> to vector<16x128xbf16>
    %c2_224 = arith.constant 2 : index
    %c0_225 = arith.constant 0 : index
    %c0_226 = arith.constant 0 : index
    %274 = vector.load %arg18[%c2_224, %c0_225, %c0_226] : memref<9x128x128xbf16, #tpu.memory_space<vmem>>, vector<1x128x128xbf16>
    %275 = vector.shape_cast %274 : vector<1x128x128xbf16> to vector<128x128xbf16>
    %cst_227 = arith.constant dense<0.000000e+00> : vector<16x128xf32>
    %276 = tpu.matmul %273, %275, %cst_227 {dimension_numbers = #tpu.dot_dimension_numbers<[1], [0], [0], [1], [0, 0, 1, 1], [], []>} : vector<16x128xbf16>, vector<128x128xbf16>, vector<16x128xf32> -> vector<16x128xf32>
    %277 = arith.addf %271, %276 : vector<16x128xf32>
    %278 = vector.extract_strided_slice %260 {offsets = [1, 0, 0], sizes = [4, 4, 128], strides = [1, 1, 1]} : vector<6x6x128xbf16> to vector<4x4x128xbf16>
    %279 = vector.shape_cast %278 : vector<4x4x128xbf16> to vector<16x128xbf16>
    %c3_228 = arith.constant 3 : index
    %c0_229 = arith.constant 0 : index
    %c0_230 = arith.constant 0 : index
    %280 = vector.load %arg18[%c3_228, %c0_229, %c0_230] : memref<9x128x128xbf16, #tpu.memory_space<vmem>>, vector<1x128x128xbf16>
    %281 = vector.shape_cast %280 : vector<1x128x128xbf16> to vector<128x128xbf16>
    %cst_231 = arith.constant dense<0.000000e+00> : vector<16x128xf32>
    %282 = tpu.matmul %279, %281, %cst_231 {dimension_numbers = #tpu.dot_dimension_numbers<[1], [0], [0], [1], [0, 0, 1, 1], [], []>} : vector<16x128xbf16>, vector<128x128xbf16>, vector<16x128xf32> -> vector<16x128xf32>
    %283 = arith.addf %277, %282 : vector<16x128xf32>
    %284 = vector.extract_strided_slice %260 {offsets = [1, 1, 0], sizes = [4, 4, 128], strides = [1, 1, 1]} : vector<6x6x128xbf16> to vector<4x4x128xbf16>
    %285 = vector.shape_cast %284 : vector<4x4x128xbf16> to vector<16x128xbf16>
    %c4_232 = arith.constant 4 : index
    %c0_233 = arith.constant 0 : index
    %c0_234 = arith.constant 0 : index
    %286 = vector.load %arg18[%c4_232, %c0_233, %c0_234] : memref<9x128x128xbf16, #tpu.memory_space<vmem>>, vector<1x128x128xbf16>
    %287 = vector.shape_cast %286 : vector<1x128x128xbf16> to vector<128x128xbf16>
    %cst_235 = arith.constant dense<0.000000e+00> : vector<16x128xf32>
    %288 = tpu.matmul %285, %287, %cst_235 {dimension_numbers = #tpu.dot_dimension_numbers<[1], [0], [0], [1], [0, 0, 1, 1], [], []>} : vector<16x128xbf16>, vector<128x128xbf16>, vector<16x128xf32> -> vector<16x128xf32>
    %289 = arith.addf %283, %288 : vector<16x128xf32>
    %290 = vector.extract_strided_slice %260 {offsets = [1, 2, 0], sizes = [4, 4, 128], strides = [1, 1, 1]} : vector<6x6x128xbf16> to vector<4x4x128xbf16>
    %291 = vector.shape_cast %290 : vector<4x4x128xbf16> to vector<16x128xbf16>
    %c5_236 = arith.constant 5 : index
    %c0_237 = arith.constant 0 : index
    %c0_238 = arith.constant 0 : index
    %292 = vector.load %arg18[%c5_236, %c0_237, %c0_238] : memref<9x128x128xbf16, #tpu.memory_space<vmem>>, vector<1x128x128xbf16>
    %293 = vector.shape_cast %292 : vector<1x128x128xbf16> to vector<128x128xbf16>
    %cst_239 = arith.constant dense<0.000000e+00> : vector<16x128xf32>
    %294 = tpu.matmul %291, %293, %cst_239 {dimension_numbers = #tpu.dot_dimension_numbers<[1], [0], [0], [1], [0, 0, 1, 1], [], []>} : vector<16x128xbf16>, vector<128x128xbf16>, vector<16x128xf32> -> vector<16x128xf32>
    %295 = arith.addf %289, %294 : vector<16x128xf32>
    %296 = vector.extract_strided_slice %260 {offsets = [2, 0, 0], sizes = [4, 4, 128], strides = [1, 1, 1]} : vector<6x6x128xbf16> to vector<4x4x128xbf16>
    %297 = vector.shape_cast %296 : vector<4x4x128xbf16> to vector<16x128xbf16>
    %c6_240 = arith.constant 6 : index
    %c0_241 = arith.constant 0 : index
    %c0_242 = arith.constant 0 : index
    %298 = vector.load %arg18[%c6_240, %c0_241, %c0_242] : memref<9x128x128xbf16, #tpu.memory_space<vmem>>, vector<1x128x128xbf16>
    %299 = vector.shape_cast %298 : vector<1x128x128xbf16> to vector<128x128xbf16>
    %cst_243 = arith.constant dense<0.000000e+00> : vector<16x128xf32>
    %300 = tpu.matmul %297, %299, %cst_243 {dimension_numbers = #tpu.dot_dimension_numbers<[1], [0], [0], [1], [0, 0, 1, 1], [], []>} : vector<16x128xbf16>, vector<128x128xbf16>, vector<16x128xf32> -> vector<16x128xf32>
    %301 = arith.addf %295, %300 : vector<16x128xf32>
    %302 = vector.extract_strided_slice %260 {offsets = [2, 1, 0], sizes = [4, 4, 128], strides = [1, 1, 1]} : vector<6x6x128xbf16> to vector<4x4x128xbf16>
    %303 = vector.shape_cast %302 : vector<4x4x128xbf16> to vector<16x128xbf16>
    %c7_244 = arith.constant 7 : index
    %c0_245 = arith.constant 0 : index
    %c0_246 = arith.constant 0 : index
    %304 = vector.load %arg18[%c7_244, %c0_245, %c0_246] : memref<9x128x128xbf16, #tpu.memory_space<vmem>>, vector<1x128x128xbf16>
    %305 = vector.shape_cast %304 : vector<1x128x128xbf16> to vector<128x128xbf16>
    %cst_247 = arith.constant dense<0.000000e+00> : vector<16x128xf32>
    %306 = tpu.matmul %303, %305, %cst_247 {dimension_numbers = #tpu.dot_dimension_numbers<[1], [0], [0], [1], [0, 0, 1, 1], [], []>} : vector<16x128xbf16>, vector<128x128xbf16>, vector<16x128xf32> -> vector<16x128xf32>
    %307 = arith.addf %301, %306 : vector<16x128xf32>
    %308 = vector.extract_strided_slice %260 {offsets = [2, 2, 0], sizes = [4, 4, 128], strides = [1, 1, 1]} : vector<6x6x128xbf16> to vector<4x4x128xbf16>
    %309 = vector.shape_cast %308 : vector<4x4x128xbf16> to vector<16x128xbf16>
    %c8_248 = arith.constant 8 : index
    %c0_249 = arith.constant 0 : index
    %c0_250 = arith.constant 0 : index
    %310 = vector.load %arg18[%c8_248, %c0_249, %c0_250] : memref<9x128x128xbf16, #tpu.memory_space<vmem>>, vector<1x128x128xbf16>
    %311 = vector.shape_cast %310 : vector<1x128x128xbf16> to vector<128x128xbf16>
    %cst_251 = arith.constant dense<0.000000e+00> : vector<16x128xf32>
    %312 = tpu.matmul %309, %311, %cst_251 {dimension_numbers = #tpu.dot_dimension_numbers<[1], [0], [0], [1], [0, 0, 1, 1], [], []>} : vector<16x128xbf16>, vector<128x128xbf16>, vector<16x128xf32> -> vector<16x128xf32>
    %313 = arith.addf %307, %312 : vector<16x128xf32>
    %c0_252 = arith.constant 0 : index
    %c0_253 = arith.constant 0 : index
    %314 = vector.load %arg19[%c0_252, %c0_253] : memref<1x128xf32, #tpu.memory_space<vmem>>, vector<1x128xf32>
    %315 = vector.broadcast %314 : vector<1x128xf32> to vector<16x128xf32>
    %316 = arith.addf %313, %315 : vector<16x128xf32>
    %cst_254 = arith.constant dense<0.000000e+00> : vector<4x128xf32>
    %317 = tpu.matmul %248, %316, %cst_254 {dimension_numbers = #tpu.dot_dimension_numbers<[1], [0], [0], [1], [0, 0, 1, 1], [], []>} : vector<4x16xf32>, vector<16x128xf32>, vector<4x128xf32> -> vector<4x128xf32>
    %c0_255 = arith.constant 0 : index
    %c0_256 = arith.constant 0 : index
    %318 = vector.load %arg5[%c0_255, %c0_256] : memref<1x4xf32, #tpu.memory_space<vmem>>, vector<1x4xf32>
    %cst_257 = arith.constant 0.000000e+00 : f32
    %319 = vector.broadcast %cst_257 : f32 to vector<4x128xf32>
    %320 = arith.maximumf %317, %319 : vector<4x128xf32>
    %cst_258 = arith.constant 0.000000e+00 : f32
    %321 = vector.broadcast %cst_258 : f32 to vector<1x4x128xf32>
    %c0_259 = arith.constant 0 : index
    %c0_260 = arith.constant 0 : index
    %c0_261 = arith.constant 0 : index
    %322 = vector.load %arg30[%c0_259, %c0_260, %c0_261] : memref<4x4x128xf32, #tpu.memory_space<vmem>>, vector<1x4x128xf32>
    tpu.vector_store %arg30[%c0_259, %c0_260, %c0_261], %321 {strides = array<i32>} : memref<4x4x128xf32, #tpu.memory_space<vmem>>, vector<1x4x128xf32>,
    %cst_262 = arith.constant 0.000000e+00 : f32
    %323 = vector.broadcast %cst_262 : f32 to vector<1x4x128xf32>
    %c3_263 = arith.constant 3 : index
    %c0_264 = arith.constant 0 : index
    %c0_265 = arith.constant 0 : index
    %324 = vector.load %arg30[%c3_263, %c0_264, %c0_265] : memref<4x4x128xf32, #tpu.memory_space<vmem>>, vector<1x4x128xf32>
    tpu.vector_store %arg30[%c3_263, %c0_264, %c0_265], %323 {strides = array<i32>} : memref<4x4x128xf32, #tpu.memory_space<vmem>>, vector<1x4x128xf32>,
    %cst_266 = arith.constant 0.000000e+00 : f32
    %325 = vector.broadcast %cst_266 : f32 to vector<4x1x128xf32>
    %c0_267 = arith.constant 0 : index
    %c0_268 = arith.constant 0 : index
    %c0_269 = arith.constant 0 : index
    %326 = vector.load %arg30[%c0_267, %c0_268, %c0_269] : memref<4x4x128xf32, #tpu.memory_space<vmem>>, vector<4x1x128xf32>
    tpu.vector_store %arg30[%c0_267, %c0_268, %c0_269], %325 {strides = array<i32>} : memref<4x4x128xf32, #tpu.memory_space<vmem>>, vector<4x1x128xf32>,
    %cst_270 = arith.constant 0.000000e+00 : f32
    %327 = vector.broadcast %cst_270 : f32 to vector<4x1x128xf32>
    %c0_271 = arith.constant 0 : index
    %c3_272 = arith.constant 3 : index
    %c0_273 = arith.constant 0 : index
    %328 = vector.load %arg30[%c0_271, %c3_272, %c0_273] : memref<4x4x128xf32, #tpu.memory_space<vmem>>, vector<4x1x128xf32>
    tpu.vector_store %arg30[%c0_271, %c3_272, %c0_273], %327 {strides = array<i32>} : memref<4x4x128xf32, #tpu.memory_space<vmem>>, vector<4x1x128xf32>,
    %329 = vector.shape_cast %320 : vector<4x128xf32> to vector<2x2x128xf32>
    %c1_274 = arith.constant 1 : index
    %c1_275 = arith.constant 1 : index
    %c0_276 = arith.constant 0 : index
    %330 = vector.load %arg30[%c1_274, %c1_275, %c0_276] : memref<4x4x128xf32, #tpu.memory_space<vmem>>, vector<2x2x128xf32>
    tpu.vector_store %arg30[%c1_274, %c1_275, %c0_276], %329 {strides = array<i32>} : memref<4x4x128xf32, #tpu.memory_space<vmem>>, vector<2x2x128xf32>,
    %c0_277 = arith.constant 0 : index
    %c0_278 = arith.constant 0 : index
    %c0_279 = arith.constant 0 : index
    %331 = vector.load %arg30[%c0_277, %c0_278, %c0_279] : memref<4x4x128xf32, #tpu.memory_space<vmem>>, vector<4x4x128xf32>
    %332 = arith.truncf %331 : vector<4x4x128xf32> to vector<4x4x128xbf16>
    %333 = vector.extract_strided_slice %332 {offsets = [0, 0, 0], sizes = [2, 2, 128], strides = [1, 1, 1]} : vector<4x4x128xbf16> to vector<2x2x128xbf16>
    %334 = vector.shape_cast %333 : vector<2x2x128xbf16> to vector<4x128xbf16>
    %c0_280 = arith.constant 0 : index
    %c0_281 = arith.constant 0 : index
    %c0_282 = arith.constant 0 : index
    %335 = vector.load %arg20[%c0_280, %c0_281, %c0_282] : memref<9x128x128xbf16, #tpu.memory_space<vmem>>, vector<1x128x128xbf16>
    %336 = vector.shape_cast %335 : vector<1x128x128xbf16> to vector<128x128xbf16>
    %cst_283 = arith.constant dense<0.000000e+00> : vector<4x128xf32>
    %337 = tpu.matmul %334, %336, %cst_283 {dimension_numbers = #tpu.dot_dimension_numbers<[1], [0], [0], [1], [0, 0, 1, 1], [], []>} : vector<4x128xbf16>, vector<128x128xbf16>, vector<4x128xf32> -> vector<4x128xf32>
    %338 = vector.extract_strided_slice %332 {offsets = [0, 1, 0], sizes = [2, 2, 128], strides = [1, 1, 1]} : vector<4x4x128xbf16> to vector<2x2x128xbf16>
    %339 = vector.shape_cast %338 : vector<2x2x128xbf16> to vector<4x128xbf16>
    %c1_284 = arith.constant 1 : index
    %c0_285 = arith.constant 0 : index
    %c0_286 = arith.constant 0 : index
    %340 = vector.load %arg20[%c1_284, %c0_285, %c0_286] : memref<9x128x128xbf16, #tpu.memory_space<vmem>>, vector<1x128x128xbf16>
    %341 = vector.shape_cast %340 : vector<1x128x128xbf16> to vector<128x128xbf16>
    %cst_287 = arith.constant dense<0.000000e+00> : vector<4x128xf32>
    %342 = tpu.matmul %339, %341, %cst_287 {dimension_numbers = #tpu.dot_dimension_numbers<[1], [0], [0], [1], [0, 0, 1, 1], [], []>} : vector<4x128xbf16>, vector<128x128xbf16>, vector<4x128xf32> -> vector<4x128xf32>
    %343 = arith.addf %337, %342 : vector<4x128xf32>
    %344 = vector.extract_strided_slice %332 {offsets = [0, 2, 0], sizes = [2, 2, 128], strides = [1, 1, 1]} : vector<4x4x128xbf16> to vector<2x2x128xbf16>
    %345 = vector.shape_cast %344 : vector<2x2x128xbf16> to vector<4x128xbf16>
    %c2_288 = arith.constant 2 : index
    %c0_289 = arith.constant 0 : index
    %c0_290 = arith.constant 0 : index
    %346 = vector.load %arg20[%c2_288, %c0_289, %c0_290] : memref<9x128x128xbf16, #tpu.memory_space<vmem>>, vector<1x128x128xbf16>
    %347 = vector.shape_cast %346 : vector<1x128x128xbf16> to vector<128x128xbf16>
    %cst_291 = arith.constant dense<0.000000e+00> : vector<4x128xf32>
    %348 = tpu.matmul %345, %347, %cst_291 {dimension_numbers = #tpu.dot_dimension_numbers<[1], [0], [0], [1], [0, 0, 1, 1], [], []>} : vector<4x128xbf16>, vector<128x128xbf16>, vector<4x128xf32> -> vector<4x128xf32>
    %349 = arith.addf %343, %348 : vector<4x128xf32>
    %350 = vector.extract_strided_slice %332 {offsets = [1, 0, 0], sizes = [2, 2, 128], strides = [1, 1, 1]} : vector<4x4x128xbf16> to vector<2x2x128xbf16>
    %351 = vector.shape_cast %350 : vector<2x2x128xbf16> to vector<4x128xbf16>
    %c3_292 = arith.constant 3 : index
    %c0_293 = arith.constant 0 : index
    %c0_294 = arith.constant 0 : index
    %352 = vector.load %arg20[%c3_292, %c0_293, %c0_294] : memref<9x128x128xbf16, #tpu.memory_space<vmem>>, vector<1x128x128xbf16>
    %353 = vector.shape_cast %352 : vector<1x128x128xbf16> to vector<128x128xbf16>
    %cst_295 = arith.constant dense<0.000000e+00> : vector<4x128xf32>
    %354 = tpu.matmul %351, %353, %cst_295 {dimension_numbers = #tpu.dot_dimension_numbers<[1], [0], [0], [1], [0, 0, 1, 1], [], []>} : vector<4x128xbf16>, vector<128x128xbf16>, vector<4x128xf32> -> vector<4x128xf32>
    %355 = arith.addf %349, %354 : vector<4x128xf32>
    %356 = vector.extract_strided_slice %332 {offsets = [1, 1, 0], sizes = [2, 2, 128], strides = [1, 1, 1]} : vector<4x4x128xbf16> to vector<2x2x128xbf16>
    %357 = vector.shape_cast %356 : vector<2x2x128xbf16> to vector<4x128xbf16>
    %c4_296 = arith.constant 4 : index
    %c0_297 = arith.constant 0 : index
    %c0_298 = arith.constant 0 : index
    %358 = vector.load %arg20[%c4_296, %c0_297, %c0_298] : memref<9x128x128xbf16, #tpu.memory_space<vmem>>, vector<1x128x128xbf16>
    %359 = vector.shape_cast %358 : vector<1x128x128xbf16> to vector<128x128xbf16>
    %cst_299 = arith.constant dense<0.000000e+00> : vector<4x128xf32>
    %360 = tpu.matmul %357, %359, %cst_299 {dimension_numbers = #tpu.dot_dimension_numbers<[1], [0], [0], [1], [0, 0, 1, 1], [], []>} : vector<4x128xbf16>, vector<128x128xbf16>, vector<4x128xf32> -> vector<4x128xf32>
    %361 = arith.addf %355, %360 : vector<4x128xf32>
    %362 = vector.extract_strided_slice %332 {offsets = [1, 2, 0], sizes = [2, 2, 128], strides = [1, 1, 1]} : vector<4x4x128xbf16> to vector<2x2x128xbf16>
    %363 = vector.shape_cast %362 : vector<2x2x128xbf16> to vector<4x128xbf16>
    %c5_300 = arith.constant 5 : index
    %c0_301 = arith.constant 0 : index
    %c0_302 = arith.constant 0 : index
    %364 = vector.load %arg20[%c5_300, %c0_301, %c0_302] : memref<9x128x128xbf16, #tpu.memory_space<vmem>>, vector<1x128x128xbf16>
    %365 = vector.shape_cast %364 : vector<1x128x128xbf16> to vector<128x128xbf16>
    %cst_303 = arith.constant dense<0.000000e+00> : vector<4x128xf32>
    %366 = tpu.matmul %363, %365, %cst_303 {dimension_numbers = #tpu.dot_dimension_numbers<[1], [0], [0], [1], [0, 0, 1, 1], [], []>} : vector<4x128xbf16>, vector<128x128xbf16>, vector<4x128xf32> -> vector<4x128xf32>
    %367 = arith.addf %361, %366 : vector<4x128xf32>
    %368 = vector.extract_strided_slice %332 {offsets = [2, 0, 0], sizes = [2, 2, 128], strides = [1, 1, 1]} : vector<4x4x128xbf16> to vector<2x2x128xbf16>
    %369 = vector.shape_cast %368 : vector<2x2x128xbf16> to vector<4x128xbf16>
    %c6_304 = arith.constant 6 : index
    %c0_305 = arith.constant 0 : index
    %c0_306 = arith.constant 0 : index
    %370 = vector.load %arg20[%c6_304, %c0_305, %c0_306] : memref<9x128x128xbf16, #tpu.memory_space<vmem>>, vector<1x128x128xbf16>
    %371 = vector.shape_cast %370 : vector<1x128x128xbf16> to vector<128x128xbf16>
    %cst_307 = arith.constant dense<0.000000e+00> : vector<4x128xf32>
    %372 = tpu.matmul %369, %371, %cst_307 {dimension_numbers = #tpu.dot_dimension_numbers<[1], [0], [0], [1], [0, 0, 1, 1], [], []>} : vector<4x128xbf16>, vector<128x128xbf16>, vector<4x128xf32> -> vector<4x128xf32>
    %373 = arith.addf %367, %372 : vector<4x128xf32>
    %374 = vector.extract_strided_slice %332 {offsets = [2, 1, 0], sizes = [2, 2, 128], strides = [1, 1, 1]} : vector<4x4x128xbf16> to vector<2x2x128xbf16>
    %375 = vector.shape_cast %374 : vector<2x2x128xbf16> to vector<4x128xbf16>
    %c7_308 = arith.constant 7 : index
    %c0_309 = arith.constant 0 : index
    %c0_310 = arith.constant 0 : index
    %376 = vector.load %arg20[%c7_308, %c0_309, %c0_310] : memref<9x128x128xbf16, #tpu.memory_space<vmem>>, vector<1x128x128xbf16>
    %377 = vector.shape_cast %376 : vector<1x128x128xbf16> to vector<128x128xbf16>
    %cst_311 = arith.constant dense<0.000000e+00> : vector<4x128xf32>
    %378 = tpu.matmul %375, %377, %cst_311 {dimension_numbers = #tpu.dot_dimension_numbers<[1], [0], [0], [1], [0, 0, 1, 1], [], []>} : vector<4x128xbf16>, vector<128x128xbf16>, vector<4x128xf32> -> vector<4x128xf32>
    %379 = arith.addf %373, %378 : vector<4x128xf32>
    %380 = vector.extract_strided_slice %332 {offsets = [2, 2, 0], sizes = [2, 2, 128], strides = [1, 1, 1]} : vector<4x4x128xbf16> to vector<2x2x128xbf16>
    %381 = vector.shape_cast %380 : vector<2x2x128xbf16> to vector<4x128xbf16>
    %c8_312 = arith.constant 8 : index
    %c0_313 = arith.constant 0 : index
    %c0_314 = arith.constant 0 : index
    %382 = vector.load %arg20[%c8_312, %c0_313, %c0_314] : memref<9x128x128xbf16, #tpu.memory_space<vmem>>, vector<1x128x128xbf16>
    %383 = vector.shape_cast %382 : vector<1x128x128xbf16> to vector<128x128xbf16>
    %cst_315 = arith.constant dense<0.000000e+00> : vector<4x128xf32>
    %384 = tpu.matmul %381, %383, %cst_315 {dimension_numbers = #tpu.dot_dimension_numbers<[1], [0], [0], [1], [0, 0, 1, 1], [], []>} : vector<4x128xbf16>, vector<128x128xbf16>, vector<4x128xf32> -> vector<4x128xf32>
    %385 = arith.addf %379, %384 : vector<4x128xf32>
    %c0_316 = arith.constant 0 : index
    %c0_317 = arith.constant 0 : index
    %386 = vector.load %arg21[%c0_316, %c0_317] : memref<1x128xf32, #tpu.memory_space<vmem>>, vector<1x128xf32>
    %387 = vector.broadcast %386 : vector<1x128xf32> to vector<4x128xf32>
    %388 = arith.addf %385, %387 : vector<4x128xf32>
    %cst_318 = arith.constant dense<0.000000e+00> : vector<1x128xf32>
    %389 = tpu.matmul %318, %388, %cst_318 {dimension_numbers = #tpu.dot_dimension_numbers<[1], [0], [0], [1], [0, 0, 1, 1], [], []>} : vector<1x4xf32>, vector<4x128xf32>, vector<1x128xf32> -> vector<1x128xf32>
    %c0_319 = arith.constant 0 : index
    %c0_320 = arith.constant 0 : index
    %c0_321 = arith.constant 0 : index
    %390 = vector.load %arg22[%c0_319, %c0_320, %c0_321] : memref<1x256x128xf32, #tpu.memory_space<vmem>>, vector<1x256x128xf32>
    %391 = vector.shape_cast %390 : vector<1x256x128xf32> to vector<256x128xf32>
    %392 = vector.shape_cast %111 : vector<256x128xf32> to vector<1x256x128xf32>
    tpu.vector_store %arg22[%c0_319, %c0_320, %c0_321], %392 {strides = array<i32>} : memref<1x256x128xf32, #tpu.memory_space<vmem>>, vector<1x256x128xf32>,
    %c0_322 = arith.constant 0 : index
    %c0_323 = arith.constant 0 : index
    %c0_324 = arith.constant 0 : index
    %393 = vector.load %arg23[%c0_322, %c0_323, %c0_324] : memref<1x64x128xf32, #tpu.memory_space<vmem>>, vector<1x64x128xf32>
    %394 = vector.shape_cast %393 : vector<1x64x128xf32> to vector<64x128xf32>
    %395 = vector.shape_cast %179 : vector<64x128xf32> to vector<1x64x128xf32>
    tpu.vector_store %arg23[%c0_322, %c0_323, %c0_324], %395 {strides = array<i32>} : memref<1x64x128xf32, #tpu.memory_space<vmem>>, vector<1x64x128xf32>,
    %c0_325 = arith.constant 0 : index
    %c0_326 = arith.constant 0 : index
    %c0_327 = arith.constant 0 : index
    %396 = vector.load %arg24[%c0_325, %c0_326, %c0_327] : memref<1x16x128xf32, #tpu.memory_space<vmem>>, vector<1x16x128xf32>
    %397 = vector.shape_cast %396 : vector<1x16x128xf32> to vector<16x128xf32>
    %398 = vector.shape_cast %247 : vector<16x128xf32> to vector<1x16x128xf32>
    tpu.vector_store %arg24[%c0_325, %c0_326, %c0_327], %398 {strides = array<i32>} : memref<1x16x128xf32, #tpu.memory_space<vmem>>, vector<1x16x128xf32>,
    %c0_328 = arith.constant 0 : index
    %c0_329 = arith.constant 0 : index
    %c0_330 = arith.constant 0 : index
    %399 = vector.load %arg25[%c0_328, %c0_329, %c0_330] : memref<1x4x128xf32, #tpu.memory_space<vmem>>, vector<1x4x128xf32>
    %400 = vector.shape_cast %399 : vector<1x4x128xf32> to vector<4x128xf32>
    %401 = vector.shape_cast %317 : vector<4x128xf32> to vector<1x4x128xf32>
    tpu.vector_store %arg25[%c0_328, %c0_329, %c0_330], %401 {strides = array<i32>} : memref<1x4x128xf32, #tpu.memory_space<vmem>>, vector<1x4x128xf32>,
    %c0_331 = arith.constant 0 : index
    %c0_332 = arith.constant 0 : index
    %c0_333 = arith.constant 0 : index
    %402 = vector.load %arg26[%c0_331, %c0_332, %c0_333] : memref<1x1x128xf32, #tpu.memory_space<vmem>>, vector<1x1x128xf32>
    %403 = vector.shape_cast %402 : vector<1x1x128xf32> to vector<1x128xf32>
    %404 = vector.shape_cast %389 : vector<1x128xf32> to vector<1x1x128xf32>
    tpu.vector_store %arg26[%c0_331, %c0_332, %c0_333], %404 {strides = array<i32>} : memref<1x1x128xf32, #tpu.memory_space<vmem>>, vector<1x1x128xf32>,
    return
  }
  func.func @transform_0(%arg0: i32) -> (i32, i32, i32) {
    %c0_i32 = arith.constant 0 : i32
    %c0_i32_0 = arith.constant 0 : i32
    %c0_i32_1 = arith.constant 0 : i32
    return %arg0, %c0_i32, %c0_i32_0 : i32, i32, i32
  }
  func.func @transform_1(%arg0: i32) -> (i32, i32, i32) {
    %c0_i32 = arith.constant 0 : i32
    %c0_i32_0 = arith.constant 0 : i32
    %c0_i32_1 = arith.constant 0 : i32
    return %arg0, %c0_i32, %c0_i32_0 : i32, i32, i32
  }
  func.func @transform_2(%arg0: i32) -> (i32, i32, i32) {
    %c0_i32 = arith.constant 0 : i32
    %c0_i32_0 = arith.constant 0 : i32
    %c0_i32_1 = arith.constant 0 : i32
    return %arg0, %c0_i32, %c0_i32_0 : i32, i32, i32
  }
  func.func @transform_3(%arg0: i32) -> (i32, i32) {
    %c0_i32 = arith.constant 0 : i32
    %c0_i32_0 = arith.constant 0 : i32
    %c0_i32_1 = arith.constant 0 : i32
    return %c0_i32, %c0_i32_0 : i32, i32
  }
  func.func @transform_4(%arg0: i32) -> (i32, i32) {
    %c0_i32 = arith.constant 0 : i32
    %c0_i32_0 = arith.constant 0 : i32
    %c0_i32_1 = arith.constant 0 : i32
    return %c0_i32, %c0_i32_0 : i32, i32
  }
  func.func @transform_5(%arg0: i32) -> (i32, i32) {
    %c0_i32 = arith.constant 0 : i32
    %c0_i32_0 = arith.constant 0 : i32
    %c0_i32_1 = arith.constant 0 : i32
    return %c0_i32, %c0_i32_0 : i32, i32
  }
  func.func @transform_6(%arg0: i32) -> (i32, i32) {
    %c0_i32 = arith.constant 0 : i32
    %c0_i32_0 = arith.constant 0 : i32
    %c0_i32_1 = arith.constant 0 : i32
    return %c0_i32, %c0_i32_0 : i32, i32
  }
  func.func @transform_7(%arg0: i32) -> (i32, i32) {
    %c0_i32 = arith.constant 0 : i32
    %c0_i32_0 = arith.constant 0 : i32
    %c0_i32_1 = arith.constant 0 : i32
    return %c0_i32, %c0_i32_0 : i32, i32
  }
  func.func @transform_8(%arg0: i32) -> (i32, i32) {
    %c0_i32 = arith.constant 0 : i32
    %c0_i32_0 = arith.constant 0 : i32
    %c0_i32_1 = arith.constant 0 : i32
    return %c0_i32, %c0_i32_0 : i32, i32
  }
  func.func @transform_9(%arg0: i32) -> (i32, i32) {
    %c0_i32 = arith.constant 0 : i32
    %c0_i32_0 = arith.constant 0 : i32
    %c0_i32_1 = arith.constant 0 : i32
    return %c0_i32, %c0_i32_0 : i32, i32
  }
  func.func @transform_10(%arg0: i32) -> (i32, i32) {
    %c0_i32 = arith.constant 0 : i32
    %c0_i32_0 = arith.constant 0 : i32
    %c0_i32_1 = arith.constant 0 : i32
    return %c0_i32, %c0_i32_0 : i32, i32
  }
  func.func @transform_11(%arg0: i32) -> (i32, i32, i32) {
    %c0_i32 = arith.constant 0 : i32
    %c0_i32_0 = arith.constant 0 : i32
    %c0_i32_1 = arith.constant 0 : i32
    %c0_i32_2 = arith.constant 0 : i32
    return %c0_i32, %c0_i32_0, %c0_i32_1 : i32, i32, i32
  }
  func.func @transform_12(%arg0: i32) -> (i32, i32) {
    %c0_i32 = arith.constant 0 : i32
    %c0_i32_0 = arith.constant 0 : i32
    %c0_i32_1 = arith.constant 0 : i32
    return %c0_i32, %c0_i32_0 : i32, i32
  }
  func.func @transform_13(%arg0: i32) -> (i32, i32, i32) {
    %c0_i32 = arith.constant 0 : i32
    %c0_i32_0 = arith.constant 0 : i32
    %c0_i32_1 = arith.constant 0 : i32
    %c0_i32_2 = arith.constant 0 : i32
    return %c0_i32, %c0_i32_0, %c0_i32_1 : i32, i32, i32
  }
  func.func @transform_14(%arg0: i32) -> (i32, i32) {
    %c0_i32 = arith.constant 0 : i32
    %c0_i32_0 = arith.constant 0 : i32
    %c0_i32_1 = arith.constant 0 : i32
    return %c0_i32, %c0_i32_0 : i32, i32
  }
  func.func @transform_15(%arg0: i32) -> (i32, i32, i32) {
    %c0_i32 = arith.constant 0 : i32
    %c0_i32_0 = arith.constant 0 : i32
    %c0_i32_1 = arith.constant 0 : i32
    %c0_i32_2 = arith.constant 0 : i32
    return %c0_i32, %c0_i32_0, %c0_i32_1 : i32, i32, i32
  }
  func.func @transform_16(%arg0: i32) -> (i32, i32) {
    %c0_i32 = arith.constant 0 : i32
    %c0_i32_0 = arith.constant 0 : i32
    %c0_i32_1 = arith.constant 0 : i32
    return %c0_i32, %c0_i32_0 : i32, i32
  }
  func.func @transform_17(%arg0: i32) -> (i32, i32, i32) {
    %c0_i32 = arith.constant 0 : i32
    %c0_i32_0 = arith.constant 0 : i32
    %c0_i32_1 = arith.constant 0 : i32
    %c0_i32_2 = arith.constant 0 : i32
    return %c0_i32, %c0_i32_0, %c0_i32_1 : i32, i32, i32
  }
  func.func @transform_18(%arg0: i32) -> (i32, i32) {
    %c0_i32 = arith.constant 0 : i32
    %c0_i32_0 = arith.constant 0 : i32
    %c0_i32_1 = arith.constant 0 : i32
    return %c0_i32, %c0_i32_0 : i32, i32
  }
  func.func @transform_19(%arg0: i32) -> (i32, i32, i32) {
    %c0_i32 = arith.constant 0 : i32
    %c0_i32_0 = arith.constant 0 : i32
    %c0_i32_1 = arith.constant 0 : i32
    %c0_i32_2 = arith.constant 0 : i32
    return %c0_i32, %c0_i32_0, %c0_i32_1 : i32, i32, i32
  }
  func.func @transform_20(%arg0: i32) -> (i32, i32) {
    %c0_i32 = arith.constant 0 : i32
    %c0_i32_0 = arith.constant 0 : i32
    %c0_i32_1 = arith.constant 0 : i32
    return %c0_i32, %c0_i32_0 : i32, i32
  }
  func.func @transform_21(%arg0: i32) -> (i32, i32, i32) {
    %c0_i32 = arith.constant 0 : i32
    %c0_i32_0 = arith.constant 0 : i32
    %c0_i32_1 = arith.constant 0 : i32
    return %arg0, %c0_i32, %c0_i32_0 : i32, i32, i32
  }
  func.func @transform_22(%arg0: i32) -> (i32, i32, i32) {
    %c0_i32 = arith.constant 0 : i32
    %c0_i32_0 = arith.constant 0 : i32
    %c0_i32_1 = arith.constant 0 : i32
    return %arg0, %c0_i32, %c0_i32_0 : i32, i32, i32
  }
  func.func @transform_23(%arg0: i32) -> (i32, i32, i32) {
    %c0_i32 = arith.constant 0 : i32
    %c0_i32_0 = arith.constant 0 : i32
    %c0_i32_1 = arith.constant 0 : i32
    return %arg0, %c0_i32, %c0_i32_0 : i32, i32, i32
  }
  func.func @transform_24(%arg0: i32) -> (i32, i32, i32) {
    %c0_i32 = arith.constant 0 : i32
    %c0_i32_0 = arith.constant 0 : i32
    %c0_i32_1 = arith.constant 0 : i32
    return %arg0, %c0_i32, %c0_i32_0 : i32, i32, i32
  }
  func.func @transform_25(%arg0: i32) -> (i32, i32, i32) {
    %c0_i32 = arith.constant 0 : i32
    %c0_i32_0 = arith.constant 0 : i32
    %c0_i32_1 = arith.constant 0 : i32
    return %arg0, %c0_i32, %c0_i32_0 : i32, i32, i32
  }
}

</mosaic_0001>

<bundles_post_ra>
// kernel: fn.1
= control target key start
LH: loop header
LB: loop body
LE: loop exit
PB: predicated region body
PF: predicated region fallthrough
CT: control target
= control target key end

     0   :  { %s16376_s0 = inlined_call_operand.vmem [shape: f32[2,256,64], index: 0, kind: input, shape index: {}]   ;;  %s16377_s1 = inlined_call_operand.vmem [shape: f32[2,64,128], index: 1, kind: input, shape index: {}]   ;;  %s16378_s2 = inlined_call_operand.vmem [shape: f32[2,16,256], index: 2, kind: input, shape index: {}]   ;;  %s16379_s3 = inlined_call_operand.vmem [shape: f32[4,16], index: 3, kind: input, shape index: {}]   ;;  %s16380_s4 = inlined_call_operand.vmem [shape: f32[1,4], index: 4, kind: input, shape index: {}]   ;;  %s16381_s5 = inlined_call_operand.vmem [shape: bf16[64,128], index: 5, kind: input, shape index: {}]   ;;  %s16382_s6 = inlined_call_operand.vmem [shape: f32[1,128], index: 6, kind: input, shape index: {}]   ;;  %s16383_s7 = inlined_call_operand.vmem [shape: bf16[128,128], index: 7, kind: input, shape index: {}]   ;;  %s16384_s8 = inlined_call_operand.vmem [shape: f32[1,128], index: 8, kind: input, shape index: {}]   ;;  %s16385_s9 = inlined_call_operand.vmem [shape: bf16[256,128], index: 9, kind: input, shape index: {}]   ;;  %s16386_s10 = inlined_call_operand.vmem [shape: f32[1,128], index: 10, kind: input, shape index: {}]   ;;  %s16387_s11 = inlined_call_operand.vmem [shape: bf16[9,128,128], index: 11, kind: input, shape index: {}]   ;;  %s16388_s12 = inlined_call_operand.vmem [shape: f32[1,128], index: 12, kind: input, shape index: {}]   ;;  %s16389_s13 = inlined_call_operand.vmem [shape: bf16[9,128,128], index: 13, kind: input, shape index: {}]   ;;  %s16390_s14 = inlined_call_operand.vmem [shape: f32[1,128], index: 14, kind: input, shape index: {}]   ;;  %s16391_s15 = inlined_call_operand.vmem [shape: bf16[9,128,128], index: 15, kind: input, shape index: {}]   ;;  %s16392_s16 = inlined_call_operand.vmem [shape: f32[1,128], index: 16, kind: input, shape index: {}]   ;;  %s16393_s17 = inlined_call_operand.vmem [shape: bf16[9,128,128], index: 17, kind: input, shape index: {}]   ;;  %s16394_s18 = inlined_call_operand.vmem [shape: f32[1,128], index: 18, kind: input, shape index: {}]   ;;  %s16395_s19 = inlined_call_operand.vmem [shape: bf16[9,128,128], index: 19, kind: input, shape index: {}]   ;;  %s16396_s20 = inlined_call_operand.vmem [shape: f32[1,128], index: 20, kind: input, shape index: {}]   ;;  %s16397_s21 = inlined_call_operand.hbm [shape: f32[2,256,128], index: 21, kind: output, shape index: {0}]   ;;  %s16398_s22 = inlined_call_operand.hbm [shape: f32[2,64,128], index: 22, kind: output, shape index: {1}]   ;;  %s16399_s23 = inlined_call_operand.hbm [shape: f32[2,16,128], index: 23, kind: output, shape index: {2}]   ;;  %s16400_s24 = inlined_call_operand.hbm [shape: f32[2,4,128], index: 24, kind: output, shape index: {3}]   ;;  %s16401_s25 = inlined_call_operand.hbm [shape: f32[2,1,128], index: 25, kind: output, shape index: {4}]  }
   0x1   :  { %16556 = sst [smem:[#allocation96_spill]] %s16376_s0 }
   0x2   :  { %16557 = sst [smem:[#allocation97_spill]] %s16377_s1 }
   0x3   :  { %16558 = sst [smem:[#allocation98_spill]] %s16378_s2 }
   0x4   :  { %16559 = sst [smem:[#allocation99_spill]] %s16379_s3 }
   0x5   :  { %16560 = sst [smem:[#allocation100_spill]] %s16380_s4 }
   0x6   :  { %16561 = sst [smem:[#allocation101_spill]] %s16381_s5 }
   0x7   :  { %16562 = sst [smem:[#allocation102_spill]] %s16382_s6 }
   0x8   :  { %16563 = sst [smem:[#allocation103_spill]] %s16383_s7 }
   0x9   :  { %16564 = sst [smem:[#allocation104_spill]] %s16384_s8 }
   0xa   :  { %16565 = sst [smem:[#allocation105_spill]] %s16385_s9 }
   0xb   :  { %16566 = sst [smem:[#allocation106_spill]] %s16386_s10 }
   0xc   :  { %16567 = sst [smem:[#allocation107_spill]] %s16387_s11 }
   0xd   :  { %16568 = sst [smem:[#allocation108_spill]] %s16388_s12 }
   0xe   :  { %16569 = sst [smem:[#allocation109_spill]] %s16389_s13 }
   0xf   :  { %16570 = sst [smem:[#allocation110_spill]] %s16390_s14 }
  0x10   :  { %16571 = sst [smem:[#allocation111_spill]] %s16391_s15 }
  0x11   :  { %16572 = sst [smem:[#allocation112_spill]] %s16396_s20 }
  0x12   :  { %16573 = sst [smem:[#allocation113_spill]] %s16397_s21 }
  0x13   :  { %16574 = sst [smem:[#allocation114_spill]] %s16398_s22 }
  0x14   :  { %16575 = sst [smem:[#allocation115_spill]] %s16399_s23 }
  0x15   :  { %16576 = sst [smem:[#allocation116_spill]] %s16400_s24 }
  0x16   :  { %16577 = sst [smem:[#allocation117_spill]] %s16401_s25 }
  0x17   :  { %31 = vsyncpa [#allocation7], 0 }
  0x18   :  { %33 = vsyncpa [#allocation7 + $0x1], 0 }
  0x19   :  { %34 = vsyncpa [#allocation9], 0 }
  0x1a   :  { %36 = vsyncpa [#allocation9 + $0x1], 0 }
  0x1b   :  { %37 = vsyncpa [#allocation12], 0 }
  0x1c   :  { %39 = vsyncpa [#allocation12 + $0x1], 0  ;;  %s12146_s29 = smov 0   ;;  %s12148_s2 = smov 0  }
  0x1d   :  { %s12150_s6 = smov 0   ;;  %s12152_s30 = smov 0  }
  0x1e LB: > { %16578 = sst [smem:[#allocation17_spill]] %s11997_s29  ;;  %s12167_s7 = sadd.s32 4294967295, %s12009_s30   ;;  %s12009_s30 = sphi %s12152_s30, %s16892_s30   ;;  %s12005_s6 = sphi %s12150_s6, %s16894_s6   ;;  %s12001_s2 = sphi %s12148_s2, %s16896_s2   ;;  %s11997_s29 = sphi %s12146_s29, %s16895_s29  }
  0x1f   : > { %16579 = sst [smem:[#allocation18_spill]] %s12005_s6  ;;  %s16406_s3 = sadd.s32 4294967294, %s12009_s30  }
  0x20   : > { %16580 = sst [smem:[#allocation19_spill]] %s12009_s30  ;;  %s12171_s26 = sadd.s32 1, %s12009_s30  }
  0x21   : > { %16581 = sst [smem:[#allocation20_spill]] %s12171_s26  ;;  %s508_s1 = sadd.s32 1, %s12005_s6 }
  0x22   : > { %s505_s8 = ssub.s32 %s12009_s30, %s12171_s26  ;;  %p518_p0 = scmp.ne.s32.totalorder %s12005_s6, %s12001_s2 }
  0x23   : > { %p506_p1 = scmp.eq.s32.totalorder %s505_s8, 0  ;;  %p519_p2 = scmp.eq.s32.totalorder %s12167_s7, 1 }
  0x24   : > { %p524_p3 = scmp.ne.s32.totalorder %s12001_s2, %s11997_s29  ;;  %p525_p4 = scmp.eq.s32.totalorder %s16406_s3, 1 }
  0x25   : > { %s12184_s27 = scalar_select %p506_p1, %s12005_s6, %s508_s1  }
  0x26   : > { %p12186_p5 = por %p519_p2, %p518_p0  ;;  %p12190_p6 = por %p525_p4, %p524_p3 }
  0x27   : > { %16582 = sst [smem:[#allocation21_spill]] %s12184_s27  ;;  %p9080_p7 = scmp.ge.s32.totalorder %s12009_s30, 1 }
  0x28   : > { %s16583_s4 = scalar_select %p12186_p5, 1, 0 }
  0x29   : > { %s16585_s28 = scalar_select %p12190_p6, 1, 0 }
  0x2a   : > { %16584 = sst [smem:[#allocation22_spill]] %s16583_s4  ;;  %p725_p8 = scmp.lt.s32.totalorder %s12009_s30, 3 }
  0x2b   : > { %16586 = sst [smem:[#allocation23_spill]] %s16585_s28 }
  0x2c   : > { %p726_p9 = pnand %p9080_p7, %p725_p8 }
  0x2e   : > { %729 = sbr.rel (%p726_p9) target bundleno = 2064 (0x810), region = 104 }
  0x33   : > { %s16587_s0 = sld [smem:[#allocation105_spill]]  ;;  %p822_p10 = scmp.lt.s32.totalorder %s12167_s7, 1  ;;  %vm1316_vm0 = vcmask 523264   ;;  %vm1121_vm1 = vcmask 1040384   ;;  %vm1123_vm2 = vcmask 1041409   ;;  %vm1126_vm3 = vcmask 1042434  }
  0x34   : > { %s16588_s6 = sld [smem:[#allocation103_spill]]  ;;  %vm1129_vm4 = vcmask 1043459   ;;  %vm5809_vm5 = vcmask 1043458   ;;  %vm6059_vm6 = vmor %vm1121_vm1, %vm1126_vm3  ;;  %vm6060_vm7 = vcmask 1044484   ;;  %vm5805_vm8 = vcmask 1041408   ;;  %s16549_s28 = sand.u32 1, %s12167_s7  }
  0x35   : > { %s16590_s30 = sld [smem:[#allocation101_spill]]  ;;  %vm6061_vm9 = vmor %vm6059_vm6, %vm6060_vm7  ;;  %vm6062_vm10 = vcmask 1046534   ;;  %vm2867_vm12 = vcmask 1042432   ;;  %vm2868_vm13 = vcmask 1046532   ;;  %vm2013_vm15 = vsmask.f32 3328 }
  0x36   : > { %s12216_s1 = scalar_select %p822_p10, %s12167_s7, 1  ;;  %vm12410_vm11 = vmor %vm6061_vm9, %vm6062_vm10  ;;  %vm5832_vm6 = vsmask.f32 3336  ;;  %vm5834_vm7 = vsmask.f32 5392 }
  0x37   : > { %s16592_s24 = sld [smem:[#allocation96_spill]]  ;;  %vm12687_vm14 = vmor %vm2867_vm12, %vm2868_vm13  ;;  %vm5836_vm9 = vsmask.f32 7448 }
  0x38   : > { %s11359_s27 = sshll.u32 %s12216_s1, 8  ;;  %s11360_s3 = sshll.u32 %s12216_s1, 6 }
  0x39   : > { %v11369_v0 = vld [vmem:[%s16587_s0 + $0x38] sm:$0xff]  ;;  %v11368_v4 = vld [vmem:[%s16587_s0 + $0x30] sm:$0xff]  ;;  %v11367_v8 = vld [vmem:[%s16587_s0 + $0x28] sm:$0xff]  ;;  %s16594_s29 = sld [smem:[#allocation97_spill]] }
  0x3a   : > { %v11377_v1 = vld [vmem:[%s16587_s0 + $0x78] sm:$0xff]  ;;  %s16589_s26 = smov %s16588_s6  ;;  %976 = vmatpush.bf16.msra.mxu0 %v11369_v0  ;;  %v11376_v5 = vld [vmem:[%s16587_s0 + $0x70] sm:$0xff]  ;;  %v11375_v9 = vld [vmem:[%s16587_s0 + $0x68] sm:$0xff]  ;;  %s16595_s10 = sld [smem:[#allocation106_spill]] }
  0x3b   : > { %v11385_v2 = vld [vmem:[%s16588_s6 + $0x38] sm:$0xff]  ;;  %s16591_s25 = smov %s16590_s30  ;;  %990 = vmatpush.bf16.msra.mxu1 %v11377_v1  ;;  %v11384_v6 = vld [vmem:[%s16589_s26 + $0x30] sm:$0xff]  ;;  %v11383_v10 = vld [vmem:[%s16589_s26 + $0x28] sm:$0xff]  ;;  %s11361_s6 = sshll.u32 %s12216_s1, 5 }
  0x3c   : > { %v11389_v3 = vld [vmem:[%s16590_s30 + $0x18] sm:$0xff]  ;;  %1084 = vmatpush.bf16.msra.mxu2 %v11385_v2  ;;  %v11388_v7 = vld [vmem:[%s16591_s25 + $0x10] sm:$0xff]  ;;  %v11387_v11 = vld [vmem:[%s16591_s25 + $0x8] sm:$0xff]  ;;  %s16604_s11 = sld [smem:[#allocation107_spill]] }
  0x3d   : > { %1369 = vmatpush.bf16.msra.mxu3 %v11389_v3  ;;  %s12240_s22 = scalar_lea.vmem %s16592_s24, %s11359_s27  ;;  %v11366_v12 = vld [vmem:[%s16587_s0 + $0x20] sm:$0xff]  ;;  %v11365_v18 = vld [vmem:[%s16587_s0 + $0x18] sm:$0xff]  ;;  %v11364_v22 = vld [vmem:[%s16587_s0 + $0x10] sm:$0xff]  ;;  %s16593_s24 = sld [smem:[#allocation98_spill]] }
  0x3e   : > { %977 = vmatpush.bf16.msra.mxu0 %v11368_v4  ;;  %v11374_v13 = vld [vmem:[%s16587_s0 + $0x60] sm:$0xff]  ;;  %v1233_v17 = vld [vmem:[%s12240_s22 + $0x8] sm:$0xff]  ;;  %v11373_v19 = vld [vmem:[%s16587_s0 + $0x58] sm:$0xff]  ;;  %s16606_s8 = sld [smem:[#allocation102_spill]]  ;;  %s16267_s27 = scalar_lea.sflag [#allocation9], %s16549_s28 }
  0x3f   : > { %991 = vmatpush.bf16.msra.mxu1 %v11376_v5  ;;  %v11382_v14 = vld [vmem:[%s16589_s26 + $0x20] sm:$0xff]  ;;  %v11381_v20 = vld [vmem:[%s16589_s26 + $0x18] sm:$0xff]  ;;  %v11372_v23 = vld [vmem:[%s16587_s0 + $0x50] sm:$0xff]  ;;  %s12292_s30 = scalar_lea.vmem %s16594_s29, %s11360_s3  ;;  %s16729_s13 = sld [smem:[#allocation109_spill]] }
  0x40   : > { %1085 = vmatpush.bf16.msra.mxu2 %v11384_v6  ;;  %v11386_v15 = vld [vmem:[%s16591_s25] sm:$0xff]  ;;  %v11380_v24 = vld [vmem:[%s16589_s26 + $0x10] sm:$0xff]  ;;  %v11363_v25 = vld [vmem:[%s16587_s0 + $0x8] sm:$0xff]  ;;  %s16786_s15 = sld [smem:[#allocation111_spill]] }
  0x41   : > { %1370 = vmatpush.bf16.msra.mxu3 %v11388_v7  ;;  %v1232_v16 = vld [vmem:[%s12240_s22] sm:$0xff]  ;;  %v11371_v26 = vld [vmem:[%s16587_s0 + $0x48] sm:$0xff]  ;;  %v1234_v37 = vld [vmem:[%s12240_s22 + $0x10] sm:$0xff]  ;;  %s16826_s12 = sld [smem:[#allocation108_spill]] }
  0x42   : > { %978 = vmatpush.bf16.msra.mxu0 %v11367_v8  ;;  %v1264_v21 = vpack.c.bf16 %v1233_v17, %v1232_v16  ;;  %v11379_v27 = vld [vmem:[%s16589_s26 + $0x8] sm:$0xff]  ;;  %v11362_v28 = vld [vmem:[%s16587_s0] sm:$0xff]  ;;  %v1235_v38 = vld [vmem:[%s12240_s22 + $0x18] sm:$0xff]  ;;  %v12011_v8 = vmov 0.0   ;;  %s16865_s14 = sld [smem:[#allocation110_spill]] }
  0x43   : > { %992 = vmatpush.bf16.msra.mxu1 %v11375_v9  ;;  %s836_s1 = scalar_lea.vmem %s16593_s24, %s11361_s6  ;;  %v11370_v29 = vld [vmem:[%s16587_s0 + $0x40] sm:$0xff]  ;;  %v1005_v36 = vld [vmem:[%s12292_s30 + $0x8] sm:$0xff]  ;;  %v1265_v42 = vpack.c.bf16 %v1235_v38, %v1234_v37  ;;  %v1006_v43 = vld [vmem:[%s12292_s30 + $0x10] sm:$0xff]  ;;  %5747 = vst [vmem:[#allocation4] sm:$0x3f] %v12011_v8  ;;  %s16873_s9 = sld [smem:[#allocation112_spill]] }
  0x44   : > { %1086 = vmatpush.bf16.msra.mxu2 %v11383_v10  ;;  %v11378_v30 = vld [vmem:[%s16589_s26] sm:$0xff]  ;;  %v840_v32 = vld [vmem:[%s836_s1 + $0x10] sm:$0xff]  ;;  %v839_v33 = vld [vmem:[%s836_s1 + $0x8] sm:$0xff]  ;;  %5749 = vst [vmem:[#allocation4 + $0x28] sm:$0x3f] %v12011_v8  ;;  %s16874_s23 = sld [smem:[#allocation100_spill]] }
  0x45   : > { %1371 = vmatpush.bf16.msra.mxu3 %v11387_v11  ;;  %v838_v31 = vld [vmem:[%s836_s1] sm:$0xff]  ;;  %v841_v34 = vld [vmem:[%s836_s1 + $0x18] sm:$0xff]  ;;  %v1237_v46 = vld [vmem:[%s12240_s22 + $0x28] sm:$0xff]  ;;  %5750 = vst [vmem:[#allocation4] sm:$0x1] %v12011_v8  ;;  %s16605_s1 = sld [smem:[#allocation104_spill]] }
  0x46   : > { %979 = vmatpush.bf16.msra.mxu0 %v11366_v12  ;;  %v1004_v35 = vld [vmem:[%s12292_s30] sm:$0xff]  ;;  %v842_v39 = vpack.c.bf16 %v840_v32, %v838_v31  ;;  %v843_v40 = vpack.c.bf16 %v841_v34, %v839_v33  ;;  %v1007_v44 = vld [vmem:[%s12292_s30 + $0x18] sm:$0xff]  ;;  %v1009_v50 = vld [vmem:[%s12292_s30 + $0x28] sm:$0xff]  ;;  %5751 = vst [vmem:[#allocation4 + $0x8] sm:$0x1] %v12011_v8 }
  0x47   : > { %993 = vmatpush.bf16.msra.mxu1 %v11374_v13  ;;  %v1012_v41 = vpack.c.bf16 %v1005_v36, %v1004_v35  ;;  %v1236_v45 = vld [vmem:[%s12240_s22 + $0x20] sm:$0xff]  ;;  %v1013_v47 = vpack.c.bf16 %v1007_v44, %v1006_v43  ;;  %v1238_v51 = vld [vmem:[%s12240_s22 + $0x30] sm:$0xff]  ;;  %v1239_v52 = vld [vmem:[%s12240_s22 + $0x38] sm:$0xff]  ;;  %5752 = vst [vmem:[#allocation4 + $0x10] sm:$0x1] %v12011_v8 }
  0x48   : > { %1087 = vmatpush.bf16.msra.mxu2 %v11382_v14  ;;  %v1266_v48 = vpack.c.bf16 %v1237_v46, %v1236_v45  ;;  %v1008_v49 = vld [vmem:[%s12292_s30 + $0x20] sm:$0xff]  ;;  %v1267_v54 = vpack.c.bf16 %v1239_v52, %v1238_v51  ;;  %v1010_v55 = vld [vmem:[%s12292_s30 + $0x30] sm:$0xff]  ;;  %v1011_v56 = vld [vmem:[%s12292_s30 + $0x38] sm:$0xff]  ;;  %5755 = vst [vmem:[#allocation4 + $0x28] sm:$0x1] %v12011_v8 }
  0x49   : > { %1372 = vmatpush.bf16.msra.mxu3 %v11386_v15  ;;  %v1014_v53 = vpack.c.bf16 %v1009_v50, %v1008_v49  ;;  %v1240_v57 = vld [vmem:[%s12240_s22 + $0x40] sm:$0xff]  ;;  %v1241_v58 = vld [vmem:[%s12240_s22 + $0x48] sm:$0xff]  ;;  %v1015_v59 = vpack.c.bf16 %v1011_v56, %v1010_v55  ;;  %v1242_v61 = vld [vmem:[%s12240_s22 + $0x50] sm:$0xff]  ;;  %5756 = vst [vmem:[#allocation4 + $0x5] sm:$0x1] %v12011_v8 }
  0x4a   : > { %980 = vmatpush.bf16.msra.mxu0 %v11365_v18  ;;  %v1268_v60 = vpack.c.bf16 %v1241_v58, %v1240_v57  ;;  %v1243_v62 = vld [vmem:[%s12240_s22 + $0x58] sm:$0xff]  ;;  %v1244_v0 = vld [vmem:[%s12240_s22 + $0x60] sm:$0xff]  ;;  %v1245_v1 = vld [vmem:[%s12240_s22 + $0x68] sm:$0xff]  ;;  %5757 = vst [vmem:[#allocation4 + $0xd] sm:$0x1] %v12011_v8 }
  0x4b   : > { %994 = vmatpush.bf16.msra.mxu1 %v11373_v19  ;;  %v1269_v63 = vpack.c.bf16 %v1243_v62, %v1242_v61  ;;  %v1270_v2 = vpack.c.bf16 %v1245_v1, %v1244_v0  ;;  %v1246_v3 = vld [vmem:[%s12240_s22 + $0x70] sm:$0xff]  ;;  %v1247_v4 = vld [vmem:[%s12240_s22 + $0x78] sm:$0xff]  ;;  %v1248_v6 = vld [vmem:[%s12240_s22 + $0x80] sm:$0xff]  ;;  %5758 = vst [vmem:[#allocation4 + $0x15] sm:$0x1] %v12011_v8 }
  0x4c   : > { %9203 = vmatmul.msk.bf16.vlgmr.msra.gmra.mxu3 %vm1316_vm0, %v1264_v21  ;;  %1088 = vmatpush.bf16.msra.mxu2 %v11381_v20  ;;  %v1271_v5 = vpack.c.bf16 %v1247_v4, %v1246_v3  ;;  %v1249_v7 = vld [vmem:[%s12240_s22 + $0x88] sm:$0xff]  ;;  %5761 = vst [vmem:[#allocation4 + $0x2d] sm:$0x1] %v12011_v8  ;;  %v12353_v10 = vld [vmem:[%s16595_s10] ss:$0 sm:$0xff]  ;;  %v1250_v55 = vld [vmem:[%s12240_s22 + $0x90] sm:$0xff] }
  0x4d   : > { %v1272_v9 = vpack.c.bf16 %v1249_v7, %v1248_v6  ;;  %7818 = vst [vmem:[#allocation5] sm:$0xf] %v12011_v8  ;;  %v1251_v56 = vld [vmem:[%s12240_s22 + $0x98] sm:$0xff]  ;;  %v1252_v4 = vld [vmem:[%s12240_s22 + $0xa0] sm:$0xff]  ;;  %s11356_s10 = sshll.u32 %s12167_s7, 2 }
  0x4e   : > { %981 = vmatpush.bf16.msra.mxu0 %v11364_v22  ;;  %7821 = vst [vmem:[#allocation5] sm:$0x1] %v12011_v8  ;;  %v1273_v57 = vpack.c.bf16 %v1251_v56, %v1250_v55  ;;  %v11413_v3 = vld [vmem:[%s16604_s11 + $0xb8] sm:$0xff]  ;;  %v11394_v56 = vld [vmem:[%s16604_s11 + $0x20] sm:$0xff] }
  0x4f   : > { %995 = vmatpush.bf16.msra.mxu1 %v11372_v23  ;;  %7825 = vst [vmem:[#allocation5 + $0x3] sm:$0x1] %v12011_v8 }
  0x50   : > { %1089 = vmatpush.bf16.msra.mxu2 %v11380_v24  ;;  %1813 = vst [vmem:[#allocation2] sm:$0xff] %v12011_v8  ;;  %v12363_v17 = vld [vmem:[#allocation4] sm:$0x3f] }
  0x51   : > { %1814 = vst [vmem:[#allocation2 + $0x8] sm:$0xff] %v12011_v8 }
  0x52   : > { %982 = vmatpush.bf16.msra.mxu0 %v11363_v25  ;;  %1815 = vst [vmem:[#allocation2 + $0x10] sm:$0x3] %v12011_v8 }
  0x53   : > { %996 = vmatpush.bf16.msra.mxu1 %v11371_v26  ;;  %1817 = vst [vmem:[#allocation2 + $0x198] sm:$0xff] %v12011_v8  ;;  %v12369_v21 = vld [vmem:[#allocation4 + $0x28] sm:$0x3f] }
  0x54   : > { %1090 = vmatpush.bf16.msra.mxu2 %v11379_v27  ;;  %1819 = vst [vmem:[#allocation2 + $0x1a8] sm:$0x3] %v12011_v8 }
  0x55   : > { %1821 = vst [vmem:[#allocation2 + $0x18] sm:$0x1] %v12011_v8 }
  0x56   : > { %983 = vmatpush.bf16.msra.mxu0 %v11362_v28  ;;  %1822 = vst [vmem:[#allocation2 + $0x30] sm:$0x1] %v12011_v8 }
  0x57   : > { %997 = vmatpush.bf16.msra.mxu1 %v11370_v29  ;;  %1823 = vst [vmem:[#allocation2 + $0x48] sm:$0x1] %v12011_v8 }
  0x58   : > { %1091 = vmatpush.bf16.msra.mxu2 %v11378_v30  ;;  %1824 = vst [vmem:[#allocation2 + $0x60] sm:$0x1] %v12011_v8 }
  0x59   : > { %984 = vmatmul.bf16.vlgmr.msra.gmra.mxu0 %v842_v39  ;;  %6777 = vst [vmem:[#allocation4] sm:$0x3f] %v12011_v8 }
  0x5a   : > { %998 = vmatmul.bf16.vlgmr.msra.gmra.mxu1 %v843_v40  ;;  %16596 = vst [vmem:[#allocation24_spill] sm:$0xff] %v12369_v21 }
  0x5b   : > { %1092 = vmatmul.bf16.vlgmr.msra.gmra.mxu2 %v1012_v41  ;;  %6778 = vst [vmem:[#allocation4 + $0x28] sm:$0x3f] %v12011_v8 }
  0x5c   : > { %9204 = vmatmul.msk.bf16.gmra.mxu3 %vm1316_vm0, %v1265_v42  ;;  %6779 = vst [vmem:[#allocation4] sm:$0x1] %v12011_v8  ;;  %3111 = vmatpush.bf16.msrb.mxu2 %v11413_v3 }
  0x5d   : > { %6784 = vst [vmem:[#allocation4 + $0x28] sm:$0x1] %v12011_v8 }
  0x5e   : > { %6785 = vst [vmem:[#allocation4 + $0x5] sm:$0x1] %v12011_v8 }
  0x5f   : > { %6790 = vst [vmem:[#allocation4 + $0x2d] sm:$0x1] %v12011_v8 }
  0x60   : > { %4476 = vst [vmem:[#allocation3] sm:$0xff] %v12011_v8 }
  0x61   : > { %1825 = vst [vmem:[#allocation2 + $0x78] sm:$0x1] %v12011_v8 }
  0x62   : > { %1826 = vst [vmem:[#allocation2 + $0x90] sm:$0x1] %v12011_v8 }
  0x63   : > { %1827 = vst [vmem:[#allocation2 + $0xa8] sm:$0x1] %v12011_v8 }
  0x64   : > { %1828 = vst [vmem:[#allocation2 + $0xc0] sm:$0x1] %v12011_v8 }
  0x65   : > { %v6801_v45 = vld [vmem:[#allocation4] sm:$0x3f]  ;;  %1829 = vst [vmem:[#allocation2 + $0xd8] sm:$0x1] %v12011_v8 }
  0x66   : > { %v12387_v46 = vpack.c.bf16 %v6801_v45, %v6801_v45  ;;  %1830 = vst [vmem:[#allocation2 + $0xf0] sm:$0x1] %v12011_v8 }
  0x67   : > { %1831 = vst [vmem:[#allocation2 + $0x108] sm:$0x1] %v12011_v8 }
  0x68   : > { %16597 = vst [vmem:[#allocation25_spill] sm:$0xff] %v12387_v46 }
  0x69   : > { %1832 = vst [vmem:[#allocation2 + $0x120] sm:$0x1] %v12011_v8 }
  0x6a   : > { %1833 = vst [vmem:[#allocation2 + $0x138] sm:$0x1] %v12011_v8 }
  0x6b   : > { %1097 = vmatmul.bf16.gmra.mxu2 %v1013_v47  ;;  %v6833_v47 = vrot.slane %v12387_v46, 2  ;;  %1834 = vst [vmem:[#allocation2 + $0x150] sm:$0x1] %v12011_v8 }
  0x6c   : > { %9205 = vmatmul.msk.bf16.gmra.mxu3 %vm1316_vm0, %v1266_v48  ;;  %1835 = vst [vmem:[#allocation2 + $0x168] sm:$0x1] %v12011_v8 }
  0x6d   : > { %v12397_v48 = vsel %vm5809_vm5, %v12387_v46, %v6833_v47  ;;  %v12402_v49 = vsel %vm5805_vm8, %v12387_v46, %v6833_v47  ;;  %1836 = vst [vmem:[#allocation2 + $0x180] sm:$0x1] %v12011_v8 }
  0x6e   : > { %16598 = vst [vmem:[#allocation26_spill] sm:$0xff] %v12397_v48  ;;  %v16422_v50 = vrot.slane %v12397_v48, 2  ;;  %v10581_v51 = vrot.slane %v12402_v49, 9 }
  0x6f   : > { %16599 = vst [vmem:[#allocation27_spill] sm:$0xff] %v12402_v49 }
  0x70   : > { %v7082_v52 = vrot.slane %v16422_v50, 7  ;;  %1839 = vst [vmem:[#allocation2 + $0x29] sm:$0x1] %v12011_v8 }
  0x71   : > { %1840 = vst [vmem:[#allocation2 + $0x41] sm:$0x1] %v12011_v8 }
  0x72   : > { %1841 = vst [vmem:[#allocation2 + $0x59] sm:$0x1] %v12011_v8 }
  0x73   : > { %1842 = vst [vmem:[#allocation2 + $0x71] sm:$0x1] %v12011_v8 }
  0x74   : > { %1843 = vst [vmem:[#allocation2 + $0x89] sm:$0x1] %v12011_v8 }
  0x75   : > { %1844 = vst [vmem:[#allocation2 + $0xa1] sm:$0x1] %v12011_v8 }
  0x76   : > { %1845 = vst [vmem:[#allocation2 + $0xb9] sm:$0x1] %v12011_v8 }
  0x77   : > { %1846 = vst [vmem:[#allocation2 + $0xd1] sm:$0x1] %v12011_v8 }
  0x78   : > { %1847 = vst [vmem:[#allocation2 + $0xe9] sm:$0x1] %v12011_v8 }
  0x79   : > { %1848 = vst [vmem:[#allocation2 + $0x101] sm:$0x1] %v12011_v8 }
  0x7a   : > { %1849 = vst [vmem:[#allocation2 + $0x119] sm:$0x1] %v12011_v8 }
  0x7b   : > { %1102 = vmatmul.bf16.gmra.mxu2 %v1014_v53  ;;  %v16600_v53 = vmov 0  ;;  %1850 = vst [vmem:[#allocation2 + $0x131] sm:$0x1] %v12011_v8 }
  0x7c   : > { %9206 = vmatmul.msk.bf16.gmra.mxu3 %vm1316_vm0, %v1267_v54  ;;  %v16601_v53 = vsel %vm12410_vm11, 4294967295, %v16600_v53  ;;  %v12416_v54 = vsel %vm12410_vm11, %v10581_v51, %v7082_v52  ;;  %1851 = vst [vmem:[#allocation2 + $0x149] sm:$0x1] %v12011_v8 }
  0x7d   : > { %16602 = vst [vmem:[#allocation28_spill] sm:$0xff] %v16601_v53 }
  0x7e   : > { %16603 = vst [vmem:[#allocation29_spill] sm:$0xff] %v12416_v54 }
  0x7f   : > { %1852 = vst [vmem:[#allocation2 + $0x161] sm:$0x1] %v12011_v8 }
  0x80   : > { %1853 = vst [vmem:[#allocation2 + $0x179] sm:$0x1] %v12011_v8 }
  0x81   : > { %1854 = vst [vmem:[#allocation2 + $0x191] sm:$0x1] %v12011_v8 }
  0x82   : > { %4477 = vst [vmem:[#allocation3 + $0x8] sm:$0x3] %v12011_v8 }
  0x83   : > { %4479 = vst [vmem:[#allocation3 + $0x90] sm:$0xff] %v12011_v8 }
  0x84   : > { %4480 = vst [vmem:[#allocation3 + $0x98] sm:$0x3] %v12011_v8 }
  0x85   : > { %4482 = vst [vmem:[#allocation3 + $0x10] sm:$0x1] %v12011_v8 }
  0x86   : > { %4483 = vst [vmem:[#allocation3 + $0x20] sm:$0x1] %v12011_v8 }
  0x87   : > { %4484 = vst [vmem:[#allocation3 + $0x30] sm:$0x1] %v12011_v8 }
  0x88   : > { %4485 = vst [vmem:[#allocation3 + $0x40] sm:$0x1] %v12011_v8 }
  0x89   : > { %4486 = vst [vmem:[#allocation3 + $0x50] sm:$0x1] %v12011_v8 }
  0x8a   : > { %4487 = vst [vmem:[#allocation3 + $0x60] sm:$0x1] %v12011_v8 }
  0x8b   : > { %1107 = vmatmul.bf16.gmra.mxu2 %v1015_v59  ;;  %4488 = vst [vmem:[#allocation3 + $0x70] sm:$0x1] %v12011_v8 }
  0x8c   : > { %9207 = vmatmul.msk.bf16.gmra.mxu3 %vm1316_vm0, %v1268_v60  ;;  %4489 = vst [vmem:[#allocation3 + $0x80] sm:$0x1] %v12011_v8 }
  0x8d   : > { %4492 = vst [vmem:[#allocation3 + $0x19] sm:$0x1] %v12011_v8 }
  0x8e   : > { %4493 = vst [vmem:[#allocation3 + $0x29] sm:$0x1] %v12011_v8 }
  0x8f   : > { %4494 = vst [vmem:[#allocation3 + $0x39] sm:$0x1] %v12011_v8 }
  0x90   : > { %4495 = vst [vmem:[#allocation3 + $0x49] sm:$0x1] %v12011_v8 }
  0x91   : > { %4496 = vst [vmem:[#allocation3 + $0x59] sm:$0x1] %v12011_v8 }
  0x92   : > { %4497 = vst [vmem:[#allocation3 + $0x69] sm:$0x1] %v12011_v8 }
  0x93   : > { %4498 = vst [vmem:[#allocation3 + $0x79] sm:$0x1] %v12011_v8 }
  0x94   : > { %4499 = vst [vmem:[#allocation3 + $0x89] sm:$0x1] %v12011_v8 }
  0x95   : > { %5753 = vst [vmem:[#allocation4 + $0x18] sm:$0x1] %v12011_v8 }
  0x96   : > { %5754 = vst [vmem:[#allocation4 + $0x20] sm:$0x1] %v12011_v8 }
  0x97   : > { %5759 = vst [vmem:[#allocation4 + $0x1d] sm:$0x1] %v12011_v8 }
  0x98   : > { %5760 = vst [vmem:[#allocation4 + $0x25] sm:$0x1] %v12011_v8 }
  0x99   : > { %7820 = vst [vmem:[#allocation5 + $0xc] sm:$0xf] %v12011_v8 }
  0x9a   : > { %7822 = vst [vmem:[#allocation5 + $0x4] sm:$0x1] %v12011_v8 }
  0x9b   : > { %7823 = vst [vmem:[#allocation5 + $0x8] sm:$0x1] %v12011_v8 }
  0x9c   : > { %9208 = vmatmul.msk.bf16.gmra.mxu3 %vm1316_vm0, %v1269_v63  ;;  %7826 = vst [vmem:[#allocation5 + $0x7] sm:$0x1] %v12011_v8 }
  0x9d   : > { %7827 = vst [vmem:[#allocation5 + $0xb] sm:$0x1] %v12011_v8 }
  0x9e   : > { %1820 = vst [vmem:[#allocation2] sm:$0x1] %v12011_v8 }
  0x9f   : > { %1837 = vst [vmem:[#allocation2 + $0x198] sm:$0x1] %v12011_v8 }
  0xa0   : > { %1838 = vst [vmem:[#allocation2 + $0x11] sm:$0x1] %v12011_v8 }
  0xa1   : > { %1855 = vst [vmem:[#allocation2 + $0x1a9] sm:$0x1] %v12011_v8 }
  0xa2   : > { %4481 = vst [vmem:[#allocation3] sm:$0x1] %v12011_v8 }
  0xa3   : > { %4490 = vst [vmem:[#allocation3 + $0x90] sm:$0x1] %v12011_v8 }
  0xa4   : > { %4491 = vst [vmem:[#allocation3 + $0x9] sm:$0x1] %v12011_v8 }
  0xa5   : > { %4500 = vst [vmem:[#allocation3 + $0x99] sm:$0x1] %v12011_v8 }
  0xa6   : > { %7824 = vst [vmem:[#allocation5 + $0xc] sm:$0x1] %v12011_v8 }
  0xa7   : > { %7828 = vst [vmem:[#allocation5 + $0xf] sm:$0x1] %v12011_v8 }
  0xac   : > { %9209 = vmatmul.msk.bf16.gmra.mxu3 %vm1316_vm0, %v1270_v2 }
  0xbc   : > { %9210 = vmatmul.msk.bf16.gmra.mxu3 %vm1316_vm0, %v1271_v5  ;;  %v1253_v5 = vld [vmem:[%s12240_s22 + $0xa8] sm:$0xff] }
  0xbd   : > { %v1274_v7 = vpack.c.bf16 %v1253_v5, %v1252_v4  ;;  %v11401_v5 = vld [vmem:[%s16604_s11 + $0x58] sm:$0xff] }
  0xcc   : > { %9211 = vmatmul.msk.bf16.gmra.mxu3 %vm1316_vm0, %v1272_v9  ;;  %v11397_v9 = vld [vmem:[%s16604_s11 + $0x38] sm:$0xff] }
  0xcd   : > { %2762 = vmatpush.bf16.msrb.mxu1 %v11397_v9 }
  0xd6   : > { %v985_v11 = vpop.f32.mrf.mxu0 }
  0xd7   : > { %v986_v12 = vadd.f32 %v12353_v10, %v985_v11  ;;  %v999_v13 = vpop.f32.mrf.mxu1  ;;  %v12513_v11 = vld [vmem:[%s16605_s1] ss:$0 sm:$0xff]  ;;  %s15102_s1 = sand.u32 1, %s12001_s2  }
  0xd8   : > { %s9081_s30 = sshll.u32 %s15102_s1, 8  ;;  %s9082_s6 = sshll.u32 %s15102_s1, 6 }
  0xd9   : > { %v1000_v14 = vadd.f32 %v999_v13, %v986_v12  ;;  %v11405_v13 = vld [vmem:[%s16604_s11 + $0x78] sm:$0xff]  ;;  %s15124_s21 = scalar_lea.vmem [#allocation6], %s9081_s30  ;;  %s15556_s5 = scalar_lea.vmem [#allocation8], %s9082_s6 }
  0xda   : > { %2529 = vmatpush.bf16.msrb.mxu0 %v11405_v13  ;;  %s9083_s29 = sshll.u32 %s15102_s1, 4  ;;  %s16872_s6 = sld [smem:[#allocation99_spill]] }
  0xdb   : > { %v1115_v15 = vrot.slane %v1000_v14, 4  ;;  %v1117_v16 = vrot.slane %v1000_v14, 3  ;;  %5765 = vst [vmem:[#allocation4 + $0x9] sm:$0xf] %v1000_v14  ;;  %s15625_s30 = scalar_lea.vmem [#allocation10], %s9083_s29  ;;  %s9084_s3 = sshll.u32 %s15102_s1, 2 }
  0xdc   : > { %9212 = vmatmul.msk.bf16.gmra.mxu3 %vm1316_vm0, %v1273_v57  ;;  %s16035_s24 = scalar_lea.vmem [#allocation11], %s9084_s3  ;;  %s11751_s3 = sshll.u32 %s12167_s7, 6 }
  0xdd   : > { %v1122_v18 = vsel %vm1121_vm1, %v1000_v14, %v1117_v16  ;;  %v1124_v19 = vsel %vm1123_vm2, %v1000_v14, %v1117_v16  ;;  %v1127_v20 = vsel %vm1126_vm3, %v1000_v14, %v1117_v16  ;;  %5766 = vst [vmem:[#allocation4 + $0x11] sm:$0xf] %v1115_v15  ;;  %v1130_v24 = vsel %vm1129_vm4, %v1000_v14, %v1117_v16  ;;  %v11412_v14 = vld [vmem:[%s16604_s11 + $0xb0] sm:$0xff]  ;;  %s8823_s4 = sshll.u32 %s15556_s5, 4  ;;  %s8824_s4 = int_to_ptr.vmem [resolvable:$true] %s8823_s4 }
  0xde   : > { %v1125_v22 = vrot.slane %v1124_v19, 1  ;;  %v1128_v23 = vrot.slane %v1127_v20, 2  ;;  %v1153_v25 = vperm.slane %v1122_v18, 0  ;;  %v1131_v26 = vrot.slane %v1130_v24, 3  ;;  %v987_v58 = vpop.f32.mrf.mxu0  ;;  %v1093_v12 = vpop.f32.mrf.mxu2  ;;  %3112 = vmatpush.bf16.msrb.mxu2 %v11412_v14  ;;  %v11396_v19 = vld [vmem:[%s16604_s11 + $0x30] sm:$0xff] }
  0xdf   : > { %v1118_v27 = vrot.slane %v1115_v15, 3  ;;  %v988_v59 = vadd.f32 %v12353_v10, %v987_v58  ;;  %v1001_v60 = vpop.f32.mrf.mxu1  ;;  %v12504_v10 = vpop.f32.mrf.mxu3  ;;  %2763 = vmatpush.bf16.msrb.mxu1 %v11396_v19  ;;  %v11409_v58 = vld [vmem:[%s16604_s11 + $0x98] sm:$0xff]  ;;  %v11400_v19 = vld [vmem:[%s16604_s11 + $0x50] sm:$0xff] }
  0xe0   : > { %v1154_v28 = vperm.slane %v1125_v22, 0  ;;  %1169 = vst [vmem:[#allocation1] ss:$4 sm:$0xff] %v1153_v25  ;;  %v1155_v29 = vperm.slane %v1128_v23, 0  ;;  %v1156_v30 = vperm.slane %v1131_v26, 0 }
  0xe1   : > { %1177 = vst [vmem:[#allocation1 + $0x20] ss:$4 sm:$0xff] %v1153_v25  ;;  %v1133_v31 = vsel %vm1123_vm2, %v1115_v15, %v1118_v27  ;;  %v1135_v32 = vsel %vm1126_vm3, %v1115_v15, %v1118_v27  ;;  %v1137_v33 = vsel %vm1129_vm4, %v1115_v15, %v1118_v27  ;;  %v1132_v34 = vsel %vm1121_vm1, %v1115_v15, %v1118_v27 }
  0xe2   : > { %1171 = vst [vmem:[#allocation1 + $0x1] ss:$4 sm:$0xff] %v1154_v28  ;;  %v1134_v35 = vrot.slane %v1133_v31, 1  ;;  %v12378_v36 = vld [vmem:[#allocation4 + $0x8] sm:$0x3f]  ;;  %v1136_v37 = vrot.slane %v1135_v32, 2  ;;  %v12445_v61 = vadd.f32 %v1001_v60, %v988_v59  ;;  %v1094_v15 = vadd.f32 %v12513_v11, %v1093_v12 }
  0xe3   : > { %1173 = vst [vmem:[#allocation1 + $0x2] ss:$4 sm:$0xff] %v1155_v29  ;;  %v1138_v38 = vrot.slane %v1137_v33, 3  ;;  %v1157_v39 = vperm.slane %v1132_v34, 0  ;;  %v11395_v31 = vld [vmem:[%s16604_s11 + $0x28] sm:$0xff]  ;;  %v1254_v59 = vld [vmem:[%s12240_s22 + $0xb0] sm:$0xff] }
  0xe4   : > { %1175 = vst [vmem:[#allocation1 + $0x3] ss:$4 sm:$0xff] %v1156_v30  ;;  %v1158_v40 = vperm.slane %v1134_v35, 0  ;;  %v1159_v42 = vperm.slane %v1136_v37, 0  ;;  %v12450_v62 = vrot.slane %v12445_v61, 3  ;;  %v12454_v63 = vrot.slane %v12445_v61, 4  ;;  %2764 = vmatpush.bf16.msrb.mxu1 %v11395_v31 }
  0xe5   : > { %1179 = vst [vmem:[#allocation1 + $0x21] ss:$4 sm:$0xff] %v1154_v28  ;;  %v1160_v43 = vperm.slane %v1138_v38, 0  ;;  %v12495_v6 = vld [vmem:[#allocation4 + $0x10] sm:$0x3f]  ;;  %v11404_v28 = vld [vmem:[%s16604_s11 + $0x70] sm:$0xff] }
  0xe6   : > { %1181 = vst [vmem:[#allocation1 + $0x22] ss:$4 sm:$0xff] %v1155_v29  ;;  %v12461_v0 = vsel %vm1129_vm4, %v12445_v61, %v12450_v62  ;;  %v12466_v1 = vrot.slane %v12454_v63, 3  ;;  %v1140_v16 = vsel %vm1123_vm2, %v12445_v61, %v12450_v62  ;;  %v1142_v18 = vsel %vm1126_vm3, %v12445_v61, %v12450_v62  ;;  %2530 = vmatpush.bf16.msrb.mxu0 %v11404_v28  ;;  %v1095_v37 = vpop.f32.mrf.mxu2 }
  0xe7   : > { %1183 = vst [vmem:[#allocation1 + $0x23] ss:$4 sm:$0xff] %v1156_v30  ;;  %v12537_v20 = vpop.f32.mrf.mxu3  ;;  %v1139_v23 = vsel %vm1121_vm1, %v12445_v61, %v12450_v62  ;;  %v1141_v24 = vrot.slane %v1140_v16, 1  ;;  %v1143_v26 = vrot.slane %v1142_v18, 2  ;;  %v1145_v27 = vrot.slane %v12461_v0, 3  ;;  %v11411_v30 = vld [vmem:[%s16604_s11 + $0xa8] sm:$0xff] }
  0xe8   : > { %6780 = vst [vmem:[#allocation4 + $0x8] sm:$0x1] %v12011_v8  ;;  %v12475_v2 = vsel %vm1129_vm4, %v12454_v63, %v12466_v1  ;;  %v1161_v29 = vperm.slane %v1139_v23, 0  ;;  %3113 = vmatpush.bf16.msrb.mxu2 %v11411_v30  ;;  %v1096_v38 = vadd.f32 %v12513_v11, %v1095_v37  ;;  %v1146_v45 = vsel %vm1121_vm1, %v12454_v63, %v12466_v1  ;;  %v11392_v18 = vld [vmem:[%s16604_s11 + $0x10] sm:$0xff]  ;;  %v11407_v30 = vld [vmem:[%s16604_s11 + $0x88] sm:$0xff] }
  0xe9   : > { %6786 = vst [vmem:[#allocation4 + $0xd] sm:$0x1] %v12011_v8  ;;  %v1162_v32 = vperm.slane %v1141_v24, 0  ;;  %v1163_v33 = vperm.slane %v1143_v26, 0  ;;  %v1164_v35 = vperm.slane %v1145_v27, 0  ;;  %v1152_v55 = vrot.slane %v12475_v2, 3  ;;  %2765 = vmatpush.bf16.msrb.mxu1 %v11394_v56 }
  0xea   : > { %6781 = vst [vmem:[#allocation4 + $0x10] sm:$0x1] %v12011_v8  ;;  %v1165_v57 = vperm.slane %v1146_v45, 0  ;;  %v1889_v45 = vld [vmem:[#allocation2] sm:$0xff] }
  0xeb   : > { %v12383_v41 = vld.sshfl [vmem:[#allocation1] sm:$0xff pattern:$0x73625140]  ;;  %6787 = vst [vmem:[#allocation4 + $0x15] sm:$0x1] %v12011_v8  ;;  %v1168_v2 = vperm.slane %v1152_v55, 0  ;;  %v12669_v56 = vpack.c.bf16 %v1889_v45, %v1889_v45 }
  0xec   : > { %1186 = vst [vmem:[#allocation1] ss:$4 sm:$0xff] %v1157_v39  ;;  %9213 = vmatmul.msk.bf16.gmra.mxu3 %vm1316_vm0, %v1274_v7  ;;  %v12542_v22 = vadd.f32 %v12383_v41, %v1094_v15  ;;  %v1149_v41 = vsel %vm1126_vm3, %v12454_v63, %v12466_v1  ;;  %v11408_v7 = vld [vmem:[%s16604_s11 + $0x90] sm:$0xff]  ;;  %v11399_v55 = vld [vmem:[%s16604_s11 + $0x48] sm:$0xff]  ;;  %v1256_v45 = vld [vmem:[%s12240_s22 + $0xc0] sm:$0xff] }
  0xed   : > { %1187 = vst [vmem:[#allocation1 + $0x1] ss:$4 sm:$0xff] %v1158_v40  ;;  %v1150_v52 = vrot.slane %v1149_v41, 2  ;;  %vm2014_vm3 = vsmask.f32 7440 }
  0xee   : > { %v12385_v44 = vld.sshfl [vmem:[#allocation1 + $0x20] sm:$0xff pattern:$0x73625140]  ;;  %1188 = vst [vmem:[#allocation1 + $0x2] ss:$4 sm:$0xff] %v1159_v42  ;;  %v1462_v9 = vrot.slane %v12542_v22, 1  ;;  %vm12731_vm4 = vmor %vm2013_vm15, %vm2014_vm3 }
  0xef   : > { %1189 = vst [vmem:[#allocation1 + $0x3] ss:$4 sm:$0xff] %v1160_v43  ;;  %v12584_v51 = vadd.f32 %v12385_v44, %v1096_v38  ;;  %v11402_v44 = vld [vmem:[%s16604_s11 + $0x60] sm:$0xff]  ;;  %v1167_v0 = vperm.slane %v1150_v52, 0  ;;  %v1463_v12 = vrot.slane %v12542_v22, 2  ;;  %v1464_v14 = vrot.slane %v12542_v22, 3 }
  0xf0   : > { %1190 = vst [vmem:[#allocation1 + $0x20] ss:$4 sm:$0xff] %v1157_v39  ;;  %v1147_v39 = vsel %vm1123_vm2, %v12454_v63, %v12466_v1  ;;  %v11393_v1 = vld [vmem:[%s16604_s11 + $0x18] sm:$0xff]  ;;  %v1465_v15 = vrot.slane %v12542_v22, 4  ;;  %v1518_v16 = vperm.slane %v12542_v22, 0  ;;  %v1466_v23 = vrot.slane %v12542_v22, 5 }
  0xf1   : > { %1191 = vst [vmem:[#allocation1 + $0x21] ss:$4 sm:$0xff] %v1158_v40  ;;  %v12569_v40 = vpop.f32.mrf.mxu3  ;;  %v1148_v47 = vrot.slane %v1147_v39, 1  ;;  %2766 = vmatpush.bf16.msrb.mxu1 %v11393_v1  ;;  %v1519_v24 = vperm.slane %v1462_v9, 0  ;;  %v1467_v27 = vrot.slane %v12542_v22, 6  ;;  %v1520_v28 = vperm.slane %v1463_v12, 0 }
  0xf2   : > { %1192 = vst [vmem:[#allocation1 + $0x22] ss:$4 sm:$0xff] %v1159_v42  ;;  %v11403_v42 = vld [vmem:[%s16604_s11 + $0x68] sm:$0xff]  ;;  %v1468_v31 = vrot.slane %v12542_v22, 7  ;;  %v1523_v38 = vperm.slane %v1466_v23, 0  ;;  %v12012_v1 = vmov 0.0|0.0  }
  0xf3   : > { %1193 = vst [vmem:[#allocation1 + $0x23] ss:$4 sm:$0xff] %v1160_v43  ;;  %v11410_v43 = vld [vmem:[%s16604_s11 + $0xa0] sm:$0xff]  ;;  %2531 = vmatpush.bf16.msrb.mxu0 %v11403_v42  ;;  %v1166_v60 = vperm.slane %v1148_v47, 0  ;;  %v1524_v41 = vperm.slane %v1467_v27, 0  ;;  %v11391_v42 = vld [vmem:[%s16604_s11 + $0x8] sm:$0xff] }
  0xf4   : > { %4502 = vst [vmem:[#allocation3 + $0x11] sm:$0xff] %v12542_v22  ;;  %3114 = vmatpush.bf16.msrb.mxu2 %v11410_v43  ;;  %v12648_v22 = vperm.slane %v1468_v31, 0  ;;  %v12659_v52 = vld [vmem:[%s16606_s8] ss:$0 sm:$0xff]  ;;  %v1473_v23 = vrot.slane %v12584_v51, 5  ;;  %v11421_v27 = vld [vmem:[%s16604_s11 + $0xf8] sm:$0xff] }
  0xf5   : > { %5767 = vst [vmem:[#allocation4 + $0x19] sm:$0xf] %v12445_v61  ;;  %v1255_v61 = vld [vmem:[%s12240_s22 + $0xb8] sm:$0xff]  ;;  %2767 = vmatpush.bf16.msrb.mxu1 %v11392_v18  ;;  %v2017_v18 = vshrl.u32 %v12669_v56, 16  ;;  %3303 = vmatpush.bf16.msrb.mxu3 %v11421_v27  ;;  %vm7878_vm15 = vsmask.f32 2312 }
  0xf6   : > { %v12547_v25 = vld.sshfl [vmem:[#allocation1] sm:$0xff pattern:$0x73625140]  ;;  %5768 = vst [vmem:[#allocation4 + $0x21] sm:$0xf] %v12454_v63  ;;  %v1275_v63 = vpack.c.bf16 %v1255_v61, %v1254_v59  ;;  %v1469_v61 = vrot.slane %v12584_v51, 1 }
  0xf7   : > { %1196 = vst [vmem:[#allocation1] ss:$4 sm:$0xff] %v1161_v29  ;;  %2532 = vmatpush.bf16.msrb.mxu0 %v11402_v44  ;;  %v11390_v59 = vld [vmem:[%s16604_s11] sm:$0xff] }
  0xf8   : > { %1197 = vst [vmem:[#allocation1 + $0x1] ss:$4 sm:$0xff] %v1162_v32  ;;  %3115 = vmatpush.bf16.msrb.mxu2 %v11409_v58  ;;  %v1891_v58 = vld [vmem:[#allocation2 + $0x10] sm:$0x3] }
  0xf9   : > { %1198 = vst [vmem:[#allocation1 + $0x2] ss:$4 sm:$0xff] %v1163_v33  ;;  %v12609_v4 = vpop.f32.mrf.mxu3  ;;  %2768 = vmatpush.bf16.msrb.mxu1 %v11391_v42  ;;  %v1945_v12 = vpack.c.bf16 %v1891_v58, %v1891_v58  ;;  %v11398_v42 = vld [vmem:[%s16604_s11 + $0x40] sm:$0xff] }
  0xfa   : > { %v12563_v34 = vld.sshfl [vmem:[#allocation1 + $0x20] sm:$0xff pattern:$0x73625140]  ;;  %1199 = vst [vmem:[#allocation1 + $0x3] ss:$4 sm:$0xff] %v1164_v35 }
  0xfb   : > { %1200 = vst [vmem:[#allocation1 + $0x20] ss:$4 sm:$0xff] %v1161_v29  ;;  %2533 = vmatpush.bf16.msrb.mxu0 %v11401_v5  ;;  %v1098_v29 = vpop.f32.mrf.mxu2  ;;  %v1471_v5 = vrot.slane %v12584_v51, 3  ;;  %v2036_v58 = vshll.u32 %v1945_v12, 16 }
  0xfc   : > { %1201 = vst [vmem:[#allocation1 + $0x21] ss:$4 sm:$0xff] %v1162_v32  ;;  %9214 = vmatmul.msk.bf16.gmra.mxu3 %vm1316_vm0, %v1275_v63  ;;  %v12619_v13 = vld [vmem:[#allocation4 + $0x18] sm:$0x3f]  ;;  %3116 = vmatpush.bf16.msrb.mxu2 %v11408_v7  ;;  %v1521_v32 = vperm.slane %v1464_v14, 0  ;;  %v1472_v7 = vrot.slane %v12584_v51, 4  ;;  %v1377_v14 = vadd.f32 %v12659_v52, %v12537_v20  ;;  %v2650_v20 = vunpack.c.l.b16 %v12669_v56 }
  0xfd   : > { %1202 = vst [vmem:[#allocation1 + $0x22] ss:$4 sm:$0xff] %v1163_v33  ;;  %v1522_v33 = vperm.slane %v1465_v15, 0  ;;  %v12654_v47 = vld [vmem:[#allocation4 + $0x20] sm:$0x3f]  ;;  %2769 = vmatpush.bf16.msrb.mxu1 %v11390_v59  ;;  %v1527_v59 = vperm.slane %v1469_v61, 0 }
  0xfe   : > { %1203 = vst [vmem:[#allocation1 + $0x23] ss:$4 sm:$0xff] %v1164_v35  ;;  %v1099_v35 = vadd.f32 %v12513_v11, %v1098_v29  ;;  %v1475_v29 = vrot.slane %v12584_v51, 7  ;;  %v1530_v27 = vperm.slane %v1472_v7, 0 }
  0xff   : > { %4503 = vst [vmem:[#allocation3 + $0x21] sm:$0xff] %v12584_v51  ;;  %2534 = vmatpush.bf16.msrb.mxu0 %v11400_v19 }
 0x100   : > { %6782 = vst [vmem:[#allocation4 + $0x18] sm:$0x1] %v12011_v8  ;;  %3117 = vmatpush.bf16.msrb.mxu2 %v11407_v30  ;;  %v12651_v43 = vadd.f32 %v12547_v25, %v1099_v35  ;;  %v11406_v25 = vld [vmem:[%s16604_s11 + $0x80] sm:$0xff]  ;;  %v1526_v30 = vperm.slane %v12584_v51, 0 }
 0x101   : > { %v12599_v62 = vld.sshfl [vmem:[#allocation1] sm:$0xff pattern:$0x73625140]  ;;  %6788 = vst [vmem:[#allocation4 + $0x1d] sm:$0x1] %v12011_v8  ;;  %v12641_v37 = vpop.f32.mrf.mxu3 }
 0x102   : > { %1206 = vst [vmem:[#allocation1] ss:$4 sm:$0xff] %v1165_v57 }
 0x103   : > { %1207 = vst [vmem:[#allocation1 + $0x1] ss:$4 sm:$0xff] %v1166_v60  ;;  %v1100_v44 = vpop.f32.mrf.mxu2  ;;  %2535 = vmatpush.bf16.msrb.mxu0 %v11399_v55  ;;  %v1257_v55 = vld [vmem:[%s12240_s22 + $0xc8] sm:$0xff] }
 0x104   : > { %1208 = vst [vmem:[#allocation1 + $0x2] ss:$4 sm:$0xff] %v1167_v0  ;;  %3118 = vmatpush.bf16.msrb.mxu2 %v11406_v25  ;;  %v1101_v9 = vadd.f32 %v12513_v11, %v1100_v44  ;;  %v1276_v25 = vpack.c.bf16 %v1257_v55, %v1256_v45  ;;  %v2020_v44 = vshll.u32 %v12669_v56, 16 }
 0x105   : > { %v12607_v3 = vld.sshfl [vmem:[#allocation1 + $0x20] sm:$0xff pattern:$0x73625140]  ;;  %1209 = vst [vmem:[#allocation1 + $0x3] ss:$4 sm:$0xff] %v1168_v2 }
 0x106   : > { %1210 = vst [vmem:[#allocation1 + $0x20] ss:$4 sm:$0xff] %v1165_v57 }
 0x107   : > { %1211 = vst [vmem:[#allocation1 + $0x21] ss:$4 sm:$0xff] %v1166_v60  ;;  %v9299_v60 = vrot.slane %v12669_v56, 9  ;;  %2536 = vmatpush.bf16.msrb.mxu0 %v11398_v42 }
 0x108   : > { %1212 = vst [vmem:[#allocation1 + $0x22] ss:$4 sm:$0xff] %v1167_v0  ;;  %v1470_v0 = vrot.slane %v12584_v51, 2 }
 0x109   : > { %1213 = vst [vmem:[#allocation1 + $0x23] ss:$4 sm:$0xff] %v1168_v2  ;;  %v12680_v63 = vpop.f32.mrf.mxu3  ;;  %v2872_v2 = vrot.slane %v12012_v1, 5 }
 0x10a   : > { %6783 = vst [vmem:[#allocation4 + $0x20] sm:$0x1] %v12011_v8  ;;  %v1528_v56 = vperm.slane %v1470_v0, 0 }
 0x10b   : > { %6789 = vst [vmem:[#allocation4 + $0x25] sm:$0x1] %v12011_v8  ;;  %v1375_v8 = vadd.f32 %v12659_v52, %v12504_v10  ;;  %v16607_v10 = vmov 0  ;;  %v2874_v31 = vrot.slane %v2872_v2, 4 }
 0x10c   : > { %v12633_v26 = vld.sshfl [vmem:[#allocation1] sm:$0xff pattern:$0x73625140]  ;;  %4504 = vst [vmem:[#allocation3 + $0x31] sm:$0xff] %v12651_v43  ;;  %v16608_v10 = vsel %vm12687_vm14, 4294967295, %v16607_v10  ;;  %9215 = vmatmul.msk.bf16.gmra.mxu3 %vm1316_vm0, %v1276_v25  ;;  %v4512_v25 = vld [vmem:[#allocation3 + $0x10] sm:$0xff] }
 0x10d   : > { %1582 = vst [vmem:[#allocation1] ss:$4 sm:$0xff] %v1518_v16 }
 0x10e   : > { %1584 = vst [vmem:[#allocation1 + $0x1] ss:$4 sm:$0xff] %v1519_v24 }
 0x10f   : > { %1586 = vst [vmem:[#allocation1 + $0x2] ss:$4 sm:$0xff] %v1520_v28 }
 0x110   : > { %v12643_v39 = vld.sshfl [vmem:[#allocation1 + $0x20] sm:$0xff pattern:$0x73625140]  ;;  %1588 = vst [vmem:[#allocation1 + $0x3] ss:$4 sm:$0xff] %v1521_v32 }
 0x111   : > { %1590 = vst [vmem:[#allocation1 + $0x20] ss:$4 sm:$0xff] %v1522_v33  ;;  %v12722_v61 = vpop.f32.mrf.mxu3 }
 0x112   : > { %1592 = vst [vmem:[#allocation1 + $0x21] ss:$4 sm:$0xff] %v1523_v38 }
 0x113   : > { %1594 = vst [vmem:[#allocation1 + $0x22] ss:$4 sm:$0xff] %v1524_v41 }
 0x114   : > { %1596 = vst [vmem:[#allocation1 + $0x23] ss:$4 sm:$0xff] %v12648_v22 }
 0x115   : > { %16609 = vst [vmem:[#allocation30_spill] sm:$0xff] %v16608_v10 }
 0x117   : > { %v1597_v57 = vld.sshfl [vmem:[#allocation1] sm:$0xff pattern:$0x73625140] }
 0x118   : > { %1599 = vst [vmem:[#allocation1] ss:$4 sm:$0xff] %v1518_v16  ;;  %v2873_v16 = vsel %vm12687_vm14, %v9299_v60, %v2872_v2  ;;  %v1781_v19 = vadd.f32 %v1597_v57, %v1375_v8  ;;  %v2019_v57 = vrot.slane %v2017_v18, 4  ;;  %v2022_v8 = vrot.slane %v2020_v44, 5 }
 0x119   : > { %1600 = vst [vmem:[#allocation1 + $0x1] ss:$4 sm:$0xff] %v1519_v24  ;;  %v1474_v24 = vrot.slane %v12584_v51, 6  ;;  %v2999_v35 = vunpack.c.l.b16 %v2873_v16  ;;  %v1529_v18 = vperm.slane %v1471_v5, 0  ;;  %v16610_v5 = vmov 0 }
 0x11a   : > { %1601 = vst [vmem:[#allocation1 + $0x2] ss:$4 sm:$0xff] %v1520_v28  ;;  %v2023_v16 = vor.u32 %v2022_v8, %v2019_v57  ;;  %v16611_v5 = vsel %vm12731_vm4, 4294967295, %v16610_v5  ;;  %v4514_v8 = vld [vmem:[#allocation3 + $0x20] sm:$0xff] }
 0x11b   : > { %v1598_v15 = vld.sshfl [vmem:[#allocation1 + $0x20] sm:$0xff pattern:$0x73625140]  ;;  %1602 = vst [vmem:[#allocation1 + $0x3] ss:$4 sm:$0xff] %v1521_v32  ;;  %v12705_v32 = vadd.f32 %v12563_v34, %v1101_v9  ;;  %v1532_v42 = vperm.slane %v1474_v24, 0 }
 0x11c   : > { %1603 = vst [vmem:[#allocation1 + $0x20] ss:$4 sm:$0xff] %v1522_v33  ;;  %v1782_v28 = vadd.f32 %v1598_v15, %v1377_v14  ;;  %v2875_v33 = vrot.slane %v1945_v12, 5  ;;  %v1103_v14 = vpop.f32.mrf.mxu2 }
 0x11d   : > { %1604 = vst [vmem:[#allocation1 + $0x21] ss:$4 sm:$0xff] %v1523_v38  ;;  %v2651_v38 = vunpack.c.l.b16 %v12012_v1  ;;  %v12013_v1 = vmov 0  }
 0x11e   : > { %1605 = vst [vmem:[#allocation1 + $0x22] ss:$4 sm:$0xff] %v1524_v41  ;;  %v2876_v34 = vsel %vm12687_vm14, %v2874_v31, %v2875_v33  ;;  %v2028_v2 = vrot.slane %v12013_v1, 5  ;;  %v2032_v15 = vrot.slane %v12013_v1, 4  ;;  %v2024_v31 = vrot.slane %v2023_v16, 4 }
 0x11f   : > { %1606 = vst [vmem:[#allocation1 + $0x23] ss:$4 sm:$0xff] %v12648_v22  ;;  %v2682_v41 = vpack.c.b16 %v2651_v38, %v2650_v20  ;;  %v3000_v60 = vunpack.c.l.b16 %v2876_v34  ;;  %v1380_v22 = vadd.f32 %v12659_v52, %v12569_v40  ;;  %v1382_v40 = vadd.f32 %v12659_v52, %v12609_v4 }
 0x120   : > { %1857 = vst [vmem:[#allocation2 + $0x19] sm:$0xff] %v1781_v19  ;;  %v2033_v0 = vor.u32 %v2032_v15, %v2028_v2  ;;  %v2038_v19 = vrot.slane %v2036_v58, 5  ;;  %v1531_v20 = vperm.slane %v1473_v23, 0  ;;  %v2029_v7 = vsel %vm12731_vm4, %v2024_v31, %v2028_v2  ;;  %v1391_v58 = vpop.f32.mrf.mxu3 }
 0x121   : > { %1858 = vst [vmem:[#allocation2 + $0x21] sm:$0xff] %v1782_v28  ;;  %2770 = vmatmul.bf16.vlgmr.msrb.gmra.mxu1 %v2682_v41  ;;  %v3031_v12 = vpack.c.b16 %v3000_v60, %v2999_v35  ;;  %v1104_v28 = vadd.f32 %v12513_v11, %v1103_v14  ;;  %v1533_v23 = vperm.slane %v1475_v29, 0  ;;  %v2417_v38 = vunpack.c.l.b16 %v2029_v7  ;;  %v4513_v60 = vld [vmem:[#allocation3 + $0x18] sm:$0x3] }
 0x122   : > { %v1607_v9 = vld.sshfl [vmem:[#allocation1] sm:$0xff pattern:$0x73625140]  ;;  %4505 = vst [vmem:[#allocation3 + $0x41] sm:$0xff] %v12705_v32  ;;  %v2034_v4 = vrot.slane %v2033_v0, 4  ;;  %v12742_v34 = vpack.c.bf16 %v4512_v25, %v4512_v25  ;;  %v1387_v1 = vadd.f32 %v12659_v52, %v12680_v63  ;;  %v12753_v15 = vpack.c.bf16 %v4513_v60, %v4513_v60 }
 0x123   : > { %1609 = vst [vmem:[#allocation1] ss:$4 sm:$0xff] %v1526_v30  ;;  %3119 = vmatmul.bf16.vlgmr.msrb.gmra.mxu2 %v3031_v12  ;;  %v1783_v35 = vadd.f32 %v1607_v9, %v1380_v22  ;;  %v12740_v57 = vadd.f32 %v12599_v62, %v1104_v28  ;;  %v1385_v62 = vadd.f32 %v12659_v52, %v12641_v37  ;;  %v4515_v9 = vld [vmem:[#allocation3 + $0x28] sm:$0x3]  ;;  %v1477_v16 = vrot.slane %v12651_v43, 2 }
 0x124   : > { %1610 = vst [vmem:[#allocation1 + $0x1] ss:$4 sm:$0xff] %v1527_v59  ;;  %v2039_v55 = vsel %vm12731_vm4, %v2034_v4, %v2038_v19  ;;  %v1105_v41 = vpop.f32.mrf.mxu2  ;;  %v4581_v2 = vshrl.u32 %v12742_v34, 16  ;;  %v4584_v51 = vshll.u32 %v12742_v34, 16  ;;  %v12758_v63 = vpack.c.bf16 %v4515_v9, %v4515_v9 }
 0x125   : > { %1611 = vst [vmem:[#allocation1 + $0x2] ss:$4 sm:$0xff] %v1528_v56  ;;  %v2418_v44 = vunpack.c.l.b16 %v2039_v55  ;;  %v1106_v22 = vadd.f32 %v12513_v11, %v1105_v41  ;;  %v1479_v0 = vrot.slane %v12651_v43, 4  ;;  %v1480_v28 = vrot.slane %v12651_v43, 5 }
 0x126   : > { %v1608_v33 = vld.sshfl [vmem:[#allocation1 + $0x20] sm:$0xff pattern:$0x73625140]  ;;  %1612 = vst [vmem:[#allocation1 + $0x3] ss:$4 sm:$0xff] %v1529_v18  ;;  %v4583_v12 = vrot.slane %v4581_v2, 4  ;;  %v12777_v55 = vpack.c.bf16 %v12363_v17, %v12363_v17  ;;  %v1390_v41 = vadd.f32 %v12659_v52, %v12722_v61 }
 0x127   : > { %16612 = vst [vmem:[#allocation31_spill] sm:$0xff] %v16611_v5  ;;  %v1784_v45 = vadd.f32 %v1608_v33, %v1382_v40  ;;  %v2449_v24 = vpack.c.b16 %v2418_v44, %v2417_v38  ;;  %v12764_v40 = vadd.f32 %v12607_v3, %v1106_v22  ;;  %v4586_v19 = vrot.slane %v4584_v51, 5 }
 0x128   : > { %1613 = vst [vmem:[#allocation1 + $0x20] ss:$4 sm:$0xff] %v1530_v27  ;;  %v1481_v31 = vrot.slane %v12651_v43, 6  ;;  %v1482_v33 = vrot.slane %v12651_v43, 7  ;;  %v1534_v3 = vperm.slane %v12651_v43, 0  ;;  %v12790_v17 = vperm.slane %v1479_v0, 0 }
 0x129   : > { %1614 = vst [vmem:[#allocation1 + $0x21] ss:$4 sm:$0xff] %v1531_v20  ;;  %2537 = vmatmul.bf16.vlgmr.msrb.gmra.mxu0 %v2449_v24  ;;  %v4587_v7 = vor.u32 %v4586_v19, %v4583_v12  ;;  %v12782_v24 = vperm.slane %v1477_v16, 0  ;;  %v12794_v2 = vperm.slane %v1480_v28, 0  ;;  %v1484_v19 = vrot.slane %v12705_v32, 2 }
 0x12a   : > { %1615 = vst [vmem:[#allocation1 + $0x22] ss:$4 sm:$0xff] %v1532_v42 }
 0x12b   : > { %1616 = vst [vmem:[#allocation1 + $0x23] ss:$4 sm:$0xff] %v1533_v23 }
 0x12c   : > { %1859 = vst [vmem:[#allocation2 + $0x31] sm:$0xff] %v1783_v35  ;;  %v1108_v4 = vpop.f32.mrf.mxu2 }
 0x12d   : > { %16613 = vst [vmem:[#allocation32_spill] sm:$0xff] %v12742_v34  ;;  %v1617_v29 = vld.sshfl [vmem:[#allocation1] sm:$0xff pattern:$0x73625140]  ;;  %v1109_v22 = vadd.f32 %v12513_v11, %v1108_v4 }
 0x12e   : > { %1860 = vst [vmem:[#allocation2 + $0x39] sm:$0xff] %v1784_v45  ;;  %v1785_v37 = vadd.f32 %v1617_v29, %v1385_v62  ;;  %v4604_v45 = vshll.u32 %v12758_v63, 16  ;;  %v4588_v29 = vrot.slane %v4587_v7, 4  ;;  %v1892_v4 = vld [vmem:[#allocation2 + $0x18] sm:$0xff]  ;;  %v1894_v7 = vld [vmem:[#allocation2 + $0x28] sm:$0x3] }
 0x12f   : > { %4506 = vst [vmem:[#allocation3 + $0x51] sm:$0xff] %v12740_v57  ;;  %v12820_v28 = vadd.f32 %v12633_v26, %v1109_v22  ;;  %v12828_v26 = vpack.c.bf16 %v1894_v7, %v1894_v7 }
 0x130   : > { %1619 = vst [vmem:[#allocation1] ss:$4 sm:$0xff] %v1526_v30  ;;  %v12756_v30 = vpack.c.bf16 %v4514_v8, %v4514_v8  ;;  %v1392_v8 = vadd.f32 %v12659_v52, %v1391_v58  ;;  %v4606_v9 = vrot.slane %v4604_v45, 5  ;;  %v12804_v58 = vperm.slane %v1482_v33, 0 }
 0x131   : > { %1620 = vst [vmem:[#allocation1 + $0x1] ss:$4 sm:$0xff] %v1527_v59 }
 0x132   : > { %1621 = vst [vmem:[#allocation1 + $0x2] ss:$4 sm:$0xff] %v1528_v56  ;;  %v1618_v14 = vld.sshfl [vmem:[#allocation1 + $0x20] sm:$0xff pattern:$0x73625140]  ;;  %v1476_v56 = vrot.slane %v12651_v43, 1 }
 0x133   : > { %1622 = vst [vmem:[#allocation1 + $0x3] ss:$4 sm:$0xff] %v1529_v18  ;;  %v1786_v59 = vadd.f32 %v1618_v14, %v1387_v1  ;;  %v1478_v18 = vrot.slane %v12651_v43, 3  ;;  %v4598_v35 = vshll.u32 %v12756_v30, 16 }
 0x134   : > { %16614 = vst [vmem:[#allocation33_spill] sm:$0xff] %v12753_v15  ;;  %v12779_v25 = vperm.slane %v1476_v56, 0  ;;  %v1483_v56 = vrot.slane %v12705_v32, 1  ;;  %v1110_v33 = vpop.f32.mrf.mxu2 }
 0x135   : > { %16615 = vst [vmem:[#allocation34_spill] sm:$0xff] %v12756_v30  ;;  %v4600_v44 = vrot.slane %v4598_v35, 5  ;;  %v12788_v60 = vperm.slane %v1478_v18, 0  ;;  %v1893_v35 = vld [vmem:[#allocation2 + $0x20] sm:$0xff] }
 0x136   : > { %1623 = vst [vmem:[#allocation1 + $0x20] ss:$4 sm:$0xff] %v1530_v27  ;;  %v4590_v27 = vshll.u32 %v12753_v15, 16 }
 0x137   : > { %1624 = vst [vmem:[#allocation1 + $0x21] ss:$4 sm:$0xff] %v1531_v20  ;;  %v4595_v20 = vshrl.u32 %v12756_v30, 16 }
 0x138   : > { %16616 = vst [vmem:[#allocation35_spill] sm:$0xff] %v12758_v63  ;;  %v4592_v62 = vrot.slane %v4590_v27, 5  ;;  %v1485_v27 = vrot.slane %v12705_v32, 3 }
 0x139   : > { %1625 = vst [vmem:[#allocation1 + $0x22] ss:$4 sm:$0xff] %v1532_v42  ;;  %v1394_v42 = vpop.f32.mrf.mxu3 }
 0x13a   : > { %1626 = vst [vmem:[#allocation1 + $0x23] ss:$4 sm:$0xff] %v1533_v23  ;;  %v4597_v23 = vrot.slane %v4595_v20, 4  ;;  %v1627_v38 = vld.sshfl [vmem:[#allocation1] sm:$0xff pattern:$0x73625140]  ;;  %v4593_v61 = vsel %vm12731_vm4, %v4588_v29, %v4592_v62  ;;  %v1395_v22 = vadd.f32 %v12659_v52, %v1394_v42 }
 0x13b   : > { %1861 = vst [vmem:[#allocation2 + $0x49] sm:$0xff] %v1785_v37  ;;  %v5801_v37 = vrot.slane %v12777_v55, 2  ;;  %v1787_v12 = vadd.f32 %v1627_v38, %v1390_v41  ;;  %v12809_v18 = vunpack.c.l.b16 %v4593_v61  ;;  %v11420_v20 = vld [vmem:[%s16604_s11 + $0xf0] sm:$0xff]  ;;  %v1946_v38 = vpack.c.bf16 %v1892_v4, %v1892_v4 }
 0x13c   : > { %1862 = vst [vmem:[#allocation2 + $0x51] sm:$0xff] %v1786_v59  ;;  %v4601_v1 = vor.u32 %v4600_v44, %v4597_v23  ;;  %v12802_v59 = vperm.slane %v1481_v31, 0  ;;  %v1486_v23 = vrot.slane %v12705_v32, 4  ;;  %3304 = vmatpush.bf16.msrb.mxu3 %v11420_v20  ;;  %v1947_v44 = vpack.c.bf16 %v1893_v35, %v1893_v35 }
 0x13d   : > { %4507 = vst [vmem:[#allocation3 + $0x61] sm:$0xff] %v12764_v40  ;;  %v1487_v41 = vrot.slane %v12705_v32, 5  ;;  %v1488_v29 = vrot.slane %v12705_v32, 6  ;;  %v1489_v62 = vrot.slane %v12705_v32, 7  ;;  %v1111_v61 = vadd.f32 %v12513_v11, %v1110_v33 }
 0x13e   : > { %1629 = vst [vmem:[#allocation1] ss:$4 sm:$0xff] %v1534_v3  ;;  %v4602_v51 = vrot.slane %v4601_v1, 4  ;;  %v9300_v20 = vrot.slane %v1946_v38, 9  ;;  %v2879_v4 = vrot.slane %v1947_v44, 5  ;;  %v2882_v42 = vrot.slane %v12828_v26, 5 }
 0x13f   : > { %1630 = vst [vmem:[#allocation1 + $0x1] ss:$4 sm:$0xff] %v12779_v25  ;;  %v2041_v7 = vshrl.u32 %v1946_v38, 16  ;;  %v2044_v11 = vshll.u32 %v1946_v38, 16  ;;  %v2050_v33 = vshll.u32 %v1947_v44, 16 }
 0x140   : > { %1631 = vst [vmem:[#allocation1 + $0x2] ss:$4 sm:$0xff] %v12782_v24  ;;  %v4607_v0 = vsel %vm12731_vm4, %v4602_v51, %v4606_v9  ;;  %v1258_v9 = vld [vmem:[%s12240_s22 + $0xd0] sm:$0xff]  ;;  %v2652_v51 = vunpack.c.l.b16 %v1946_v38  ;;  %v2880_v43 = vsel %vm12687_vm14, %v9300_v20, %v2879_v4 }
 0x141   : > { %v1628_v14 = vld.sshfl [vmem:[#allocation1 + $0x20] sm:$0xff pattern:$0x73625140]  ;;  %1632 = vst [vmem:[#allocation1 + $0x3] ss:$4 sm:$0xff] %v12788_v60  ;;  %v12822_v31 = vunpack.c.l.b16 %v4607_v0  ;;  %v12826_v45 = vpop.f32.mrf.mxu3  ;;  %v1542_v0 = vperm.slane %v12705_v32, 0 }
 0x142   : > { %1633 = vst [vmem:[#allocation1 + $0x20] ss:$4 sm:$0xff] %v12790_v17  ;;  %v1788_v16 = vadd.f32 %v1628_v14, %v1392_v8  ;;  %v1259_v14 = vld [vmem:[%s12240_s22 + $0xd8] sm:$0xff]  ;;  %v2043_v38 = vrot.slane %v2041_v7, 4 }
 0x143   : > { %1634 = vst [vmem:[#allocation1 + $0x21] ss:$4 sm:$0xff] %v12794_v2  ;;  %v1899_v8 = vld [vmem:[#allocation2 + $0x50] sm:$0xff]  ;;  %v1900_v32 = vld [vmem:[#allocation2 + $0x58] sm:$0x3] }
 0x144   : > { %16617 = vst [vmem:[#allocation36_spill] sm:$0xff] %v12809_v18 }
 0x145   : > { %1635 = vst [vmem:[#allocation1 + $0x22] ss:$4 sm:$0xff] %v12802_v59 }
 0x146   : > { %16618 = vst [vmem:[#allocation37_spill] sm:$0xff] %v12822_v31 }
 0x147   : > { %1636 = vst [vmem:[#allocation1 + $0x23] ss:$4 sm:$0xff] %v12804_v58 }
 0x148   : > { %1863 = vst [vmem:[#allocation2 + $0x61] sm:$0xff] %v1787_v12  ;;  %v1637_v1 = vld.sshfl [vmem:[#allocation1] sm:$0xff pattern:$0x73625140]  ;;  %v2653_v12 = vunpack.c.l.b16 %v1947_v44 }
 0x149   : > { %1864 = vst [vmem:[#allocation2 + $0x69] sm:$0xff] %v1788_v16  ;;  %v1277_v16 = vpack.c.bf16 %v1259_v14, %v1258_v9  ;;  %v2054_v9 = vshrl.u32 %v1947_v44, 16  ;;  %v1895_v44 = vld [vmem:[#allocation2 + $0x30] sm:$0xff] }
 0x14a   : > { %4508 = vst [vmem:[#allocation3 + $0x71] sm:$0xff] %v12820_v28  ;;  %v12844_v35 = vpack.c.b16 %v2653_v12, %v2652_v51  ;;  %v12855_v51 = vadd.f32 %v12643_v39, %v1111_v61  ;;  %v2046_v12 = vrot.slane %v2044_v11, 5  ;;  %v2060_v39 = vshll.u32 %v12828_v26, 16 }
 0x14b   : > { %1639 = vst [vmem:[#allocation1] ss:$4 sm:$0xff] %v1534_v3  ;;  %9216 = vmatmul.msk.bf16.gmra.mxu3 %vm1316_vm0, %v1277_v16  ;;  %v2881_v3 = vrot.slane %v2879_v4, 4  ;;  %v2052_v16 = vrot.slane %v2050_v33, 5  ;;  %v2056_v20 = vrot.slane %v2054_v9, 4  ;;  %v12862_v4 = vpop.f32.mrf.mxu3  ;;  %v12865_v61 = vpack.c.bf16 %v1895_v44, %v1895_v44 }
 0x14c   : > { %1640 = vst [vmem:[#allocation1 + $0x1] ss:$4 sm:$0xff] %v12779_v25  ;;  %v1789_v25 = vadd.f32 %v1637_v1, %v1395_v22  ;;  %2775 = vmatmul.bf16.gmra.mxu1 %v12844_v35  ;;  %v1896_v22 = vld [vmem:[#allocation2 + $0x38] sm:$0xff]  ;;  %v12881_v26 = vperm.slane %v1485_v27, 0  ;;  %v2062_v9 = vrot.slane %v2060_v39, 5 }
 0x14d   : > { %1641 = vst [vmem:[#allocation1 + $0x2] ss:$4 sm:$0xff] %v12782_v24  ;;  %v2883_v24 = vsel %vm12687_vm14, %v2881_v3, %v2882_v42  ;;  %v2047_v42 = vor.u32 %v2046_v12, %v2043_v38  ;;  %v2057_v7 = vor.u32 %v2056_v20, %v2052_v16  ;;  %v12872_v11 = vpack.c.bf16 %v1896_v22, %v1896_v22 }
 0x14e   : > { %v12851_v14 = vld.sshfl [vmem:[#allocation1 + $0x20] sm:$0xff pattern:$0x73625140]  ;;  %1642 = vst [vmem:[#allocation1 + $0x3] ss:$4 sm:$0xff] %v12788_v60  ;;  %v3001_v60 = vunpack.c.l.b16 %v2880_v43  ;;  %v3002_v1 = vunpack.c.l.b16 %v2883_v24  ;;  %v12877_v43 = vperm.slane %v1484_v19, 0  ;;  %v2654_v39 = vunpack.c.l.b16 %v12865_v61 }
 0x14f   : > { %1643 = vst [vmem:[#allocation1 + $0x20] ss:$4 sm:$0xff] %v12790_v17  ;;  %v12870_v17 = vperm.slane %v1483_v56, 0  ;;  %v2048_v3 = vrot.slane %v2047_v42, 4  ;;  %v2058_v33 = vrot.slane %v2057_v7, 4  ;;  %v2065_v27 = vshrl.u32 %v12865_v61, 16 }
 0x150   : > { %1644 = vst [vmem:[#allocation1 + $0x21] ss:$4 sm:$0xff] %v12794_v2  ;;  %v1897_v2 = vld [vmem:[#allocation2 + $0x40] sm:$0x3]  ;;  %v12887_v56 = vpack.c.b16 %v3002_v1, %v3001_v60  ;;  %v2068_v38 = vshll.u32 %v12865_v61, 16  ;;  %v12903_v12 = vperm.slane %v1488_v29, 0 }
 0x151   : > { %1645 = vst [vmem:[#allocation1 + $0x22] ss:$4 sm:$0xff] %v12802_v59  ;;  %v12885_v59 = vperm.slane %v1486_v23, 0  ;;  %v1951_v19 = vpack.c.bf16 %v1897_v2, %v1897_v2  ;;  %v2074_v23 = vshll.u32 %v12872_v11, 16  ;;  %v2053_v20 = vsel %vm12731_vm4, %v2048_v3, %v2052_v16 }
 0x152   : > { %1646 = vst [vmem:[#allocation1 + $0x23] ss:$4 sm:$0xff] %v12804_v58  ;;  %v2886_v58 = vrot.slane %v12872_v11, 5  ;;  %3124 = vmatmul.bf16.gmra.mxu2 %v12887_v56  ;;  %v2063_v44 = vsel %vm12731_vm4, %v2058_v33, %v2062_v9  ;;  %v2419_v60 = vunpack.c.l.b16 %v2053_v20  ;;  %v2070_v42 = vrot.slane %v2068_v38, 5  ;;  %v1898_v20 = vld [vmem:[#allocation2 + $0x48] sm:$0xff] }
 0x153   : > { %16619 = vst [vmem:[#allocation38_spill] sm:$0xff] %v12887_v56  ;;  %v2420_v1 = vunpack.c.l.b16 %v2063_v44  ;;  %v12913_v29 = vrot.slane %v2074_v23, 5  ;;  %v2078_v7 = vshrl.u32 %v12872_v11, 16  ;;  %v12919_v2 = vpop.f32.mrf.mxu3  ;;  %v2655_v3 = vunpack.c.l.b16 %v12872_v11  ;;  %v1261_v11 = vld [vmem:[%s12240_s22 + $0xe8] sm:$0xff] }
 0x154   : > { %1865 = vst [vmem:[#allocation2 + $0x79] sm:$0xff] %v1789_v25  ;;  %v12899_v25 = vperm.slane %v1487_v41, 0  ;;  %v2888_v22 = vrot.slane %v2886_v58, 4  ;;  %v2067_v41 = vrot.slane %v2065_v27, 4  ;;  %v9301_v33 = vrot.slane %v12865_v61, 9  ;;  %v1260_v61 = vld [vmem:[%s12240_s22 + $0xe0] sm:$0xff] }
 0x155   : > { %4509 = vst [vmem:[#allocation3 + $0x81] sm:$0xff] %v12855_v51  ;;  %v12895_v24 = vld.sshfl [vmem:[#allocation1] sm:$0xff pattern:$0x73625140]  ;;  %v12917_v16 = vpack.c.b16 %v2420_v1, %v2419_v60  ;;  %v2889_v9 = vrot.slane %v1951_v19, 5  ;;  %v2080_v23 = vrot.slane %v2078_v7, 4  ;;  %v12928_v44 = vpack.c.bf16 %v12378_v36, %v12378_v36 }
 0x156   : > { %1649 = vst [vmem:[#allocation1] ss:$4 sm:$0xff] %v1542_v0  ;;  %v2071_v38 = vor.u32 %v2070_v42, %v2067_v41  ;;  %v12932_v60 = vperm.slane %v1489_v62, 0  ;;  %v1278_v41 = vpack.c.bf16 %v1261_v11, %v1260_v61  ;;  %v2084_v42 = vshll.u32 %v1951_v19, 16 }
 0x157   : > { %1650 = vst [vmem:[#allocation1 + $0x1] ss:$4 sm:$0xff] %v12870_v17  ;;  %2542 = vmatmul.bf16.gmra.mxu0 %v12917_v16  ;;  %v2890_v1 = vsel %vm12687_vm14, %v2888_v22, %v2889_v9  ;;  %v2081_v36 = vor.u32 %v2080_v23, %v12913_v29  ;;  %v12942_v7 = vpack.c.bf16 %v1898_v20, %v1898_v20 }
 0x158   : > { %1651 = vst [vmem:[#allocation1 + $0x2] ss:$4 sm:$0xff] %v12877_v43  ;;  %v12948_v62 = vsel %vm5805_vm8, %v12777_v55, %v5801_v37  ;;  %v12954_v22 = vsel %vm5809_vm5, %v12777_v55, %v5801_v37  ;;  %v1397_v9 = vadd.f32 %v12659_v52, %v12826_v45  ;;  %v12959_v19 = vpack.c.b16 %v2655_v3, %v2654_v39 }
 0x159   : > { %16620 = vst [vmem:[#allocation39_spill] sm:$0xff] %v12917_v16  ;;  %v12923_v27 = vld.sshfl [vmem:[#allocation1 + $0x20] sm:$0xff pattern:$0x73625140]  ;;  %v2887_v20 = vsel %vm12687_vm14, %v9301_v33, %v2886_v58  ;;  %v2072_v23 = vrot.slane %v2071_v38, 4  ;;  %v2082_v61 = vrot.slane %v2081_v36, 4  ;;  %v12965_v11 = vpack.c.bf16 %v1899_v8, %v1899_v8 }
 0x15a   : > { %1652 = vst [vmem:[#allocation1 + $0x3] ss:$4 sm:$0xff] %v12881_v26  ;;  %v12969_v37 = vpack.c.bf16 %v12495_v6, %v12495_v6  ;;  %v1790_v50 = vadd.f32 %v12851_v14, %v1397_v9  ;;  %v3004_v45 = vunpack.c.l.b16 %v2890_v1  ;;  %v2089_v58 = vshrl.u32 %v12942_v7, 16 }
 0x15b   : > { %1653 = vst [vmem:[#allocation1 + $0x20] ss:$4 sm:$0xff] %v12885_v59  ;;  %9217 = vmatmul.msk.bf16.gmra.mxu3 %vm1316_vm0, %v1278_v41  ;;  %v2086_v41 = vrot.slane %v2084_v42, 5  ;;  %v12979_v38 = vpop.f32.mrf.mxu3  ;;  %v3003_v6 = vunpack.c.l.b16 %v2887_v20  ;;  %v2092_v14 = vshll.u32 %v12942_v7, 16  ;;  %v2077_v1 = vsel %vm12731_vm4, %v2072_v23, %v12913_v29  ;;  %v1904_v49 = vld [vmem:[#allocation2 + $0x78] sm:$0xff] }
 0x15c   : > { %1654 = vst [vmem:[#allocation1 + $0x21] ss:$4 sm:$0xff] %v12899_v25  ;;  %2780 = vmatmul.bf16.gmra.mxu1 %v12959_v19  ;;  %v2098_v42 = vshll.u32 %v12965_v11, 16  ;;  %v2102_v9 = vshrl.u32 %v12965_v11, 16  ;;  %v1490_v20 = vrot.slane %v12740_v57, 1  ;;  %v2893_v29 = vrot.slane %v12965_v11, 5 }
 0x15d   : > { %1655 = vst [vmem:[#allocation1 + $0x22] ss:$4 sm:$0xff] %v12903_v12  ;;  %v2087_v36 = vsel %vm12731_vm4, %v2082_v61, %v2086_v41  ;;  %v12994_v33 = vpack.c.b16 %v3004_v45, %v3003_v6  ;;  %v2091_v23 = vrot.slane %v2089_v58, 4  ;;  %v2094_v61 = vrot.slane %v2092_v14, 5 }
 0x15e   : > { %16621 = vst [vmem:[#allocation40_spill] sm:$0xff] %v12959_v19  ;;  %v1402_v45 = vadd.f32 %v12659_v52, %v12919_v2  ;;  %v2421_v6 = vunpack.c.l.b16 %v2077_v1  ;;  %v1492_v58 = vrot.slane %v12740_v57, 3  ;;  %v13012_v14 = vpack.c.bf16 %v1900_v32, %v1900_v32 }
 0x15f   : > { %1656 = vst [vmem:[#allocation1 + $0x23] ss:$4 sm:$0xff] %v12932_v60  ;;  %v1493_v2 = vrot.slane %v12740_v57, 4  ;;  %v1494_v3 = vrot.slane %v12740_v57, 5  ;;  %v16630_v31 = vshrl.u32 %v12948_v62, 16 }
 0x160   : > { %1866 = vst [vmem:[#allocation2 + $0x81] sm:$0xff] %v1790_v50  ;;  %v2422_v50 = vunpack.c.l.b16 %v2087_v36  ;;  %v1792_v1 = vadd.f32 %v12923_v27, %v1402_v45  ;;  %v2656_v36 = vunpack.c.l.b16 %v12942_v7  ;;  %v9302_v27 = vrot.slane %v12942_v7, 9  ;;  %v1262_v7 = vld [vmem:[%s12240_s22 + $0xf0] sm:$0xff] }
 0x161   : > { %v12977_v8 = vld.sshfl [vmem:[#allocation1] sm:$0xff pattern:$0x73625140]  ;;  %16622 = vst [vmem:[#allocation41_spill] sm:$0xff] %v12994_v33  ;;  %v13040_v54 = vperm.slane %v1492_v58, 0  ;;  %v16625_v58 = vperm.slane %v12740_v57, 0 }
 0x162   : > { %1659 = vst [vmem:[#allocation1] ss:$4 sm:$0xff] %v1542_v0  ;;  %v1491_v0 = vrot.slane %v12740_v57, 2  ;;  %3129 = vmatmul.bf16.gmra.mxu2 %v12994_v33  ;;  %v13027_v32 = vpack.c.b16 %v2422_v50, %v2421_v6  ;;  %v13135_v34 = vrot.slane %v16630_v31, 6 }
 0x163   : > { %1660 = vst [vmem:[#allocation1 + $0x1] ss:$4 sm:$0xff] %v12870_v17  ;;  %v1400_v17 = vadd.f32 %v12659_v52, %v12862_v4  ;;  %v2104_v4 = vrot.slane %v2102_v9, 4  ;;  %v2895_v9 = vrot.slane %v2893_v29, 4 }
 0x164   : > { %1661 = vst [vmem:[#allocation1 + $0x2] ss:$4 sm:$0xff] %v12877_v43  ;;  %v11419_v43 = vld [vmem:[%s16604_s11 + $0xe8] sm:$0xff]  ;;  %v13038_v6 = vperm.slane %v1491_v0, 0  ;;  %v2108_v0 = vshll.u32 %v13012_v14, 16 }
 0x165   : > { %1662 = vst [vmem:[#allocation1 + $0x3] ss:$4 sm:$0xff] %v12881_v26  ;;  %v13014_v26 = vrot.slane %v2098_v42, 5  ;;  %v1791_v39 = vadd.f32 %v12895_v24, %v1400_v17  ;;  %3305 = vmatpush.bf16.msrb.mxu3 %v11419_v43  ;;  %v2657_v42 = vunpack.c.l.b16 %v12965_v11  ;;  %v1406_v24 = vpop.f32.mrf.mxu3  ;;  %v2095_v17 = vor.u32 %v2094_v61, %v2091_v23  ;;  %v1901_v43 = vld [vmem:[#allocation2 + $0x60] sm:$0xff]  ;;  %v1263_v23 = vld [vmem:[%s12240_s22 + $0xf8] sm:$0xff]  ;;  %v1902_v61 = vld [vmem:[#allocation2 + $0x68] sm:$0xff] }
 0x166   : > { %v12999_v41 = vld.sshfl [vmem:[#allocation1 + $0x20] sm:$0xff pattern:$0x73625140]  ;;  %16623 = vst [vmem:[#allocation42_spill] sm:$0xff] %v13027_v32  ;;  %v13034_v11 = vperm.slane %v1490_v20, 0  ;;  %v1279_v20 = vpack.c.bf16 %v1263_v23, %v1262_v7  ;;  %v2894_v7 = vsel %vm12687_vm14, %v9302_v27, %v2893_v29  ;;  %v13063_v23 = vperm.slane %v1493_v2, 0 }
 0x167   : > { %1663 = vst [vmem:[#allocation1 + $0x20] ss:$4 sm:$0xff] %v12885_v59  ;;  %v1495_v59 = vrot.slane %v12740_v57, 6  ;;  %v2105_v50 = vor.u32 %v2104_v4, %v13014_v26  ;;  %2547 = vmatmul.bf16.gmra.mxu0 %v13027_v32  ;;  %v16626_v2 = vrot.slane %v12928_v44, 2 }
 0x168   : > { %1664 = vst [vmem:[#allocation1 + $0x21] ss:$4 sm:$0xff] %v12899_v25  ;;  %v1496_v25 = vrot.slane %v12740_v57, 7 }
 0x169   : > { %1665 = vst [vmem:[#allocation1 + $0x22] ss:$4 sm:$0xff] %v12903_v12  ;;  %v11418_v12 = vld [vmem:[%s16604_s11 + $0xe0] sm:$0xff] }
 0x16a   : > { %1666 = vst [vmem:[#allocation1 + $0x23] ss:$4 sm:$0xff] %v12932_v60  ;;  %v2896_v60 = vrot.slane %v13012_v14, 5  ;;  %3306 = vmatpush.bf16.msrb.mxu3 %v11418_v12  ;;  %v11417_v12 = vld [vmem:[%s16604_s11 + $0xd8] sm:$0xff]  ;;  %v1407_v14 = vadd.f32 %v12659_v52, %v1406_v24  ;;  %v13074_v46 = vperm.slane %v1496_v25, 0  ;;  %v13082_v24 = vsel %vm5809_vm5, %v12928_v44, %v16626_v2 }
 0x16b   : > { %1867 = vst [vmem:[#allocation2 + $0x91] sm:$0xff] %v1791_v39  ;;  %v13047_v39 = vpack.c.b16 %v2657_v42, %v2656_v36  ;;  %v2096_v36 = vrot.slane %v2095_v17, 4  ;;  %v13061_v42 = vpack.c.bf16 %v1901_v43, %v1901_v43  ;;  %9218 = vmatmul.msk.bf16.gmra.mxu3 %vm1316_vm0, %v1279_v20  ;;  %vm5831_vm0 = vsmask.f32 1280 }
 0x16c   : > { %1868 = vst [vmem:[#allocation2 + $0x99] sm:$0xff] %v1792_v1  ;;  %v13045_v45 = vld.sshfl [vmem:[#allocation1] sm:$0xff pattern:$0x73625140]  ;;  %v2897_v4 = vsel %vm12687_vm14, %v2895_v9, %v2896_v60  ;;  %v1405_v1 = vadd.f32 %v12659_v52, %v12979_v38  ;;  %v2106_v9 = vrot.slane %v2105_v50, 4  ;;  %v13068_v38 = vpack.c.bf16 %v1902_v61, %v1902_v61  ;;  %v11416_v50 = vld [vmem:[%s16604_s11 + $0xd0] sm:$0xff]  ;;  %vm13386_vm10 = vmor %vm5831_vm0, %vm5832_vm6 }
 0x16d   : > { %16624 = vst [vmem:[#allocation43_spill] sm:$0xff] %v13047_v39  ;;  %v13070_v60 = vperm.slane %v1494_v3, 0  ;;  %2785 = vmatmul.bf16.gmra.mxu1 %v13047_v39  ;;  %v3006_v29 = vunpack.c.l.b16 %v2897_v4  ;;  %v3005_v3 = vunpack.c.l.b16 %v2894_v7  ;;  %v1409_v17 = vpop.f32.mrf.mxu3  ;;  %v2101_v43 = vsel %vm12731_vm4, %v2096_v36, %v13014_v26  ;;  %v1903_v36 = vld [vmem:[#allocation2 + $0x70] sm:$0x3]  ;;  %vm13417_vm12 = vmor %vm13386_vm10, %vm5834_vm7 }
 0x16e   : > { %1669 = vst [vmem:[#allocation1] ss:$4 sm:$0xff] %v16625_v58  ;;  %v13072_v58 = vperm.slane %v1495_v59, 0  ;;  %3307 = vmatpush.bf16.msrb.mxu3 %v11417_v12  ;;  %v2110_v59 = vrot.slane %v2108_v0, 5  ;;  %v1793_v25 = vadd.f32 %v12977_v8, %v1405_v1  ;;  %v2113_v61 = vshrl.u32 %v13061_v42, 16  ;;  %vm13446_vm13 = vmor %vm13417_vm12, %vm5836_vm9 }
 0x16f   : > { %1670 = vst [vmem:[#allocation1 + $0x1] ss:$4 sm:$0xff] %v13034_v11  ;;  %v2116_v20 = vshll.u32 %v13061_v42, 16  ;;  %v1794_v4 = vadd.f32 %v12999_v41, %v1407_v14  ;;  %v2122_v0 = vshll.u32 %v13068_v38, 16  ;;  %v2126_v1 = vshrl.u32 %v13068_v38, 16 }
 0x170   : > { %1671 = vst [vmem:[#allocation1 + $0x2] ss:$4 sm:$0xff] %v13038_v6  ;;  %v2111_v8 = vsel %vm12731_vm4, %v2106_v9, %v2110_v59  ;;  %v5841_v12 = vshll.u32 %v12948_v62, 16  ;;  %v13106_v26 = vpack.c.b16 %v3006_v29, %v3005_v3  ;;  %v13112_v41 = vsel %vm5805_vm8, %v12928_v44, %v16626_v2  ;;  %v11415_v29 = vld [vmem:[%s16604_s11 + $0xc8] sm:$0xff] }
 0x171   : > { %v13084_v27 = vld.sshfl [vmem:[#allocation1 + $0x20] sm:$0xff pattern:$0x73625140]  ;;  %1672 = vst [vmem:[#allocation1 + $0x3] ss:$4 sm:$0xff] %v13040_v54  ;;  %v16628_v9 = vrot.slane %v12954_v22, 2  ;;  %v2423_v3 = vunpack.c.l.b16 %v2101_v43  ;;  %v1957_v15 = vpack.c.bf16 %v1903_v36, %v1903_v36 }
 0x172   : > { %1673 = vst [vmem:[#allocation1 + $0x20] ss:$4 sm:$0xff] %v13063_v23  ;;  %3308 = vmatpush.bf16.msrb.mxu3 %v11416_v50  ;;  %v2900_v7 = vrot.slane %v13068_v38, 5  ;;  %3134 = vmatmul.bf16.gmra.mxu2 %v13106_v26  ;;  %v2424_v50 = vunpack.c.l.b16 %v2111_v8  ;;  %v2115_v2 = vrot.slane %v2113_v61, 4  ;;  %v2118_v63 = vrot.slane %v2116_v20, 5 }
 0x173   : > { %1674 = vst [vmem:[#allocation1 + $0x21] ss:$4 sm:$0xff] %v13070_v60  ;;  %v13117_v59 = vshll.u32 %v16628_v9, 16  ;;  %v16629_v14 = vrot.slane %v12969_v37, 2  ;;  %v13131_v30 = vrot.slane %v2122_v0, 5  ;;  %v5851_v43 = vshrl.u32 %v13112_v41, 16 }
 0x174   : > { %1675 = vst [vmem:[#allocation1 + $0x22] ss:$4 sm:$0xff] %v13072_v58  ;;  %v2658_v61 = vunpack.c.l.b16 %v13061_v42  ;;  %v2659_v20 = vunpack.c.l.b16 %v13068_v38  ;;  %v16631_v0 = vperm.slane %v12740_v57, 0  ;;  %v2902_v31 = vrot.slane %v2900_v7, 4  ;;  %v11414_v38 = vld [vmem:[%s16604_s11 + $0xc0] sm:$0xff] }
 0x175   : > { %16627 = vst [vmem:[#allocation44_spill] sm:$0xff] %v13106_v26  ;;  %v13129_v9 = vsel %vm5809_vm5, %v12969_v37, %v16629_v14  ;;  %v13142_v14 = vrot.slane %v5841_v12, 7  ;;  %v13150_v18 = vpack.c.b16 %v2424_v50, %v2423_v3  ;;  %v9303_v12 = vrot.slane %v13061_v42, 9  ;;  %v1905_v3 = vld [vmem:[#allocation2 + $0x80] sm:$0xff] }
 0x176   : > { %1676 = vst [vmem:[#allocation1 + $0x23] ss:$4 sm:$0xff] %v13074_v46  ;;  %3309 = vmatpush.bf16.msrb.mxu3 %v11415_v29  ;;  %v1411_v29 = vpop.f32.mrf.mxu3  ;;  %v2119_v48 = vor.u32 %v2118_v63, %v2115_v2  ;;  %v16633_v50 = vrot.slane %v12969_v37, 2  ;;  %v13166_v26 = vrot.slane %v5851_v43, 6  ;;  %v2132_v2 = vshll.u32 %v1957_v15, 16 }
 0x177   : > { %1869 = vst [vmem:[#allocation2 + $0xa9] sm:$0xff] %v1793_v25  ;;  %v2128_v25 = vrot.slane %v2126_v1, 4  ;;  %v1410_v1 = vadd.f32 %v12659_v52, %v1409_v17  ;;  %v1412_v17 = vadd.f32 %v12659_v52, %v1411_v29  ;;  %2552 = vmatmul.bf16.gmra.mxu0 %v13150_v18  ;;  %v13172_v52 = vpack.c.b16 %v2659_v20, %v2658_v61 }
 0x178   : > { %1870 = vst [vmem:[#allocation2 + $0xb1] sm:$0xff] %v1794_v4  ;;  %v13138_v8 = vld.sshfl [vmem:[#allocation1] sm:$0xff pattern:$0x73625140]  ;;  %v5854_v4 = vshll.u32 %v13112_v41, 16  ;;  %v13164_v36 = vsel %vm5805_vm8, %v12969_v37, %v16633_v50  ;;  %v2120_v29 = vrot.slane %v2119_v48, 4  ;;  %v13184_v61 = vpack.c.bf16 %v1905_v3, %v1905_v3 }
 0x179   : > { %1679 = vst [vmem:[#allocation1] ss:$4 sm:$0xff] %v16631_v0  ;;  %v2903_v0 = vrot.slane %v1957_v15, 5  ;;  %v1796_v43 = vadd.f32 %v13084_v27, %v1412_v17  ;;  %v1498_v15 = vrot.slane %v12764_v40, 2  ;;  %v1501_v48 = vrot.slane %v12764_v40, 5 }
 0x17a   : > { %1680 = vst [vmem:[#allocation1 + $0x1] ss:$4 sm:$0xff] %v13034_v11  ;;  %v2129_v11 = vor.u32 %v2128_v25, %v13131_v30  ;;  %3310 = vmatpush.bf16.msrb.mxu3 %v11414_v38  ;;  %v13178_v25 = vpack.c.bf16 %v1904_v49, %v1904_v49  ;;  %v13186_v20 = vrot.slane %v5854_v4, 7  ;;  %v2134_v4 = vrot.slane %v2132_v2, 5 }
 0x17b   : > { %16632 = vst [vmem:[#allocation45_spill] sm:$0xff] %v13150_v18  ;;  %v2904_v42 = vsel %vm12687_vm14, %v2902_v31, %v2903_v0  ;;  %v2146_v38 = vshll.u32 %v13184_v61, 16  ;;  %v1502_v0 = vrot.slane %v12764_v40, 6  ;;  %vm7882_vm6 = vsmask.f32 4368 }
 0x17c   : > { %1681 = vst [vmem:[#allocation1 + $0x2] ss:$4 sm:$0xff] %v13038_v6  ;;  %v1795_v6 = vadd.f32 %v13045_v45, %v1410_v1  ;;  %v1497_v45 = vrot.slane %v12764_v40, 1  ;;  %v2130_v49 = vrot.slane %v2129_v11, 4  ;;  %v3008_v27 = vunpack.c.l.b16 %v2904_v42  ;;  %v13222_v42 = vld [vmem:[%s16606_s8] ss:$0 sm:$0xff] }
 0x17d   : > { %v13168_v63 = vld.sshfl [vmem:[#allocation1 + $0x20] sm:$0xff pattern:$0x73625140]  ;;  %1682 = vst [vmem:[#allocation1 + $0x3] ss:$4 sm:$0xff] %v13040_v54  ;;  %v2901_v54 = vsel %vm12687_vm14, %v9303_v12, %v2900_v7  ;;  %3311 = vmatmul.bf16.vlgmr.msrb.gmra.mxu3 %v12844_v35  ;;  %2790 = vmatmul.bf16.gmra.mxu1 %v13172_v52  ;;  %v2137_v1 = vshrl.u32 %v13178_v25, 16 }
 0x17e   : > { %16634 = vst [vmem:[#allocation46_spill] sm:$0xff] %v13172_v52  ;;  %v3007_v7 = vunpack.c.l.b16 %v2901_v54  ;;  %v1414_v35 = vpop.f32.mrf.mxu3  ;;  %v2140_v31 = vshll.u32 %v13178_v25, 16  ;;  %v2150_v12 = vshrl.u32 %v13184_v61, 16  ;;  %v1503_v11 = vrot.slane %v12764_v40, 7  ;;  %v1906_v54 = vld [vmem:[#allocation2 + $0x88] sm:$0x3] }
 0x17f   : > { %1683 = vst [vmem:[#allocation1 + $0x20] ss:$4 sm:$0xff] %v13063_v23  ;;  %v1499_v23 = vrot.slane %v12764_v40, 3  ;;  %v13209_v3 = vperm.slane %v1497_v45, 0  ;;  %v2135_v50 = vsel %vm12731_vm4, %v2130_v49, %v2134_v4  ;;  %v1415_v2 = vadd.f32 %v13222_v42, %v1414_v35  ;;  %v16739_v10 = vld [vmem:[#allocation44_spill] sm:$0xff] }
 0x180   : > { %1684 = vst [vmem:[#allocation1 + $0x21] ss:$4 sm:$0xff] %v13070_v60  ;;  %v1500_v60 = vrot.slane %v12764_v40, 4  ;;  %v2139_v49 = vrot.slane %v2137_v1, 4  ;;  %v2142_v4 = vrot.slane %v2140_v31, 5  ;;  %v13233_v57 = vrot.slane %v2146_v38, 5 }
 0x181   : > { %1685 = vst [vmem:[#allocation1 + $0x22] ss:$4 sm:$0xff] %v13072_v58  ;;  %v16439_v58 = vperm.slane %v12764_v40, 0  ;;  %v2152_v35 = vrot.slane %v2150_v12, 4  ;;  %v16636_v1 = vrot.slane %v13082_v24, 2  ;;  %v13247_v31 = vperm.slane %v1502_v0, 0 }
 0x182   : > { %1686 = vst [vmem:[#allocation1 + $0x23] ss:$4 sm:$0xff] %v13074_v46  ;;  %v2125_v46 = vsel %vm12731_vm4, %v2120_v29, %v13131_v30  ;;  %v13215_v30 = vperm.slane %v1499_v23, 0  ;;  %v13227_v29 = vperm.slane %v1500_v60, 0  ;;  %v2426_v23 = vunpack.c.l.b16 %v2135_v50 }
 0x183   : > { %1871 = vst [vmem:[#allocation2 + $0xc1] sm:$0xff] %v1795_v6  ;;  %v13213_v6 = vperm.slane %v1498_v15, 0  ;;  %v2425_v45 = vunpack.c.l.b16 %v2125_v46  ;;  %v2907_v15 = vrot.slane %v13184_v61, 5  ;;  %v1960_v46 = vpack.c.bf16 %v1906_v54, %v1906_v54 }
 0x184   : > { %1872 = vst [vmem:[#allocation2 + $0xc9] sm:$0xff] %v1796_v43  ;;  %v13205_v17 = vld.sshfl [vmem:[#allocation1] sm:$0xff pattern:$0x73625140]  ;;  %v13225_v43 = vpack.c.b16 %v3008_v27, %v3007_v7  ;;  %v5844_v27 = vor.u32 %v13142_v14, %v13135_v34  ;;  %v13239_v7 = vperm.slane %v1501_v48, 0  ;;  %v5864_v50 = vshrl.u32 %v13164_v36, 16 }
 0x185   : > { %1689 = vst [vmem:[#allocation1] ss:$4 sm:$0xff] %v16439_v58  ;;  %v13244_v58 = vshll.u32 %v16636_v1, 16  ;;  %v1797_v38 = vadd.f32 %v13138_v8, %v1415_v2  ;;  %v5867_v34 = vshll.u32 %v13164_v36, 16  ;;  %v13252_v14 = vperm.slane %v1503_v11, 0  ;;  %v1907_v8 = vld [vmem:[#allocation2 + $0x90] sm:$0xff] }
 0x186   : > { %16635 = vst [vmem:[#allocation47_spill] sm:$0xff] %v13225_v43  ;;  %3139 = vmatmul.bf16.gmra.mxu2 %v13225_v43  ;;  %v2660_v48 = vunpack.c.l.b16 %v13178_v25  ;;  %v2909_v12 = vrot.slane %v2907_v15, 4  ;;  %v13257_v54 = vpack.c.b16 %v2426_v23, %v2425_v45  ;;  %v1416_v1 = vpop.f32.mrf.mxu3  ;;  %v2661_v0 = vunpack.c.l.b16 %v13184_v61 }
 0x187   : > { %1690 = vst [vmem:[#allocation1 + $0x1] ss:$4 sm:$0xff] %v13209_v3  ;;  %v2143_v43 = vor.u32 %v2142_v4, %v2139_v49  ;;  %v2153_v18 = vor.u32 %v2152_v35, %v13233_v57  ;;  %v13261_v2 = vrot.slane %v5844_v27, 2  ;;  %v5857_v11 = vor.u32 %v13186_v20, %v13166_v26  ;;  %v1908_v35 = vld [vmem:[#allocation2 + $0x98] sm:$0xff] }
 0x188   : > { %1691 = vst [vmem:[#allocation1 + $0x2] ss:$4 sm:$0xff] %v13213_v6  ;;  %v9304_v32 = vrot.slane %v13178_v25, 9  ;;  %v2910_v33 = vrot.slane %v1960_v46, 5  ;;  %v13268_v23 = vrot.slane %v5864_v50, 6  ;;  %v16638_v61 = vrot.slane %v13129_v9, 2  ;;  %2557 = vmatmul.bf16.gmra.mxu0 %v13257_v54 }
 0x189   : > { %v13237_v60 = vld.sshfl [vmem:[#allocation1 + $0x20] sm:$0xff pattern:$0x73625140]  ;;  %1692 = vst [vmem:[#allocation1 + $0x3] ss:$4 sm:$0xff] %v13215_v30  ;;  %v2156_v4 = vshll.u32 %v1960_v46, 16  ;;  %v13282_v50 = vpack.c.bf16 %v1907_v8, %v1907_v8 }
 0x18a   : > { %1693 = vst [vmem:[#allocation1 + $0x20] ss:$4 sm:$0xff] %v13227_v29  ;;  %v13272_v49 = vshll.u32 %v16638_v61, 16  ;;  %v16639_v26 = vrot.slane %v12954_v22, 2  ;;  %v2911_v27 = vsel %vm12687_vm14, %v2909_v12, %v2910_v33  ;;  %v13284_v45 = vrot.slane %v5867_v34, 7 }
 0x18b   : > { %1694 = vst [vmem:[#allocation1 + $0x21] ss:$4 sm:$0xff] %v13239_v7  ;;  %v2154_v46 = vrot.slane %v2153_v18, 4  ;;  %v13290_v21 = vrot.slane %v5857_v11, 2  ;;  %v16641_v22 = vperm.slane %v12764_v40, 0  ;;  %v2908_v33 = vsel %vm12687_vm14, %v9304_v32, %v2907_v15  ;;  %v1910_v32 = vld [vmem:[#allocation2 + $0xa8] sm:$0xff] }
 0x18c   : > { %1695 = vst [vmem:[#allocation1 + $0x22] ss:$4 sm:$0xff] %v13247_v31  ;;  %v13277_v20 = vrot.slane %v16639_v26, 7  ;;  %v1417_v26 = vadd.f32 %v13222_v42, %v1416_v1  ;;  %v13298_v34 = vpack.c.bf16 %v1908_v35, %v1908_v35  ;;  %v3010_v40 = vunpack.c.l.b16 %v2911_v27 }
 0x18d   : > { %16637 = vst [vmem:[#allocation48_spill] sm:$0xff] %v13257_v54  ;;  %v2144_v54 = vrot.slane %v2143_v43, 4  ;;  %3316 = vmatmul.bf16.gmra.mxu3 %v12959_v19  ;;  %v13303_v43 = vpack.c.bf16 %v12619_v13, %v12619_v13  ;;  %v2158_v18 = vrot.slane %v2156_v4, 5  ;;  %v16644_v15 = vrot.slane %v13129_v9, 2 }
 0x18e   : > { %1696 = vst [vmem:[#allocation1 + $0x23] ss:$4 sm:$0xff] %v13252_v14  ;;  %v2161_v13 = vshrl.u32 %v13282_v50, 16  ;;  %v1419_v8 = vpop.f32.mrf.mxu3  ;;  %v2164_v4 = vshll.u32 %v13282_v50, 16  ;;  %v2170_v27 = vshll.u32 %v13298_v34, 16  ;;  %v1510_v25 = vrot.slane %v12820_v28, 7 }
 0x18f   : > { %1873 = vst [vmem:[#allocation2 + $0xd9] sm:$0xff] %v1797_v38  ;;  %v13288_v38 = vpack.c.b16 %v2661_v0, %v2660_v48  ;;  %v16643_v48 = vrot.slane %v13082_v24, 2  ;;  %v13314_v0 = vrot.slane %v16644_v15, 7  ;;  %v3009_v24 = vunpack.c.l.b16 %v2908_v33 }
 0x190   : > { %v13286_v61 = vld.sshfl [vmem:[#allocation1] sm:$0xff pattern:$0x73625140]  ;;  %16642 = vst [vmem:[#allocation50_spill] sm:$0xff] %v13303_v43  ;;  %v2149_v11 = vsel %vm12731_vm4, %v2144_v54, %v13233_v57  ;;  %v2159_v9 = vsel %vm12731_vm4, %v2154_v46, %v2158_v18  ;;  %v1420_v35 = vadd.f32 %v13222_v42, %v1419_v8  ;;  %v5804_v57 = vrot.slane %v13303_v43, 2 }
 0x191   : > { %16640 = vst [vmem:[#allocation49_spill] sm:$0xff] %v13288_v38  ;;  %2795 = vmatmul.bf16.gmra.mxu1 %v13288_v38  ;;  %v13309_v1 = vrot.slane %v16643_v48, 7  ;;  %v1504_v54 = vrot.slane %v12820_v28, 1  ;;  %v13339_v46 = vpack.c.b16 %v3010_v40, %v3009_v24  ;;  %v2428_v18 = vunpack.c.l.b16 %v2159_v9 }
 0x192   : > { %1699 = vst [vmem:[#allocation1] ss:$4 sm:$0xff] %v16641_v22  ;;  %v13334_v22 = vpack.c.bf16 %v12654_v47, %v12654_v47  ;;  %v1799_v33 = vadd.f32 %v13205_v17, %v1420_v35  ;;  %v2914_v47 = vrot.slane %v13298_v34, 5  ;;  %v2163_v40 = vrot.slane %v2161_v13, 4 }
 0x193   : > { %1700 = vst [vmem:[#allocation1 + $0x1] ss:$4 sm:$0xff] %v13209_v3  ;;  %v2166_v48 = vrot.slane %v2164_v4, 5  ;;  %v1507_v15 = vrot.slane %v12820_v28, 4  ;;  %v13349_v8 = vrot.slane %v2170_v27, 5  ;;  %v1508_v17 = vrot.slane %v12820_v28, 5 }
 0x194   : > { %1701 = vst [vmem:[#allocation1 + $0x2] ss:$4 sm:$0xff] %v13213_v6  ;;  %v1798_v6 = vadd.f32 %v13168_v63, %v1417_v26  ;;  %v1505_v63 = vrot.slane %v12820_v28, 2  ;;  %v1506_v26 = vrot.slane %v12820_v28, 3  ;;  %v1509_v35 = vrot.slane %v12820_v28, 6 }
 0x195   : > { %v13318_v3 = vld.sshfl [vmem:[#allocation1 + $0x20] sm:$0xff pattern:$0x73625140]  ;;  %1702 = vst [vmem:[#allocation1 + $0x3] ss:$4 sm:$0xff] %v13215_v30  ;;  %v2174_v30 = vshrl.u32 %v13298_v34, 16  ;;  %v5870_v13 = vor.u32 %v13284_v45, %v13268_v23  ;;  %v13404_v16 = vpack.c.bf16 %v1910_v32, %v1910_v32 }
 0x196   : > { %1703 = vst [vmem:[#allocation1 + $0x20] ss:$4 sm:$0xff] %v13227_v29  ;;  %v1909_v29 = vld [vmem:[#allocation2 + $0xa0] sm:$0x3]  ;;  %3144 = vmatmul.bf16.gmra.mxu2 %v13339_v46  ;;  %v13354_v12 = vperm.slane %v1504_v54, 0  ;;  %v13360_v9 = vperm.slane %v1505_v63, 0  ;;  %v2662_v54 = vunpack.c.l.b16 %v13282_v50 }
 0x197   : > { %1704 = vst [vmem:[#allocation1 + $0x21] ss:$4 sm:$0xff] %v13239_v7  ;;  %v2427_v7 = vunpack.c.l.b16 %v2149_v11  ;;  %v2176_v24 = vrot.slane %v2174_v30, 4  ;;  %v13362_v4 = vperm.slane %v1506_v26, 0  ;;  %v1421_v30 = vpop.f32.mrf.mxu3  ;;  %v9305_v23 = vrot.slane %v13282_v50, 9 }
 0x198   : > { %16645 = vst [vmem:[#allocation51_spill] sm:$0xff] %v13339_v46  ;;  %v1422_v45 = vadd.f32 %v13222_v42, %v1421_v30  ;;  %v13421_v32 = vrot.slane %v5870_v13, 2  ;;  %v2188_v50 = vshll.u32 %v13404_v16, 16  ;;  %v16659_v19 = vperm.slane %v12820_v28, 0 }
 0x199   : > { %1705 = vst [vmem:[#allocation1 + $0x22] ss:$4 sm:$0xff] %v13247_v31  ;;  %v1963_v31 = vpack.c.bf16 %v1909_v29, %v1909_v29  ;;  %v13366_v27 = vpack.c.b16 %v2428_v18, %v2427_v7  ;;  %v2663_v29 = vunpack.c.l.b16 %v13298_v34  ;;  %v2177_v26 = vor.u32 %v2176_v24, %v13349_v8 }
 0x19a   : > { %1706 = vst [vmem:[#allocation1 + $0x23] ss:$4 sm:$0xff] %v13252_v14  ;;  %v16450_v14 = vperm.slane %v12820_v28, 0  ;;  %v13376_v7 = vsel %vm5805_vm8, %v13303_v43, %v5804_v57  ;;  %v13380_v34 = vperm.slane %v1507_v15, 0  ;;  %v1800_v15 = vadd.f32 %v13237_v60, %v1422_v45 }
 0x19b   : > { %1874 = vst [vmem:[#allocation2 + $0xe1] sm:$0xff] %v1798_v6  ;;  %v2916_v6 = vrot.slane %v2914_v47, 4  ;;  %v2917_v63 = vrot.slane %v1963_v31, 5  ;;  %2562 = vmatmul.bf16.gmra.mxu0 %v13366_v27  ;;  %v2180_v30 = vshll.u32 %v1963_v31, 16  ;;  %v13400_v18 = vperm.slane %v1508_v17, 0 }
 0x19c   : > { %1875 = vst [vmem:[#allocation2 + $0xf1] sm:$0xff] %v1799_v33  ;;  %v13358_v11 = vld.sshfl [vmem:[#allocation1] sm:$0xff pattern:$0x73625140]  ;;  %v2167_v33 = vor.u32 %v2166_v48, %v2163_v40  ;;  %v1911_v40 = vld [vmem:[#allocation2 + $0xb0] sm:$0xff]  ;;  %v13392_v48 = vsel %vm5809_vm5, %v13303_v43, %v5804_v57  ;;  %v13407_v57 = vperm.slane %v1509_v35, 0  ;;  %v2915_v60 = vsel %vm12687_vm14, %v9305_v23, %v2914_v47 }
 0x19d   : > { %1709 = vst [vmem:[#allocation1] ss:$4 sm:$0xff] %v16450_v14  ;;  %v2918_v24 = vsel %vm12687_vm14, %v2916_v6, %v2917_v63  ;;  %3321 = vmatmul.bf16.gmra.mxu3 %v13047_v39  ;;  %v2178_v31 = vrot.slane %v2177_v26, 4  ;;  %v13412_v6 = vpack.c.bf16 %v1911_v40, %v1911_v40  ;;  %v5830_v35 = vrot.slane %v13392_v48, 2 }
 0x19e   : > { %16646 = vst [vmem:[#allocation52_spill] sm:$0xff] %v13366_v27  ;;  %v13402_v27 = vpack.c.b16 %v2663_v29, %v2662_v54  ;;  %v2168_v46 = vrot.slane %v2167_v33, 4  ;;  %v13424_v54 = vperm.slane %v1510_v25, 0  ;;  %v3012_v29 = vunpack.c.l.b16 %v2918_v24 }
 0x19f   : > { %1710 = vst [vmem:[#allocation1 + $0x1] ss:$4 sm:$0xff] %v13354_v12  ;;  %v5877_v47 = vshrl.u32 %v13376_v7, 16  ;;  %v5880_v33 = vshll.u32 %v13376_v7, 16  ;;  %v16652_v45 = vrot.slane %v13334_v22, 2  ;;  %v2182_v13 = vrot.slane %v2180_v30, 5  ;;  %v1424_v25 = vpop.f32.mrf.mxu3 }
 0x1a0   : > { %1711 = vst [vmem:[#allocation1 + $0x2] ss:$4 sm:$0xff] %v13360_v9  ;;  %v3011_v63 = vunpack.c.l.b16 %v2915_v60  ;;  %v2173_v26 = vsel %vm12731_vm4, %v2168_v46, %v13349_v8  ;;  %v2185_v40 = vshrl.u32 %v13404_v16, 16  ;;  %v16654_v48 = vmov 0 }
 0x1a1   : > { %1712 = vst [vmem:[#allocation1 + $0x3] ss:$4 sm:$0xff] %v13362_v4  ;;  %v13398_v14 = vld.sshfl [vmem:[#allocation1 + $0x20] sm:$0xff pattern:$0x73625140]  ;;  %2800 = vmatmul.bf16.gmra.mxu1 %v13402_v27  ;;  %v13434_v23 = vsel %vm5805_vm8, %v13334_v22, %v16652_v45  ;;  %v16655_v48 = vsel %vm13446_vm13, 4294967295, %v16654_v48  ;;  %v2183_v24 = vsel %vm12731_vm4, %v2178_v31, %v2182_v13 }
 0x1a2   : > { %16649 = vst [vmem:[#allocation53_spill] sm:$0xff] %v13402_v27  ;;  %v2194_v46 = vshll.u32 %v13412_v6, 16  ;;  %v2198_v8 = vshrl.u32 %v13412_v6, 16  ;;  %v16657_v30 = vrot.slane %v13117_v59, 7  ;;  %v6272_v17 = vshrl.u32 %v13434_v23, 16 }
 0x1a3   : > { %1713 = vst [vmem:[#allocation1 + $0x20] ss:$4 sm:$0xff] %v13380_v34  ;;  %v13465_v39 = vpack.c.b16 %v3012_v29, %v3011_v63  ;;  %v6275_v13 = vshll.u32 %v13434_v23, 16  ;;  %v2921_v56 = vrot.slane %v13412_v6, 5  ;;  %v2187_v29 = vrot.slane %v2185_v40, 4 }
 0x1a4   : > { %1876 = vst [vmem:[#allocation2 + $0xf9] sm:$0xff] %v1800_v15  ;;  %v1425_v15 = vadd.f32 %v13222_v42, %v1424_v25  ;;  %v13460_v60 = vsel %vm13446_vm13, %v13261_v2, %v16657_v30  ;;  %v1912_v25 = vld [vmem:[#allocation2 + $0xb8] sm:$0x3]  ;;  %v2429_v2 = vunpack.c.l.b16 %v2173_v26  ;;  %v2430_v30 = vunpack.c.l.b16 %v2183_v24 }
 0x1a5   : > { %1714 = vst [vmem:[#allocation1 + $0x21] ss:$4 sm:$0xff] %v13400_v18  ;;  %v2190_v63 = vrot.slane %v2188_v50, 5  ;;  %v13475_v43 = vrot.slane %v5877_v47, 6  ;;  %v1966_v31 = vpack.c.bf16 %v1912_v25, %v1912_v25  ;;  %v2200_v28 = vrot.slane %v2198_v8, 4  ;;  %v1913_v25 = vld [vmem:[#allocation2 + $0xc0] sm:$0xff] }
 0x1a6   : > { %16653 = vst [vmem:[#allocation54_spill] sm:$0xff] %v13434_v23  ;;  %v1801_v59 = vadd.f32 %v13286_v61, %v1425_v15  ;;  %3149 = vmatmul.bf16.gmra.mxu2 %v13465_v39  ;;  %v13478_v23 = vrot.slane %v2194_v46, 5  ;;  %v13482_v61 = vshll.u32 %v5830_v35, 16  ;;  %v13484_v15 = vrot.slane %v5830_v35, 7 }
 0x1a7   : > { %1715 = vst [vmem:[#allocation1 + $0x22] ss:$4 sm:$0xff] %v13407_v57  ;;  %v16660_v26 = vrot.slane %v13244_v58, 7  ;;  %v16661_v47 = vrot.slane %v12948_v62, 9  ;;  %v1511_v35 = vrot.slane %v12855_v51, 1  ;;  %v2923_v40 = vrot.slane %v2921_v56, 4  ;;  %v1426_v58 = vpop.f32.mrf.mxu3 }
 0x1a8   : > { %1716 = vst [vmem:[#allocation1 + $0x23] ss:$4 sm:$0xff] %v13424_v54  ;;  %v13463_v45 = vld.sshfl [vmem:[#allocation1] sm:$0xff pattern:$0x73625140]  ;;  %v2664_v24 = vunpack.c.l.b16 %v13404_v16  ;;  %v2191_v46 = vor.u32 %v2190_v63, %v2187_v29  ;;  %v1427_v62 = vadd.f32 %v13222_v42, %v1426_v58  ;;  %v2924_v8 = vrot.slane %v1966_v31, 5 }
 0x1a9   : > { %16656 = vst [vmem:[#allocation55_spill] sm:$0xff] %v16655_v48  ;;  %vm7884_vm9 = vsmask.f32 5396  ;;  %vm7886_vm12 = vsmask.f32 6424 }
 0x1aa   : > { %16658 = vst [vmem:[#allocation56_spill] sm:$0xff] %v13465_v39  ;;  %v1802_v29 = vadd.f32 %v13318_v3, %v1427_v62 }
 0x1ab   : > { %1719 = vst [vmem:[#allocation1] ss:$4 sm:$0xff] %v16659_v19  ;;  %v13480_v19 = vrot.slane %v5880_v33, 7  ;;  %v13501_v33 = vsel %vm12410_vm11, %v16661_v47, %v13277_v20  ;;  %v9306_v20 = vrot.slane %v13404_v16, 9  ;;  %v1914_v16 = vld [vmem:[#allocation2 + $0xc8] sm:$0xff] }
 0x1ac   : > { %1720 = vst [vmem:[#allocation1 + $0x1] ss:$4 sm:$0xff] %v13354_v12  ;;  %v13486_v12 = vrot.slane %v6272_v17, 6  ;;  %v2201_v17 = vor.u32 %v2200_v28, %v13478_v23  ;;  %v2192_v28 = vrot.slane %v2191_v46, 4 }
 0x1ad   : > { %1721 = vst [vmem:[#allocation1 + $0x2] ss:$4 sm:$0xff] %v13360_v9  ;;  %v13494_v9 = vsel %vm13446_vm13, %v13290_v21, %v16660_v26  ;;  %v2665_v21 = vunpack.c.l.b16 %v13412_v6  ;;  %v13522_v6 = vrot.slane %v6275_v13, 7  ;;  %v16462_v13 = vperm.slane %v12855_v51, 0  ;;  %3326 = vmatmul.bf16.gmra.mxu3 %v13172_v52 }
 0x1ae   : > { %1722 = vst [vmem:[#allocation1 + $0x3] ss:$4 sm:$0xff] %v13362_v4  ;;  %v13506_v4 = vpack.c.b16 %v2430_v30, %v2429_v2  ;;  %v1513_v30 = vrot.slane %v12855_v51, 3  ;;  %v13536_v26 = vpack.c.bf16 %v1913_v25, %v1913_v25  ;;  %v2922_v3 = vsel %vm12687_vm14, %v9306_v20, %v2921_v56 }
 0x1af   : > { %1877 = vst [vmem:[#allocation2 + $0x109] sm:$0xff] %v1801_v59  ;;  %v13504_v50 = vld.sshfl [vmem:[#allocation1 + $0x20] sm:$0xff pattern:$0x73625140]  ;;  %v16663_v59 = vrot.slane %v13112_v41, 9  ;;  %v2925_v41 = vsel %vm12687_vm14, %v2923_v40, %v2924_v8  ;;  %v13534_v63 = vpack.c.b16 %v2665_v21, %v2664_v24  ;;  %v13545_v40 = vpack.c.bf16 %v1914_v16, %v1914_v16  ;;  %v1429_v20 = vpop.f32.mrf.mxu3 }
 0x1b0   : > { %16662 = vst [vmem:[#allocation57_spill] sm:$0xff] %v13506_v4  ;;  %2567 = vmatmul.bf16.gmra.mxu0 %v13506_v4  ;;  %v13552_v62 = vperm.slane %v1513_v30, 0  ;;  %v2197_v25 = vsel %vm12731_vm4, %v2192_v28, %v13478_v23  ;;  %v1430_v30 = vadd.f32 %v13222_v42, %v1429_v20 }
 0x1b1   : > { %1723 = vst [vmem:[#allocation1 + $0x20] ss:$4 sm:$0xff] %v13380_v34  ;;  %v13520_v2 = vsel %vm12410_vm11, %v16663_v59, %v13309_v1  ;;  %v1512_v34 = vrot.slane %v12855_v51, 2  ;;  %v2204_v1 = vshll.u32 %v1966_v31, 16  ;;  %v2202_v31 = vrot.slane %v2201_v17, 4  ;;  %2805 = vmatmul.bf16.gmra.mxu1 %v13534_v63 }
 0x1b2   : > { %1724 = vst [vmem:[#allocation1 + $0x21] ss:$4 sm:$0xff] %v13400_v18  ;;  %v1514_v18 = vrot.slane %v12855_v51, 4  ;;  %v3013_v17 = vunpack.c.l.b16 %v2922_v3  ;;  %v2209_v59 = vshrl.u32 %v13536_v26, 16 }
 0x1b3   : > { %1725 = vst [vmem:[#allocation1 + $0x22] ss:$4 sm:$0xff] %v13407_v57  ;;  %v13540_v57 = vperm.slane %v1511_v35, 0  ;;  %v13547_v21 = vperm.slane %v1512_v34, 0  ;;  %v3014_v35 = vunpack.c.l.b16 %v2925_v41  ;;  %v2206_v56 = vrot.slane %v2204_v1, 5 }
 0x1b4   : > { %1726 = vst [vmem:[#allocation1 + $0x23] ss:$4 sm:$0xff] %v13424_v54  ;;  %v11824_v54 = vld [vmem:[#allocation3 + $0x81] sm:$0xff]  ;;  %v13554_v8 = vperm.slane %v1514_v18, 0  ;;  %v2212_v34 = vshll.u32 %v13536_v26, 16  ;;  %v2218_v18 = vshll.u32 %v13545_v40, 16 }
 0x1b5   : > { %v13538_v47 = vld.sshfl [vmem:[#allocation1] sm:$0xff pattern:$0x73625140]  ;;  %1878 = vst [vmem:[#allocation2 + $0x111] sm:$0xff] %v1802_v29  ;;  %v1515_v58 = vrot.slane %v11824_v54, 5  ;;  %v1516_v24 = vrot.slane %v11824_v54, 6  ;;  %v2207_v16 = vsel %vm12731_vm4, %v2202_v31, %v2206_v56  ;;  %v13584_v31 = vpack.c.b16 %v3014_v35, %v3013_v17 }
 0x1b6   : > { %1729 = vst [vmem:[#allocation1] ss:$4 sm:$0xff] %v16462_v13  ;;  %v1517_v46 = vrot.slane %v11824_v54, 7  ;;  %v2222_v29 = vshrl.u32 %v13545_v40, 16  ;;  %v16664_v41 = vrot.slane %v13164_v36, 9  ;;  %v16665_v1 = vrot.slane %v13334_v22, 2 }
 0x1b7   : > { %1730 = vst [vmem:[#allocation1 + $0x1] ss:$4 sm:$0xff] %v13540_v57  ;;  %v13582_v3 = vperm.slane %v1515_v58, 0  ;;  %v1915_v54 = vld [vmem:[#allocation2 + $0xd0] sm:$0x3]  ;;  %v5883_v36 = vor.u32 %v13480_v19, %v13475_v43  ;;  %v13590_v20 = vperm.slane %v1516_v24, 0  ;;  %3154 = vmatmul.bf16.gmra.mxu2 %v13584_v31  ;;  %v2431_v58 = vunpack.c.l.b16 %v2197_v25 }
 0x1b8   : > { %1731 = vst [vmem:[#allocation1 + $0x2] ss:$4 sm:$0xff] %v13547_v21  ;;  %v13574_v23 = vsel %vm12410_vm11, %v16664_v41, %v13314_v0  ;;  %v13580_v28 = vsel %vm5809_vm5, %v13334_v22, %v16665_v1  ;;  %v1803_v0 = vadd.f32 %v13358_v11, %v1430_v30  ;;  %v2928_v41 = vrot.slane %v13545_v40, 5  ;;  %v4520_v1 = vld [vmem:[#allocation3 + $0x50] sm:$0xff]  ;;  %v1916_v24 = vld [vmem:[#allocation2 + $0xd8] sm:$0xff] }
 0x1b9   : > { %1732 = vst [vmem:[#allocation1 + $0x3] ss:$4 sm:$0xff] %v13552_v62  ;;  %v2432_v35 = vunpack.c.l.b16 %v2207_v16  ;;  %v2211_v17 = vrot.slane %v2209_v59, 4  ;;  %v2214_v13 = vrot.slane %v2212_v34, 5  ;;  %v13597_v4 = vperm.slane %v1517_v46, 0 }
 0x1ba   : > { %16666 = vst [vmem:[#allocation58_spill] sm:$0xff] %v13580_v28  ;;  %v1969_v43 = vpack.c.bf16 %v1915_v54, %v1915_v54  ;;  %v13599_v19 = vrot.slane %v2218_v18, 5  ;;  %v2224_v11 = vrot.slane %v2222_v29, 4  ;;  %v16668_v30 = vrot.slane %v13272_v49, 7  ;;  %v1431_v54 = vpop.f32.mrf.mxu3  ;;  %v4521_v25 = vld [vmem:[#allocation3 + $0x58] sm:$0x3] }
 0x1bb   : > { %16667 = vst [vmem:[#allocation59_spill] sm:$0xff] %v13584_v31  ;;  %v13586_v56 = vld.sshfl [vmem:[#allocation1 + $0x20] sm:$0xff pattern:$0x73625140]  ;;  %v2667_v59 = vunpack.c.l.b16 %v13545_v40  ;;  %v13611_v46 = vpack.c.bf16 %v4520_v1, %v4520_v1  ;;  %v5888_v34 = vrot.slane %v13482_v61, 7  ;;  %v16670_v16 = vrot.slane %v13376_v7, 9 }
 0x1bc   : > { %1733 = vst [vmem:[#allocation1 + $0x20] ss:$4 sm:$0xff] %v13554_v8  ;;  %v13606_v31 = vsel %vm13446_vm13, %v13421_v32, %v16668_v30  ;;  %v6278_v32 = vor.u32 %v13522_v6, %v13486_v12  ;;  %v2930_v18 = vrot.slane %v2928_v41, 4  ;;  %v13626_v29 = vpack.c.b16 %v2432_v35, %v2431_v58  ;;  %v1917_v1 = vld [vmem:[#allocation2 + $0xe0] sm:$0xff] }
 0x1bd   : > { %1734 = vst [vmem:[#allocation1 + $0x21] ss:$4 sm:$0xff] %v13582_v3  ;;  %v13619_v49 = vsel %vm12410_vm11, %v16670_v16, %v13484_v15  ;;  %v2666_v61 = vunpack.c.l.b16 %v13536_v26  ;;  %v13629_v7 = vpack.c.bf16 %v1916_v24, %v1916_v24  ;;  %v5884_v30 = vrot.slane %v5883_v36, 2  ;;  %3331 = vmatmul.bf16.gmra.mxu3 %v13288_v38 }
 0x1be   : > { %1879 = vst [vmem:[#allocation2 + $0x121] sm:$0xff] %v1803_v0  ;;  %v2215_v0 = vor.u32 %v2214_v13, %v2211_v17  ;;  %v16672_v15 = vperm.slane %v12855_v51, 0  ;;  %v1432_v12 = vadd.f32 %v13222_v42, %v1431_v54  ;;  %v2931_v6 = vrot.slane %v1969_v43, 5  ;;  %v13644_v17 = vpop.f32.mrf.mxu1 }
 0x1bf   : > { %1735 = vst [vmem:[#allocation1 + $0x22] ss:$4 sm:$0xff] %v13590_v20  ;;  %v2225_v16 = vor.u32 %v2224_v11, %v13599_v19  ;;  %v13637_v58 = vpack.c.b16 %v2667_v59, %v2666_v61  ;;  %v9307_v13 = vrot.slane %v13536_v26, 9  ;;  %v4637_v35 = vshrl.u32 %v13611_v46, 16  ;;  %v2538_v59 = vpop.f32.mrf.mxu0 }
 0x1c0   : > { %16669 = vst [vmem:[#allocation60_spill] sm:$0xff] %v13611_v46  ;;  %v13624_v40 = vld.sshfl [vmem:[#allocation1] sm:$0xff pattern:$0x73625140]  ;;  %2572 = vmatmul.bf16.gmra.mxu0 %v13626_v29  ;;  %v4640_v36 = vshll.u32 %v13611_v46, 16  ;;  %v1804_v51 = vadd.f32 %v13398_v14, %v1432_v12  ;;  %v2932_v11 = vsel %vm12687_vm14, %v2930_v18, %v2931_v6  ;;  %v13648_v24 = vpack.c.bf16 %v1917_v1, %v1917_v1  ;;  %v3120_v18 = vpop.f32.mrf.mxu2 }
 0x1c1   : > { %1736 = vst [vmem:[#allocation1 + $0x23] ss:$4 sm:$0xff] %v13597_v4  ;;  %v2929_v26 = vsel %vm12687_vm14, %v9307_v13, %v2928_v41  ;;  %v2216_v54 = vrot.slane %v2215_v0, 4  ;;  %v2233_v61 = vshrl.u32 %v13629_v7, 16  ;;  %v13655_v14 = vrot.slane %v6278_v32, 2  ;;  %2810 = vmatmul.bf16.gmra.mxu1 %v13637_v58 }
 0x1c2   : > { %16671 = vst [vmem:[#allocation61_spill] sm:$0xff] %v13626_v29  ;;  %v13666_v41 = vsel %vm13446_vm13, %v5884_v30, %v5888_v34  ;;  %v3016_v0 = vunpack.c.l.b16 %v2932_v11  ;;  %v4639_v1 = vrot.slane %v4637_v35, 4  ;;  %v4642_v6 = vrot.slane %v4640_v36, 5  ;;  %v1434_v29 = vpop.f32.mrf.mxu3  ;;  %v4522_v35 = vld [vmem:[#allocation3 + $0x60] sm:$0xff] }
 0x1c3   : > { %1739 = vst [vmem:[#allocation1] ss:$4 sm:$0xff] %v16672_v15  ;;  %v16673_v15 = vrot.slane %v13580_v28, 2  ;;  %v3015_v13 = vunpack.c.l.b16 %v2929_v26  ;;  %v2221_v34 = vsel %vm12731_vm4, %v2216_v54, %v13599_v19  ;;  %v2235_v11 = vrot.slane %v2233_v61, 4  ;;  %v1918_v26 = vld [vmem:[#allocation2 + $0xe8] sm:$0x3] }
 0x1c4   : > { %1740 = vst [vmem:[#allocation1 + $0x1] ss:$4 sm:$0xff] %v13540_v57  ;;  %v2228_v57 = vshll.u32 %v1969_v43, 16  ;;  %v2226_v43 = vrot.slane %v2225_v16, 4  ;;  %v2246_v16 = vshrl.u32 %v13648_v24, 16  ;;  %v1435_v36 = vadd.f32 %v13222_v42, %v1434_v29 }
 0x1c5   : > { %1741 = vst [vmem:[#allocation1 + $0x2] ss:$4 sm:$0xff] %v13547_v21  ;;  %v2236_v21 = vshll.u32 %v13629_v7, 16  ;;  %v13659_v12 = vshll.u32 %v16673_v15, 16  ;;  %v13685_v19 = vpack.c.b16 %v3016_v0, %v3015_v13  ;;  %v2935_v54 = vrot.slane %v13648_v24, 5 }
 0x1c6   : > { %1742 = vst [vmem:[#allocation1 + $0x3] ss:$4 sm:$0xff] %v13552_v62  ;;  %v13662_v62 = vpack.c.bf16 %v4521_v25, %v4521_v25  ;;  %v2230_v15 = vrot.slane %v2228_v57, 5  ;;  %v1919_v25 = vld [vmem:[#allocation2 + $0xf0] sm:$0xff]  ;;  %v4523_v29 = vld [vmem:[#allocation3 + $0x68] sm:$0x3]  ;;  %v1805_v0 = vadd.f32 %v13463_v45, %v1435_v36 }
 0x1c7   : > { %1880 = vst [vmem:[#allocation2 + $0x129] sm:$0xff] %v1804_v51  ;;  %v2242_v51 = vshll.u32 %v13648_v24, 16  ;;  %v2238_v39 = vrot.slane %v2236_v21, 5  ;;  %v13688_v61 = vpack.c.bf16 %v1919_v25, %v1919_v25  ;;  %3159 = vmatmul.bf16.gmra.mxu2 %v13685_v19  ;;  %v2540_v13 = vpop.f32.mrf.mxu0  ;;  %v13704_v53 = vpack.c.bf16 %v4523_v29, %v4523_v29 }
 0x1c8   : > { %v13669_v32 = vld.sshfl [vmem:[#allocation1 + $0x20] sm:$0xff pattern:$0x73625140]  ;;  %v2231_v57 = vsel %vm12731_vm4, %v2226_v43, %v2230_v15  ;;  %v4646_v38 = vshll.u32 %v13662_v62, 16  ;;  %16674 = vst [vmem:[#allocation62_spill] sm:$0xff] %v13685_v19  ;;  %v2773_v43 = vpop.f32.mrf.mxu1  ;;  %v2433_v15 = vunpack.c.l.b16 %v2221_v34  ;;  %v2772_v34 = vadd.f32 %v13644_v17, %v2538_v59 }
 0x1c9   : > { %1743 = vst [vmem:[#allocation1 + $0x20] ss:$4 sm:$0xff] %v13554_v8  ;;  %v13693_v30 = vrot.slane %v2242_v51, 5  ;;  %v2248_v8 = vrot.slane %v2246_v16, 4  ;;  %v2434_v25 = vunpack.c.l.b16 %v2231_v57  ;;  %v2774_v51 = vadd.f32 %v2773_v43, %v2540_v13  ;;  %v4524_v16 = vld [vmem:[#allocation3 + $0x70] sm:$0xff] }
 0x1ca   : > { %1744 = vst [vmem:[#allocation1 + $0x21] ss:$4 sm:$0xff] %v13582_v3  ;;  %v4643_v3 = vor.u32 %v4642_v6, %v4639_v1  ;;  %v2239_v1 = vor.u32 %v2238_v39, %v2235_v11  ;;  %v1920_v6 = vld [vmem:[#allocation2 + $0xf8] sm:$0xff]  ;;  %v13702_v52 = vrot.slane %v4646_v38, 5  ;;  %v2937_v45 = vrot.slane %v2935_v54, 4  ;;  %v1436_v29 = vpop.f32.mrf.mxu3 }
 0x1cb   : > { %1745 = vst [vmem:[#allocation1 + $0x22] ss:$4 sm:$0xff] %v13590_v20  ;;  %v13695_v20 = vpack.c.bf16 %v4522_v35, %v4522_v35  ;;  %v4525_v35 = vld [vmem:[#allocation3 + $0x78] sm:$0x3]  ;;  %v2257_v36 = vshrl.u32 %v13688_v61, 16  ;;  %v2260_v39 = vshll.u32 %v13688_v61, 16  ;;  %v13712_v17 = vadd.f32 %v3120_v18, %v2772_v34 }
 0x1cc   : > { %1746 = vst [vmem:[#allocation1 + $0x23] ss:$4 sm:$0xff] %v13597_v4  ;;  %v1972_v4 = vpack.c.bf16 %v1918_v26, %v1918_v26  ;;  %v13709_v11 = vrot.slane %v4643_v3, 4  ;;  %v2249_v59 = vor.u32 %v2248_v8, %v13693_v30  ;;  %v13717_v57 = vpack.c.bf16 %v1920_v6, %v1920_v6 }
 0x1cd   : > { %v13691_v21 = vld.sshfl [vmem:[#allocation1] sm:$0xff pattern:$0x73625140]  ;;  %16675 = vst [vmem:[#allocation63_spill] sm:$0xff] %v13695_v20  ;;  %v13719_v26 = vpack.c.b16 %v2434_v25, %v2433_v15  ;;  %v2669_v43 = vunpack.c.l.b16 %v13648_v24  ;;  %v13722_v19 = vpack.c.bf16 %v4524_v16, %v4524_v16  ;;  %v1437_v3 = vadd.f32 %v13222_v42, %v1436_v29  ;;  %v1921_v16 = vld [vmem:[#allocation2 + $0x100] sm:$0x3]  ;;  %3336 = vmatmul.bf16.gmra.mxu3 %v13402_v27 }
 0x1ce   : > { %5908 = vst [vmem:[#allocation1] ss:$4 sm:$0xff] %v13460_v60  ;;  %v3122_v60 = vpop.f32.mrf.mxu2  ;;  %v2938_v13 = vrot.slane %v1972_v4, 5  ;;  %v2252_v28 = vshll.u32 %v1972_v4, 16  ;;  %v13725_v18 = vpack.c.bf16 %v4525_v35, %v4525_v35  ;;  %v4651_v34 = vshrl.u32 %v13695_v20, 16 }
 0x1cf   : > { %5911 = vst [vmem:[#allocation1 + $0x1] ss:$4 sm:$0xff] %v13494_v9  ;;  %v13714_v38 = vadd.f32 %v3122_v60, %v2774_v51  ;;  %v2240_v15 = vrot.slane %v2239_v1, 4  ;;  %v2262_v25 = vrot.slane %v2260_v39, 5  ;;  %v1806_v24 = vadd.f32 %v13504_v50, %v1437_v3 }
 0x1d0   : > { %5914 = vst [vmem:[#allocation1 + $0x2] ss:$4 sm:$0xff] %v13606_v31  ;;  %2577 = vmatmul.bf16.gmra.mxu0 %v13719_v26  ;;  %v2939_v8 = vsel %vm12687_vm14, %v2937_v45, %v2938_v13  ;;  %v13732_v6 = vpop.f32.mrf.mxu1  ;;  %v2250_v51 = vrot.slane %v2249_v59, 4  ;;  %v2266_v4 = vshll.u32 %v13717_v57, 16  ;;  %v2270_v35 = vshrl.u32 %v13717_v57, 16 }
 0x1d1   : > { %5917 = vst [vmem:[#allocation1 + $0x3] ss:$4 sm:$0xff] %v13666_v41  ;;  %v16680_v60 = vunpack.c.l.b16 %v13629_v7  ;;  %v2942_v45 = vrot.slane %v13717_v57, 5  ;;  %v4654_v50 = vshll.u32 %v13695_v20, 16  ;;  %v2254_v39 = vrot.slane %v2252_v28, 5 }
 0x1d2   : > { %16676 = vst [vmem:[#allocation64_spill] sm:$0xff] %v13712_v17  ;;  %v4649_v59 = vsel %vm12731_vm4, %v13709_v11, %v13702_v52  ;;  %v4660_v3 = vshll.u32 %v13704_v53, 16  ;;  %v2268_v11 = vrot.slane %v2266_v4, 5 }
 0x1d3   : > { %16677 = vst [vmem:[#allocation65_spill] sm:$0xff] %v13714_v38  ;;  %v13738_v29 = vpack.c.b16 %v2669_v43, %v16680_v60  ;;  %v4653_v43 = vrot.slane %v4651_v34, 4  ;;  %v2255_v52 = vsel %vm12731_vm4, %v2250_v51, %v2254_v39  ;;  %v2272_v34 = vrot.slane %v2270_v35, 4  ;;  %v16686_v51 = vld [vmem:[#allocation50_spill] sm:$0xff] }
 0x1d4   : > { %1881 = vst [vmem:[#allocation2 + $0x139] sm:$0xff] %v1805_v0  ;;  %v2259_v0 = vrot.slane %v2257_v36, 4  ;;  %v3018_v36 = vunpack.c.l.b16 %v2939_v8  ;;  %v4526_v8 = vld [vmem:[#allocation3 + $0x80] sm:$0xff]  ;;  %v2670_v60 = vunpack.c.l.b16 %v13688_v61  ;;  %v2436_v4 = vunpack.c.l.b16 %v2255_v52 }
 0x1d5   : > { %16678 = vst [vmem:[#allocation66_spill] sm:$0xff] %v13719_v26  ;;  %v16682_v26 = vrot.slane %v13629_v7, 9  ;;  %2815 = vmatmul.bf16.gmra.mxu1 %v13738_v29  ;;  %v2245_v7 = vsel %vm12731_vm4, %v2240_v15, %v13693_v30  ;;  %v9309_v30 = vrot.slane %v13688_v61, 9  ;;  %v2944_v15 = vrot.slane %v2942_v45, 4  ;;  %v1923_v38 = vld [vmem:[#allocation2 + $0x110] sm:$0xff] }
 0x1d6   : > { %16679 = vst [vmem:[#allocation67_spill] sm:$0xff] %v13722_v19  ;;  %v2671_v35 = vunpack.c.l.b16 %v13717_v57  ;;  %v4668_v52 = vshll.u32 %v13722_v19, 16 }
 0x1d7   : > { %16681 = vst [vmem:[#allocation68_spill] sm:$0xff] %v13738_v29  ;;  %v2936_v1 = vsel %vm12687_vm14, %v16682_v26, %v2935_v54  ;;  %v1975_v54 = vpack.c.bf16 %v1921_v16, %v1921_v16  ;;  %v2263_v26 = vor.u32 %v2262_v25, %v2259_v0  ;;  %v4656_v0 = vrot.slane %v4654_v50, 5 }
 0x1d8   : > { %1882 = vst [vmem:[#allocation2 + $0x141] sm:$0xff] %v1806_v24  ;;  %v13751_v13 = vld.sshfl [vmem:[#allocation1] sm:$0xff pattern:$0x73625140]  ;;  %v3017_v28 = vunpack.c.l.b16 %v2936_v1  ;;  %v1439_v24 = vpop.f32.mrf.mxu3  ;;  %v2435_v16 = vunpack.c.l.b16 %v2245_v7  ;;  %v13768_v1 = vpack.c.bf16 %v4526_v8, %v4526_v8  ;;  %v13773_v27 = vpop.f32.mrf.mxu1  ;;  %v2943_v50 = vsel %vm12687_vm14, %v9309_v30, %v2942_v45 }
 0x1d9   : > { %16683 = vst [vmem:[#allocation69_spill] sm:$0xff] %v13751_v13  ;;  %v1440_v25 = vadd.f32 %v13222_v42, %v1439_v24  ;;  %v2945_v39 = vrot.slane %v1975_v54, 5  ;;  %v2264_v13 = vrot.slane %v2263_v26, 4  ;;  %v2273_v24 = vor.u32 %v2272_v34, %v2268_v11 }
 0x1da   : > { %5982 = vst [vmem:[#allocation1] ss:$4 sm:$0xff] %v12777_v55  ;;  %v13766_v55 = vpack.c.b16 %v3018_v36, %v3017_v28  ;;  %v2276_v36 = vshll.u32 %v1975_v54, 16  ;;  %v4657_v57 = vor.u32 %v4656_v0, %v4653_v43  ;;  %v4665_v26 = vshrl.u32 %v13722_v19, 16  ;;  %v3125_v43 = vpop.f32.mrf.mxu2 }
 0x1db   : > { %5984 = vst [vmem:[#allocation1 + $0x1] ss:$4 sm:$0xff] %v12928_v44  ;;  %v1807_v61 = vadd.f32 %v13538_v47, %v1440_v25  ;;  %v2946_v7 = vsel %vm12687_vm14, %v2944_v15, %v2945_v39  ;;  %v2269_v8 = vsel %vm12731_vm4, %v2264_v13, %v2268_v11  ;;  %v1922_v47 = vld [vmem:[#allocation2 + $0x108] sm:$0xff]  ;;  %v13783_v28 = vunpack.c.l.b16 %v4649_v59  ;;  %v2543_v13 = vpop.f32.mrf.mxu0 }
 0x1dc   : > { %5986 = vst [vmem:[#allocation1 + $0x2] ss:$4 sm:$0xff] %v12969_v37  ;;  %3164 = vmatmul.bf16.gmra.mxu2 %v13766_v55  ;;  %v5160_v45 = vshrl.u32 %v13768_v1, 16  ;;  %v5163_v54 = vshll.u32 %v13768_v1, 16  ;;  %v13788_v34 = vpack.c.b16 %v2436_v4, %v2435_v16  ;;  %v13790_v30 = vpack.c.b16 %v2671_v35, %v2670_v60  ;;  %v4527_v4 = vld [vmem:[#allocation3 + $0x88] sm:$0x3] }
 0x1dd   : > { %16684 = vst [vmem:[#allocation70_spill] sm:$0xff] %v13766_v55  ;;  %v3019_v15 = vunpack.c.l.b16 %v2943_v50  ;;  %v4662_v25 = vrot.slane %v4660_v3, 5  ;;  %v3020_v11 = vunpack.c.l.b16 %v2946_v7  ;;  %v2274_v0 = vrot.slane %v2273_v24, 4  ;;  %3341 = vmatmul.bf16.gmra.mxu3 %v13534_v63  ;;  %v16759_v48 = vld [vmem:[#allocation66_spill] sm:$0xff] }
 0x1de   : > { %16685 = vst [vmem:[#allocation71_spill] sm:$0xff] %v13768_v1  ;;  %v2278_v39 = vrot.slane %v2276_v36, 5  ;;  %v2777_v59 = vadd.f32 %v13732_v6, %v2543_v13  ;;  %v13795_v17 = vpack.c.bf16 %v1922_v47, %v1922_v47  ;;  %v4658_v29 = vrot.slane %v4657_v57, 4  ;;  %v4528_v13 = vld [vmem:[#allocation3 + $0x90] sm:$0xff] }
 0x1df   : > { %5988 = vst [vmem:[#allocation1 + $0x3] ss:$4 sm:$0xff] %v16686_v51  ;;  %v4667_v16 = vrot.slane %v4665_v26, 4  ;;  %v4670_v35 = vrot.slane %v4668_v52, 5  ;;  %v5162_v50 = vrot.slane %v5160_v45, 4  ;;  %v5165_v7 = vrot.slane %v5163_v54, 5 }
 0x1e0   : > { %1883 = vst [vmem:[#allocation2 + $0x151] sm:$0xff] %v1807_v61  ;;  %v13792_v61 = vunpack.c.l.b16 %v2269_v8  ;;  %v1441_v55 = vpop.f32.mrf.mxu3  ;;  %v13801_v24 = vadd.f32 %v3125_v43, %v2777_v59  ;;  %2582 = vmatmul.bf16.gmra.mxu0 %v13788_v34  ;;  %v4674_v6 = vshll.u32 %v13725_v18, 16  ;;  %v9739_v36 = vrot.slane %v13695_v20, 9 }
 0x1e1   : > { %16687 = vst [vmem:[#allocation50_spill] sm:$0xff] %v13783_v28  ;;  %v1442_v3 = vadd.f32 %v13222_v42, %v1441_v55  ;;  %v4923_v8 = vrot.slane %v13704_v53, 5  ;;  %v13809_v42 = vpop.f32.mrf.mxu1  ;;  %v2279_v55 = vsel %vm12731_vm4, %v2274_v0, %v2278_v39  ;;  %v13815_v26 = vpack.c.bf16 %v4527_v4, %v4527_v4 }
 0x1e2   : > { %v13818_v47 = vpack.c.b16 %v3020_v11, %v3019_v15  ;;  %v4663_v53 = vsel %vm12731_vm4, %v4658_v29, %v4662_v25  ;;  %v9738_v52 = vrot.slane %v13611_v46, 9  ;;  %v4671_v54 = vor.u32 %v4670_v35, %v4667_v16  ;;  %v11429_v15 = vld [vmem:[%s16604_s11 + $0x138] sm:$0xff]  ;;  %v3127_v16 = vpop.f32.mrf.mxu2  ;;  %v4529_v46 = vld [vmem:[#allocation3 + $0x98] sm:$0x3] }
 0x1e3   : > { %v1808_v57 = vadd.f32 %v13586_v56, %v1442_v3  ;;  %v4919_v56 = vrot.slane %v13662_v62, 5  ;;  %v5166_v43 = vor.u32 %v5165_v7, %v5162_v50  ;;  %v11437_v29 = vld [vmem:[%s16604_s11 + $0x178] sm:$0xff]  ;;  %v2438_v25 = vunpack.c.l.b16 %v2279_v55  ;;  %v2545_v59 = vpop.f32.mrf.mxu0  ;;  %3517 = vmatpush.bf16.msra.mxu0 %v11429_v15  ;;  %v11428_v7 = vld [vmem:[%s16604_s11 + $0x130] sm:$0xff] }
 0x1e4   : > { %16689 = vst [vmem:[#allocation73_spill] sm:$0xff] %v13818_v47  ;;  %v11445_v62 = vld [vmem:[%s16604_s11 + $0x1b8] sm:$0xff]  ;;  %v2284_v11 = vshll.u32 %v13795_v17, 16  ;;  %v4924_v0 = vsel %vm12687_vm14, %v9739_v36, %v4923_v8  ;;  %v9740_v39 = vrot.slane %v13722_v19, 9  ;;  %v13843_v3 = vrot.slane %v4674_v6, 5  ;;  %3715 = vmatpush.bf16.msra.mxu1 %v11437_v29  ;;  %v11436_v36 = vld [vmem:[%s16604_s11 + $0x170] sm:$0xff] }
 0x1e5   : > { %1884 = vst [vmem:[#allocation2 + $0x159] sm:$0xff] %v1808_v57  ;;  %2820 = vmatmul.bf16.gmra.mxu1 %v13790_v30  ;;  %v13845_v35 = vunpack.c.l.b16 %v4663_v53  ;;  %v5169_v50 = vshll.u32 %v13815_v26, 16  ;;  %v2779_v8 = vadd.f32 %v13773_v27, %v2545_v59  ;;  %v13858_v55 = vsel %vm12687_vm14, %v9738_v52, %v4919_v56  ;;  %3907 = vmatpush.bf16.msra.mxu2 %v11445_v62  ;;  %v11444_v15 = vld [vmem:[%s16604_s11 + $0x1b0] sm:$0xff]  ;;  %v13867_v29 = vld [vmem:[%s16606_s8] ss:$0 sm:$0xff] }
 0x1e6   : > { %v13797_v60 = vld.sshfl [vmem:[#allocation1] sm:$0xff pattern:$0x73625140]  ;;  %16691 = vst [vmem:[#allocation75_spill] sm:$0xff] %v13858_v55  ;;  %v4927_v53 = vrot.slane %v13725_v18, 5  ;;  %v13870_v45 = vpack.c.bf16 %v4528_v13, %v4528_v13  ;;  %v5167_v52 = vrot.slane %v5166_v43, 4  ;;  %v16493_v13 = vunpack.c.l.b16 %v13768_v1 }
 0x1e7   : > { %16688 = vst [vmem:[#allocation72_spill] sm:$0xff] %v13797_v60  ;;  %v1924_v59 = vld [vmem:[#allocation2 + $0x118] sm:$0x3]  ;;  %v13872_v56 = vadd.f32 %v3127_v16, %v2779_v8  ;;  %v4952_v60 = vunpack.c.l.b16 %v4924_v0  ;;  %3518 = vmatpush.bf16.msra.mxu0 %v11428_v7  ;;  %v11435_v0 = vld [vmem:[%s16604_s11 + $0x168] sm:$0xff]  ;;  %v13929_v18 = vrot.slane %v2284_v11, 5 }
 0x1e8   : > { %6098 = vst [vmem:[#allocation1] ss:$4 sm:$0xff] %v13501_v33  ;;  %v13813_v33 = vpack.c.bf16 %v1923_v38, %v1923_v38  ;;  %v1444_v57 = vpop.f32.mrf.mxu3  ;;  %v4672_v38 = vrot.slane %v4671_v54, 4  ;;  %v13877_v62 = vsel %vm12687_vm14, %v9740_v39, %v4927_v53  ;;  %v5171_v54 = vrot.slane %v5169_v50, 5  ;;  %3716 = vmatpush.bf16.msra.mxu1 %v11436_v36  ;;  %v11427_v39 = vld [vmem:[%s16604_s11 + $0x128] sm:$0xff]  ;;  %v11434_v11 = vld [vmem:[%s16604_s11 + $0x160] sm:$0xff] }
 0x1e9   : > { %6101 = vst [vmem:[#allocation1 + $0x1] ss:$4 sm:$0xff] %v13520_v2  ;;  %v1445_v27 = vadd.f32 %v13867_v29, %v1444_v57  ;;  %v13879_v20 = vpop.f32.mrf.mxu1  ;;  %v16491_v57 = vunpack.c.l.b16 %v13858_v55  ;;  %v13893_v16 = vpack.c.bf16 %v1924_v59, %v1924_v59  ;;  %v16492_v50 = vunpack.c.l.b16 %v13877_v62  ;;  %3908 = vmatpush.bf16.msra.mxu2 %v11444_v15  ;;  %v11443_v7 = vld [vmem:[%s16604_s11 + $0x1a8] sm:$0xff] }
 0x1ea   : > { %6104 = vst [vmem:[#allocation1 + $0x2] ss:$4 sm:$0xff] %v13574_v23  ;;  %v2290_v4 = vshll.u32 %v13813_v33, 16  ;;  %v2294_v6 = vshrl.u32 %v13813_v33, 16  ;;  %v5172_v53 = vsel %vm12731_vm4, %v5167_v52, %v5171_v54  ;;  %v5418_v59 = vunpack.c.l.b16 %v13870_v45  ;;  %v3130_v54 = vpop.f32.mrf.mxu2 }
 0x1eb   : > { %6107 = vst [vmem:[#allocation1 + $0x3] ss:$4 sm:$0xff] %v13619_v49  ;;  %v1809_v36 = vadd.f32 %v13624_v40, %v1445_v27  ;;  %v16695_v15 = vshrl.u32 %v13795_v17, 16  ;;  %v13921_v40 = vpack.c.bf16 %v4529_v46, %v4529_v46  ;;  %v13925_v27 = vpack.c.b16 %v16492_v50, %v4952_v60  ;;  %v2548_v52 = vpop.f32.mrf.mxu0  ;;  %3519 = vmatpush.bf16.msra.mxu0 %v11427_v39  ;;  %v11442_v39 = vld [vmem:[%s16604_s11 + $0x1a0] sm:$0xff] }
 0x1ec   : > { %16690 = vst [vmem:[#allocation74_spill] sm:$0xff] %v13845_v35  ;;  %v13881_v19 = vrot.slane %v2290_v4, 5  ;;  %v13895_v4 = vrot.slane %v2294_v6, 4  ;;  %v13909_v6 = vpack.c.b16 %v4952_v60, %v16491_v57  ;;  %3169 = vmatmul.bf16.gmra.mxu2 %v13818_v47  ;;  %v2673_v57 = vunpack.c.l.b16 %v13813_v33  ;;  %3717 = vmatpush.bf16.msra.mxu1 %v11435_v0  ;;  %v11426_v60 = vld [vmem:[%s16604_s11 + $0x120] sm:$0xff]  ;;  %v16719_v35 = vld [vmem:[#allocation65_spill] sm:$0xff] }
 0x1ed   : > { %16692 = vst [vmem:[#allocation76_spill] sm:$0xff] %v13870_v45  ;;  %v13919_v8 = vrot.slane %v16695_v15, 4  ;;  %v13936_v46 = vpack.c.b16 %v5418_v59, %v16493_v13  ;;  %v2782_v15 = vadd.f32 %v13809_v42, %v2548_v52  ;;  %v5287_v59 = vrot.slane %v13815_v26, 5  ;;  %3909 = vmatpush.bf16.msra.mxu2 %v11443_v7  ;;  %3346 = vmatmul.bf16.gmra.mxu3 %v13637_v58 }
 0x1ee   : > { %16694 = vst [vmem:[#allocation78_spill] sm:$0xff] %v13909_v6  ;;  %v16700_v13 = vrot.slane %v13813_v33, 5  ;;  %v2297_v42 = vor.u32 %v13895_v4, %v13881_v19  ;;  %v10030_v7 = vrot.slane %v13870_v45, 9  ;;  %v2952_v4 = vrot.slane %v13893_v16, 5 }
 0x1ef   : > { %16696 = vst [vmem:[#allocation79_spill] sm:$0xff] %v13921_v40  ;;  %v13959_v52 = vadd.f32 %v3130_v54, %v2782_v15  ;;  %3520 = vmatpush.bf16.msra.mxu0 %v11426_v60  ;;  %v11425_v54 = vld [vmem:[%s16604_s11 + $0x118] sm:$0xff]  ;;  %v9310_v15 = vrot.slane %v13795_v17, 9 }
 0x1f0   : > { %16697 = vst [vmem:[#allocation80_spill] sm:$0xff] %v13925_v27  ;;  %v1446_v50 = vpop.f32.mrf.mxu3  ;;  %3718 = vmatpush.bf16.msra.mxu1 %v11434_v11  ;;  %v11441_v60 = vld [vmem:[%s16604_s11 + $0x198] sm:$0xff]  ;;  %v2298_v11 = vrot.slane %v2297_v42, 4  ;;  %v16705_v42 = vunpack.c.l.b16 %v13877_v62  ;;  %v11424_v62 = vld [vmem:[%s16604_s11 + $0x110] sm:$0xff] }
 0x1f1   : > { %16698 = vst [vmem:[#allocation81_spill] sm:$0xff] %v13936_v46  ;;  %v1447_v0 = vadd.f32 %v13867_v29, %v1446_v50  ;;  %v2951_v46 = vrot.slane %v16700_v13, 4  ;;  %v6283_v50 = vrot.slane %v13659_v12, 7  ;;  %v13968_v13 = vpop.f32.mrf.mxu1  ;;  %v16702_v12 = vunpack.c.l.b16 %v13795_v17  ;;  %3910 = vmatpush.bf16.msra.mxu2 %v11442_v39 }
 0x1f2   : > { %v13885_v43 = vld.sshfl [vmem:[#allocation1] sm:$0xff pattern:$0x73625140]  ;;  %1885 = vst [vmem:[#allocation2 + $0x169] sm:$0xff] %v1809_v36  ;;  %v5628_v36 = vrot.slane %v13921_v40, 5  ;;  %v2287_v17 = vor.u32 %v13929_v18, %v13919_v8 }
 0x1f3   : > { %16693 = vst [vmem:[#allocation77_spill] sm:$0xff] %v13885_v43  ;;  %v1810_v6 = vadd.f32 %v13669_v32, %v1447_v0  ;;  %v1925_v43 = vld [vmem:[#allocation2 + $0x120] sm:$0xff]  ;;  %v13981_v32 = vpack.c.b16 %v2673_v57, %v16702_v12  ;;  %v2953_v57 = vsel %vm12687_vm14, %v2951_v46, %v2952_v4  ;;  %v2550_v46 = vpop.f32.mrf.mxu0  ;;  %v3132_v4 = vpop.f32.mrf.mxu2  ;;  %3521 = vmatpush.bf16.msra.mxu0 %v11425_v54  ;;  %v11440_v54 = vld [vmem:[%s16604_s11 + $0x190] sm:$0xff] }
 0x1f4   : > { %6191 = vst [vmem:[#allocation1] ss:$4 sm:$0xff] %v12928_v44  ;;  %v13915_v44 = vpack.c.b16 %v2438_v25, %v13792_v61  ;;  %v1926_v61 = vld [vmem:[#allocation2 + $0x128] sm:$0xff]  ;;  %v4677_v25 = vsel %vm12731_vm4, %v4672_v38, %v13843_v3  ;;  %v13946_v38 = vunpack.c.l.b16 %v5172_v53  ;;  %v9885_v3 = vrot.slane %v13768_v1, 9 }
 0x1f5   : > { %6193 = vst [vmem:[#allocation1 + $0x1] ss:$4 sm:$0xff] %v12969_v37  ;;  %v2300_v53 = vshll.u32 %v13893_v16, 16  ;;  %v13962_v26 = vunpack.c.l.b16 %v4677_v25  ;;  %v13971_v1 = vpack.c.bf16 %v1926_v61, %v1926_v61  ;;  %v11433_v25 = vld [vmem:[%s16604_s11 + $0x158] sm:$0xff]  ;;  %2825 = vmatmul.bf16.gmra.mxu1 %v13981_v32  ;;  %v14001_v39 = vpack.c.bf16 %v1925_v43, %v1925_v43  ;;  %3911 = vmatpush.bf16.msra.mxu2 %v11441_v60 }
 0x1f6   : > { %6195 = vst [vmem:[#allocation1 + $0x2] ss:$4 sm:$0xff] %v16686_v51  ;;  %2587 = vmatmul.bf16.gmra.mxu0 %v13915_v44  ;;  %v5288_v61 = vsel %vm12687_vm14, %v9885_v3, %v5287_v59  ;;  %v16703_v3 = vrot.slane %v13813_v33, 5  ;;  %v5629_v12 = vsel %vm12687_vm14, %v10030_v7, %v5628_v36  ;;  %v14016_v43 = vsel %vm13446_vm13, %v13655_v14, %v6283_v50 }
 0x1f7   : > { %6198 = vst [vmem:[#allocation1 + $0x3] ss:$4 sm:$0xff] %v13334_v22  ;;  %v5306_v0 = vunpack.c.l.b16 %v5288_v61  ;;  %v2302_v59 = vrot.slane %v2300_v53, 5  ;;  %v2314_v18 = vshll.u32 %v13971_v1, 16  ;;  %v2318_v8 = vshrl.u32 %v13971_v1, 16  ;;  %3719 = vmatpush.bf16.msra.mxu1 %v11433_v25  ;;  %3522 = vmatpush.bf16.msra.mxu0 %v11424_v62 }
 0x1f8   : > { %16699 = vst [vmem:[#allocation82_spill] sm:$0xff] %v13946_v38  ;;  %v5647_v61 = vunpack.c.l.b16 %v5629_v12  ;;  %v2784_v53 = vadd.f32 %v13879_v20, %v2550_v46  ;;  %v1449_v7 = vpop.f32.mrf.mxu3  ;;  %v3022_v36 = vunpack.c.l.b16 %v2953_v57  ;;  %v2288_v50 = vrot.slane %v2287_v17, 4  ;;  %v1927_v57 = vld [vmem:[#allocation2 + $0x130] sm:$0x3] }
 0x1f9   : > { %16701 = vst [vmem:[#allocation83_spill] sm:$0xff] %v13962_v26  ;;  %v14011_v33 = vpack.c.b16 %v5306_v0, %v16705_v42  ;;  %v1450_v14 = vadd.f32 %v13867_v29, %v1449_v7  ;;  %v2303_v20 = vsel %vm12731_vm4, %v2298_v11, %v2302_v59  ;;  %v2308_v60 = vshll.u32 %v14001_v39, 16  ;;  %v14042_v11 = vpop.f32.mrf.mxu1  ;;  %3912 = vmatpush.bf16.msra.mxu2 %v11440_v54 }
 0x1fa   : > { %1886 = vst [vmem:[#allocation2 + $0x171] sm:$0xff] %v1810_v6  ;;  %v2950_v6 = vsel %vm12687_vm14, %v9310_v15, %v16703_v3  ;;  %v11432_v15 = vld [vmem:[%s16604_s11 + $0x150] sm:$0xff]  ;;  %v14034_v25 = vadd.f32 %v3132_v4, %v2784_v53  ;;  %v2305_v3 = vshrl.u32 %v14001_v39, 16  ;;  %v14038_v12 = vpack.c.b16 %v5647_v61, %v5306_v0 }
 0x1fb   : > { %16706 = vst [vmem:[#allocation85_spill] sm:$0xff] %v14011_v33  ;;  %v1811_v17 = vadd.f32 %v13691_v21, %v1450_v14  ;;  %v14047_v59 = vrot.slane %v2314_v18, 5  ;;  %v2320_v46 = vrot.slane %v2318_v8, 4  ;;  %v2440_v42 = vunpack.c.l.b16 %v2303_v20  ;;  %3720 = vmatpush.bf16.msra.mxu1 %v11432_v15  ;;  %v2553_v14 = vpop.f32.mrf.mxu0  ;;  %v16710_v20 = vld [vmem:[#allocation58_spill] sm:$0xff] }
 0x1fc   : > { %16707 = vst [vmem:[#allocation86_spill] sm:$0xff] %v14038_v12  ;;  %v2956_v0 = vrot.slane %v13971_v1, 5  ;;  %v1981_v61 = vpack.c.bf16 %v1927_v57, %v1927_v57  ;;  %v2307_v53 = vrot.slane %v2305_v3, 4  ;;  %v2310_v7 = vrot.slane %v2308_v60, 5 }
 0x1fd   : > { %1887 = vst [vmem:[#allocation2 + $0x181] sm:$0xff] %v1811_v17  ;;  %v2321_v18 = vor.u32 %v2320_v46, %v14047_v59  ;;  %v2787_v8 = vadd.f32 %v13968_v13, %v2553_v14  ;;  %v2675_v15 = vunpack.c.l.b16 %v13971_v1  ;;  %v16711_v54 = vrot.slane %v16710_v20, 2  ;;  %v1748_v3 = vld.sshfl [vmem:[#allocation1 + $0x20] sm:$0xff pattern:$0x73625140]  ;;  %v16713_v14 = vld [vmem:[#allocation54_spill] sm:$0xff] }
 0x1fe   : > { %v14005_v16 = vld.sshfl [vmem:[#allocation1] sm:$0xff pattern:$0x73625140]  ;;  %v2324_v60 = vshll.u32 %v1981_v61, 16  ;;  %v2674_v13 = vunpack.c.l.b16 %v14001_v39  ;;  %v2311_v1 = vor.u32 %v2310_v7, %v2307_v53  ;;  %v9311_v53 = vrot.slane %v14001_v39, 9 }
 0x1ff   : > { %16704 = vst [vmem:[#allocation84_spill] sm:$0xff] %v14005_v16  ;;  %v6379_v57 = vrot.slane %v16711_v54, 7  ;;  %v2322_v20 = vrot.slane %v2321_v18, 4  ;;  %v16715_v18 = vld [vmem:[#allocation68_spill] sm:$0xff] }
 0x200   : > { %6302 = vst [vmem:[#allocation1] ss:$4 sm:$0xff] %v13494_v9  ;;  %v3021_v9 = vunpack.c.l.b16 %v2950_v6  ;;  %v2293_v6 = vsel %vm12731_vm4, %v2288_v50, %v13881_v19  ;;  %v3135_v19 = vpop.f32.mrf.mxu2  ;;  %v1451_v62 = vpop.f32.mrf.mxu3  ;;  %v1928_v50 = vld [vmem:[#allocation2 + $0x138] sm:$0xff]  ;;  %3351 = vmatmul.bf16.gmra.mxu3 %v16715_v18  ;;  %v2957_v39 = vsel %vm12687_vm14, %v9311_v53, %v2956_v0 }
 0x201   : > { %6304 = vst [vmem:[#allocation1 + $0x1] ss:$4 sm:$0xff] %v13606_v31  ;;  %v2439_v21 = vunpack.c.l.b16 %v2293_v6  ;;  %v1452_v17 = vadd.f32 %v13867_v29, %v1451_v62  ;;  %v1929_v6 = vld [vmem:[#allocation2 + $0x140] sm:$0xff]  ;;  %v14063_v46 = vadd.f32 %v3135_v19, %v2787_v8  ;;  %v10307_v62 = vrot.slane %v16713_v14, 9  ;;  %v14075_v8 = vpop.f32.mrf.mxu1 }
 0x202   : > { %6306 = vst [vmem:[#allocation1 + $0x2] ss:$4 sm:$0xff] %v13666_v41  ;;  %v14049_v4 = vpack.c.b16 %v3022_v36, %v3021_v9  ;;  %v2958_v9 = vrot.slane %v2956_v0, 4  ;;  %v11431_v29 = vld [vmem:[%s16604_s11 + $0x148] sm:$0xff]  ;;  %v14077_v54 = vpack.c.bf16 %v1928_v50, %v1928_v50  ;;  %v2326_v50 = vrot.slane %v2324_v60, 5 }
 0x203   : > { %6309 = vst [vmem:[#allocation1 + $0x3] ss:$4 sm:$0xff] %v14016_v43  ;;  %v14055_v36 = vpack.c.b16 %v2440_v42, %v2439_v21  ;;  %v2959_v42 = vrot.slane %v1981_v61, 5  ;;  %v11423_v21 = vld [vmem:[%s16604_s11 + $0x108] sm:$0xff]  ;;  %v1812_v19 = vadd.f32 %v1748_v3, %v1452_v17  ;;  %v14080_v61 = vpack.c.b16 %v2675_v15, %v2674_v13  ;;  %3721 = vmatpush.bf16.msra.mxu1 %v11431_v29 }
 0x204   : > { %16708 = vst [vmem:[#allocation87_spill] sm:$0xff] %v14049_v4  ;;  %3174 = vmatmul.bf16.gmra.mxu2 %v14049_v4  ;;  %3523 = vmatpush.bf16.msra.mxu0 %v11423_v21  ;;  %v1937_v14 = vld [vmem:[#allocation2 + $0x180] sm:$0xff]  ;;  %v14091_v17 = vpack.c.bf16 %v1929_v6, %v1929_v6  ;;  %v2329_v60 = vshrl.u32 %v14077_v54, 16  ;;  %v2332_v6 = vshll.u32 %v14077_v54, 16  ;;  %v2676_v55 = vunpack.c.l.b16 %v14077_v54 }
 0x205   : > { %16709 = vst [vmem:[#allocation88_spill] sm:$0xff] %v14055_v36  ;;  %v2960_v7 = vsel %vm12687_vm14, %v2958_v9, %v2959_v42  ;;  %v14093_v15 = vpack.c.bf16 %v1937_v14, %v1937_v14  ;;  %2830 = vmatmul.bf16.gmra.mxu1 %v14080_v61  ;;  %v2312_v9 = vrot.slane %v2311_v1, 4  ;;  %v2327_v42 = vsel %vm12731_vm4, %v2322_v20, %v2326_v50 }
 0x206   : > { %2592 = vmatmul.bf16.gmra.mxu0 %v14055_v36  ;;  %1888 = vst [vmem:[#allocation2 + $0x189] sm:$0xff] %v1812_v19  ;;  %v3024_v13 = vunpack.c.l.b16 %v2960_v7  ;;  %v16716_v19 = vld [vmem:[#allocation64_spill] sm:$0xff]  ;;  %v1930_v7 = vld [vmem:[#allocation2 + $0x148] sm:$0x3]  ;;  %v2338_v20 = vshll.u32 %v14091_v17, 16  ;;  %v2342_v14 = vshrl.u32 %v14091_v17, 16 }
 0x207   : > { %v3425_v0 = vshrl.u32 %v14093_v15, 16  ;;  %v3428_v1 = vshll.u32 %v14093_v15, 16  ;;  %v2963_v33 = vrot.slane %v14091_v17, 5  ;;  %v1984_v38 = vpack.c.bf16 %v1930_v7, %v1930_v7 }
 0x208   : > { %v3137_v3 = vpop.f32.mrf.mxu2  ;;  %v3312_v29 = vpop.f32.mrf.mxu3 }
 0x209   : > { %v14110_v53 = vadd.f32 %v3312_v29, %v16716_v19  ;;  %v2331_v29 = vrot.slane %v2329_v60, 4  ;;  %v2334_v19 = vrot.slane %v2332_v6, 5  ;;  %v3427_v40 = vrot.slane %v3425_v0, 4 }
 0x20a   : > { %v14061_v16 = vld.sshfl [vmem:[#allocation1] sm:$0xff pattern:$0x73625140]  ;;  %v9312_v60 = vrot.slane %v14077_v54, 9 }
 0x20b   : > { %16712 = vst [vmem:[#allocation58_spill] sm:$0xff] %v14061_v16  ;;  %v2335_v0 = vor.u32 %v2334_v19, %v2331_v29 }
 0x20c   : > { %6398 = vst [vmem:[#allocation1] ss:$4 sm:$0xff] %v13520_v2  ;;  %v14087_v2 = vsel %vm12410_vm11, %v10307_v62, %v6379_v57  ;;  %v2555_v57 = vpop.f32.mrf.mxu0  ;;  %v2317_v62 = vsel %vm12731_vm4, %v2312_v9, %v14047_v59  ;;  %v11453_v59 = vld [vmem:[%s16604_s11 + $0x1f8] sm:$0xff]  ;;  %v14119_v9 = vpop.f32.mrf.mxu1 }
 0x20d   : > { %6400 = vst [vmem:[#allocation1 + $0x1] ss:$4 sm:$0xff] %v13574_v23  ;;  %v2789_v21 = vadd.f32 %v14042_v11, %v2555_v57  ;;  %v3023_v11 = vunpack.c.l.b16 %v2957_v39  ;;  %v2442_v57 = vunpack.c.l.b16 %v2327_v42  ;;  %v2441_v12 = vunpack.c.l.b16 %v2317_v62  ;;  %4121 = vmatpush.bf16.msra.mxu3 %v11453_v59  ;;  %v1938_v6 = vld [vmem:[#allocation2 + $0x188] sm:$0xff] }
 0x20e   : > { %6402 = vst [vmem:[#allocation1 + $0x2] ss:$4 sm:$0xff] %v13619_v49  ;;  %v2344_v39 = vrot.slane %v2342_v14, 4  ;;  %v2677_v62 = vunpack.c.l.b16 %v14091_v17  ;;  %v2965_v59 = vrot.slane %v2963_v33, 4  ;;  %v9459_v17 = vrot.slane %v14093_v15, 9 }
 0x20f   : > { %6405 = vst [vmem:[#allocation1 + $0x3] ss:$4 sm:$0xff] %v14087_v2  ;;  %v14114_v50 = vadd.f32 %v3137_v3, %v2789_v21  ;;  %v14122_v27 = vpack.c.b16 %v3024_v13, %v3023_v11  ;;  %v3430_v3 = vrot.slane %v3428_v1, 5  ;;  %v14124_v21 = vrot.slane %v2338_v20, 5  ;;  %v1939_v13 = vld [vmem:[#allocation2 + $0x190] sm:$0x3] }
 0x210   : > { %v14127_v42 = vpack.c.b16 %v2442_v57, %v2441_v12  ;;  %v3140_v7 = vpop.f32.mrf.mxu2  ;;  %v14132_v1 = vpack.c.bf16 %v1938_v6, %v1938_v6  ;;  %v1993_v20 = vpack.c.bf16 %v1939_v13, %v1939_v13  ;;  %v3314_v45 = vpop.f32.mrf.mxu3  ;;  %v2966_v12 = vrot.slane %v1984_v38, 5  ;;  %v1931_v6 = vld [vmem:[#allocation2 + $0x150] sm:$0xff]  ;;  %3356 = vmatmul.bf16.gmra.mxu3 %v13790_v30 }
 0x211   : > { %16717 = vst [vmem:[#allocation54_spill] sm:$0xff] %v14122_v27  ;;  %v2348_v57 = vshll.u32 %v1984_v38, 16  ;;  %v3431_v26 = vor.u32 %v3430_v3, %v3427_v40  ;;  %v14136_v28 = vadd.f32 %v3314_v45, %v16719_v35  ;;  %v2345_v54 = vor.u32 %v2344_v39, %v14124_v21 }
 0x212   : > { %16718 = vst [vmem:[#allocation68_spill] sm:$0xff] %v14127_v42  ;;  %v14144_v29 = vpack.c.b16 %v2677_v62, %v2676_v55  ;;  %v3434_v19 = vshll.u32 %v14132_v1, 16  ;;  %v3438_v40 = vshrl.u32 %v14132_v1, 16  ;;  %v2967_v45 = vsel %vm12687_vm14, %v2965_v59, %v2966_v12 }
 0x213   : > { %v3644_v39 = vrot.slane %v1993_v20, 5  ;;  %v3432_v13 = vrot.slane %v3431_v26, 4  ;;  %v3444_v55 = vshll.u32 %v1993_v20, 16  ;;  %v2336_v62 = vrot.slane %v2335_v0, 4 }
 0x214   : > { %3179 = vmatmul.bf16.gmra.mxu2 %v14122_v27  ;;  %v2558_v11 = vpop.f32.mrf.mxu0  ;;  %v3641_v27 = vrot.slane %v14132_v1, 5  ;;  %v2796_v38 = vpop.f32.mrf.mxu1  ;;  %v2964_v20 = vsel %vm12687_vm14, %v9312_v60, %v2963_v33  ;;  %v3026_v0 = vunpack.c.l.b16 %v2967_v45 }
 0x215   : > { %v2792_v14 = vadd.f32 %v14075_v8, %v2558_v11  ;;  %v1932_v8 = vld [vmem:[#allocation2 + $0x158] sm:$0xff]  ;;  %v3436_v11 = vrot.slane %v3434_v19, 5  ;;  %2835 = vmatmul.bf16.gmra.mxu1 %v14144_v29  ;;  %v3025_v45 = vunpack.c.l.b16 %v2964_v20 }
 0x216   : > { %2597 = vmatmul.bf16.gmra.mxu0 %v14127_v42  ;;  %v3642_v35 = vsel %vm12687_vm14, %v9459_v17, %v3641_v27  ;;  %v3643_v3 = vrot.slane %v3641_v27, 4  ;;  %v14153_v42 = vpack.c.bf16 %v1932_v8, %v1932_v8  ;;  %v14162_v8 = vpack.c.bf16 %v1931_v6, %v1931_v6 }
 0x217   : > { %v14141_v36 = vadd.f32 %v3140_v7, %v2792_v14  ;;  %v3440_v7 = vrot.slane %v3438_v40, 4  ;;  %v2346_v14 = vrot.slane %v2345_v54, 4  ;;  %v3663_v59 = vunpack.c.l.b16 %v3642_v35 }
 0x218   : > { %v3645_v4 = vsel %vm12687_vm14, %v3643_v3, %v3644_v39  ;;  %v3437_v27 = vsel %vm12731_vm4, %v3432_v13, %v3436_v11  ;;  %v3142_v19 = vpop.f32.mrf.mxu2  ;;  %v2350_v54 = vrot.slane %v2348_v57, 5  ;;  %v3317_v3 = vpop.f32.mrf.mxu3  ;;  %v3446_v13 = vrot.slane %v3444_v55, 5 }
 0x219   : > { %v3664_v12 = vunpack.c.l.b16 %v3645_v4  ;;  %v3441_v26 = vor.u32 %v3440_v7, %v3436_v11  ;;  %v11439_v4 = vld [vmem:[%s16604_s11 + $0x188] sm:$0xff]  ;;  %v14171_v11 = vadd.f32 %v3317_v3, %v13801_v24  ;;  %v2362_v60 = vshll.u32 %v14153_v42, 16 }
 0x21a   : > { %v2351_v33 = vsel %vm12731_vm4, %v2346_v14, %v2350_v54  ;;  %v2366_v57 = vshrl.u32 %v14153_v42, 16  ;;  %3913 = vmatpush.bf16.msra.mxu2 %v11439_v4  ;;  %v2341_v24 = vsel %vm12731_vm4, %v2336_v62, %v14124_v21  ;;  %v2353_v55 = vshrl.u32 %v14162_v8, 16 }
 0x21b   : > { %v14168_v35 = vpack.c.b16 %v3664_v12, %v3663_v59  ;;  %v3442_v39 = vrot.slane %v3441_v26, 4  ;;  %v3465_v59 = vunpack.c.l.b16 %v3437_v27  ;;  %v14185_v12 = vpack.c.b16 %v3026_v0, %v3025_v45 }
 0x21c   : > { %v2560_v17 = vpop.f32.mrf.mxu0  ;;  %v2798_v7 = vpop.f32.mrf.mxu1  ;;  %v2444_v26 = vunpack.c.l.b16 %v2351_v33  ;;  %v2970_v20 = vrot.slane %v14153_v42, 5  ;;  %v14189_v54 = vrot.slane %v2362_v60, 5  ;;  %v2443_v21 = vunpack.c.l.b16 %v2341_v24 }
 0x21d   : > { %v2794_v40 = vadd.f32 %v14119_v9, %v2560_v17  ;;  %16720 = vst [vmem:[#allocation64_spill] sm:$0xff] %v14168_v35  ;;  %v3447_v6 = vsel %vm12731_vm4, %v3442_v39, %v3446_v13  ;;  %v1933_v17 = vld [vmem:[#allocation2 + $0x160] sm:$0x3]  ;;  %v2355_v39 = vrot.slane %v2353_v55, 4  ;;  %v2679_v45 = vunpack.c.l.b16 %v14153_v42  ;;  %v1935_v55 = vld [vmem:[#allocation2 + $0x170] sm:$0xff]  ;;  %v11430_v42 = vld [vmem:[%s16604_s11 + $0x140] sm:$0xff] }
 0x21e   : > { %v3466_v14 = vunpack.c.l.b16 %v3447_v6  ;;  %16721 = vst [vmem:[#allocation65_spill] sm:$0xff] %v14185_v12  ;;  %v1987_v27 = vpack.c.bf16 %v1933_v17, %v1933_v17  ;;  %v14194_v13 = vpack.c.b16 %v2444_v26, %v2443_v21  ;;  %v2678_v24 = vunpack.c.l.b16 %v14162_v8  ;;  %3722 = vmatpush.bf16.msra.mxu1 %v11430_v42 }
 0x21f   : > { %v14177_v9 = vadd.f32 %v3142_v19, %v2794_v40  ;;  %v2356_v19 = vshll.u32 %v14162_v8, 16  ;;  %v2368_v40 = vrot.slane %v2366_v57, 4  ;;  %v2972_v57 = vrot.slane %v2970_v20, 4 }
 0x220   : > { %v14191_v3 = vpack.c.b16 %v3466_v14, %v3465_v59  ;;  %v3145_v4 = vpop.f32.mrf.mxu2  ;;  %16723 = vst [vmem:[#allocation90_spill] sm:$0xff] %v14194_v13  ;;  %v3319_v33 = vpop.f32.mrf.mxu3  ;;  %v2973_v26 = vrot.slane %v1987_v27, 5  ;;  %v2372_v17 = vshll.u32 %v1987_v27, 16  ;;  %3361 = vmatmul.bf16.gmra.mxu3 %v13981_v32  ;;  %v9313_v21 = vrot.slane %v14162_v8, 9 }
 0x221   : > { %v2358_v6 = vrot.slane %v2356_v19, 5  ;;  %v14198_v60 = vadd.f32 %v3319_v33, %v13872_v56  ;;  %v2369_v59 = vor.u32 %v2368_v40, %v14189_v54  ;;  %v14211_v19 = vpack.c.b16 %v2679_v45, %v2678_v24 }
 0x222   : > { %16722 = vst [vmem:[#allocation89_spill] sm:$0xff] %v14191_v3  ;;  %v1989_v33 = vpack.c.bf16 %v1935_v55, %v1935_v55  ;;  %v2971_v27 = vsel %vm12687_vm14, %v9313_v21, %v2970_v20  ;;  %v11452_v20 = vld [vmem:[%s16604_s11 + $0x1f0] sm:$0xff]  ;;  %v1936_v21 = vld [vmem:[#allocation2 + $0x178] sm:$0x3] }
 0x223   : > { %16724 = vst [vmem:[#allocation91_spill] sm:$0xff] %v14198_v60  ;;  %v2359_v40 = vor.u32 %v2358_v6, %v2355_v39  ;;  %v2374_v39 = vrot.slane %v2372_v17, 5  ;;  %4122 = vmatpush.bf16.msra.mxu3 %v11452_v20 }
 0x224   : > { %3184 = vmatmul.bf16.gmra.mxu2 %v14185_v12  ;;  %v2563_v62 = vpop.f32.mrf.mxu0  ;;  %v2801_v56 = vpop.f32.mrf.mxu1  ;;  %v2390_v55 = vshrl.u32 %v1989_v33, 16  ;;  %v1990_v12 = vpack.c.bf16 %v1936_v21, %v1936_v21 }
 0x225   : > { %v2797_v0 = vadd.f32 %v2796_v38, %v2563_v62  ;;  %v11422_v38 = vld [vmem:[%s16604_s11 + $0x100] sm:$0xff]  ;;  %v2974_v62 = vsel %vm12687_vm14, %v2972_v57, %v2973_v26  ;;  %2840 = vmatmul.bf16.gmra.mxu1 %v14211_v19 }
 0x226   : > { %2602 = vmatmul.bf16.gmra.mxu0 %v14194_v13  ;;  %v3028_v24 = vunpack.c.l.b16 %v2974_v62  ;;  %v3027_v13 = vunpack.c.l.b16 %v2971_v27  ;;  %v2977_v62 = vrot.slane %v1989_v33, 5  ;;  %v2392_v27 = vrot.slane %v2390_v55, 4 }
 0x227   : > { %v14201_v14 = vadd.f32 %v3145_v4, %v2797_v0  ;;  %3524 = vmatpush.bf16.msra.mxu0 %v11422_v38  ;;  %v2370_v4 = vrot.slane %v2369_v59, 4  ;;  %v1934_v0 = vld [vmem:[#allocation2 + $0x168] sm:$0xff]  ;;  %v2360_v38 = vrot.slane %v2359_v40, 4  ;;  %v2386_v59 = vshll.u32 %v1989_v33, 16 }
 0x228   : > { %v3147_v35 = vpop.f32.mrf.mxu2  ;;  %v3322_v6 = vpop.f32.mrf.mxu3  ;;  %v1988_v42 = vpack.c.bf16 %v1934_v0, %v1934_v0  ;;  %v14236_v17 = vpack.c.b16 %v3028_v24, %v3027_v13  ;;  %v2681_v13 = vunpack.c.l.b16 %v1989_v33  ;;  %v2396_v21 = vshll.u32 %v1990_v12, 16 }
 0x229   : > { %v14221_v8 = vadd.f32 %v3322_v6, %v13959_v52  ;;  %v2375_v57 = vsel %vm12731_vm4, %v2370_v4, %v2374_v39  ;;  %v2365_v52 = vsel %vm12731_vm4, %v2360_v38, %v14189_v54  ;;  %v2388_v0 = vrot.slane %v2386_v59, 5 }
 0x22a   : > { %16726 = vst [vmem:[#allocation93_spill] sm:$0xff] %v14236_v17  ;;  %v2446_v40 = vunpack.c.l.b16 %v2375_v57  ;;  %v2380_v4 = vshll.u32 %v1988_v42, 16  ;;  %v2445_v39 = vunpack.c.l.b16 %v2365_v52  ;;  %v2979_v57 = vrot.slane %v2977_v62, 4 }
 0x22b   : > { %16725 = vst [vmem:[#allocation92_spill] sm:$0xff] %v14221_v8  ;;  %v2680_v55 = vunpack.c.l.b16 %v1988_v42  ;;  %v9314_v33 = vrot.slane %v1988_v42, 9 }
 0x22c   : > { %v2565_v3 = vpop.f32.mrf.mxu0  ;;  %v14239_v60 = vpack.c.b16 %v2446_v40, %v2445_v39  ;;  %v2382_v20 = vrot.slane %v2380_v4, 5  ;;  %v2398_v39 = vrot.slane %v2396_v21, 5 }
 0x22d   : > { %v2799_v45 = vadd.f32 %v2798_v7, %v2565_v3  ;;  %v11438_v7 = vld [vmem:[%s16604_s11 + $0x180] sm:$0xff]  ;;  %v2803_v3 = vpop.f32.mrf.mxu1 }
 0x22e   : > { %3914 = vmatpush.bf16.msra.mxu2 %v11438_v7  ;;  %v2393_v7 = vor.u32 %v2392_v27, %v2388_v0  ;;  %v2978_v27 = vsel %vm12687_vm14, %v9314_v33, %v2977_v62 }
 0x22f   : > { %v14225_v26 = vadd.f32 %v3147_v35, %v2799_v45  ;;  %v2377_v35 = vshrl.u32 %v1988_v42, 16 }
 0x230   : > { %v3150_v6 = vpop.f32.mrf.mxu2  ;;  %v3324_v54 = vpop.f32.mrf.mxu3  ;;  %3366 = vmatmul.bf16.gmra.mxu3 %v14080_v61 }
 0x231   : > { %v2379_v24 = vrot.slane %v2377_v35, 4  ;;  %v14242_v38 = vadd.f32 %v3324_v54, %v14034_v25  ;;  %v2394_v35 = vrot.slane %v2393_v7, 4 }
 0x233   : > { %v2383_v40 = vor.u32 %v2382_v20, %v2379_v24  ;;  %v3029_v24 = vunpack.c.l.b16 %v2978_v27 }
 0x234   : > { %3189 = vmatmul.bf16.gmra.mxu2 %v14236_v17  ;;  %v2568_v45 = vpop.f32.mrf.mxu0  ;;  %v2980_v17 = vrot.slane %v1990_v12, 5 }
 0x235   : > { %v2802_v8 = vadd.f32 %v2801_v56, %v2568_v45  ;;  %v2806_v52 = vpop.f32.mrf.mxu1  ;;  %v14247_v56 = vpack.c.b16 %v2681_v13, %v2680_v55  ;;  %v2384_v42 = vrot.slane %v2383_v40, 4 }
 0x236   : > { %2607 = vmatmul.bf16.gmra.mxu0 %v14239_v60  ;;  %v2981_v25 = vsel %vm12687_vm14, %v2979_v57, %v2980_v17  ;;  %v2399_v17 = vsel %vm12731_vm4, %v2394_v35, %v2398_v39 }
 0x237   : > { %v14244_v59 = vadd.f32 %v3150_v6, %v2802_v8  ;;  %2845 = vmatmul.bf16.gmra.mxu1 %v14247_v56  ;;  %v3030_v6 = vunpack.c.l.b16 %v2981_v25  ;;  %v2389_v20 = vsel %vm12731_vm4, %v2384_v42, %v2388_v0  ;;  %v2448_v62 = vunpack.c.l.b16 %v2399_v17  ;;  %v11461_v0 = vld [vmem:[%s16604_s11 + $0x238] sm:$0xff]  ;;  %v11451_v42 = vld [vmem:[%s16604_s11 + $0x1e8] sm:$0xff] }
 0x238   : > { %v3152_v4 = vpop.f32.mrf.mxu2  ;;  %v3327_v12 = vpop.f32.mrf.mxu3  ;;  %4319 = vmatpush.bf16.msrb.mxu0 %v11461_v0  ;;  %4123 = vmatpush.bf16.msra.mxu3 %v11451_v42  ;;  %v16733_v0 = vld [vmem:[#allocation24_spill] sm:$0xff] }
 0x239   : > { %v14256_v54 = vadd.f32 %v3327_v12, %v14063_v46  ;;  %v14264_v7 = vpack.c.b16 %v3030_v6, %v3029_v24  ;;  %v16731_v24 = vld [vmem:[#allocation40_spill] sm:$0xff] }
 0x23b   : > { %16727 = vst [vmem:[#allocation94_spill] sm:$0xff] %v14264_v7 }
 0x23c   : > { %v2570_v8 = vpop.f32.mrf.mxu0 }
 0x23d   : > { %v2804_v45 = vadd.f32 %v2803_v3, %v2570_v8  ;;  %v2808_v57 = vpop.f32.mrf.mxu1  ;;  %v2447_v3 = vunpack.c.l.b16 %v2389_v20  ;;  %v11477_v8 = vld [vmem:[%s16729_s13 + $0x78] sm:$0xff] }
 0x23e   : > { %4759 = vmatpush.bf16.msrb.mxu1 %v11477_v8  ;;  %v5780_v8 = vpack.c.bf16 %v16733_v0, %v16733_v0 }
 0x23f   : > { %v14260_v13 = vadd.f32 %v3152_v4, %v2804_v45  ;;  %v14267_v33 = vpack.c.b16 %v2448_v62, %v2447_v3 }
 0x240   : > { %v3155_v46 = vpop.f32.mrf.mxu2  ;;  %v3329_v25 = vpop.f32.mrf.mxu3  ;;  %3371 = vmatmul.bf16.gmra.mxu3 %v14144_v29  ;;  %v6564_v42 = vrot.slane %v5780_v8, 2 }
 0x241   : > { %16728 = vst [vmem:[#allocation95_spill] sm:$0xff] %v14267_v33  ;;  %v14270_v40 = vadd.f32 %v3329_v25, %v14114_v50 }
 0x244   : > { %3194 = vmatmul.bf16.gmra.mxu2 %v14264_v7  ;;  %v2573_v55 = vpop.f32.mrf.mxu0 }
 0x245   : > { %v2807_v21 = vadd.f32 %v2806_v52, %v2573_v55  ;;  %v2811_v4 = vpop.f32.mrf.mxu1  ;;  %v16730_v52 = vld [vmem:[#allocation38_spill] sm:$0xff] }
 0x246   : > { %2612 = vmatmul.bf16.gmra.mxu0 %v14267_v33  ;;  %v16740_v33 = vld [vmem:[#allocation46_spill] sm:$0xff] }
 0x247   : > { %v14272_v35 = vadd.f32 %v3155_v46, %v2807_v21  ;;  %3723 = vmatmul.bf16.vlgmr.msra.gmra.mxu1 %v16730_v52  ;;  %v11450_v21 = vld [vmem:[%s16604_s11 + $0x1e0] sm:$0xff] }
 0x248   : > { %v3157_v27 = vpop.f32.mrf.mxu2  ;;  %v3332_v45 = vpop.f32.mrf.mxu3  ;;  %4124 = vmatpush.bf16.msra.mxu3 %v11450_v21 }
 0x249   : > { %v14284_v12 = vadd.f32 %v3332_v45, %v14141_v36  ;;  %v16732_v36 = vld [vmem:[#allocation39_spill] sm:$0xff] }
 0x24c   : > { %v2575_v50 = vpop.f32.mrf.mxu0 }
 0x24d   : > { %v2809_v39 = vadd.f32 %v2808_v57, %v2575_v50  ;;  %v2813_v17 = vpop.f32.mrf.mxu1 }
 0x24f   : > { %v14286_v6 = vadd.f32 %v3157_v27, %v2809_v39  ;;  %v11469_v39 = vld [vmem:[%s16729_s13 + $0x38] sm:$0xff] }
 0x250   : > { %v3160_v62 = vpop.f32.mrf.mxu2  ;;  %v3334_v55 = vpop.f32.mrf.mxu3  ;;  %3376 = vmatmul.bf16.gmra.mxu3 %v14211_v19  ;;  %4860 = vmatpush.bf16.msrb.mxu2 %v11469_v39 }
 0x251   : > { %v14293_v57 = vadd.f32 %v3334_v55, %v14177_v9  ;;  %v16735_v55 = vld [vmem:[#allocation43_spill] sm:$0xff] }
 0x254   : > { %3915 = vmatmul.bf16.vlgmr.msra.gmra.mxu2 %v16731_v24  ;;  %v2578_v20 = vpop.f32.mrf.mxu0 }
 0x255   : > { %v2812_v3 = vadd.f32 %v2811_v4, %v2578_v20  ;;  %v2816_v25 = vpop.f32.mrf.mxu1  ;;  %v16734_v4 = vld [vmem:[#allocation41_spill] sm:$0xff]  ;;  %v11449_v20 = vld [vmem:[%s16604_s11 + $0x1d8] sm:$0xff] }
 0x256   : > { %3525 = vmatmul.bf16.vlgmr.msra.gmra.mxu0 %v16732_v36  ;;  %4125 = vmatpush.bf16.msra.mxu3 %v11449_v20  ;;  %v16737_v20 = vld [vmem:[#allocation42_spill] sm:$0xff] }
 0x257   : > { %v14295_v46 = vadd.f32 %v3160_v62, %v2812_v3  ;;  %3728 = vmatmul.bf16.gmra.mxu1 %v16734_v4  ;;  %v14320_v3 = vsel %vm5805_vm8, %v5780_v8, %v6564_v42 }
 0x258   : > { %v3162_v9 = vpop.f32.mrf.mxu2  ;;  %v3337_v27 = vpop.f32.mrf.mxu3 }
 0x259   : > { %v14309_v45 = vadd.f32 %v3337_v27, %v14201_v14  ;;  %v14329_v27 = vsel %vm5809_vm5, %v5780_v8, %v6564_v42  ;;  %v11446_v42 = vld [vmem:[%s16604_s11 + $0x1c0] sm:$0xff] }
 0x25c   : > { %v2580_v52 = vpop.f32.mrf.mxu0 }
 0x25d   : > { %v2814_v50 = vadd.f32 %v2813_v17, %v2580_v52  ;;  %v2818_v62 = vpop.f32.mrf.mxu1  ;;  %v11448_v17 = vld [vmem:[%s16604_s11 + $0x1d0] sm:$0xff]  ;;  %v6570_v52 = vshrl.u32 %v14320_v3, 16 }
 0x25e   : > { %4126 = vmatpush.bf16.msra.mxu3 %v11448_v17  ;;  %v11460_v17 = vld [vmem:[%s16604_s11 + $0x230] sm:$0xff] }
 0x25f   : > { %v14311_v24 = vadd.f32 %v3162_v9, %v2814_v50  ;;  %v6573_v9 = vshll.u32 %v14320_v3, 16  ;;  %4320 = vmatpush.bf16.msrb.mxu0 %v11460_v17 }
 0x260   : > { %v3165_v36 = vpop.f32.mrf.mxu2  ;;  %v3339_v0 = vpop.f32.mrf.mxu3  ;;  %3381 = vmatmul.bf16.gmra.mxu3 %v14247_v56 }
 0x261   : > { %v14326_v50 = vadd.f32 %v3339_v0, %v14225_v26  ;;  %v11476_v26 = vld [vmem:[%s16729_s13 + $0x70] sm:$0xff]  ;;  %v14348_v0 = vld.sshfl [vmem:[#allocation1] sm:$0xff pattern:$0x73625140] }
 0x262   : > { %4760 = vmatpush.bf16.msrb.mxu1 %v11476_v26  ;;  %16738 = vst [vmem:[#allocation40_spill] sm:$0xff] %v14348_v0 }
 0x263   : > { %16736 = vst [vmem:[#allocation38_spill] sm:$0xff] %v14326_v50 }
 0x264   : > { %3920 = vmatmul.bf16.gmra.mxu2 %v16735_v55  ;;  %v2583_v14 = vpop.f32.mrf.mxu0  ;;  %6489 = vst [vmem:[#allocation1] ss:$4 sm:$0xff] %v12969_v37 }
 0x265   : > { %v2817_v21 = vadd.f32 %v2816_v25, %v2583_v14  ;;  %v11447_v25 = vld [vmem:[%s16604_s11 + $0x1c8] sm:$0xff]  ;;  %v2821_v55 = vpop.f32.mrf.mxu1  ;;  %v6569_v14 = vrot.slane %v14329_v27, 2  ;;  %6491 = vst [vmem:[#allocation1 + $0x1] ss:$4 sm:$0xff] %v16686_v51  ;;  %v3252_v51 = vunpack.c.l.b16 %v14132_v1 }
 0x266   : > { %3530 = vmatmul.bf16.gmra.mxu0 %v16737_v20  ;;  %4127 = vmatpush.bf16.msra.mxu3 %v11447_v25  ;;  %6493 = vst [vmem:[#allocation1 + $0x2] ss:$4 sm:$0xff] %v13334_v22 }
 0x267   : > { %v14331_v39 = vadd.f32 %v3165_v36, %v2817_v21  ;;  %v6572_v36 = vrot.slane %v6570_v52, 6  ;;  %v6575_v21 = vrot.slane %v6573_v9, 7  ;;  %3733 = vmatmul.bf16.gmra.mxu1 %v16739_v10  ;;  %v6579_v9 = vshll.u32 %v6569_v14, 16  ;;  %6496 = vst [vmem:[#allocation1 + $0x3] ss:$4 sm:$0xff] %v5780_v8 }
 0x268   : > { %v3167_v25 = vpop.f32.mrf.mxu2  ;;  %v3342_v5 = vpop.f32.mrf.mxu3  ;;  %v3251_v8 = vunpack.c.l.b16 %v14093_v15 }
 0x269   : > { %v6576_v52 = vor.u32 %v6575_v21, %v6572_v36  ;;  %v14355_v27 = vadd.f32 %v3342_v5, %v14244_v59  ;;  %v6581_v37 = vrot.slane %v6579_v9, 7 }
 0x26a   : > { %4128 = vmatpush.bf16.msra.mxu3 %v11446_v42 }
 0x26b   : > { %v6577_v10 = vrot.slane %v6576_v52, 2 }
 0x26c   : > { %v2585_v4 = vpop.f32.mrf.mxu0 }
 0x26d   : > { %v2819_v17 = vadd.f32 %v2818_v62, %v2585_v4  ;;  %v2823_v0 = vpop.f32.mrf.mxu1  ;;  %v6582_v22 = vsel %vm13446_vm13, %v6577_v10, %v6581_v37  ;;  %v16743_v10 = vld [vmem:[#allocation47_spill] sm:$0xff]  ;;  %v16745_v37 = vld [vmem:[#allocation49_spill] sm:$0xff] }
 0x26e   : > { %v14361_v42 = vld.sshfl [vmem:[#allocation1] sm:$0xff pattern:$0x73625140] }
 0x26f   : > { %v14357_v26 = vadd.f32 %v3167_v25, %v2819_v17  ;;  %16741 = vst [vmem:[#allocation39_spill] sm:$0xff] %v14361_v42  ;;  %v16744_v17 = vld [vmem:[#allocation27_spill] sm:$0xff] }
 0x270   : > { %v3344_v62 = vpop.f32.mrf.mxu3  ;;  %v3170_v5 = vpop.f32.mrf.mxu2  ;;  %6600 = vst [vmem:[#allocation1] ss:$4 sm:$0xff] %v13606_v31  ;;  %v11468_v31 = vld [vmem:[%s16729_s13 + $0x30] sm:$0xff]  ;;  %v6861_v52 = vshrl.u32 %v16744_v17, 16  ;;  %v6864_v9 = vshll.u32 %v16744_v17, 16 }
 0x271   : > { %v14366_v59 = vadd.f32 %v3344_v62, %v14260_v13  ;;  %6602 = vst [vmem:[#allocation1 + $0x1] ss:$4 sm:$0xff] %v13666_v41  ;;  %4861 = vmatpush.bf16.msrb.mxu2 %v11468_v31  ;;  %v10452_v62 = vrot.slane %v14320_v3, 9  ;;  %v11459_v31 = vld [vmem:[%s16604_s11 + $0x228] sm:$0xff]  ;;  %v16748_v17 = vld [vmem:[#allocation26_spill] sm:$0xff] }
 0x272   : > { %6604 = vst [vmem:[#allocation1 + $0x2] ss:$4 sm:$0xff] %v14016_v43  ;;  %4321 = vmatpush.bf16.msrb.mxu0 %v11459_v31  ;;  %v16751_v31 = vld [vmem:[#allocation53_spill] sm:$0xff] }
 0x273   : > { %6607 = vst [vmem:[#allocation1 + $0x3] ss:$4 sm:$0xff] %v6582_v22 }
 0x274   : > { %3925 = vmatmul.bf16.gmra.mxu2 %v16740_v33  ;;  %v2588_v50 = vpop.f32.mrf.mxu0  ;;  %v16742_v33 = vld [vmem:[#allocation45_spill] sm:$0xff] }
 0x275   : > { %v2822_v4 = vadd.f32 %v2821_v55, %v2588_v50  ;;  %v2826_v1 = vpop.f32.mrf.mxu1  ;;  %v14374_v50 = vpack.c.b16 %v3252_v51, %v3251_v8  ;;  %v6863_v8 = vrot.slane %v6861_v52, 6  ;;  %v16749_v52 = vrot.slane %v16748_v17, 2 }
 0x276   : > { %3535 = vmatmul.bf16.gmra.mxu0 %v16742_v33 }
 0x277   : > { %v14370_v36 = vadd.f32 %v3170_v5, %v2822_v4  ;;  %3386 = vmatmul.bf16.gmra.mxu3 %v14374_v50  ;;  %3738 = vmatmul.bf16.gmra.mxu1 %v16743_v10 }
 0x278   : > { %v3347_v55 = vpop.f32.mrf.mxu3  ;;  %v3172_v21 = vpop.f32.mrf.mxu2 }
 0x279   : > { %v14383_v41 = vadd.f32 %v3347_v55, %v14272_v35  ;;  %v6677_v35 = vrot.slane %v6569_v14, 7  ;;  %v16746_v55 = vld [vmem:[#allocation48_spill] sm:$0xff] }
 0x27b   : > { %v6678_v14 = vsel %vm12410_vm11, %v10452_v62, %v6677_v35 }
 0x27c   : > { %v2590_v13 = vpop.f32.mrf.mxu0 }
 0x27d   : > { %v2824_v15 = vadd.f32 %v2823_v0, %v2590_v13  ;;  %v2828_v43 = vpop.f32.mrf.mxu1  ;;  %v6866_v13 = vrot.slane %v6864_v9, 7  ;;  %v6870_v9 = vshll.u32 %v16749_v52, 16 }
 0x27f   : > { %v14385_v25 = vadd.f32 %v3172_v21, %v2824_v15  ;;  %v6867_v21 = vor.u32 %v6866_v13, %v6863_v8  ;;  %v6872_v35 = vrot.slane %v6870_v9, 7  ;;  %v16754_v9 = vld [vmem:[#allocation56_spill] sm:$0xff] }
 0x280   : > { %v3349_v4 = vpop.f32.mrf.mxu3 }
 0x281   : > { %v14392_v5 = vadd.f32 %v3349_v4, %v14286_v6  ;;  %v14404_v6 = vld.sshfl [vmem:[#allocation1] sm:$0xff pattern:$0x73625140]  ;;  %v6868_v62 = vrot.slane %v6867_v21, 2 }
 0x282   : > { %16747 = vst [vmem:[#allocation24_spill] sm:$0xff] %v14404_v6  ;;  %v16753_v21 = vld [vmem:[#allocation52_spill] sm:$0xff] }
 0x283   : > { %6696 = vst [vmem:[#allocation1] ss:$4 sm:$0xff] %v13574_v23  ;;  %v6873_v23 = vsel %vm13446_vm13, %v6868_v62, %v6872_v35 }
 0x284   : > { %3930 = vmatmul.bf16.gmra.mxu2 %v16745_v37  ;;  %v2593_v0 = vpop.f32.mrf.mxu0  ;;  %v16750_v37 = vld [vmem:[#allocation51_spill] sm:$0xff]  ;;  %6698 = vst [vmem:[#allocation1 + $0x1] ss:$4 sm:$0xff] %v13619_v49 }
 0x285   : > { %v2827_v51 = vadd.f32 %v2826_v1, %v2593_v0  ;;  %v11475_v1 = vld [vmem:[%s16729_s13 + $0x68] sm:$0xff]  ;;  %v2831_v3 = vpop.f32.mrf.mxu1  ;;  %6700 = vst [vmem:[#allocation1 + $0x2] ss:$4 sm:$0xff] %v14087_v2 }
 0x286   : > { %3540 = vmatmul.bf16.gmra.mxu0 %v16746_v55  ;;  %4761 = vmatpush.bf16.msrb.mxu1 %v11475_v1  ;;  %6703 = vst [vmem:[#allocation1 + $0x3] ss:$4 sm:$0xff] %v6678_v14 }
 0x287   : > { %v3175_v22 = vpop.f32.mrf.mxu2  ;;  %4129 = vmatmul.bf16.vlgmr.msra.gmra.mxu3 %v16737_v20  ;;  %3743 = vmatmul.bf16.gmra.mxu1 %v16750_v37 }
 0x288   : > { %v14394_v15 = vadd.f32 %v3175_v22, %v2827_v51  ;;  %v3352_v4 = vpop.f32.mrf.mxu3 }
 0x289   : > { %v14415_v22 = vadd.f32 %v3352_v4, %v14295_v46  ;;  %v11467_v4 = vld [vmem:[%s16729_s13 + $0x28] sm:$0xff] }
 0x28a   : > { %4862 = vmatpush.bf16.msrb.mxu2 %v11467_v4 }
 0x28c   : > { %v2595_v0 = vpop.f32.mrf.mxu0 }
 0x28d   : > { %v2829_v51 = vadd.f32 %v2828_v43, %v2595_v0  ;;  %v2833_v13 = vpop.f32.mrf.mxu1  ;;  %v14422_v17 = vld.sshfl [vmem:[#allocation1] sm:$0xff pattern:$0x73625140] }
 0x28e   : > { %16752 = vst [vmem:[#allocation43_spill] sm:$0xff] %v14422_v17 }
 0x28f   : > { %v3177_v20 = vpop.f32.mrf.mxu2  ;;  %6931 = vst [vmem:[#allocation1] ss:$4 sm:$0xff] %v6873_v23 }
 0x290   : > { %v14417_v8 = vadd.f32 %v3177_v20, %v2829_v51  ;;  %v3354_v1 = vpop.f32.mrf.mxu3 }
 0x291   : > { %v14425_v46 = vadd.f32 %v3354_v1, %v14311_v24  ;;  %v16755_v1 = vld [vmem:[#allocation57_spill] sm:$0xff] }
 0x294   : > { %3935 = vmatmul.bf16.gmra.mxu2 %v16751_v31  ;;  %v2598_v49 = vpop.f32.mrf.mxu0 }
 0x295   : > { %v2832_v43 = vadd.f32 %v2831_v3, %v2598_v49  ;;  %v2836_v52 = vpop.f32.mrf.mxu1 }
 0x296   : > { %3545 = vmatmul.bf16.gmra.mxu0 %v16753_v21 }
 0x297   : > { %v3180_v2 = vpop.f32.mrf.mxu2  ;;  %4134 = vmatmul.bf16.gmra.mxu3 %v16742_v33  ;;  %3748 = vmatmul.bf16.gmra.mxu1 %v16754_v9 }
 0x298   : > { %v14427_v14 = vadd.f32 %v3180_v2, %v2832_v43  ;;  %v3357_v3 = vpop.f32.mrf.mxu3  ;;  %v11474_v2 = vld [vmem:[%s16729_s13 + $0x60] sm:$0xff] }
 0x299   : > { %v14436_v24 = vadd.f32 %v3357_v3, %v14331_v39  ;;  %v11458_v39 = vld [vmem:[%s16604_s11 + $0x220] sm:$0xff]  ;;  %4762 = vmatpush.bf16.msrb.mxu1 %v11474_v2 }
 0x29a   : > { %4322 = vmatpush.bf16.msrb.mxu0 %v11458_v39 }
 0x29c   : > { %v2600_v0 = vpop.f32.mrf.mxu0 }
 0x29d   : > { %v2834_v51 = vadd.f32 %v2833_v13, %v2600_v0  ;;  %v2838_v35 = vpop.f32.mrf.mxu1 }
 0x29f   : > { %v3182_v20 = vpop.f32.mrf.mxu2 }
 0x2a0   : > { %v14438_v62 = vadd.f32 %v3182_v20, %v2834_v51  ;;  %v3359_v31 = vpop.f32.mrf.mxu3 }
 0x2a1   : > { %v14442_v13 = vadd.f32 %v3359_v31, %v14357_v26 }
 0x2a4   : > { %3940 = vmatmul.bf16.gmra.mxu2 %v13534_v63  ;;  %v2603_v33 = vpop.f32.mrf.mxu0 }
 0x2a5   : > { %v2837_v23 = vadd.f32 %v2836_v52, %v2603_v33  ;;  %v2841_v63 = vpop.f32.mrf.mxu1  ;;  %v16756_v52 = vld [vmem:[#allocation59_spill] sm:$0xff] }
 0x2a6   : > { %3550 = vmatmul.bf16.gmra.mxu0 %v16755_v1 }
 0x2a7   : > { %v3185_v49 = vpop.f32.mrf.mxu2  ;;  %4139 = vmatmul.bf16.gmra.mxu3 %v16746_v55  ;;  %3753 = vmatmul.bf16.gmra.mxu1 %v16756_v52 }
 0x2a8   : > { %v14444_v43 = vadd.f32 %v3185_v49, %v2837_v23  ;;  %v3362_v51 = vpop.f32.mrf.mxu3 }
 0x2a9   : > { %v14456_v4 = vadd.f32 %v3362_v51, %v14370_v36  ;;  %v16758_v36 = vld [vmem:[#allocation62_spill] sm:$0xff] }
 0x2ac   : > { %v2605_v26 = vpop.f32.mrf.mxu0 }
 0x2ad   : > { %v2839_v0 = vadd.f32 %v2838_v35, %v2605_v26  ;;  %v2843_v33 = vpop.f32.mrf.mxu1  ;;  %v16757_v35 = vld [vmem:[#allocation61_spill] sm:$0xff] }
 0x2af   : > { %v3187_v3 = vpop.f32.mrf.mxu2 }
 0x2b0   : > { %v14458_v20 = vadd.f32 %v3187_v3, %v2839_v0  ;;  %v3364_v49 = vpop.f32.mrf.mxu3 }
 0x2b1   : > { %v14462_v55 = vadd.f32 %v3364_v49, %v14385_v25 }
 0x2b4   : > { %3945 = vmatmul.bf16.gmra.mxu2 %v13637_v58  ;;  %v2608_v23 = vpop.f32.mrf.mxu0  ;;  %v11466_v58 = vld [vmem:[%s16729_s13 + $0x20] sm:$0xff] }
 0x2b5   : > { %v2842_v31 = vadd.f32 %v2841_v63, %v2608_v23  ;;  %v2846_v26 = vpop.f32.mrf.mxu1  ;;  %4863 = vmatpush.bf16.msrb.mxu2 %v11466_v58 }
 0x2b6   : > { %3555 = vmatmul.bf16.gmra.mxu0 %v16757_v35 }
 0x2b7   : > { %v3190_v39 = vpop.f32.mrf.mxu2  ;;  %4144 = vmatmul.bf16.gmra.mxu3 %v16753_v21  ;;  %3758 = vmatmul.bf16.gmra.mxu1 %v16758_v36 }
 0x2b8   : > { %v14464_v2 = vadd.f32 %v3190_v39, %v2842_v31  ;;  %v3367_v3 = vpop.f32.mrf.mxu3 }
 0x2b9   : > { %v14473_v25 = vadd.f32 %v3367_v3, %v14394_v15  ;;  %v11457_v15 = vld [vmem:[%s16604_s11 + $0x218] sm:$0xff] }
 0x2ba   : > { %4323 = vmatpush.bf16.msrb.mxu0 %v11457_v15 }
 0x2bc   : > { %v2610_v0 = vpop.f32.mrf.mxu0 }
 0x2bd   : > { %v2844_v51 = vadd.f32 %v2843_v33, %v2610_v0  ;;  %v2848_v31 = vpop.f32.mrf.mxu1 }
 0x2bf   : > { %v3192_v63 = vpop.f32.mrf.mxu2 }
 0x2c0   : > { %v14475_v23 = vadd.f32 %v3192_v63, %v2844_v51  ;;  %v3369_v39 = vpop.f32.mrf.mxu3 }
 0x2c1   : > { %v14479_v33 = vadd.f32 %v3369_v39, %v14417_v8 }
 0x2c4   : > { %3950 = vmatmul.bf16.gmra.mxu2 %v16715_v18  ;;  %v2613_v21 = vpop.f32.mrf.mxu0  ;;  %v11473_v18 = vld [vmem:[%s16729_s13 + $0x58] sm:$0xff] }
 0x2c5   : > { %v2847_v49 = vadd.f32 %v2846_v26, %v2613_v21  ;;  %v3724_v6 = vpop.f32.mrf.mxu1  ;;  %v16760_v26 = vld [vmem:[#allocation70_spill] sm:$0xff]  ;;  %4763 = vmatpush.bf16.msrb.mxu1 %v11473_v18 }
 0x2c6   : > { %3560 = vmatmul.bf16.gmra.mxu0 %v16759_v48 }
 0x2c7   : > { %v3195_v16 = vpop.f32.mrf.mxu2  ;;  %4149 = vmatmul.bf16.gmra.mxu3 %v16755_v1  ;;  %3763 = vmatmul.bf16.gmra.mxu1 %v16760_v26 }
 0x2c8   : > { %v14481_v0 = vadd.f32 %v3195_v16, %v2847_v49  ;;  %v3372_v51 = vpop.f32.mrf.mxu3 }
 0x2c9   : > { %v14493_v58 = vadd.f32 %v3372_v51, %v14427_v14 }
 0x2cc   : > { %v2615_v8 = vpop.f32.mrf.mxu0 }
 0x2cd   : > { %v2849_v16 = vadd.f32 %v2848_v31, %v2615_v8  ;;  %v3726_v21 = vpop.f32.mrf.mxu1 }
 0x2cf   : > { %v3197_v3 = vpop.f32.mrf.mxu2 }
 0x2d0   : > { %v14495_v63 = vadd.f32 %v3197_v3, %v2849_v16  ;;  %v3374_v1 = vpop.f32.mrf.mxu3 }
 0x2d1   : > { %v14500_v15 = vadd.f32 %v3374_v1, %v14438_v62 }
 0x2d4   : > { %3955 = vmatmul.bf16.gmra.mxu2 %v13790_v30  ;;  %v3526_v49 = vpop.f32.mrf.mxu0 }
 0x2d5   : > { %v3606_v39 = vadd.f32 %v3526_v49, %v14110_v53  ;;  %v3729_v31 = vpop.f32.mrf.mxu1  ;;  %v11465_v53 = vld [vmem:[%s16729_s13 + $0x18] sm:$0xff] }
 0x2d6   : > { %3565 = vmatmul.bf16.gmra.mxu0 %v13788_v34  ;;  %4864 = vmatpush.bf16.msrb.mxu2 %v11465_v53 }
 0x2d7   : > { %v3916_v17 = vpop.f32.mrf.mxu2  ;;  %v3804_v18 = vadd.f32 %v3724_v6, %v3606_v39  ;;  %4154 = vmatmul.bf16.gmra.mxu3 %v16757_v35  ;;  %3768 = vmatmul.bf16.gmra.mxu1 %v13818_v47 }
 0x2d8   : > { %v3377_v16 = vpop.f32.mrf.mxu3 }
 0x2d9   : > { %v14503_v8 = vadd.f32 %v3916_v17, %v3804_v18  ;;  %v14512_v6 = vadd.f32 %v3377_v16, %v14444_v43 }
 0x2dc   : > { %v3528_v14 = vpop.f32.mrf.mxu0 }
 0x2dd   : > { %v3607_v30 = vadd.f32 %v3528_v14, %v14136_v28  ;;  %v3731_v17 = vpop.f32.mrf.mxu1 }
 0x2df   : > { %v3918_v62 = vpop.f32.mrf.mxu2  ;;  %v3805_v51 = vadd.f32 %v3726_v21, %v3607_v30  ;;  %v11456_v21 = vld [vmem:[%s16604_s11 + $0x210] sm:$0xff] }
 0x2e0   : > { %v3379_v28 = vpop.f32.mrf.mxu3  ;;  %4324 = vmatpush.bf16.msrb.mxu0 %v11456_v21 }
 0x2e1   : > { %v14514_v3 = vadd.f32 %v3918_v62, %v3805_v51  ;;  %v14519_v1 = vadd.f32 %v3379_v28, %v14458_v20 }
 0x2e4   : > { %3960 = vmatmul.bf16.gmra.mxu2 %v13981_v32  ;;  %v3531_v35 = vpop.f32.mrf.mxu0  ;;  %v11472_v32 = vld [vmem:[%s16729_s13 + $0x50] sm:$0xff] }
 0x2e5   : > { %v3608_v49 = vadd.f32 %v3531_v35, %v14171_v11  ;;  %v3734_v43 = vpop.f32.mrf.mxu1  ;;  %v16761_v11 = vld [vmem:[#allocation87_spill] sm:$0xff]  ;;  %4764 = vmatpush.bf16.msrb.mxu1 %v11472_v32 }
 0x2e6   : > { %3570 = vmatmul.bf16.gmra.mxu0 %v13915_v44 }
 0x2e7   : > { %v3921_v39 = vpop.f32.mrf.mxu2  ;;  %v3806_v18 = vadd.f32 %v3729_v31, %v3608_v49  ;;  %4159 = vmatmul.bf16.gmra.mxu3 %v16759_v48  ;;  %3773 = vmatmul.bf16.gmra.mxu1 %v16761_v11  ;;  %v16762_v31 = vld [vmem:[#allocation91_spill] sm:$0xff]  ;;  %v16763_v48 = vld [vmem:[#allocation92_spill] sm:$0xff] }
 0x2e8   : > { %v3382_v16 = vpop.f32.mrf.mxu3 }
 0x2e9   : > { %v14522_v14 = vadd.f32 %v3921_v39, %v3806_v18  ;;  %v14534_v62 = vadd.f32 %v3382_v16, %v14464_v2 }
 0x2ec   : > { %v3533_v20 = vpop.f32.mrf.mxu0 }
 0x2ed   : > { %v3609_v30 = vadd.f32 %v3533_v20, %v16762_v31  ;;  %v3736_v35 = vpop.f32.mrf.mxu1  ;;  %v16764_v31 = vld [vmem:[#allocation88_spill] sm:$0xff] }
 0x2ef   : > { %v3923_v53 = vpop.f32.mrf.mxu2  ;;  %v3807_v51 = vadd.f32 %v3731_v17, %v3609_v30  ;;  %v16765_v17 = vld [vmem:[#allocation54_spill] sm:$0xff] }
 0x2f0   : > { %v3384_v18 = vpop.f32.mrf.mxu3 }
 0x2f1   : > { %v14536_v49 = vadd.f32 %v3923_v53, %v3807_v51  ;;  %v14541_v32 = vadd.f32 %v3384_v18, %v14475_v23  ;;  %v11464_v53 = vld [vmem:[%s16729_s13 + $0x10] sm:$0xff] }
 0x2f2   : > { %4865 = vmatpush.bf16.msrb.mxu2 %v11464_v53 }
 0x2f4   : > { %3965 = vmatmul.bf16.gmra.mxu2 %v14080_v61  ;;  %v3536_v28 = vpop.f32.mrf.mxu0 }
 0x2f5   : > { %v3610_v39 = vadd.f32 %v3536_v28, %v16763_v48  ;;  %v3739_v11 = vpop.f32.mrf.mxu1 }
 0x2f6   : > { %3575 = vmatmul.bf16.gmra.mxu0 %v16764_v31 }
 0x2f7   : > { %v3926_v21 = vpop.f32.mrf.mxu2  ;;  %v3808_v20 = vadd.f32 %v3734_v43, %v3610_v39  ;;  %4164 = vmatmul.bf16.gmra.mxu3 %v13788_v34  ;;  %3778 = vmatmul.bf16.gmra.mxu1 %v16765_v17 }
 0x2f9   : > { %v14544_v2 = vadd.f32 %v3926_v21, %v3808_v20 }
 0x2fa   : > { %v3387_v16 = vpop.f32.mrf.mxu3 }
 0x2fb   : > { %v14553_v43 = vadd.f32 %v3387_v16, %v14481_v0 }
 0x2fc   : > { %v3538_v30 = vpop.f32.mrf.mxu0 }
 0x2fd   : > { %v3611_v61 = vadd.f32 %v3538_v30, %v14242_v38  ;;  %v3741_v28 = vpop.f32.mrf.mxu1  ;;  %v16766_v30 = vld [vmem:[#allocation68_spill] sm:$0xff] }
 0x2ff   : > { %v3928_v23 = vpop.f32.mrf.mxu2  ;;  %v3809_v51 = vadd.f32 %v3736_v35, %v3611_v61  ;;  %v11455_v35 = vld [vmem:[%s16604_s11 + $0x208] sm:$0xff] }
 0x300   : > { %4325 = vmatpush.bf16.msrb.mxu0 %v11455_v35 }
 0x301   : > { %v14555_v48 = vadd.f32 %v3928_v23, %v3809_v51 }
 0x302   : > { %v3389_v38 = vpop.f32.mrf.mxu3 }
 0x303   : > { %v14560_v21 = vadd.f32 %v3389_v38, %v14495_v63 }
 0x304   : > { %3970 = vmatmul.bf16.gmra.mxu2 %v14144_v29  ;;  %v3541_v34 = vpop.f32.mrf.mxu0  ;;  %v11471_v29 = vld [vmem:[%s16729_s13 + $0x48] sm:$0xff] }
 0x305   : > { %v3612_v39 = vadd.f32 %v3541_v34, %v14256_v54  ;;  %v3744_v0 = vpop.f32.mrf.mxu1  ;;  %v16767_v54 = vld [vmem:[#allocation65_spill] sm:$0xff]  ;;  %4765 = vmatpush.bf16.msrb.mxu1 %v11471_v29 }
 0x306   : > { %3580 = vmatmul.bf16.gmra.mxu0 %v16766_v30 }
 0x307   : > { %v3931_v18 = vpop.f32.mrf.mxu2  ;;  %v3810_v20 = vadd.f32 %v3739_v11, %v3612_v39  ;;  %4169 = vmatmul.bf16.gmra.mxu3 %v13915_v44  ;;  %3783 = vmatmul.bf16.gmra.mxu1 %v16767_v54  ;;  %v11525_v44 = vld [vmem:[%s16729_s13 + $0x1f8] sm:$0xff] }
 0x308   : > { %5588 = vmatpush.bf16.msrb.mxu3 %v11525_v44 }
 0x309   : > { %v14563_v16 = vadd.f32 %v3931_v18, %v3810_v20 }
 0x30a   : > { %v4130_v61 = vpop.f32.mrf.mxu3 }
 0x30b   : > { %v14575_v23 = vadd.f32 %v4130_v61, %v14503_v8 }
 0x30c   : > { %v3543_v63 = vpop.f32.mrf.mxu0 }
 0x30d   : > { %v3613_v11 = vadd.f32 %v3543_v63, %v14270_v40  ;;  %16768 = vst [vmem:[#allocation42_spill] sm:$0xff] %v14575_v23  ;;  %v3746_v34 = vpop.f32.mrf.mxu1 }
 0x30f   : > { %v3933_v53 = vpop.f32.mrf.mxu2  ;;  %v3811_v51 = vadd.f32 %v3741_v28, %v3613_v11  ;;  %v16770_v28 = vld [vmem:[#allocation90_spill] sm:$0xff]  ;;  %v16771_v11 = vld [vmem:[#allocation93_spill] sm:$0xff] }
 0x311   : > { %v14577_v39 = vadd.f32 %v3933_v53, %v3811_v51 }
 0x312   : > { %v4132_v40 = vpop.f32.mrf.mxu3 }
 0x313   : > { %v14585_v35 = vadd.f32 %v4132_v40, %v14514_v3 }
 0x314   : > { %3975 = vmatmul.bf16.gmra.mxu2 %v14211_v19  ;;  %v3546_v38 = vpop.f32.mrf.mxu0 }
 0x315   : > { %v3614_v18 = vadd.f32 %v3546_v38, %v14284_v12  ;;  %16769 = vst [vmem:[#allocation46_spill] sm:$0xff] %v14585_v35  ;;  %v3749_v29 = vpop.f32.mrf.mxu1  ;;  %v11463_v12 = vld [vmem:[%s16729_s13 + $0x8] sm:$0xff]  ;;  %v1942_v35 = vld [vmem:[#allocation2 + $0x1a8] sm:$0x3] }
 0x316   : > { %3585 = vmatmul.bf16.gmra.mxu0 %v16770_v28  ;;  %4866 = vmatpush.bf16.msrb.mxu2 %v11463_v12 }
 0x317   : > { %v3936_v20 = vpop.f32.mrf.mxu2  ;;  %v3812_v8 = vadd.f32 %v3744_v0, %v3614_v18  ;;  %4174 = vmatmul.bf16.gmra.mxu3 %v16764_v31  ;;  %3788 = vmatmul.bf16.gmra.mxu1 %v16771_v11 }
 0x319   : > { %v14588_v63 = vadd.f32 %v3936_v20, %v3812_v8 }
 0x31a   : > { %v4135_v53 = vpop.f32.mrf.mxu3 }
 0x31b   : > { %v14597_v0 = vadd.f32 %v4135_v53, %v14522_v14 }
 0x31c   : > { %v3548_v19 = vpop.f32.mrf.mxu0 }
 0x31d   : > { %v3615_v61 = vadd.f32 %v3548_v19, %v14293_v57  ;;  %16772 = vst [vmem:[#allocation45_spill] sm:$0xff] %v14597_v0  ;;  %v3751_v44 = vpop.f32.mrf.mxu1 }
 0x31f   : > { %v3938_v3 = vpop.f32.mrf.mxu2  ;;  %v3813_v51 = vadd.f32 %v3746_v34, %v3615_v61  ;;  %v11454_v34 = vld [vmem:[%s16604_s11 + $0x200] sm:$0xff] }
 0x320   : > { %4326 = vmatpush.bf16.msrb.mxu0 %v11454_v34 }
 0x321   : > { %v14599_v38 = vadd.f32 %v3938_v3, %v3813_v51 }
 0x322   : > { %v4137_v57 = vpop.f32.mrf.mxu3 }
 0x323   : > { %v14604_v20 = vadd.f32 %v4137_v57, %v14536_v49 }
 0x324   : > { %3980 = vmatmul.bf16.gmra.mxu2 %v14247_v56  ;;  %v3551_v31 = vpop.f32.mrf.mxu0  ;;  %v11470_v56 = vld [vmem:[%s16729_s13 + $0x40] sm:$0xff] }
 0x325   : > { %v3616_v18 = vadd.f32 %v3551_v31, %v14309_v45  ;;  %16773 = vst [vmem:[#allocation47_spill] sm:$0xff] %v14604_v20  ;;  %v3754_v14 = vpop.f32.mrf.mxu1  ;;  %v4510_v45 = vld [vmem:[#allocation3] sm:$0xff]  ;;  %4766 = vmatpush.bf16.msrb.mxu1 %v11470_v56 }
 0x326   : > { %3590 = vmatmul.bf16.gmra.mxu0 %v14239_v60  ;;  %v14621_v51 = vpack.c.bf16 %v4510_v45, %v4510_v45 }
 0x327   : > { %v3941_v40 = vpop.f32.mrf.mxu2  ;;  %v3814_v8 = vadd.f32 %v3749_v29, %v3616_v18  ;;  %4179 = vmatmul.bf16.gmra.mxu3 %v16766_v30  ;;  %3793 = vmatmul.bf16.gmra.mxu1 %v14264_v7  ;;  %v16774_v29 = vld [vmem:[#allocation38_spill] sm:$0xff]  ;;  %v16777_v7 = vld [vmem:[#allocation95_spill] sm:$0xff] }
 0x328   : > { %v11524_v30 = vld [vmem:[%s16729_s13 + $0x1f0] sm:$0xff]  ;;  %v4570_v34 = vshll.u32 %v14621_v51, 16 }
 0x329   : > { %v14607_v19 = vadd.f32 %v3941_v40, %v3814_v8  ;;  %v11462_v40 = vld [vmem:[%s16729_s13] sm:$0xff]  ;;  %v4567_v8 = vshrl.u32 %v14621_v51, 16  ;;  %5589 = vmatpush.bf16.msrb.mxu3 %v11524_v30 }
 0x32a   : > { %v4140_v53 = vpop.f32.mrf.mxu3  ;;  %4867 = vmatpush.bf16.msrb.mxu2 %v11462_v40 }
 0x32b   : > { %v14619_v3 = vadd.f32 %v4140_v53, %v14544_v2  ;;  %v4569_v53 = vrot.slane %v4567_v8, 4  ;;  %v16780_v8 = vld [vmem:[#allocation64_spill] sm:$0xff] }
 0x32c   : > { %v3553_v49 = vpop.f32.mrf.mxu0 }
 0x32d   : > { %v3617_v61 = vadd.f32 %v3553_v49, %v16774_v29  ;;  %16775 = vst [vmem:[#allocation27_spill] sm:$0xff] %v14619_v3  ;;  %v3756_v18 = vpop.f32.mrf.mxu1  ;;  %v4511_v49 = vld [vmem:[#allocation3 + $0x8] sm:$0x3] }
 0x32e   : > { %v14643_v40 = vpack.c.bf16 %v4511_v49, %v4511_v49 }
 0x32f   : > { %v3943_v12 = vpop.f32.mrf.mxu2  ;;  %v3815_v31 = vadd.f32 %v3751_v44, %v3617_v61  ;;  %v1940_v44 = vld [vmem:[#allocation2 + $0x198] sm:$0xff] }
 0x330   : > { %v14639_v11 = vpack.c.bf16 %v1940_v44, %v1940_v44  ;;  %v4516_v44 = vld [vmem:[#allocation3 + $0x30] sm:$0xff] }
 0x331   : > { %v14623_v57 = vadd.f32 %v3943_v12, %v3815_v31  ;;  %v4572_v12 = vrot.slane %v4570_v34, 5 }
 0x332   : > { %v4142_v45 = vpop.f32.mrf.mxu3  ;;  %16778 = vst [vmem:[#allocation48_spill] sm:$0xff] %v14639_v11 }
 0x333   : > { %v14636_v61 = vadd.f32 %v4142_v45, %v14555_v48  ;;  %v4576_v48 = vshll.u32 %v14643_v40, 16 }
 0x334   : > { %3985 = vmatmul.bf16.gmra.mxu2 %v14374_v50  ;;  %v3556_v2 = vpop.f32.mrf.mxu0  ;;  %v11826_v50 = vld [vmem:[#allocation2 + $0x8] sm:$0xff] }
 0x335   : > { %v3618_v56 = vadd.f32 %v3556_v2, %v14355_v27  ;;  %16776 = vst [vmem:[#allocation49_spill] sm:$0xff] %v14636_v61  ;;  %v14641_v30 = vpack.c.bf16 %v11826_v50, %v11826_v50  ;;  %v3759_v54 = vpop.f32.mrf.mxu1  ;;  %v4573_v2 = vor.u32 %v4572_v12, %v4569_v53  ;;  %v14656_v53 = vpack.c.bf16 %v4516_v44, %v4516_v44  ;;  %v4517_v44 = vld [vmem:[#allocation3 + $0x38] sm:$0x3] }
 0x336   : > { %3595 = vmatmul.bf16.gmra.mxu0 %v16777_v7 }
 0x337   : > { %v3946_v29 = vpop.f32.mrf.mxu2  ;;  %v3816_v31 = vadd.f32 %v3754_v14, %v3618_v56  ;;  %16779 = vst [vmem:[#allocation26_spill] sm:$0xff] %v14641_v30  ;;  %4184 = vmatmul.bf16.gmra.mxu3 %v16770_v28  ;;  %3798 = vmatmul.bf16.gmra.mxu1 %v16780_v8  ;;  %v3855_v14 = vunpack.c.l.b16 %v14639_v11  ;;  %v3856_v34 = vunpack.c.l.b16 %v14641_v30  ;;  %v4578_v28 = vrot.slane %v4576_v48, 5 }
 0x338   : > { %v4609_v0 = vshrl.u32 %v14656_v53, 16 }
 0x339   : > { %v14645_v27 = vadd.f32 %v3946_v29, %v3816_v31  ;;  %v4574_v31 = vrot.slane %v4573_v2, 4  ;;  %v3857_v61 = vpack.c.b16 %v3856_v34, %v3855_v14 }
 0x33a   : > { %v4145_v50 = vpop.f32.mrf.mxu3  ;;  %v4611_v14 = vrot.slane %v4609_v0, 4  ;;  %v4518_v0 = vld [vmem:[#allocation3 + $0x40] sm:$0xff] }
 0x33b   : > { %v14654_v29 = vadd.f32 %v4145_v50, %v14563_v16  ;;  %v4579_v20 = vsel %vm12731_vm4, %v4574_v31, %v4578_v28  ;;  %v14669_v28 = vpack.c.bf16 %v4517_v44, %v4517_v44 }
 0x33c   : > { %v3558_v56 = vpop.f32.mrf.mxu0  ;;  %v4695_v48 = vunpack.c.l.b16 %v4579_v20 }
 0x33d   : > { %v3619_v45 = vadd.f32 %v3558_v56, %v14366_v59  ;;  %16781 = vst [vmem:[#allocation51_spill] sm:$0xff] %v14654_v29  ;;  %v3761_v8 = vpop.f32.mrf.mxu1  ;;  %v4612_v59 = vshll.u32 %v14656_v53, 16 }
 0x33f   : > { %v3948_v49 = vpop.f32.mrf.mxu2  ;;  %v3817_v12 = vadd.f32 %v3756_v18, %v3619_v45  ;;  %v4614_v34 = vrot.slane %v4612_v59, 5  ;;  %v4618_v59 = vshll.u32 %v14669_v28, 16 }
 0x341   : > { %v14658_v17 = vadd.f32 %v3948_v49, %v3817_v12  ;;  %v16784_v49 = vld [vmem:[#allocation89_spill] sm:$0xff] }
 0x342   : > { %v4147_v2 = vpop.f32.mrf.mxu3 }
 0x343   : > { %v14666_v18 = vadd.f32 %v4147_v2, %v14577_v39  ;;  %v11485_v39 = vld [vmem:[%s16729_s13 + $0xb8] sm:$0xff]  ;;  %v4796_v2 = vunpack.c.l.b16 %v14621_v51 }
 0x344   : > { %3990 = vmatmul.bf16.gmra.mxu2 %v3857_v61  ;;  %v3561_v56 = vpop.f32.mrf.mxu0  ;;  %v16785_v61 = vld [vmem:[#allocation36_spill] sm:$0xff]  ;;  %5010 = vmatpush.bf16.msra.mxu1 %v11485_v39 }
 0x345   : > { %v3620_v16 = vadd.f32 %v3561_v56, %v14383_v41  ;;  %16783 = vst [vmem:[#allocation53_spill] sm:$0xff] %v14666_v18  ;;  %v3764_v31 = vpop.f32.mrf.mxu1  ;;  %v4703_v29 = vpack.c.b16 %v16785_v61, %v4695_v48  ;;  %v11549_v41 = vld [vmem:[%s16786_s15 + $0x78] sm:$0xff]  ;;  %v16787_v48 = vld [vmem:[#allocation32_spill] sm:$0xff] }
 0x346   : > { %3600 = vmatmul.bf16.gmra.mxu0 %v16784_v49  ;;  %v16534_v44 = vunpack.c.l.b16 %v16787_v48  ;;  %v11523_v39 = vld [vmem:[%s16729_s13 + $0x1e8] sm:$0xff] }
 0x347   : > { %v3951_v50 = vpop.f32.mrf.mxu2  ;;  %v3818_v45 = vadd.f32 %v3759_v54, %v3620_v16  ;;  %4189 = vmatmul.bf16.gmra.mxu3 %v14239_v60  ;;  %v4615_v54 = vor.u32 %v4614_v34, %v4611_v14  ;;  %4767 = vmatmul.bf16.vlgmr.msrb.gmra.mxu1 %v4703_v29  ;;  %v14688_v14 = vpack.c.bf16 %v4518_v0, %v4518_v0 }
 0x348   : > { %5968 = vmatpush.bf16.msra.mxu0 %v11549_v41  ;;  %v4620_v41 = vrot.slane %v4618_v59, 5  ;;  %5590 = vmatpush.bf16.msrb.mxu3 %v11523_v39  ;;  %v16791_v39 = vld [vmem:[#allocation41_spill] sm:$0xff] }
 0x349   : > { %v14671_v12 = vadd.f32 %v3951_v50, %v3818_v45  ;;  %v4616_v60 = vrot.slane %v4615_v54, 4  ;;  %v4626_v0 = vshll.u32 %v14688_v14, 16 }
 0x34a   : > { %v4150_v16 = vpop.f32.mrf.mxu3 }
 0x34b   : > { %v14686_v45 = vadd.f32 %v4150_v16, %v14588_v63  ;;  %v11484_v63 = vld [vmem:[%s16729_s13 + $0xb0] sm:$0xff]  ;;  %v4621_v54 = vsel %vm12731_vm4, %v4616_v60, %v4620_v41 }
 0x34c   : > { %v3563_v20 = vpop.f32.mrf.mxu0  ;;  %5011 = vmatpush.bf16.msra.mxu1 %v11484_v63  ;;  %v14705_v16 = vunpack.c.l.b16 %v4621_v54 }
 0x34d   : > { %v3621_v56 = vadd.f32 %v3563_v20, %v14392_v5  ;;  %16788 = vst [vmem:[#allocation52_spill] sm:$0xff] %v14686_v45  ;;  %v3766_v34 = vpop.f32.mrf.mxu1  ;;  %v4804_v5 = vpack.c.b16 %v16534_v44, %v4796_v2  ;;  %v4519_v2 = vld [vmem:[#allocation3 + $0x48] sm:$0x3]  ;;  %v4628_v44 = vrot.slane %v4626_v0, 5 }
 0x34e   : > { %16789 = vst [vmem:[#allocation56_spill] sm:$0xff] %v14705_v16 }
 0x34f   : > { %v3953_v50 = vpop.f32.mrf.mxu2  ;;  %v3819_v29 = vadd.f32 %v3761_v8, %v3621_v56  ;;  %v4623_v8 = vshrl.u32 %v14688_v14, 16 }
 0x351   : > { %v14690_v18 = vadd.f32 %v3953_v50, %v3819_v29  ;;  %v11493_v50 = vld [vmem:[%s16729_s13 + $0xf8] sm:$0xff]  ;;  %v4625_v41 = vrot.slane %v4623_v8, 4  ;;  %v11522_v8 = vld [vmem:[%s16729_s13 + $0x1e0] sm:$0xff] }
 0x352   : > { %v4152_v56 = vpop.f32.mrf.mxu3  ;;  %5122 = vmatpush.bf16.msra.mxu2 %v11493_v50  ;;  %5591 = vmatpush.bf16.msrb.mxu3 %v11522_v8  ;;  %v4029_v8 = vshrl.u32 %v14639_v11, 16 }
 0x353   : > { %v14711_v60 = vadd.f32 %v4152_v56, %v14599_v38  ;;  %v11483_v38 = vld [vmem:[%s16729_s13 + $0xa8] sm:$0xff]  ;;  %v4629_v0 = vor.u32 %v4628_v44, %v4625_v41 }
 0x354   : > { %4868 = vmatmul.bf16.vlgmr.msrb.gmra.mxu2 %v4804_v5  ;;  %v3566_v20 = vpop.f32.mrf.mxu0  ;;  %5012 = vmatpush.bf16.msra.mxu1 %v11483_v38 }
 0x355   : > { %v3622_v59 = vadd.f32 %v3566_v20, %v14415_v22  ;;  %16790 = vst [vmem:[#allocation57_spill] sm:$0xff] %v14711_v60  ;;  %v3769_v63 = vpop.f32.mrf.mxu1  ;;  %v14714_v22 = vpack.c.bf16 %v4519_v2, %v4519_v2  ;;  %v16792_v20 = vld [vmem:[#allocation37_spill] sm:$0xff]  ;;  %v11482_v2 = vld [vmem:[%s16729_s13 + $0xa0] sm:$0xff] }
 0x356   : > { %4327 = vmatmul.bf16.vlgmr.msrb.gmra.mxu0 %v16791_v39  ;;  %v14720_v45 = vpack.c.b16 %v14705_v16, %v16792_v20  ;;  %v16794_v39 = vld [vmem:[#allocation34_spill] sm:$0xff] }
 0x357   : > { %v3956_v29 = vpop.f32.mrf.mxu2  ;;  %v3820_v5 = vadd.f32 %v3764_v31, %v3622_v59  ;;  %v11492_v31 = vld [vmem:[%s16729_s13 + $0xf0] sm:$0xff]  ;;  %4194 = vmatmul.bf16.gmra.mxu3 %v16777_v7  ;;  %v4632_v56 = vshll.u32 %v14714_v22, 16  ;;  %v11491_v7 = vld [vmem:[%s16729_s13 + $0xe8] sm:$0xff]  ;;  %v16537_v38 = vunpack.c.l.b16 %v16794_v39 }
 0x358   : > { %4772 = vmatmul.bf16.gmra.mxu1 %v14720_v45  ;;  %5123 = vmatpush.bf16.msra.mxu2 %v11492_v31  ;;  %v4630_v31 = vrot.slane %v4629_v0, 4 }
 0x359   : > { %v14716_v54 = vadd.f32 %v3956_v29, %v3820_v5  ;;  %v4042_v5 = vshrl.u32 %v14641_v30, 16  ;;  %v4634_v16 = vrot.slane %v4632_v56, 5  ;;  %5013 = vmatpush.bf16.msra.mxu1 %v11482_v2  ;;  %v11490_v56 = vld [vmem:[%s16729_s13 + $0xe0] sm:$0xff]  ;;  %v14769_v2 = vpack.c.bf16 %v1942_v35, %v1942_v35 }
 0x35a   : > { %v4155_v29 = vpop.f32.mrf.mxu3 }
 0x35b   : > { %v14743_v41 = vadd.f32 %v4155_v29, %v14607_v19  ;;  %v16795_v19 = vunpack.c.l.b16 %v14656_v53  ;;  %v4031_v29 = vrot.slane %v4029_v8, 4  ;;  %v11489_v8 = vld [vmem:[%s16729_s13 + $0xd8] sm:$0xff] }
 0x35c   : > { %v3568_v59 = vpop.f32.mrf.mxu0  ;;  %5124 = vmatpush.bf16.msra.mxu2 %v11491_v7 }
 0x35d   : > { %v3623_v50 = vadd.f32 %v3568_v59, %v14425_v46  ;;  %16793 = vst [vmem:[#allocation59_spill] sm:$0xff] %v14743_v41  ;;  %v4032_v46 = vshll.u32 %v14639_v11, 16  ;;  %v4038_v59 = vshll.u32 %v14641_v30, 16  ;;  %v3771_v42 = vpop.f32.mrf.mxu1  ;;  %v14756_v0 = vpack.c.b16 %v16795_v19, %v16537_v38  ;;  %v11520_v38 = vld [vmem:[%s16729_s13 + $0x1d0] sm:$0xff] }
 0x35e   : > { %v4044_v19 = vrot.slane %v4042_v5, 4  ;;  %v4048_v41 = vshll.u32 %v14769_v2, 16 }
 0x35f   : > { %v3958_v44 = vpop.f32.mrf.mxu2  ;;  %v3821_v60 = vadd.f32 %v3766_v34, %v3623_v50  ;;  %16796 = vst [vmem:[#allocation61_spill] sm:$0xff] %v14756_v0  ;;  %v11521_v34 = vld [vmem:[%s16729_s13 + $0x1d8] sm:$0xff]  ;;  %v4034_v7 = vrot.slane %v4032_v46, 5 }
 0x360   : > { %v11481_v50 = vld [vmem:[%s16729_s13 + $0x98] sm:$0xff]  ;;  %5592 = vmatpush.bf16.msrb.mxu3 %v11521_v34  ;;  %5125 = vmatpush.bf16.msra.mxu2 %v11490_v56 }
 0x361   : > { %v14750_v47 = vadd.f32 %v3958_v44, %v3821_v60  ;;  %v4635_v60 = vsel %vm12731_vm4, %v4630_v31, %v4634_v16  ;;  %v4040_v44 = vrot.slane %v4038_v59, 5  ;;  %5014 = vmatpush.bf16.msra.mxu1 %v11481_v50  ;;  %v11480_v16 = vld [vmem:[%s16729_s13 + $0x90] sm:$0xff]  ;;  %v16797_v50 = vld [vmem:[#allocation44_spill] sm:$0xff]  ;;  %v4035_v56 = vor.u32 %v4034_v7, %v4031_v29 }
 0x362   : > { %v4157_v31 = vpop.f32.mrf.mxu3  ;;  %v14785_v59 = vunpack.c.l.b16 %v4635_v60  ;;  %v11488_v60 = vld [vmem:[%s16729_s13 + $0xd0] sm:$0xff] }
 0x363   : > { %v14783_v46 = vadd.f32 %v4157_v31, %v14623_v57  ;;  %v4045_v30 = vor.u32 %v4044_v19, %v4040_v44  ;;  %v11519_v57 = vld [vmem:[%s16729_s13 + $0x1c8] sm:$0xff]  ;;  %v4036_v29 = vrot.slane %v4035_v56, 4  ;;  %v4050_v19 = vrot.slane %v4048_v41, 5 }
 0x364   : > { %4873 = vmatmul.bf16.gmra.mxu2 %v14756_v0  ;;  %v3571_v11 = vpop.f32.mrf.mxu0  ;;  %5593 = vmatpush.bf16.msrb.mxu3 %v11520_v38  ;;  %v16798_v0 = vld [vmem:[#allocation50_spill] sm:$0xff]  ;;  %v11479_v38 = vld [vmem:[%s16729_s13 + $0x88] sm:$0xff] }
 0x365   : > { %v3624_v35 = vadd.f32 %v3571_v11, %v14436_v24  ;;  %v3774_v24 = vpop.f32.mrf.mxu1  ;;  %5015 = vmatpush.bf16.msra.mxu1 %v11480_v16  ;;  %5126 = vmatpush.bf16.msra.mxu2 %v11489_v8  ;;  %v14793_v23 = vpack.c.b16 %v16798_v0, %v14785_v59  ;;  %v4046_v7 = vrot.slane %v4045_v30, 4  ;;  %v11518_v16 = vld [vmem:[%s16729_s13 + $0x1c0] sm:$0xff]  ;;  %v11487_v30 = vld [vmem:[%s16729_s13 + $0xc8] sm:$0xff] }
 0x366   : > { %4332 = vmatmul.bf16.gmra.mxu0 %v16797_v50 }
 0x367   : > { %v3961_v5 = vpop.f32.mrf.mxu2  ;;  %v3822_v34 = vadd.f32 %v3769_v63, %v3624_v35  ;;  %v11548_v63 = vld [vmem:[%s16786_s15 + $0x70] sm:$0xff]  ;;  %4199 = vmatmul.bf16.gmra.mxu3 %v16784_v49  ;;  %v11478_v49 = vld [vmem:[%s16729_s13 + $0x80] sm:$0xff] }
 0x368   : > { %4777 = vmatmul.bf16.gmra.mxu1 %v14793_v23  ;;  %5594 = vmatpush.bf16.msrb.mxu3 %v11519_v57  ;;  %v16542_v57 = vunpack.c.l.b16 %v14688_v14 }
 0x369   : > { %v14789_v11 = vadd.f32 %v3961_v5, %v3822_v34  ;;  %5969 = vmatpush.bf16.msra.mxu0 %v11548_v63  ;;  %5016 = vmatpush.bf16.msra.mxu1 %v11479_v38  ;;  %v16799_v5 = vld [vmem:[#allocation60_spill] sm:$0xff]  ;;  %v4041_v63 = vsel %vm12731_vm4, %v4036_v29, %v4040_v44 }
 0x36a   : > { %v4160_v8 = vpop.f32.mrf.mxu3  ;;  %v16541_v34 = vunpack.c.l.b16 %v16799_v5  ;;  %5127 = vmatpush.bf16.msra.mxu2 %v11488_v60  ;;  %v4069_v44 = vunpack.c.l.b16 %v4041_v63  ;;  %v16802_v63 = vld [vmem:[#allocation83_spill] sm:$0xff] }
 0x36b   : > { %v14821_v50 = vadd.f32 %v4160_v8, %v14645_v27 }
 0x36c   : > { %v3573_v35 = vpop.f32.mrf.mxu0  ;;  %5595 = vmatpush.bf16.msrb.mxu3 %v11518_v16  ;;  %v14834_v27 = vpack.c.b16 %v16541_v34, %v16542_v57  ;;  %v16805_v34 = vld [vmem:[#allocation63_spill] sm:$0xff] }
 0x36d   : > { %v3625_v31 = vadd.f32 %v3573_v35, %v14442_v13  ;;  %v4051_v13 = vsel %vm12731_vm4, %v4046_v7, %v4050_v19  ;;  %v3776_v38 = vpop.f32.mrf.mxu1  ;;  %5017 = vmatpush.bf16.msra.mxu1 %v11478_v49  ;;  %v16544_v57 = vunpack.c.l.b16 %v16805_v34 }
 0x36e   : > { %5128 = vmatpush.bf16.msra.mxu2 %v11487_v30  ;;  %v4070_v29 = vunpack.c.l.b16 %v4051_v13 }
 0x36f   : > { %v3963_v41 = vpop.f32.mrf.mxu2  ;;  %v3823_v56 = vadd.f32 %v3771_v42, %v3625_v31  ;;  %v11486_v42 = vld [vmem:[%s16729_s13 + $0xc0] sm:$0xff] }
 0x370   : > { %v4071_v31 = vpack.c.b16 %v4070_v29, %v4069_v44  ;;  %v4899_v29 = vrot.slane %v14643_v40, 5  ;;  %v11557_v40 = vld [vmem:[%s16786_s15 + $0xb8] sm:$0xff] }
 0x371   : > { %v14828_v60 = vadd.f32 %v3963_v41, %v3823_v56  ;;  %v16801_v56 = vld [vmem:[#allocation74_spill] sm:$0xff]  ;;  %6158 = vmatpush.bf16.msra.mxu3 %v11557_v40  ;;  %v11547_v40 = vld [vmem:[%s16786_s15 + $0x68] sm:$0xff] }
 0x372   : > { %v4162_v16 = vpop.f32.mrf.mxu3  ;;  %5129 = vmatpush.bf16.msra.mxu2 %v11486_v42  ;;  %v14849_v13 = vpack.c.b16 %v16802_v63, %v16801_v56  ;;  %5970 = vmatpush.bf16.msra.mxu0 %v11547_v40  ;;  %v16807_v40 = vld [vmem:[#allocation35_spill] sm:$0xff] }
 0x373   : > { %v14842_v49 = vadd.f32 %v4162_v16, %v14658_v17  ;;  %v16803_v17 = vld [vmem:[#allocation67_spill] sm:$0xff] }
 0x374   : > { %4878 = vmatmul.bf16.gmra.mxu2 %v14834_v27  ;;  %v3576_v7 = vpop.f32.mrf.mxu0  ;;  %v16543_v16 = vunpack.c.l.b16 %v16803_v17 }
 0x375   : > { %v3626_v19 = vadd.f32 %v3576_v7, %v14456_v4  ;;  %v3779_v30 = vpop.f32.mrf.mxu1 }
 0x376   : > { %4337 = vmatmul.bf16.gmra.mxu0 %v16743_v10 }
 0x377   : > { %v3966_v35 = vpop.f32.mrf.mxu2  ;;  %v3824_v8 = vadd.f32 %v3774_v24, %v3626_v19  ;;  %4204 = vmatmul.bf16.gmra.mxu3 %v4071_v31  ;;  %v9733_v24 = vrot.slane %v14621_v51, 9  ;;  %v9734_v19 = vrot.slane %v16787_v48, 9  ;;  %v14868_v51 = vpack.c.b16 %v16543_v16, %v16544_v57  ;;  %v11556_v16 = vld [vmem:[%s16786_s15 + $0xb0] sm:$0xff] }
 0x378   : > { %4782 = vmatmul.bf16.gmra.mxu1 %v14849_v13  ;;  %6159 = vmatpush.bf16.msra.mxu3 %v11556_v16  ;;  %v11554_v16 = vld [vmem:[%s16786_s15 + $0xa0] sm:$0xff] }
 0x379   : > { %v14845_v41 = vadd.f32 %v3966_v35, %v3824_v8  ;;  %v16804_v35 = vld [vmem:[#allocation33_spill] sm:$0xff] }
 0x37a   : > { %v4165_v7 = vpop.f32.mrf.mxu3  ;;  %v4903_v31 = vrot.slane %v16804_v35, 5 }
 0x37b   : > { %16800 = vst [vmem:[#allocation62_spill] sm:$0xff] %v14845_v41  ;;  %v14856_v10 = vadd.f32 %v4165_v7, %v14671_v12 }
 0x37c   : > { %v3578_v4 = vpop.f32.mrf.mxu0 }
 0x37d   : > { %v3627_v42 = vadd.f32 %v3578_v4, %v14462_v55  ;;  %v3781_v41 = vpop.f32.mrf.mxu1  ;;  %v4900_v4 = vsel %vm12687_vm14, %v9733_v24, %v4899_v29 }
 0x37e   : > { %v4946_v35 = vunpack.c.l.b16 %v4900_v4  ;;  %v11501_v4 = vld [vmem:[%s16729_s13 + $0x138] sm:$0xff] }
 0x37f   : > { %v3968_v44 = vpop.f32.mrf.mxu2  ;;  %v3825_v8 = vadd.f32 %v3776_v38, %v3627_v42  ;;  %v14877_v38 = vsel %vm12687_vm14, %v9734_v19, %v4903_v31  ;;  %5247 = vmatpush.bf16.msrb.mxu1 %v11501_v4  ;;  %v4907_v4 = vrot.slane %v16807_v40, 5 }
 0x381   : > { %v14862_v55 = vadd.f32 %v3968_v44, %v3825_v8  ;;  %v16545_v8 = vunpack.c.l.b16 %v14877_v38 }
 0x382   : > { %v4167_v44 = vpop.f32.mrf.mxu3 }
 0x383   : > { %v14886_v24 = vadd.f32 %v4167_v44, %v14690_v18  ;;  %v11555_v18 = vld [vmem:[%s16786_s15 + $0xa8] sm:$0xff]  ;;  %v9736_v44 = vrot.slane %v14656_v53, 9 }
 0x384   : > { %4883 = vmatmul.bf16.gmra.mxu2 %v14868_v51  ;;  %v3581_v42 = vpop.f32.mrf.mxu0  ;;  %6160 = vmatpush.bf16.msra.mxu3 %v11555_v18  ;;  %v16809_v18 = vunpack.c.l.b16 %v16794_v39 }
 0x385   : > { %v3628_v7 = vadd.f32 %v3581_v42, %v14473_v25  ;;  %v3784_v19 = vpop.f32.mrf.mxu1  ;;  %v4954_v25 = vpack.c.b16 %v16545_v8, %v4946_v35 }
 0x386   : > { %4342 = vmatmul.bf16.gmra.mxu0 %v16750_v37 }
 0x387   : > { %v3971_v57 = vpop.f32.mrf.mxu2  ;;  %v3826_v29 = vadd.f32 %v3779_v30, %v3628_v7  ;;  %5596 = vmatmul.bf16.vlgmr.msrb.gmra.mxu3 %v14720_v45  ;;  %v4911_v45 = vrot.slane %v14669_v28, 5  ;;  %v11553_v28 = vld [vmem:[%s16786_s15 + $0x98] sm:$0xff] }
 0x388   : > { %5018 = vmatmul.bf16.vlgmr.msra.gmra.mxu1 %v4954_v25  ;;  %v9735_v25 = vrot.slane %v16794_v39, 9  ;;  %6161 = vmatpush.bf16.msra.mxu3 %v11554_v16 }
 0x389   : > { %v14889_v31 = vadd.f32 %v3971_v57, %v3826_v29 }
 0x38a   : > { %v4170_v30 = vpop.f32.mrf.mxu3  ;;  %v14932_v39 = vsel %vm12687_vm14, %v9735_v25, %v4907_v4 }
 0x38b   : > { %v14908_v7 = vadd.f32 %v4170_v30, %v14716_v54  ;;  %v11500_v54 = vld [vmem:[%s16729_s13 + $0x130] sm:$0xff] }
 0x38c   : > { %v3583_v37 = vpop.f32.mrf.mxu0  ;;  %5248 = vmatpush.bf16.msrb.mxu1 %v11500_v54  ;;  %6162 = vmatpush.bf16.msra.mxu3 %v11553_v28 }
 0x38d   : > { %v3629_v57 = vadd.f32 %v3583_v37, %v14479_v33  ;;  %v3786_v29 = vpop.f32.mrf.mxu1  ;;  %v16808_v33 = vunpack.c.l.b16 %v16787_v48 }
 0x38f   : > { %v3973_v42 = vpop.f32.mrf.mxu2  ;;  %v3827_v35 = vadd.f32 %v3781_v41, %v3629_v57  ;;  %v5066_v37 = vpack.c.b16 %v16809_v18, %v16808_v33  ;;  %v14928_v41 = vsel %vm12687_vm14, %v9736_v44, %v4911_v45  ;;  %v11552_v44 = vld [vmem:[%s16786_s15 + $0x90] sm:$0xff] }
 0x390   : > { %v16546_v16 = vunpack.c.l.b16 %v14928_v41  ;;  %6163 = vmatpush.bf16.msra.mxu3 %v11552_v44 }
 0x391   : > { %v14918_v8 = vadd.f32 %v3973_v42, %v3827_v35  ;;  %v11509_v42 = vld [vmem:[%s16729_s13 + $0x178] sm:$0xff] }
 0x392   : > { %v4172_v30 = vpop.f32.mrf.mxu3  ;;  %5363 = vmatpush.bf16.msrb.mxu2 %v11509_v42 }
 0x393   : > { %v14943_v35 = vadd.f32 %v4172_v30, %v14750_v47  ;;  %v11499_v47 = vld [vmem:[%s16729_s13 + $0x128] sm:$0xff] }
 0x394   : > { %5130 = vmatmul.bf16.vlgmr.msra.gmra.mxu2 %v5066_v37  ;;  %v3586_v48 = vpop.f32.mrf.mxu0  ;;  %5249 = vmatpush.bf16.msrb.mxu1 %v11499_v47  ;;  %v11498_v37 = vld [vmem:[%s16729_s13 + $0x120] sm:$0xff]  ;;  %v16810_v47 = vunpack.c.l.b16 %v14656_v53  ;;  %v11588_v53 = vld [vmem:[%s16786_s15 + $0x1b0] sm:$0xff] }
 0x395   : > { %v3630_v57 = vadd.f32 %v3586_v48, %v14493_v58  ;;  %v4948_v58 = vunpack.c.l.b16 %v14932_v39  ;;  %v3789_v40 = vpop.f32.mrf.mxu1  ;;  %v11507_v48 = vld [vmem:[%s16729_s13 + $0x168] sm:$0xff] }
 0x396   : > { %4347 = vmatmul.bf16.gmra.mxu0 %v16754_v9  ;;  %v11508_v9 = vld [vmem:[%s16729_s13 + $0x170] sm:$0xff] }
 0x397   : > { %v3976_v45 = vpop.f32.mrf.mxu2  ;;  %v3828_v25 = vadd.f32 %v3784_v19, %v3630_v57  ;;  %v14953_v33 = vpack.c.b16 %v16546_v16, %v4948_v58  ;;  %v11551_v19 = vld [vmem:[%s16786_s15 + $0x88] sm:$0xff]  ;;  %5601 = vmatmul.bf16.gmra.mxu3 %v14793_v23  ;;  %5364 = vmatpush.bf16.msrb.mxu2 %v11508_v9  ;;  %v11550_v23 = vld [vmem:[%s16786_s15 + $0x80] sm:$0xff]  ;;  %v16811_v9 = vunpack.c.l.b16 %v14688_v14 }
 0x398   : > { %6164 = vmatpush.bf16.msra.mxu3 %v11551_v19  ;;  %5250 = vmatpush.bf16.msrb.mxu1 %v11498_v37  ;;  %v11506_v37 = vld [vmem:[%s16729_s13 + $0x160] sm:$0xff] }
 0x399   : > { %v14947_v4 = vadd.f32 %v3976_v45, %v3828_v25  ;;  %5023 = vmatmul.bf16.gmra.mxu1 %v14953_v33  ;;  %v9737_v45 = vrot.slane %v14688_v14, 9  ;;  %v5067_v19 = vpack.c.b16 %v16811_v9, %v16810_v47  ;;  %v11505_v47 = vld [vmem:[%s16729_s13 + $0x158] sm:$0xff] }
 0x39a   : > { %v4175_v28 = vpop.f32.mrf.mxu3 }
 0x39b   : > { %v14977_v30 = vadd.f32 %v4175_v28, %v14789_v11  ;;  %5365 = vmatpush.bf16.msrb.mxu2 %v11507_v48  ;;  %v11496_v28 = vld [vmem:[%s16729_s13 + $0x110] sm:$0xff] }
 0x39c   : > { %v3588_v18 = vpop.f32.mrf.mxu0  ;;  %6165 = vmatpush.bf16.msra.mxu3 %v11550_v23 }
 0x39d   : > { %v3631_v54 = vadd.f32 %v3588_v18, %v14500_v15  ;;  %v3791_v44 = vpop.f32.mrf.mxu1  ;;  %v4915_v15 = vrot.slane %v14714_v22, 5  ;;  %v16812_v18 = vld [vmem:[#allocation76_spill] sm:$0xff]  ;;  %v11497_v22 = vld [vmem:[%s16729_s13 + $0x118] sm:$0xff] }
 0x39e   : > { %v5507_v16 = vshrl.u32 %v16812_v18, 16  ;;  %v5510_v11 = vshll.u32 %v16812_v18, 16  ;;  %5251 = vmatpush.bf16.msrb.mxu1 %v11497_v22 }
 0x39f   : > { %v3978_v57 = vpop.f32.mrf.mxu2  ;;  %v3829_v42 = vadd.f32 %v3786_v29, %v3631_v54  ;;  %v11589_v29 = vld [vmem:[%s16786_s15 + $0x1b8] sm:$0xff]  ;;  %v15003_v54 = vsel %vm12687_vm14, %v9737_v45, %v4915_v15  ;;  %5366 = vmatpush.bf16.msrb.mxu2 %v11506_v37 }
 0x3a0   : > { %6547 = vmatpush.bf16.msrb.mxu3 %v11589_v29  ;;  %v4950_v15 = vunpack.c.l.b16 %v15003_v54  ;;  %v11512_v54 = vld [vmem:[%s16729_s13 + $0x190] sm:$0xff] }
 0x3a1   : > { %v14981_v25 = vadd.f32 %v3978_v57, %v3829_v42  ;;  %v5509_v57 = vrot.slane %v5507_v16, 4  ;;  %v5512_v42 = vrot.slane %v5510_v11, 5  ;;  %v16813_v16 = vld [vmem:[#allocation75_spill] sm:$0xff] }
 0x3a2   : > { %v4177_v23 = vpop.f32.mrf.mxu3  ;;  %5252 = vmatpush.bf16.msrb.mxu1 %v11496_v28  ;;  %v16814_v11 = vunpack.c.l.b16 %v16813_v16 }
 0x3a3   : > { %5367 = vmatpush.bf16.msrb.mxu2 %v11505_v47  ;;  %v5513_v22 = vor.u32 %v5512_v42, %v5509_v57  ;;  %v11503_v47 = vld [vmem:[%s16729_s13 + $0x148] sm:$0xff] }
 0x3a4   : > { %5135 = vmatmul.bf16.gmra.mxu2 %v5067_v19  ;;  %v3591_v14 = vpop.f32.mrf.mxu0  ;;  %v15013_v19 = vadd.f32 %v4177_v23, %v14828_v60  ;;  %6548 = vmatpush.bf16.msrb.mxu3 %v11588_v53  ;;  %v15023_v29 = vpack.c.b16 %v16814_v11, %v4950_v15  ;;  %v16815_v60 = vld [vmem:[#allocation79_spill] sm:$0xff]  ;;  %v11495_v53 = vld [vmem:[%s16729_s13 + $0x108] sm:$0xff] }
 0x3a5   : > { %v3632_v48 = vadd.f32 %v3591_v14, %v14512_v6  ;;  %v3794_v18 = vpop.f32.mrf.mxu1  ;;  %v5516_v37 = vshll.u32 %v16815_v60, 16  ;;  %v11504_v14 = vld [vmem:[%s16729_s13 + $0x150] sm:$0xff]  ;;  %v11494_v23 = vld [vmem:[%s16729_s13 + $0x100] sm:$0xff]  ;;  %v5514_v57 = vrot.slane %v5513_v22, 4  ;;  %v16816_v60 = vunpack.c.l.b16 %v16799_v5  ;;  %v11585_v22 = vld [vmem:[%s16786_s15 + $0x198] sm:$0xff] }
 0x3a6   : > { %4352 = vmatmul.bf16.gmra.mxu0 %v16756_v52  ;;  %v11546_v52 = vld [vmem:[%s16786_s15 + $0x60] sm:$0xff]  ;;  %5253 = vmatpush.bf16.msrb.mxu1 %v11495_v53  ;;  %v11584_v5 = vld [vmem:[%s16786_s15 + $0x190] sm:$0xff] }
 0x3a7   : > { %v3981_v9 = vpop.f32.mrf.mxu2  ;;  %v3830_v45 = vadd.f32 %v3789_v40, %v3632_v48  ;;  %v11587_v40 = vld [vmem:[%s16786_s15 + $0x1a8] sm:$0xff]  ;;  %5606 = vmatmul.bf16.gmra.mxu3 %v14849_v13  ;;  %5971 = vmatpush.bf16.msra.mxu0 %v11546_v52  ;;  %v11586_v48 = vld [vmem:[%s16786_s15 + $0x1a0] sm:$0xff]  ;;  %v5518_v42 = vrot.slane %v5516_v37, 5  ;;  %v16817_v52 = vunpack.c.l.b16 %v16805_v34 }
 0x3a8   : > { %6549 = vmatpush.bf16.msrb.mxu3 %v11587_v40  ;;  %5368 = vmatpush.bf16.msrb.mxu2 %v11504_v14 }
 0x3a9   : > { %v15017_v6 = vadd.f32 %v3981_v9, %v3830_v45  ;;  %5028 = vmatmul.bf16.gmra.mxu1 %v15023_v29  ;;  %v5068_v40 = vpack.c.b16 %v16817_v52, %v16816_v60  ;;  %v16820_v52 = vunpack.c.l.b16 %v16803_v17  ;;  %v11517_v17 = vld [vmem:[%s16729_s13 + $0x1b8] sm:$0xff] }
 0x3aa   : > { %5254 = vmatpush.bf16.msrb.mxu1 %v11494_v23 }
 0x3ac   : > { %v3593_v28 = vpop.f32.mrf.mxu0  ;;  %6550 = vmatpush.bf16.msrb.mxu3 %v11586_v48  ;;  %5369 = vmatpush.bf16.msrb.mxu2 %v11503_v47  ;;  %v16818_v48 = vld [vmem:[#allocation82_spill] sm:$0xff] }
 0x3ad   : > { %v3633_v13 = vadd.f32 %v3593_v28, %v14519_v1  ;;  %v3796_v16 = vpop.f32.mrf.mxu1  ;;  %v5519_v1 = vsel %vm12731_vm4, %v5514_v57, %v5518_v42  ;;  %v11583_v57 = vld [vmem:[%s16786_s15 + $0x188] sm:$0xff]  ;;  %vm7880_vm4 = vsmask.f32 3340 }
 0x3ae   : > { %v5537_v53 = vunpack.c.l.b16 %v5519_v1  ;;  %v16819_v42 = vld [vmem:[#allocation80_spill] sm:$0xff]  ;;  %5469 = vmatpush.bf16.msra.mxu1 %v11517_v17 }
 0x3af   : > { %v3983_v9 = vpop.f32.mrf.mxu2  ;;  %v3831_v45 = vadd.f32 %v3791_v44, %v3633_v13  ;;  %v11502_v44 = vld [vmem:[%s16729_s13 + $0x140] sm:$0xff] }
 0x3b0   : > { %6551 = vmatpush.bf16.msrb.mxu3 %v11585_v22  ;;  %5370 = vmatpush.bf16.msrb.mxu2 %v11502_v44  ;;  %v5538_v23 = vpack.c.b16 %v5537_v53, %v16818_v48 }
 0x3b1   : > { %v15050_v11 = vadd.f32 %v3983_v9, %v3831_v45 }
 0x3b4   : > { %5140 = vmatmul.bf16.gmra.mxu2 %v5068_v40  ;;  %v3596_v37 = vpop.f32.mrf.mxu0  ;;  %6552 = vmatpush.bf16.msrb.mxu3 %v11584_v5  ;;  %v16821_v40 = vld [vmem:[#allocation71_spill] sm:$0xff] }
 0x3b5   : > { %v3634_v3 = vadd.f32 %v3596_v37, %v14534_v62  ;;  %v3799_v28 = vpop.f32.mrf.mxu1  ;;  %v11582_v62 = vld [vmem:[%s16786_s15 + $0x180] sm:$0xff]  ;;  %v16822_v1 = vunpack.c.l.b16 %v16821_v40 }
 0x3b6   : > { %4357 = vmatmul.bf16.gmra.mxu0 %v16758_v36  ;;  %v16829_v40 = vld [vmem:[#allocation56_spill] sm:$0xff] }
 0x3b7   : > { %v3986_v34 = vpop.f32.mrf.mxu2  ;;  %v3832_v14 = vadd.f32 %v3794_v18, %v3634_v3  ;;  %5611 = vmatmul.bf16.gmra.mxu3 %v5538_v23  ;;  %v5069_v22 = vpack.c.b16 %v16822_v1, %v16820_v52  ;;  %v11545_v3 = vld [vmem:[%s16786_s15 + $0x58] sm:$0xff]  ;;  %v5192_v1 = vpack.c.b16 %v14785_v59, %v16829_v40  ;;  %v11514_v59 = vld [vmem:[%s16729_s13 + $0x1a0] sm:$0xff]  ;;  %v16835_v40 = vpack.c.b16 %v16801_v56, %v16798_v0  ;;  %v11527_v56 = vld [vmem:[%s16729_s13 + $0x208] sm:$0xff] }
 0x3b8   : > { %6553 = vmatpush.bf16.msrb.mxu3 %v11583_v57  ;;  %5972 = vmatpush.bf16.msra.mxu0 %v11545_v3 }
 0x3b9   : > { %v15070_v13 = vadd.f32 %v3986_v34, %v3832_v14  ;;  %5033 = vmatmul.bf16.gmra.mxu1 %v16819_v42  ;;  %v16823_v34 = vld [vmem:[#allocation77_spill] sm:$0xff] }
 0x3bc   : > { %v3598_v47 = vpop.f32.mrf.mxu0  ;;  %6554 = vmatpush.bf16.msrb.mxu3 %v11582_v62 }
 0x3bd   : > { %v3635_v36 = vadd.f32 %v3598_v47, %v14541_v32  ;;  %v3801_v45 = vpop.f32.mrf.mxu1  ;;  %v16825_v47 = vunpack.c.l.b16 %v14877_v38  ;;  %v16827_v38 = vld [vmem:[#allocation42_spill] sm:$0xff] }
 0x3bf   : > { %v3988_v18 = vpop.f32.mrf.mxu2  ;;  %v3833_v9 = vadd.f32 %v3796_v16, %v3635_v36  ;;  %v5307_v62 = vpack.c.b16 %v4948_v58, %v16825_v47  ;;  %v11513_v47 = vld [vmem:[%s16729_s13 + $0x198] sm:$0xff] }
 0x3c1   : > { %v15080_v60 = vadd.f32 %v3988_v18, %v3833_v9 }
 0x3c4   : > { %5145 = vmatmul.bf16.gmra.mxu2 %v5069_v22  ;;  %v3601_v44 = vpop.f32.mrf.mxu0  ;;  %v11533_v22 = vld [vmem:[%s16729_s13 + $0x238] sm:$0xff] }
 0x3c5   : > { %v3636_v37 = vadd.f32 %v3601_v44, %v14553_v43  ;;  %v4768_v32 = vpop.f32.mrf.mxu1  ;;  %v16824_v43 = vpack.c.b16 %v16792_v20, %v16785_v61  ;;  %v11516_v61 = vld [vmem:[%s16729_s13 + $0x1b0] sm:$0xff]  ;;  %v11515_v44 = vld [vmem:[%s16729_s13 + $0x1a8] sm:$0xff]  ;;  %5698 = vmatpush.bf16.msra.mxu2 %v11533_v22 }
 0x3c6   : > { %4362 = vmatmul.bf16.gmra.mxu0 %v16760_v26  ;;  %5470 = vmatpush.bf16.msra.mxu1 %v11516_v61  ;;  %v11528_v22 = vld [vmem:[%s16729_s13 + $0x210] sm:$0xff] }
 0x3c7   : > { %v3991_v53 = vpop.f32.mrf.mxu2  ;;  %v3834_v5 = vadd.f32 %v3799_v28, %v3636_v37  ;;  %6166 = vmatmul.bf16.vlgmr.msra.gmra.mxu3 %v16823_v34  ;;  %v16830_v37 = vld [vmem:[#allocation39_spill] sm:$0xff] }
 0x3c9   : > { %v15088_v16 = vadd.f32 %v3991_v53, %v3834_v5  ;;  %5255 = vmatmul.bf16.vlgmr.msrb.gmra.mxu1 %v16824_v43  ;;  %v11532_v53 = vld [vmem:[%s16729_s13 + $0x230] sm:$0xff] }
 0x3ca   : > { %5471 = vmatpush.bf16.msra.mxu1 %v11515_v44  ;;  %5699 = vmatpush.bf16.msra.mxu2 %v11532_v53  ;;  %v11510_v44 = vld [vmem:[%s16729_s13 + $0x180] sm:$0xff] }
 0x3cc   : > { %v3603_v14 = vpop.f32.mrf.mxu0 }
 0x3cd   : > { %v3637_v26 = vadd.f32 %v3603_v14, %v14560_v21  ;;  %v4770_v57 = vpop.f32.mrf.mxu1  ;;  %v15117_v21 = vld [vmem:[%s16826_s12] ss:$0 sm:$0xff] }
 0x3ce   : > { %5472 = vmatpush.bf16.msra.mxu1 %v11514_v59 }
 0x3cf   : > { %v3993_v28 = vpop.f32.mrf.mxu2  ;;  %v3835_v23 = vadd.f32 %v3801_v45, %v3637_v26  ;;  %v16828_v45 = vld [vmem:[#allocation73_spill] sm:$0xff]  ;;  %v16832_v26 = vunpack.c.l.b16 %v14928_v41  ;;  %v11530_v41 = vld [vmem:[%s16729_s13 + $0x220] sm:$0xff] }
 0x3d1   : > { %v15108_v36 = vadd.f32 %v3993_v28, %v3835_v23  ;;  %v5308_v28 = vpack.c.b16 %v4950_v15, %v16832_v26  ;;  %v11531_v23 = vld [vmem:[%s16729_s13 + $0x228] sm:$0xff]  ;;  %v16838_v26 = vld [vmem:[#allocation27_spill] sm:$0xff] }
 0x3d2   : > { %5700 = vmatpush.bf16.msra.mxu2 %v11531_v23  ;;  %5473 = vmatpush.bf16.msra.mxu1 %v11513_v47  ;;  %v16833_v15 = vld [vmem:[#allocation45_spill] sm:$0xff] }
 0x3d4   : > { %5371 = vmatmul.bf16.vlgmr.msrb.gmra.mxu2 %v5307_v62  ;;  %v4328_v20 = vpop.f32.mrf.mxu0 }
 0x3d5   : > { %v4408_v18 = vadd.f32 %v4328_v20, %v16827_v38  ;;  %v4773_v52 = vpop.f32.mrf.mxu1 }
 0x3d6   : > { %4367 = vmatmul.bf16.gmra.mxu0 %v16828_v45  ;;  %5701 = vmatpush.bf16.msra.mxu2 %v11530_v41  ;;  %v11544_v45 = vld [vmem:[%s16786_s15 + $0x50] sm:$0xff] }
 0x3d7   : > { %v4869_v39 = vpop.f32.mrf.mxu2  ;;  %v4444_v58 = vadd.f32 %v15117_v21, %v4408_v18  ;;  %6555 = vmatmul.bf16.vlgmr.msrb.gmra.mxu3 %v16830_v37  ;;  %v16834_v18 = vld [vmem:[#allocation87_spill] sm:$0xff]  ;;  %5474 = vmatpush.bf16.msra.mxu1 %v11512_v54 }
 0x3d8   : > { %v15121_v9 = vadd.f32 %v4869_v39, %v4768_v32  ;;  %v16831_v32 = vld [vmem:[#allocation46_spill] sm:$0xff]  ;;  %5973 = vmatpush.bf16.msra.mxu0 %v11544_v45  ;;  %v16836_v37 = vld [vmem:[#allocation47_spill] sm:$0xff] }
 0x3d9   : > { %8730 = vst [vmem:[%s15124_s21] sm:$0xff] %v4444_v58  ;;  %5260 = vmatmul.bf16.gmra.mxu1 %v5192_v1  ;;  %v11529_v58 = vld [vmem:[%s16729_s13 + $0x218] sm:$0xff] }
 0x3da   : > { %5702 = vmatpush.bf16.msra.mxu2 %v11529_v58  ;;  %v11541_v54 = vld [vmem:[%s16786_s15 + $0x38] sm:$0xff] }
 0x3dc   : > { %v4330_v5 = vpop.f32.mrf.mxu0 }
 0x3dd   : > { %v4409_v3 = vadd.f32 %v4330_v5, %v16831_v32  ;;  %v4775_v14 = vpop.f32.mrf.mxu1 }
 0x3de   : > { %5703 = vmatpush.bf16.msra.mxu2 %v11528_v22  ;;  %v16843_v22 = vld [vmem:[#allocation51_spill] sm:$0xff] }
 0x3df   : > { %v4871_v17 = vpop.f32.mrf.mxu2  ;;  %v4445_v34 = vadd.f32 %v15117_v21, %v4409_v3  ;;  %v16837_v3 = vld [vmem:[#allocation78_spill] sm:$0xff] }
 0x3e0   : > { %v15144_v43 = vadd.f32 %v4871_v17, %v4770_v57 }
 0x3e1   : > { %8731 = vst [vmem:[%s15124_s21 + $0x8] sm:$0xff] %v4445_v34  ;;  %v11526_v34 = vld [vmem:[%s16729_s13 + $0x200] sm:$0xff] }
 0x3e2   : > { %5704 = vmatpush.bf16.msra.mxu2 %v11527_v56 }
 0x3e4   : > { %5376 = vmatmul.bf16.gmra.mxu2 %v5308_v28  ;;  %v4333_v57 = vpop.f32.mrf.mxu0 }
 0x3e5   : > { %v4410_v62 = vadd.f32 %v4333_v57, %v16833_v15  ;;  %v4778_v39 = vpop.f32.mrf.mxu1  ;;  %v16839_v57 = vld [vmem:[#allocation54_spill] sm:$0xff]  ;;  %v16840_v15 = vpack.c.b16 %v16818_v48, %v16802_v63  ;;  %v11539_v63 = vld [vmem:[%s16786_s15 + $0x28] sm:$0xff] }
 0x3e6   : > { %4372 = vmatmul.bf16.gmra.mxu0 %v16834_v18  ;;  %5705 = vmatpush.bf16.msra.mxu2 %v11526_v34  ;;  %v16842_v48 = vld [vmem:[#allocation85_spill] sm:$0xff] }
 0x3e7   : > { %v4874_v61 = vpop.f32.mrf.mxu2  ;;  %v4446_v20 = vadd.f32 %v15117_v21, %v4410_v62  ;;  %v16845_v34 = vld [vmem:[#allocation61_spill] sm:$0xff] }
 0x3e8   : > { %v15165_v38 = vadd.f32 %v4874_v61, %v4773_v52  ;;  %v11511_v52 = vld [vmem:[%s16729_s13 + $0x188] sm:$0xff]  ;;  %v11540_v61 = vld [vmem:[%s16786_s15 + $0x30] sm:$0xff] }
 0x3e9   : > { %8732 = vst [vmem:[%s15124_s21 + $0x10] sm:$0xff] %v4446_v20  ;;  %5265 = vmatmul.bf16.gmra.mxu1 %v16835_v40  ;;  %v16841_v20 = vld [vmem:[#allocation49_spill] sm:$0xff] }
 0x3ea   : > { %5475 = vmatpush.bf16.msra.mxu1 %v11511_v52 }
 0x3ec   : > { %v4335_v1 = vpop.f32.mrf.mxu0 }
 0x3ed   : > { %v4411_v53 = vadd.f32 %v4335_v1, %v16836_v37  ;;  %v4780_v0 = vpop.f32.mrf.mxu1  ;;  %v11538_v1 = vld [vmem:[%s16786_s15 + $0x20] sm:$0xff] }
 0x3ee   : > { %5476 = vmatpush.bf16.msra.mxu1 %v11510_v44 }
 0x3ef   : > { %v4876_v5 = vpop.f32.mrf.mxu2  ;;  %v4447_v59 = vadd.f32 %v15117_v21, %v4411_v53 }
 0x3f0   : > { %v15189_v32 = vadd.f32 %v4876_v5, %v4775_v14 }
 0x3f1   : > { %8733 = vst [vmem:[%s15124_s21 + $0x18] sm:$0xff] %v4447_v59  ;;  %v16844_v59 = vld [vmem:[#allocation65_spill] sm:$0xff] }
 0x3f2   : > { %6039 = vmatpush.bf16.msrb.mxu1 %v11541_v54 }
 0x3f4   : > { %5381 = vmatmul.bf16.gmra.mxu2 %v16837_v3  ;;  %v4338_v17 = vpop.f32.mrf.mxu0  ;;  %v11537_v3 = vld [vmem:[%s16786_s15 + $0x18] sm:$0xff] }
 0x3f5   : > { %v4412_v14 = vadd.f32 %v4338_v17, %v16838_v26  ;;  %v4783_v41 = vpop.f32.mrf.mxu1  ;;  %v11543_v17 = vld [vmem:[%s16786_s15 + $0x48] sm:$0xff] }
 0x3f6   : > { %4377 = vmatmul.bf16.gmra.mxu0 %v16839_v57  ;;  %6040 = vmatpush.bf16.msrb.mxu1 %v11540_v61  ;;  %v11535_v61 = vld [vmem:[%s16786_s15 + $0x8] sm:$0xff] }
 0x3f7   : > { %v4879_v28 = vpop.f32.mrf.mxu2  ;;  %v4448_v23 = vadd.f32 %v15117_v21, %v4412_v14  ;;  %5974 = vmatpush.bf16.msra.mxu0 %v11543_v17  ;;  %v11536_v14 = vld [vmem:[%s16786_s15 + $0x10] sm:$0xff]  ;;  %v11571_v17 = vld [vmem:[%s16786_s15 + $0x128] sm:$0xff] }
 0x3f8   : > { %v15201_v47 = vadd.f32 %v4879_v28, %v4778_v39  ;;  %v15243_v28 = vpop.f32.mrf.mxu3 }
 0x3f9   : > { %8734 = vst [vmem:[%s15124_s21 + $0x20] sm:$0xff] %v4448_v23  ;;  %5270 = vmatmul.bf16.gmra.mxu1 %v16840_v15 }
 0x3fa   : > { %6041 = vmatpush.bf16.msrb.mxu1 %v11539_v63 }
 0x3fc   : > { %v4340_v62 = vpop.f32.mrf.mxu0 }
 0x3fd   : > { %v4413_v18 = vadd.f32 %v4340_v62, %v16841_v20  ;;  %v4785_v52 = vpop.f32.mrf.mxu1 }
 0x3fe   : > { %6042 = vmatpush.bf16.msrb.mxu1 %v11538_v1 }
 0x3ff   : > { %v4881_v39 = vpop.f32.mrf.mxu2  ;;  %v4449_v58 = vadd.f32 %v15117_v21, %v4413_v18  ;;  %v11534_v18 = vld [vmem:[%s16786_s15] sm:$0xff] }
 0x400   : > { %v15216_v45 = vadd.f32 %v4881_v39, %v4780_v0  ;;  %v16847_v39 = vld [vmem:[#allocation52_spill] sm:$0xff] }
 0x401   : > { %8735 = vst [vmem:[%s15124_s21 + $0x28] sm:$0xff] %v4449_v58 }
 0x402   : > { %6043 = vmatpush.bf16.msrb.mxu1 %v11537_v3 }
 0x404   : > { %5386 = vmatmul.bf16.gmra.mxu2 %v16842_v48  ;;  %v4343_v40 = vpop.f32.mrf.mxu0 }
 0x405   : > { %v4414_v44 = vadd.f32 %v4343_v40, %v16843_v22  ;;  %v5019_v0 = vpop.f32.mrf.mxu1 }
 0x406   : > { %4382 = vmatmul.bf16.gmra.mxu0 %v16844_v59  ;;  %v5039_v56 = vadd.f32 %v5019_v0, %v15121_v9  ;;  %v16846_v9 = vld [vmem:[#allocation53_spill] sm:$0xff]  ;;  %6044 = vmatpush.bf16.msrb.mxu1 %v11536_v14  ;;  %v11565_v59 = vld [vmem:[%s16786_s15 + $0xf8] sm:$0xff] }
 0x407   : > { %v4884_v37 = vpop.f32.mrf.mxu2  ;;  %v4450_v53 = vadd.f32 %v15117_v21, %v4414_v44  ;;  %v11581_v44 = vld [vmem:[%s16786_s15 + $0x178] sm:$0xff] }
 0x408   : > { %v15228_v5 = vadd.f32 %v4884_v37, %v4783_v41  ;;  %v11572_v37 = vld [vmem:[%s16786_s15 + $0x130] sm:$0xff]  ;;  %6456 = vmatpush.bf16.msrb.mxu2 %v11581_v44 }
 0x409   : > { %8736 = vst [vmem:[%s15124_s21 + $0x30] sm:$0xff] %v4450_v53  ;;  %5477 = vmatmul.bf16.vlgmr.msra.gmra.mxu1 %v16845_v34  ;;  %v11542_v53 = vld [vmem:[%s16786_s15 + $0x40] sm:$0xff]  ;;  %v11568_v44 = vld [vmem:[%s16786_s15 + $0x110] sm:$0xff] }
 0x40a   : > { %6045 = vmatpush.bf16.msrb.mxu1 %v11535_v61  ;;  %5975 = vmatpush.bf16.msra.mxu0 %v11542_v53  ;;  %v11563_v61 = vld [vmem:[%s16786_s15 + $0xe8] sm:$0xff] }
 0x40c   : > { %v4345_v26 = vpop.f32.mrf.mxu0 }
 0x40d   : > { %v4415_v23 = vadd.f32 %v4345_v26, %v16846_v9  ;;  %v5021_v15 = vpop.f32.mrf.mxu1 }
 0x40e   : > { %v5040_v62 = vadd.f32 %v5021_v15, %v15144_v43  ;;  %v15262_v43 = vpop.f32.mrf.mxu3  ;;  %6046 = vmatpush.bf16.msrb.mxu1 %v11534_v18  ;;  %6249 = vmatpush.bf16.msrb.mxu0 %v11565_v59  ;;  %v11564_v15 = vld [vmem:[%s16786_s15 + $0xf0] sm:$0xff]  ;;  %v11561_v59 = vld [vmem:[%s16786_s15 + $0xd8] sm:$0xff] }
 0x40f   : > { %v4886_v57 = vpop.f32.mrf.mxu2  ;;  %v4451_v41 = vadd.f32 %v15117_v21, %v4415_v23 }
 0x410   : > { %v15247_v54 = vadd.f32 %v4886_v57, %v4785_v52  ;;  %v11573_v52 = vld [vmem:[%s16786_s15 + $0x138] sm:$0xff]  ;;  %v11579_v57 = vld [vmem:[%s16786_s15 + $0x168] sm:$0xff] }
 0x411   : > { %8737 = vst [vmem:[%s15124_s21 + $0x38] sm:$0xff] %v4451_v41  ;;  %v11570_v41 = vld [vmem:[%s16786_s15 + $0x120] sm:$0xff] }
 0x412   : > { %6360 = vmatpush.bf16.msra.mxu1 %v11573_v52  ;;  %6250 = vmatpush.bf16.msrb.mxu0 %v11564_v15  ;;  %v11559_v15 = vld [vmem:[%s16786_s15 + $0xc8] sm:$0xff] }
 0x414   : > { %5706 = vmatmul.bf16.vlgmr.msra.gmra.mxu2 %v14953_v33  ;;  %v4348_v20 = vpop.f32.mrf.mxu0  ;;  %v16848_v33 = vld [vmem:[#allocation93_spill] sm:$0xff] }
 0x415   : > { %v4416_v58 = vadd.f32 %v4348_v20, %v16847_v39  ;;  %v16850_v20 = vld [vmem:[#allocation59_spill] sm:$0xff] }
 0x416   : > { %4387 = vmatmul.bf16.gmra.mxu0 %v16848_v33  ;;  %v5024_v1 = vpop.f32.mrf.mxu1  ;;  %6361 = vmatpush.bf16.msra.mxu1 %v11572_v37  ;;  %v15293_v9 = vpop.f32.mrf.mxu3  ;;  %v11569_v39 = vld [vmem:[%s16786_s15 + $0x118] sm:$0xff] }
 0x417   : > { %v5131_v63 = vpop.f32.mrf.mxu2  ;;  %v4452_v48 = vadd.f32 %v15117_v21, %v4416_v58  ;;  %v5041_v22 = vadd.f32 %v5024_v1, %v15165_v38  ;;  %v11580_v38 = vld [vmem:[%s16786_s15 + $0x170] sm:$0xff]  ;;  %6251 = vmatpush.bf16.msrb.mxu0 %v11563_v61  ;;  %v11577_v1 = vld [vmem:[%s16786_s15 + $0x158] sm:$0xff] }
 0x418   : > { %v15265_v40 = vadd.f32 %v5131_v63, %v5039_v56  ;;  %v16849_v56 = vld [vmem:[#allocation57_spill] sm:$0xff]  ;;  %6457 = vmatpush.bf16.msrb.mxu2 %v11580_v38  ;;  %v16851_v63 = vld [vmem:[#allocation94_spill] sm:$0xff] }
 0x419   : > { %8738 = vst [vmem:[%s15124_s21 + $0x40] sm:$0xff] %v4452_v48  ;;  %5482 = vmatmul.bf16.gmra.mxu1 %v14834_v27 }
 0x41a   : > { %6362 = vmatpush.bf16.msra.mxu1 %v11571_v17 }
 0x41c   : > { %v4350_v0 = vpop.f32.mrf.mxu0  ;;  %6458 = vmatpush.bf16.msrb.mxu2 %v11579_v57  ;;  %v16852_v57 = vld [vmem:[#allocation26_spill] sm:$0xff] }
 0x41d   : > { %v4417_v3 = vadd.f32 %v4350_v0, %v16849_v56  ;;  %v11567_v0 = vld [vmem:[%s16786_s15 + $0x108] sm:$0xff] }
 0x41e   : > { %v5026_v27 = vpop.f32.mrf.mxu1  ;;  %6363 = vmatpush.bf16.msra.mxu1 %v11570_v41  ;;  %v15334_v37 = vpop.f32.mrf.mxu3  ;;  %v4245_v41 = vrot.slane %v16852_v57, 5 }
 0x41f   : > { %v5133_v34 = vpop.f32.mrf.mxu2  ;;  %v4453_v26 = vadd.f32 %v15117_v21, %v4417_v3  ;;  %v15297_v23 = vadd.f32 %v5026_v27, %v15189_v32  ;;  %v11578_v32 = vld [vmem:[%s16786_s15 + $0x160] sm:$0xff] }
 0x420   : > { %v15291_v14 = vadd.f32 %v5133_v34, %v5040_v62  ;;  %6459 = vmatpush.bf16.msrb.mxu2 %v11578_v32  ;;  %v11566_v34 = vld [vmem:[%s16786_s15 + $0x100] sm:$0xff] }
 0x421   : > { %8739 = vst [vmem:[%s15124_s21 + $0x48] sm:$0xff] %v4453_v26  ;;  %v11560_v26 = vld [vmem:[%s16786_s15 + $0xd0] sm:$0xff] }
 0x422   : > { %6364 = vmatpush.bf16.msra.mxu1 %v11569_v39 }
 0x424   : > { %5711 = vmatmul.bf16.gmra.mxu2 %v15023_v29  ;;  %v4353_v62 = vpop.f32.mrf.mxu0 }
 0x425   : > { %v4418_v18 = vadd.f32 %v4353_v62, %v16850_v20  ;;  %6460 = vmatpush.bf16.msrb.mxu2 %v11577_v1  ;;  %v11558_v1 = vld [vmem:[%s16786_s15 + $0xc0] sm:$0xff] }
 0x426   : > { %4392 = vmatmul.bf16.gmra.mxu0 %v16851_v63  ;;  %v5029_v48 = vpop.f32.mrf.mxu1  ;;  %6365 = vmatpush.bf16.msra.mxu1 %v11568_v44  ;;  %v15371_v62 = vpop.f32.mrf.mxu3  ;;  %v4247_v63 = vrot.slane %v4245_v41, 4 }
 0x427   : > { %v5136_v29 = vpop.f32.mrf.mxu2  ;;  %v4454_v58 = vadd.f32 %v15117_v21, %v4418_v18  ;;  %v5043_v33 = vadd.f32 %v5029_v48, %v15201_v47  ;;  %v11576_v47 = vld [vmem:[%s16786_s15 + $0x150] sm:$0xff]  ;;  %v16853_v18 = vld [vmem:[#allocation64_spill] sm:$0xff]  ;;  %v4248_v48 = vrot.slane %v14769_v2, 5 }
 0x428   : > { %v15320_v52 = vadd.f32 %v5136_v29, %v5041_v22  ;;  %v11562_v22 = vld [vmem:[%s16786_s15 + $0xe0] sm:$0xff] }
 0x429   : > { %8740 = vst [vmem:[%s15124_s21 + $0x50] sm:$0xff] %v4454_v58  ;;  %5487 = vmatmul.bf16.gmra.mxu1 %v14868_v51  ;;  %6252 = vmatpush.bf16.msrb.mxu0 %v11562_v22  ;;  %v16854_v29 = vld [vmem:[#allocation48_spill] sm:$0xff] }
 0x42a   : > { %6461 = vmatpush.bf16.msrb.mxu2 %v11576_v47  ;;  %6366 = vmatpush.bf16.msra.mxu1 %v11567_v0  ;;  %v9604_v58 = vrot.slane %v16854_v29, 9  ;;  %v11603_v29 = vld [vmem:[%s16786_s15 + $0x228] sm:$0xff] }
 0x42c   : > { %v4355_v53 = vpop.f32.mrf.mxu0  ;;  %v4246_v22 = vsel %vm12687_vm14, %v9604_v58, %v4245_v41  ;;  %v11605_v41 = vld [vmem:[%s16786_s15 + $0x238] sm:$0xff] }
 0x42d   : > { %v4419_v38 = vadd.f32 %v4355_v53, %v14783_v46  ;;  %6253 = vmatpush.bf16.msrb.mxu0 %v11561_v59  ;;  %v11575_v46 = vld [vmem:[%s16786_s15 + $0x148] sm:$0xff]  ;;  %v4249_v53 = vsel %vm12687_vm14, %v4247_v63, %v4248_v48 }
 0x42e   : > { %v5031_v3 = vpop.f32.mrf.mxu1  ;;  %6462 = vmatpush.bf16.msrb.mxu2 %v11575_v46  ;;  %6367 = vmatpush.bf16.msra.mxu1 %v11566_v34  ;;  %v15393_v59 = vpop.f32.mrf.mxu3  ;;  %v4268_v0 = vunpack.c.l.b16 %v4249_v53  ;;  %v16858_v63 = vld [vmem:[#allocation40_spill] sm:$0xff] }
 0x42f   : > { %v15347_v56 = vpop.f32.mrf.mxu2  ;;  %v4455_v51 = vadd.f32 %v15117_v21, %v4419_v38  ;;  %v15352_v17 = vadd.f32 %v5031_v3, %v15216_v45  ;;  %v11574_v45 = vld [vmem:[%s16786_s15 + $0x140] sm:$0xff]  ;;  %v4267_v38 = vunpack.c.l.b16 %v4246_v22  ;;  %v16856_v3 = vld [vmem:[#allocation86_spill] sm:$0xff]  ;;  %v16859_v22 = vld [vmem:[#allocation69_spill] sm:$0xff] }
 0x431   : > { %8741 = vst [vmem:[%s15124_s21 + $0x58] sm:$0xff] %v4455_v51  ;;  %6254 = vmatpush.bf16.msrb.mxu0 %v11560_v26  ;;  %v4269_v46 = vpack.c.b16 %v4268_v0, %v4267_v38  ;;  %v11595_v0 = vld [vmem:[%s16786_s15 + $0x1e8] sm:$0xff] }
 0x432   : > { %6463 = vmatpush.bf16.msrb.mxu2 %v11574_v45 }
 0x434   : > { %5716 = vmatmul.bf16.gmra.mxu2 %v16819_v42  ;;  %v4358_v27 = vpop.f32.mrf.mxu0 }
 0x435   : > { %v4420_v32 = vadd.f32 %v4358_v27, %v14821_v50  ;;  %6255 = vmatpush.bf16.msrb.mxu0 %v11559_v15  ;;  %v16857_v15 = vld [vmem:[#allocation72_spill] sm:$0xff] }
 0x436   : > { %4397 = vmatmul.bf16.gmra.mxu0 %v16853_v18  ;;  %v5034_v39 = vpop.f32.mrf.mxu1  ;;  %v15409_v45 = vpop.f32.mrf.mxu3 }
 0x437   : > { %v5141_v42 = vpop.f32.mrf.mxu2  ;;  %v4456_v61 = vadd.f32 %v15117_v21, %v4420_v32  ;;  %v5045_v50 = vadd.f32 %v5034_v39, %v15228_v5 }
 0x438   : > { %v15375_v20 = vadd.f32 %v5141_v42, %v5043_v33  ;;  %v16855_v33 = vld [vmem:[#allocation81_spill] sm:$0xff] }
 0x439   : > { %8742 = vst [vmem:[%s15124_s21 + $0x60] sm:$0xff] %v4456_v61  ;;  %5492 = vmatmul.bf16.gmra.mxu1 %v16855_v33  ;;  %6256 = vmatpush.bf16.msrb.mxu0 %v11558_v1 }
 0x43c   : > { %v4360_v44 = vpop.f32.mrf.mxu0 }
 0x43d   : > { %v4421_v2 = vadd.f32 %v4360_v44, %v14842_v49 }
 0x43e   : > { %v15396_v51 = vpop.f32.mrf.mxu1  ;;  %v15426_v58 = vpop.f32.mrf.mxu3 }
 0x43f   : > { %v15391_v47 = vpop.f32.mrf.mxu2  ;;  %v4457_v5 = vadd.f32 %v15117_v21, %v4421_v2  ;;  %v11596_v2 = vld [vmem:[%s16786_s15 + $0x1f0] sm:$0xff] }
 0x441   : > { %8743 = vst [vmem:[%s15124_s21 + $0x68] sm:$0xff] %v4457_v5  ;;  %v11601_v5 = vld [vmem:[%s16786_s15 + $0x218] sm:$0xff] }
 0x444   : > { %5721 = vmatmul.bf16.gmra.mxu2 %v16856_v3  ;;  %v4363_v12 = vpop.f32.mrf.mxu0  ;;  %v11600_v3 = vld [vmem:[%s16786_s15 + $0x210] sm:$0xff] }
 0x445   : > { %v4422_v34 = vadd.f32 %v4363_v12, %v14856_v10  ;;  %v11604_v10 = vld [vmem:[%s16786_s15 + $0x230] sm:$0xff] }
 0x446   : > { %4402 = vmatmul.bf16.gmra.mxu0 %v4269_v46  ;;  %v15404_v57 = vpop.f32.mrf.mxu1  ;;  %v15456_v46 = vpop.f32.mrf.mxu3 }
 0x447   : > { %v5146_v26 = vpop.f32.mrf.mxu2  ;;  %v4458_v49 = vadd.f32 %v15117_v21, %v4422_v34 }
 0x448   : > { %v15402_v27 = vadd.f32 %v5146_v26, %v5045_v50  ;;  %v11602_v50 = vld [vmem:[%s16786_s15 + $0x220] sm:$0xff] }
 0x449   : > { %8744 = vst [vmem:[%s15124_s21 + $0x70] sm:$0xff] %v4458_v49  ;;  %6047 = vmatmul.bf16.vlgmr.msrb.gmra.mxu1 %v16857_v15  ;;  %v11599_v15 = vld [vmem:[%s16786_s15 + $0x208] sm:$0xff] }
 0x44a   : > { %6754 = vmatpush.bf16.msrb.mxu1 %v11605_v41  ;;  %v11594_v41 = vld [vmem:[%s16786_s15 + $0x1e0] sm:$0xff] }
 0x44c   : > { %v4365_v32 = vpop.f32.mrf.mxu0 }
 0x44d   : > { %v4423_v42 = vadd.f32 %v4365_v32, %v14886_v24  ;;  %v11597_v24 = vld [vmem:[%s16786_s15 + $0x1f8] sm:$0xff] }
 0x44e   : > { %v15420_v39 = vpop.f32.mrf.mxu1  ;;  %6755 = vmatpush.bf16.msrb.mxu1 %v11604_v10  ;;  %v11598_v10 = vld [vmem:[%s16786_s15 + $0x200] sm:$0xff] }
 0x44f   : > { %v15417_v61 = vpop.f32.mrf.mxu2  ;;  %v4459_v18 = vadd.f32 %v15117_v21, %v4423_v42 }
 0x451   : > { %8745 = vst [vmem:[%s15124_s21 + $0x78] sm:$0xff] %v4459_v18 }
 0x452   : > { %6756 = vmatpush.bf16.msrb.mxu1 %v11603_v29  ;;  %v15480_v29 = vpop.f32.mrf.mxu3 }
 0x454   : > { %6464 = vmatmul.bf16.vlgmr.msrb.gmra.mxu2 %v16858_v63  ;;  %v4368_v48 = vpop.f32.mrf.mxu0 }
 0x455   : > { %v4424_v1 = vadd.f32 %v4368_v48, %v14908_v7  ;;  %v16860_v7 = vld [vmem:[#allocation58_spill] sm:$0xff]  ;;  %v16861_v48 = vld [vmem:[#allocation84_spill] sm:$0xff] }
 0x456   : > { %5976 = vmatmul.bf16.vlgmr.msra.gmra.mxu0 %v16859_v22  ;;  %v15440_v53 = vpop.f32.mrf.mxu1  ;;  %6757 = vmatpush.bf16.msrb.mxu1 %v11602_v50  ;;  %v11592_v50 = vld [vmem:[%s16786_s15 + $0x1d0] sm:$0xff] }
 0x457   : > { %v15436_v33 = vpop.f32.mrf.mxu2  ;;  %v4460_v44 = vadd.f32 %v15117_v21, %v4424_v1  ;;  %6658 = vmatpush.bf16.msra.mxu0 %v11597_v24  ;;  %v16862_v1 = vld [vmem:[#allocation43_spill] sm:$0xff] }
 0x459   : > { %8746 = vst [vmem:[%s15124_s21 + $0x80] sm:$0xff] %v4460_v44  ;;  %6368 = vmatmul.bf16.vlgmr.msra.gmra.mxu1 %v16860_v7  ;;  %v11591_v44 = vld [vmem:[%s16786_s15 + $0x1c8] sm:$0xff] }
 0x45a   : > { %6758 = vmatpush.bf16.msrb.mxu1 %v11601_v5 }
 0x45b   : > { %6659 = vmatpush.bf16.msra.mxu0 %v11596_v2 }
 0x45c   : > { %v4370_v38 = vpop.f32.mrf.mxu0 }
 0x45d   : > { %v4425_v12 = vadd.f32 %v4370_v38, %v14943_v35  ;;  %v11593_v35 = vld [vmem:[%s16786_s15 + $0x1d8] sm:$0xff]  ;;  %v11590_v38 = vld [vmem:[%s16786_s15 + $0x1c0] sm:$0xff] }
 0x45e   : > { %v15462_v49 = vpop.f32.mrf.mxu1  ;;  %6759 = vmatpush.bf16.msrb.mxu1 %v11600_v3  ;;  %v16863_v3 = vld [vmem:[#allocation62_spill] sm:$0xff] }
 0x45f   : > { %v15459_v34 = vpop.f32.mrf.mxu2  ;;  %v4461_v26 = vadd.f32 %v15117_v21, %v4425_v12  ;;  %6660 = vmatpush.bf16.msra.mxu0 %v11595_v0  ;;  %v15503_v0 = vpop.f32.mrf.mxu3  ;;  %v4230_v12 = vadd.f32 %v15243_v28, %v16863_v3  ;;  %v4233_v3 = vadd.f32 %v15334_v37, %v14918_v8  ;;  %v5277_v37 = vadd.f32 %v15420_v39, %v15291_v14 }
 0x460   : > { %v4235_v39 = vadd.f32 %v15393_v59, %v14981_v25  ;;  %v4236_v59 = vadd.f32 %v15409_v45, %v15017_v6 }
 0x461   : > { %8747 = vst [vmem:[%s15124_s21 + $0x88] sm:$0xff] %v4461_v26 }
 0x462   : > { %6760 = vmatpush.bf16.msrb.mxu1 %v11599_v15 }
 0x463   : > { %6661 = vmatpush.bf16.msra.mxu0 %v11594_v41 }
 0x464   : > { %v4373_v32 = vpop.f32.mrf.mxu0 }
 0x465   : > { %v4426_v42 = vadd.f32 %v4373_v32, %v14977_v30  ;;  %v16864_v32 = vld [vmem:[#allocation24_spill] sm:$0xff] }
 0x466   : > { %6257 = vmatmul.bf16.vlgmr.msrb.gmra.mxu0 %v16861_v48  ;;  %v15484_v24 = vpop.f32.mrf.mxu1  ;;  %6761 = vmatpush.bf16.msrb.mxu1 %v11598_v10  ;;  %v4231_v10 = vadd.f32 %v15262_v43, %v14862_v55 }
 0x467   : > { %v15478_v18 = vpop.f32.mrf.mxu2  ;;  %v4462_v63 = vadd.f32 %v15117_v21, %v4426_v42  ;;  %6662 = vmatpush.bf16.msra.mxu0 %v11593_v35  ;;  %v15517_v42 = vpop.f32.mrf.mxu3 }
 0x469   : > { %8748 = vst [vmem:[%s15124_s21 + $0x90] sm:$0xff] %v4462_v63  ;;  %6762 = vmatmul.bf16.vlgmr.msrb.gmra.mxu1 %v16862_v1 }
 0x46b   : > { %6663 = vmatpush.bf16.msra.mxu0 %v11592_v50 }
 0x46c   : > { %v4375_v30 = vpop.f32.mrf.mxu0 }
 0x46d   : > { %v4427_v22 = vadd.f32 %v4375_v30, %v15013_v19  ;;  %v4232_v30 = vadd.f32 %v15293_v9, %v14889_v31 }
 0x46e   : > { %v15498_v7 = vpop.f32.mrf.mxu1 }
 0x46f   : > { %v15495_v2 = vpop.f32.mrf.mxu2  ;;  %v4463_v5 = vadd.f32 %v15117_v21, %v4427_v22  ;;  %6664 = vmatpush.bf16.msra.mxu0 %v11591_v44  ;;  %v5597_v22 = vpop.f32.mrf.mxu3 }
 0x471   : > { %8749 = vst [vmem:[%s15124_s21 + $0x98] sm:$0xff] %v4463_v5 }
 0x473   : > { %6665 = vmatpush.bf16.msra.mxu0 %v11590_v38 }
 0x474   : > { %v4378_v19 = vpop.f32.mrf.mxu0 }
 0x475   : > { %v4428_v26 = vadd.f32 %v4378_v19, %v4230_v12  ;;  %v5276_v19 = vadd.f32 %v15404_v57, %v15265_v40 }
 0x476   : > { %6666 = vmatmul.bf16.vlgmr.msra.gmra.mxu0 %v16864_v32  ;;  %v15512_v35 = vpop.f32.mrf.mxu1 }
 0x477   : > { %v15508_v41 = vpop.f32.mrf.mxu2  ;;  %v4464_v15 = vadd.f32 %v15117_v21, %v4428_v26  ;;  %v5599_v9 = vpop.f32.mrf.mxu3 }
 0x479   : > { %8750 = vst [vmem:[%s15124_s21 + $0xa0] sm:$0xff] %v4464_v15  ;;  %v5392_v15 = vadd.f32 %v15436_v33, %v5276_v19  ;;  %v15548_v33 = vld [vmem:[%s16865_s14] ss:$0 sm:$0xff] }
 0x47c   : > { %v4380_v28 = vpop.f32.mrf.mxu0 }
 0x47d   : > { %v4429_v63 = vadd.f32 %v4380_v28, %v4231_v10 }
 0x47e   : > { %v15522_v1 = vpop.f32.mrf.mxu1 }
 0x47f   : > { %v15519_v48 = vpop.f32.mrf.mxu2  ;;  %v4465_v50 = vadd.f32 %v15117_v21, %v4429_v63  ;;  %v4234_v63 = vadd.f32 %v15371_v62, %v14947_v4  ;;  %v5602_v4 = vpop.f32.mrf.mxu3 }
 0x481   : > { %8751 = vst [vmem:[%s15124_s21 + $0xa8] sm:$0xff] %v4465_v50 }
 0x484   : > { %v4383_v44 = vpop.f32.mrf.mxu0 }
 0x485   : > { %v4430_v5 = vadd.f32 %v4383_v44, %v4232_v30  ;;  %v5393_v30 = vadd.f32 %v15459_v34, %v5277_v37  ;;  %v5278_v34 = vadd.f32 %v15440_v53, %v15320_v52  ;;  %v5154_v52 = vadd.f32 %v15347_v56, %v15297_v23 }
 0x486   : > { %v5478_v43 = vpop.f32.mrf.mxu1  ;;  %v4237_v23 = vadd.f32 %v15426_v58, %v15050_v11  ;;  %v4238_v58 = vadd.f32 %v15456_v46, %v15070_v13  ;;  %v5282_v46 = vadd.f32 %v15512_v35, %v15402_v27  ;;  %v4240_v27 = vadd.f32 %v15503_v0, %v15088_v16 }
 0x487   : > { %v15527_v38 = vpop.f32.mrf.mxu2  ;;  %v4466_v55 = vadd.f32 %v15117_v21, %v4430_v5  ;;  %v5498_v28 = vadd.f32 %v5478_v43, %v5392_v15  ;;  %v5394_v19 = vadd.f32 %v15478_v18, %v5278_v34  ;;  %v5279_v18 = vadd.f32 %v15462_v49, %v5154_v52 }
 0x488   : > { %v5280_v49 = vadd.f32 %v15484_v24, %v15375_v20  ;;  %v5156_v20 = vadd.f32 %v15391_v47, %v15352_v17  ;;  %v4239_v17 = vadd.f32 %v15480_v29, %v15080_v60 }
 0x489   : > { %8752 = vst [vmem:[%s15124_s21 + $0xb0] sm:$0xff] %v4466_v55  ;;  %v5617_v57 = vadd.f32 %v5597_v22, %v5498_v28  ;;  %v5604_v28 = vpop.f32.mrf.mxu3  ;;  %v5395_v37 = vadd.f32 %v15495_v2, %v5279_v18 }
 0x48c   : > { %v4385_v12 = vpop.f32.mrf.mxu0 }
 0x48d   : > { %v4431_v26 = vadd.f32 %v4385_v12, %v4233_v3 }
 0x48e   : > { %v5480_v10 = vpop.f32.mrf.mxu1 }
 0x48f   : > { %v15535_v31 = vpop.f32.mrf.mxu2  ;;  %v4467_v32 = vadd.f32 %v15117_v21, %v4431_v26  ;;  %v5499_v62 = vadd.f32 %v5480_v10, %v5393_v30 }
 0x491   : > { %8753 = vst [vmem:[%s15124_s21 + $0xb8] sm:$0xff] %v4467_v32  ;;  %v5618_v3 = vadd.f32 %v5599_v9, %v5499_v62  ;;  %v5607_v45 = vpop.f32.mrf.mxu3 }
 0x494   : > { %v4388_v8 = vpop.f32.mrf.mxu0 }
 0x495   : > { %v4432_v40 = vadd.f32 %v4388_v8, %v4234_v63 }
 0x496   : > { %v5483_v55 = vpop.f32.mrf.mxu1 }
 0x497   : > { %v5707_v50 = vpop.f32.mrf.mxu2  ;;  %v4468_v44 = vadd.f32 %v15117_v21, %v4432_v40  ;;  %v5500_v10 = vadd.f32 %v5483_v55, %v5394_v19  ;;  %v5396_v55 = vadd.f32 %v15508_v41, %v5280_v49  ;;  %v5281_v41 = vadd.f32 %v15498_v7, %v5156_v20 }
 0x498   : > { %v5727_v5 = vadd.f32 %v5707_v50, %v5617_v57 }
 0x499   : > { %8754 = vst [vmem:[%s15124_s21 + $0xc0] sm:$0xff] %v4468_v44  ;;  %v5619_v63 = vadd.f32 %v5602_v4, %v5500_v10 }
 0x49a   : > { %v5739_v14 = vadd.f32 %v15548_v33, %v5727_v5 }
 0x49c   : > { %8762 = vst [vmem:[%s15556_s5] sm:$0xff] %v5739_v14  ;;  %v4390_v22 = vpop.f32.mrf.mxu0 }
 0x49d   : > { %v4433_v43 = vadd.f32 %v4390_v22, %v4235_v39 }
 0x49e   : > { %v5485_v32 = vpop.f32.mrf.mxu1 }
 0x49f   : > { %v5709_v12 = vpop.f32.mrf.mxu2  ;;  %v4469_v26 = vadd.f32 %v15117_v21, %v4433_v43  ;;  %v5501_v30 = vadd.f32 %v5485_v32, %v5395_v37 }
 0x4a0   : > { %v5728_v15 = vadd.f32 %v5709_v12, %v5618_v3  ;;  %v5609_v3 = vpop.f32.mrf.mxu3  ;;  %v5397_v12 = vadd.f32 %v15519_v48, %v5281_v41 }
 0x4a1   : > { %8755 = vst [vmem:[%s15124_s21 + $0xc8] sm:$0xff] %v4469_v26  ;;  %v5620_v44 = vadd.f32 %v5604_v28, %v5501_v30 }
 0x4a2   : > { %v5740_v25 = vadd.f32 %v15548_v33, %v5728_v15 }
 0x4a4   : > { %8763 = vst [vmem:[%s15556_s5 + $0x8] sm:$0xff] %v5740_v25  ;;  %v4393_v53 = vpop.f32.mrf.mxu0  ;;  %v5398_v25 = vadd.f32 %v15527_v38, %v5282_v46 }
 0x4a5   : > { %v4434_v9 = vadd.f32 %v4393_v53, %v4236_v59  ;;  %v5046_v53 = vadd.f32 %v15396_v51, %v15247_v54 }
 0x4a6   : > { %v5488_v50 = vpop.f32.mrf.mxu1 }
 0x4a7   : > { %v5712_v8 = vpop.f32.mrf.mxu2  ;;  %v4470_v40 = vadd.f32 %v15117_v21, %v4434_v9  ;;  %v5502_v39 = vadd.f32 %v5488_v50, %v5396_v55  ;;  %v5158_v35 = vadd.f32 %v15417_v61, %v5046_v53  ;;  %v4241_v61 = vadd.f32 %v15517_v42, %v15108_v36 }
 0x4a8   : > { %v5729_v57 = vadd.f32 %v5712_v8, %v5619_v63  ;;  %v5612_v52 = vpop.f32.mrf.mxu3 }
 0x4a9   : > { %8756 = vst [vmem:[%s15124_s21 + $0xd0] sm:$0xff] %v4470_v40  ;;  %v5621_v34 = vadd.f32 %v5607_v45, %v5502_v39  ;;  %v5283_v9 = vadd.f32 %v15522_v1, %v5158_v35  ;;  %v11621_v35 = vld [vmem:[%s16393_s17 + $0x78] sm:$0xff] }
 0x4aa   : > { %v5741_v6 = vadd.f32 %v15548_v33, %v5729_v57  ;;  %6991 = vmatpush.bf16.msra.mxu2 %v11621_v35  ;;  %v11624_v35 = vld [vmem:[%s16393_s17 + $0x90] sm:$0xff] }
 0x4ab   : > { %v5399_v54 = vadd.f32 %v15535_v31, %v5283_v9 }
 0x4ac   : > { %8764 = vst [vmem:[%s15556_s5 + $0x10] sm:$0xff] %v5741_v6  ;;  %v4395_v56 = vpop.f32.mrf.mxu0 }
 0x4ad   : > { %v4435_v2 = vadd.f32 %v4395_v56, %v4237_v23 }
 0x4ae   : > { %v5490_v14 = vpop.f32.mrf.mxu1 }
 0x4af   : > { %v5714_v5 = vpop.f32.mrf.mxu2  ;;  %v4471_v4 = vadd.f32 %v15117_v21, %v4435_v2  ;;  %v5503_v32 = vadd.f32 %v5490_v14, %v5397_v12 }
 0x4b0   : > { %v5730_v62 = vadd.f32 %v5714_v5, %v5620_v44  ;;  %v5614_v0 = vpop.f32.mrf.mxu3 }
 0x4b1   : > { %8757 = vst [vmem:[%s15124_s21 + $0xd8] sm:$0xff] %v4471_v4  ;;  %v5622_v48 = vadd.f32 %v5609_v3, %v5503_v32 }
 0x4b2   : > { %v5742_v11 = vadd.f32 %v15548_v33, %v5730_v62 }
 0x4b4   : > { %8765 = vst [vmem:[%s15556_s5 + $0x18] sm:$0xff] %v5742_v11  ;;  %v4398_v24 = vpop.f32.mrf.mxu0 }
 0x4b5   : > { %v4436_v22 = vadd.f32 %v4398_v24, %v4238_v58 }
 0x4b6   : > { %v5493_v15 = vpop.f32.mrf.mxu1 }
 0x4b7   : > { %v5717_v43 = vpop.f32.mrf.mxu2  ;;  %v4472_v19 = vadd.f32 %v15117_v21, %v4436_v22  ;;  %v5504_v18 = vadd.f32 %v5493_v15, %v5398_v25 }
 0x4b8   : > { %v5731_v26 = vadd.f32 %v5717_v43, %v5621_v34  ;;  %v6167_v44 = vpop.f32.mrf.mxu3 }
 0x4b9   : > { %8758 = vst [vmem:[%s15124_s21 + $0xe0] sm:$0xff] %v4472_v19  ;;  %v5623_v8 = vadd.f32 %v5612_v52, %v5504_v18 }
 0x4ba   : > { %v5743_v13 = vadd.f32 %v15548_v33, %v5731_v26  ;;  %v11820_v26 = vld [vmem:[%s16392_s16] ss:$0 sm:$0xff] }
 0x4bc   : > { %8766 = vst [vmem:[%s15556_s5 + $0x20] sm:$0xff] %v5743_v13  ;;  %v4400_v47 = vpop.f32.mrf.mxu0 }
 0x4bd   : > { %v4437_v7 = vadd.f32 %v4400_v47, %v4239_v17 }
 0x4be   : > { %v5495_v29 = vpop.f32.mrf.mxu1 }
 0x4bf   : > { %v5719_v10 = vpop.f32.mrf.mxu2  ;;  %v4473_v59 = vadd.f32 %v15117_v21, %v4437_v7  ;;  %v5505_v57 = vadd.f32 %v5495_v29, %v5399_v54 }
 0x4c0   : > { %v5732_v28 = vadd.f32 %v5719_v10, %v5622_v48  ;;  %v6169_v62 = vpop.f32.mrf.mxu3 }
 0x4c1   : > { %8759 = vst [vmem:[%s15124_s21 + $0xe8] sm:$0xff] %v4473_v59  ;;  %v5624_v6 = vadd.f32 %v5614_v0, %v5505_v57  ;;  %v11629_v0 = vld [vmem:[%s16393_s17 + $0xb8] sm:$0xff] }
 0x4c2   : > { %v5744_v60 = vadd.f32 %v15548_v33, %v5732_v28  ;;  %7174 = vmatpush.bf16.msrb.mxu0 %v11629_v0  ;;  %v11645_v0 = vld [vmem:[%s16393_s17 + $0x138] sm:$0xff] }
 0x4c4   : > { %8767 = vst [vmem:[%s15556_s5 + $0x28] sm:$0xff] %v5744_v60  ;;  %v4403_v38 = vpop.f32.mrf.mxu0 }
 0x4c5   : > { %v4438_v63 = vadd.f32 %v4403_v38, %v4240_v27 }
 0x4c6   : > { %v6048_v1 = vpop.f32.mrf.mxu1 }
 0x4c7   : > { %v5722_v37 = vpop.f32.mrf.mxu2  ;;  %v4474_v51 = vadd.f32 %v15117_v21, %v4438_v63 }
 0x4c8   : > { %v5733_v40 = vadd.f32 %v5722_v37, %v5623_v8  ;;  %v6556_v22 = vpop.f32.mrf.mxu3  ;;  %v11613_v8 = vld [vmem:[%s16393_s17 + $0x38] sm:$0xff] }
 0x4c9   : > { %8760 = vst [vmem:[%s15124_s21 + $0xf0] sm:$0xff] %v4474_v51  ;;  %7062 = vmatpush.bf16.msra.mxu3 %v11613_v8  ;;  %v11615_v8 = vld [vmem:[%s16393_s17 + $0x48] sm:$0xff] }
 0x4ca   : > { %v5745_v16 = vadd.f32 %v15548_v33, %v5733_v40  ;;  %v11620_v40 = vld [vmem:[%s16393_s17 + $0x70] sm:$0xff] }
 0x4cb   : > { %6992 = vmatpush.bf16.msra.mxu2 %v11620_v40  ;;  %v11632_v40 = vld [vmem:[%s16393_s17 + $0xd0] sm:$0xff] }
 0x4cc   : > { %8768 = vst [vmem:[%s15556_s5 + $0x30] sm:$0xff] %v5745_v16  ;;  %v4405_v50 = vpop.f32.mrf.mxu0 }
 0x4cd   : > { %v4439_v30 = vadd.f32 %v4405_v50, %v4241_v61  ;;  %v11612_v61 = vld [vmem:[%s16393_s17 + $0x30] sm:$0xff] }
 0x4ce   : > { %v6050_v2 = vpop.f32.mrf.mxu1  ;;  %7063 = vmatpush.bf16.msra.mxu3 %v11612_v61  ;;  %v11614_v61 = vld [vmem:[%s16393_s17 + $0x40] sm:$0xff] }
 0x4cf   : > { %v5724_v23 = vpop.f32.mrf.mxu2  ;;  %v4475_v31 = vadd.f32 %v15117_v21, %v4439_v30 }
 0x4d0   : > { %v5734_v56 = vadd.f32 %v5724_v23, %v5624_v6  ;;  %v6558_v47 = vpop.f32.mrf.mxu3 }
 0x4d1   : > { %8761 = vst [vmem:[%s15124_s21 + $0xf8] sm:$0xff] %v4475_v31 }
 0x4d2   : > { %v5746_v45 = vadd.f32 %v15548_v33, %v5734_v56 }
 0x4d4   : > { %8769 = vst [vmem:[%s15556_s5 + $0x38] sm:$0xff] %v5746_v45  ;;  %v5977_v49 = vpop.f32.mrf.mxu0  ;;  %v11628_v45 = vld [vmem:[%s16393_s17 + $0xb0] sm:$0xff] }
 0x4d5   : > { %v6049_v36 = vadd.f32 %v6048_v1, %v5977_v49  ;;  %7175 = vmatpush.bf16.msrb.mxu0 %v11628_v45  ;;  %v11661_v45 = vld [vmem:[%s16393_s17 + $0x1b8] sm:$0xff] }
 0x4d6   : > { %v6369_v55 = vpop.f32.mrf.mxu1 }
 0x4d7   : > { %v6172_v4 = vadd.f32 %v6167_v44, %v6049_v36  ;;  %v6465_v21 = vpop.f32.mrf.mxu2 }
 0x4dc   : > { %v5979_v5 = vpop.f32.mrf.mxu0 }
 0x4dd   : > { %v6051_v39 = vadd.f32 %v6050_v2, %v5979_v5  ;;  %v11619_v2 = vld [vmem:[%s16393_s17 + $0x68] sm:$0xff] }
 0x4de   : > { %v6371_v11 = vpop.f32.mrf.mxu1  ;;  %6993 = vmatpush.bf16.msra.mxu2 %v11619_v2  ;;  %v11652_v2 = vld [vmem:[%s16393_s17 + $0x170] sm:$0xff] }
 0x4df   : > { %v6173_v24 = vadd.f32 %v6169_v62, %v6051_v39  ;;  %v6467_v15 = vpop.f32.mrf.mxu2 }
 0x4e4   : > { %v6258_v42 = vpop.f32.mrf.mxu0 }
 0x4e5   : > { %v6263_v14 = vadd.f32 %v6258_v42, %v6172_v4  ;;  %v11611_v42 = vld [vmem:[%s16393_s17 + $0x28] sm:$0xff]  ;;  %v11637_v4 = vld [vmem:[%s16393_s17 + $0xf8] sm:$0xff] }
 0x4e6   : > { %v6763_v3 = vpop.f32.mrf.mxu1  ;;  %7265 = vmatpush.bf16.msra.mxu1 %v11637_v4  ;;  %7064 = vmatpush.bf16.msra.mxu3 %v11611_v42  ;;  %v11643_v42 = vld [vmem:[%s16393_s17 + $0x128] sm:$0xff]  ;;  %v11669_v4 = vld [vmem:[%s16393_s17 + $0x1f8] sm:$0xff] }
 0x4e7   : > { %v6374_v58 = vadd.f32 %v6369_v55, %v6263_v14 }
 0x4e9   : > { %v6470_v33 = vadd.f32 %v6465_v21, %v6374_v58  ;;  %v11627_v58 = vld [vmem:[%s16393_s17 + $0xa8] sm:$0xff]  ;;  %v11636_v21 = vld [vmem:[%s16393_s17 + $0xf0] sm:$0xff] }
 0x4ea   : > { %7176 = vmatpush.bf16.msrb.mxu0 %v11627_v58  ;;  %7266 = vmatpush.bf16.msra.mxu1 %v11636_v21 }
 0x4eb   : > { %v6561_v43 = vadd.f32 %v6556_v22, %v6470_v33 }
 0x4ec   : > { %v6260_v20 = vpop.f32.mrf.mxu0 }
 0x4ed   : > { %v6264_v41 = vadd.f32 %v6260_v20, %v6173_v24 }
 0x4ee   : > { %v6765_v25 = vpop.f32.mrf.mxu1 }
 0x4ef   : > { %v6375_v34 = vadd.f32 %v6371_v11, %v6264_v41  ;;  %v11618_v41 = vld [vmem:[%s16393_s17 + $0x60] sm:$0xff] }
 0x4f0   : > { %6994 = vmatpush.bf16.msra.mxu2 %v11618_v41 }
 0x4f1   : > { %v6471_v13 = vadd.f32 %v6467_v15, %v6375_v34 }
 0x4f3   : > { %v6562_v7 = vadd.f32 %v6558_v47, %v6471_v13  ;;  %v11635_v13 = vld [vmem:[%s16393_s17 + $0xe8] sm:$0xff] }
 0x4f4   : > { %v6667_v12 = vpop.f32.mrf.mxu0  ;;  %7267 = vmatpush.bf16.msra.mxu1 %v11635_v13 }
 0x4f5   : > { %v6672_v19 = vadd.f32 %v6667_v12, %v6561_v43 }
 0x4f7   : > { %v6768_v32 = vadd.f32 %v6763_v3, %v6672_v19  ;;  %v11610_v3 = vld [vmem:[%s16393_s17 + $0x20] sm:$0xff] }
 0x4f8   : > { %7065 = vmatpush.bf16.msra.mxu3 %v11610_v3 }
 0x4f9   : > { %v6774_v17 = vadd.f32 %v11820_v26, %v6768_v32  ;;  %v11626_v32 = vld [vmem:[%s16393_s17 + $0xa0] sm:$0xff] }
 0x4fa   : > { %7177 = vmatpush.bf16.msrb.mxu0 %v11626_v32  ;;  %v11667_v32 = vld [vmem:[%s16393_s17 + $0x1e8] sm:$0xff] }
 0x4fb   : > { %v6793_v46 = vrot.slane %v6774_v17, 4  ;;  %6797 = vst [vmem:[#allocation4 + $0x9] sm:$0xf] %v6774_v17 }
 0x4fc   : > { %8770 = vst [vmem:[%s15625_s30] sm:$0xff] %v6774_v17  ;;  %v6669_v48 = vpop.f32.mrf.mxu0 }
 0x4fd   : > { %6798 = vst [vmem:[#allocation4 + $0x11] sm:$0xf] %v6793_v46  ;;  %v6673_v10 = vadd.f32 %v6669_v48, %v6562_v7  ;;  %v11617_v7 = vld [vmem:[%s16393_s17 + $0x58] sm:$0xff] }
 0x4fe   : > { %v11609_v48 = vld [vmem:[%s16393_s17 + $0x18] sm:$0xff]  ;;  %6995 = vmatpush.bf16.msra.mxu2 %v11617_v7 }
 0x4ff   : > { %v6769_v59 = vadd.f32 %v6765_v25, %v6673_v10  ;;  %v11625_v25 = vld [vmem:[%s16393_s17 + $0x98] sm:$0xff]  ;;  %7066 = vmatpush.bf16.msra.mxu3 %v11609_v48 }
 0x500   : > { %7178 = vmatpush.bf16.msrb.mxu0 %v11625_v25  ;;  %v11648_v25 = vld [vmem:[%s16393_s17 + $0x150] sm:$0xff] }
 0x501   : > { %v6775_v28 = vadd.f32 %v11820_v26, %v6769_v59  ;;  %v11634_v59 = vld [vmem:[%s16393_s17 + $0xe0] sm:$0xff] }
 0x502   : > { %v6802_v52 = vld [vmem:[#allocation4 + $0x8] sm:$0x3f]  ;;  %7268 = vmatpush.bf16.msra.mxu1 %v11634_v59 }
 0x503   : > { %v15628_v53 = vpack.c.bf16 %v6802_v52, %v6802_v52  ;;  %v6794_v18 = vrot.slane %v6775_v28, 4  ;;  %6799 = vst [vmem:[#allocation4 + $0x19] sm:$0xf] %v6775_v28 }
 0x504   : > { %v6803_v60 = vld [vmem:[#allocation4 + $0x10] sm:$0x3f]  ;;  %8771 = vst [vmem:[%s15625_s30 + $0x8] sm:$0xff] %v6775_v28  ;;  %7179 = vmatpush.bf16.msrb.mxu0 %v11624_v35 }
 0x505   : > { %v15631_v29 = vpack.c.bf16 %v6803_v60, %v6803_v60  ;;  %v6834_v27 = vrot.slane %v15628_v53, 2  ;;  %6800 = vst [vmem:[#allocation4 + $0x21] sm:$0xf] %v6794_v18  ;;  %v11616_v18 = vld [vmem:[%s16393_s17 + $0x50] sm:$0xff] }
 0x506   : > { %v11608_v60 = vld [vmem:[%s16393_s17 + $0x10] sm:$0xff]  ;;  %6996 = vmatpush.bf16.msra.mxu2 %v11616_v18  ;;  %v11639_v18 = vld [vmem:[%s16393_s17 + $0x108] sm:$0xff] }
 0x507   : > { %v6835_v38 = vrot.slane %v15631_v29, 2  ;;  %v15640_v9 = vsel %vm5805_vm8, %v15628_v53, %v6834_v27  ;;  %v15644_v63 = vsel %vm5809_vm5, %v15628_v53, %v6834_v27  ;;  %7067 = vmatpush.bf16.msra.mxu3 %v11608_v60 }
 0x508   : > { %v6848_v37 = vrot.slane %v15644_v63, 2  ;;  %v6874_v54 = vshrl.u32 %v15640_v9, 16  ;;  %v6877_v51 = vshll.u32 %v15640_v9, 16  ;;  %v10582_v58 = vrot.slane %v15640_v9, 9  ;;  %v11659_v63 = vld [vmem:[%s16393_s17 + $0x1a8] sm:$0xff]  ;;  %v11668_v9 = vld [vmem:[%s16393_s17 + $0x1f0] sm:$0xff] }
 0x509   : > { %v15657_v57 = vsel %vm5805_vm8, %v15631_v29, %v6835_v38  ;;  %v15661_v16 = vsel %vm5809_vm5, %v15631_v29, %v6835_v38  ;;  %v11633_v38 = vld [vmem:[%s16393_s17 + $0xd8] sm:$0xff] }
 0x50a   : > { %v6854_v1 = vrot.slane %v15661_v16, 2  ;;  %v6876_v50 = vrot.slane %v6874_v54, 6  ;;  %v6879_v30 = vrot.slane %v6877_v51, 7  ;;  %v6883_v6 = vshll.u32 %v6848_v37, 16  ;;  %v6804_v23 = vld [vmem:[#allocation4 + $0x18] sm:$0x3f]  ;;  %7269 = vmatpush.bf16.msra.mxu1 %v11633_v38  ;;  %6997 = vmatpush.bf16.msra.mxu2 %v11615_v8 }
 0x50b   : > { %v6887_v31 = vshrl.u32 %v15657_v57, 16  ;;  %v6890_v56 = vshll.u32 %v15657_v57, 16  ;;  %v15682_v36 = vpack.c.bf16 %v6804_v23, %v6804_v23  ;;  %v11607_v54 = vld [vmem:[%s16393_s17 + $0x8] sm:$0xff] }
 0x50c   : > { %v6880_v49 = vor.u32 %v6879_v30, %v6876_v50  ;;  %v6896_v55 = vshll.u32 %v6854_v1, 16  ;;  %v6885_v14 = vrot.slane %v6883_v6, 7  ;;  %v11623_v51 = vld [vmem:[%s16393_s17 + $0x88] sm:$0xff]  ;;  %7068 = vmatpush.bf16.msra.mxu3 %v11607_v54  ;;  %v11606_v50 = vld [vmem:[%s16393_s17] sm:$0xff]  ;;  %v11653_v6 = vld [vmem:[%s16393_s17 + $0x178] sm:$0xff] }
 0x50d   : > { %v6889_v44 = vrot.slane %v6887_v31, 6  ;;  %v6892_v5 = vrot.slane %v6890_v56, 7  ;;  %v6836_v11 = vrot.slane %v15682_v36, 2  ;;  %v16867_v23 = vld [vmem:[#allocation25_spill] sm:$0xff]  ;;  %7180 = vmatpush.bf16.msrb.mxu0 %v11623_v51  ;;  %v11622_v31 = vld [vmem:[%s16393_s17 + $0x80] sm:$0xff]  ;;  %v11665_v51 = vld [vmem:[%s16393_s17 + $0x1d8] sm:$0xff] }
 0x50e   : > { %v6881_v62 = vrot.slane %v6880_v49, 2  ;;  %v6898_v22 = vrot.slane %v6896_v55, 7  ;;  %7270 = vmatpush.bf16.msra.mxu1 %v11632_v40  ;;  %6998 = vmatpush.bf16.msra.mxu2 %v11614_v61  ;;  %v11631_v56 = vld [vmem:[%s16393_s17 + $0xc8] sm:$0xff]  ;;  %v11644_v49 = vld [vmem:[%s16393_s17 + $0x130] sm:$0xff]  ;;  %v11677_v61 = vld [vmem:[%s16393_s17 + $0x238] sm:$0xff] }
 0x50f   : > { %v6893_v39 = vor.u32 %v6892_v5, %v6889_v44  ;;  %v15707_v34 = vsel %vm5805_vm8, %v15682_v36, %v6836_v11  ;;  %v15711_v43 = vsel %vm5809_vm5, %v15682_v36, %v6836_v11  ;;  %v6805_v44 = vld [vmem:[#allocation4 + $0x20] sm:$0x3f]  ;;  %v11630_v5 = vld [vmem:[%s16393_s17 + $0xc0] sm:$0xff]  ;;  %v11660_v55 = vld [vmem:[%s16393_s17 + $0x1b0] sm:$0xff] }
 0x510   : > { %v15699_v24 = vsel %vm13446_vm13, %v6881_v62, %v6885_v14  ;;  %v6860_v12 = vrot.slane %v15711_v43, 2  ;;  %v6900_v19 = vshrl.u32 %v15707_v34, 16  ;;  %v6903_v26 = vshll.u32 %v15707_v34, 16  ;;  %7069 = vmatpush.bf16.msra.mxu3 %v11606_v50  ;;  %v11651_v11 = vld [vmem:[%s16393_s17 + $0x168] sm:$0xff]  ;;  %v11664_v50 = vld [vmem:[%s16393_s17 + $0x1d0] sm:$0xff] }
 0x511   : > { %v6894_v33 = vrot.slane %v6893_v39, 2  ;;  %6934 = vst [vmem:[#allocation1 + $0x1] ss:$4 sm:$0xff] %v15699_v24  ;;  %7181 = vmatpush.bf16.msrb.mxu0 %v11622_v31  ;;  %v7086_v62 = vrot.slane %v6848_v37, 7  ;;  %v7090_v14 = vrot.slane %v6854_v1, 7  ;;  %v15820_v39 = vpack.c.bf16 %v6805_v44, %v6805_v44  ;;  %v11642_v1 = vld [vmem:[%s16393_s17 + $0x120] sm:$0xff] }
 0x512   : > { %v6902_v17 = vrot.slane %v6900_v19, 6  ;;  %v6905_v47 = vrot.slane %v6903_v26, 7  ;;  %v6909_v46 = vshll.u32 %v6860_v12, 16  ;;  %7376 = vmatpush.bf16.msrb.mxu2 %v11645_v0  ;;  %7271 = vmatpush.bf16.msra.mxu1 %v11631_v56  ;;  %v7094_v21 = vrot.slane %v6860_v12, 7  ;;  %v16869_v43 = vld [vmem:[#allocation29_spill] sm:$0xff]  ;;  %v11650_v12 = vld [vmem:[%s16393_s17 + $0x160] sm:$0xff] }
 0x513   : > { %v15721_v15 = vsel %vm13446_vm13, %v6894_v33, %v6898_v22  ;;  %v10583_v37 = vrot.slane %v15657_v57, 9  ;;  %v15840_v33 = vsel %vm12410_vm11, %v10582_v58, %v7086_v62  ;;  %v10584_v22 = vrot.slane %v15707_v34, 9  ;;  %v11658_v34 = vld [vmem:[%s16393_s17 + $0x1a0] sm:$0xff]  ;;  %v11641_v26 = vld [vmem:[%s16393_s17 + $0x118] sm:$0xff]  ;;  %v11647_v38 = vld [vmem:[%s16393_s17 + $0x148] sm:$0xff] }
 0x514   : > { %6937 = vst [vmem:[#allocation1 + $0x2] ss:$4 sm:$0xff] %v15721_v15  ;;  %v6906_v10 = vor.u32 %v6905_v47, %v6902_v17  ;;  %v6911_v52 = vrot.slane %v6909_v46, 7  ;;  %7472 = vmatpush.bf16.msrb.mxu3 %v11653_v6  ;;  %v7282_v3 = vrot.slane %v15820_v39, 2  ;;  %v11649_v17 = vld [vmem:[%s16393_s17 + $0x158] sm:$0xff]  ;;  %v11640_v46 = vld [vmem:[%s16393_s17 + $0x110] sm:$0xff] }
 0x515   : > { %7563 = vmatpush.bf16.msra.mxu0 %v11661_v45  ;;  %v15846_v57 = vsel %vm12410_vm11, %v10583_v37, %v7090_v14  ;;  %v15855_v19 = vsel %vm12410_vm11, %v10584_v22, %v7094_v21  ;;  %v11657_v47 = vld [vmem:[%s16393_s17 + $0x198] sm:$0xff]  ;;  %v11655_v54 = vld [vmem:[%s16393_s17 + $0x188] sm:$0xff]  ;;  %v11646_v0 = vld [vmem:[%s16393_s17 + $0x140] sm:$0xff] }
 0x516   : > { %v6907_v28 = vrot.slane %v6906_v10, 2  ;;  %7377 = vmatpush.bf16.msrb.mxu2 %v11644_v49  ;;  %7272 = vmatpush.bf16.msra.mxu1 %v11630_v5  ;;  %v15870_v13 = vsel %vm5805_vm8, %v15820_v39, %v7282_v3  ;;  %v11666_v10 = vld [vmem:[%s16393_s17 + $0x1e0] sm:$0xff]  ;;  %v11676_v31 = vld [vmem:[%s16393_s17 + $0x230] sm:$0xff]  ;;  %v11663_v5 = vld [vmem:[%s16393_s17 + $0x1c8] sm:$0xff] }
 0x517   : > { %v7288_v7 = vshrl.u32 %v15870_v13, 16  ;;  %v7291_v48 = vshll.u32 %v15870_v13, 16  ;;  %v11654_v6 = vld [vmem:[%s16393_s17 + $0x180] sm:$0xff]  ;;  %v10729_v58 = vrot.slane %v15870_v13, 9  ;;  %v11672_v37 = vld [vmem:[%s16393_s17 + $0x210] sm:$0xff] }
 0x518   : > { %v15752_v27 = vsel %vm13446_vm13, %v6907_v28, %v6911_v52  ;;  %7473 = vmatpush.bf16.msrb.mxu3 %v11652_v2  ;;  %v11656_v28 = vld [vmem:[%s16393_s17 + $0x190] sm:$0xff]  ;;  %v7285_v52 = vsel %vm5809_vm5, %v15820_v39, %v7282_v3  ;;  %v11675_v2 = vld [vmem:[%s16393_s17 + $0x228] sm:$0xff]  ;;  %v6806_v44 = vld [vmem:[#allocation4 + $0x28] sm:$0x3f] }
 0x519   : > { %6940 = vst [vmem:[#allocation1 + $0x3] ss:$4 sm:$0xff] %v15752_v27  ;;  %7564 = vmatpush.bf16.msra.mxu0 %v11660_v55  ;;  %v7290_v60 = vrot.slane %v7288_v7, 6  ;;  %v7293_v35 = vrot.slane %v7291_v48, 7  ;;  %v7287_v8 = vrot.slane %v7285_v52, 2  ;;  %v11674_v55 = vld [vmem:[%s16393_s17 + $0x220] sm:$0xff] }
 0x51a   : > { %7378 = vmatpush.bf16.msrb.mxu2 %v11643_v42  ;;  %7674 = vmatpush.bf16.msrb.mxu1 %v11669_v4  ;;  %v11662_v42 = vld [vmem:[%s16393_s17 + $0x1c0] sm:$0xff] }
 0x51b   : > { %v7294_v40 = vor.u32 %v7293_v35, %v7290_v60  ;;  %v7395_v4 = vrot.slane %v7287_v8, 7 }
 0x51c   : > { %7474 = vmatpush.bf16.msrb.mxu3 %v11651_v11  ;;  %v11673_v11 = vld [vmem:[%s16393_s17 + $0x218] sm:$0xff] }
 0x51d   : > { %7565 = vmatpush.bf16.msra.mxu0 %v11659_v63  ;;  %v7396_v21 = vsel %vm12410_vm11, %v10729_v58, %v7395_v4 }
 0x51e   : > { %7379 = vmatpush.bf16.msrb.mxu2 %v11642_v1  ;;  %7675 = vmatpush.bf16.msrb.mxu1 %v11668_v9 }
 0x520   : > { %v6941_v30 = vld.sshfl [vmem:[#allocation1] sm:$0xff pattern:$0x73625140]  ;;  %7475 = vmatpush.bf16.msrb.mxu3 %v11650_v12 }
 0x521   : > { %7005 = vst [vmem:[#allocation1] ss:$4 sm:$0xff] %v16867_v23  ;;  %6999 = vmatmul.bf16.vlgmr.msra.gmra.mxu2 %v6941_v30  ;;  %7566 = vmatpush.bf16.msra.mxu0 %v11658_v34  ;;  %v7297_v30 = vshll.u32 %v7287_v8, 16  ;;  %v7295_v23 = vrot.slane %v7294_v40, 2  ;;  %v11670_v34 = vld [vmem:[%s16393_s17 + $0x200] sm:$0xff] }
 0x522   : > { %7007 = vst [vmem:[#allocation1 + $0x1] ss:$4 sm:$0xff] %v15628_v53  ;;  %7380 = vmatpush.bf16.msrb.mxu2 %v11641_v26  ;;  %7676 = vmatpush.bf16.msrb.mxu1 %v11667_v32 }
 0x523   : > { %7009 = vst [vmem:[#allocation1 + $0x2] ss:$4 sm:$0xff] %v15631_v29  ;;  %v7299_v45 = vrot.slane %v7297_v30, 7 }
 0x524   : > { %7011 = vst [vmem:[#allocation1 + $0x3] ss:$4 sm:$0xff] %v15682_v36  ;;  %7476 = vmatpush.bf16.msrb.mxu3 %v11649_v17 }
 0x525   : > { %7567 = vmatpush.bf16.msra.mxu0 %v11657_v47  ;;  %v7300_v49 = vsel %vm13446_vm13, %v7295_v23, %v7299_v45  ;;  %v7835_v47 = vld [vmem:[#allocation5] sm:$0xf] }
 0x526   : > { %7381 = vmatpush.bf16.msrb.mxu2 %v11640_v46  ;;  %7677 = vmatpush.bf16.msrb.mxu1 %v11666_v10  ;;  %v15970_v7 = vpack.c.bf16 %v7835_v47, %v7835_v47  ;;  %v11689_v47 = vld [vmem:[%s16395_s19 + $0x58] sm:$0xff] }
 0x528   : > { %7477 = vmatpush.bf16.msrb.mxu3 %v11648_v25 }
 0x529   : > { %7568 = vmatpush.bf16.msra.mxu0 %v11656_v28 }
 0x52a   : > { %7382 = vmatpush.bf16.msrb.mxu2 %v11639_v18  ;;  %7678 = vmatpush.bf16.msrb.mxu1 %v11665_v51  ;;  %v11693_v51 = vld [vmem:[%s16395_s19 + $0x78] sm:$0xff] }
 0x52b   : > { %v7012_v16 = vld.sshfl [vmem:[#allocation1] sm:$0xff pattern:$0x73625140] }
 0x52c   : > { %7070 = vmatmul.bf16.vlgmr.msra.gmra.mxu3 %v7012_v16  ;;  %7114 = vst [vmem:[#allocation1] ss:$4 sm:$0xff] %v16869_v43 }
 0x52d   : > { %7117 = vst [vmem:[#allocation1 + $0x1] ss:$4 sm:$0xff] %v15840_v33  ;;  %7478 = vmatpush.bf16.msrb.mxu3 %v11647_v38  ;;  %7569 = vmatpush.bf16.msra.mxu0 %v11655_v54 }
 0x52e   : > { %7120 = vst [vmem:[#allocation1 + $0x2] ss:$4 sm:$0xff] %v15846_v57  ;;  %7679 = vmatpush.bf16.msrb.mxu1 %v11664_v50 }
 0x52f   : > { %7123 = vst [vmem:[#allocation1 + $0x3] ss:$4 sm:$0xff] %v15855_v19 }
 0x531   : > { %7479 = vmatpush.bf16.msrb.mxu3 %v11646_v0  ;;  %7570 = vmatpush.bf16.msra.mxu0 %v11654_v6 }
 0x532   : > { %7680 = vmatpush.bf16.msrb.mxu1 %v11663_v5 }
 0x536   : > { %v7124_v59 = vld.sshfl [vmem:[#allocation1] sm:$0xff pattern:$0x73625140]  ;;  %7681 = vmatpush.bf16.msrb.mxu1 %v11662_v42 }
 0x537   : > { %7182 = vmatmul.bf16.vlgmr.msrb.gmra.mxu0 %v7124_v59  ;;  %7207 = vst [vmem:[#allocation1] ss:$4 sm:$0xff] %v15628_v53  ;;  %v11638_v53 = vld [vmem:[%s16393_s17 + $0x100] sm:$0xff] }
 0x538   : > { %7209 = vst [vmem:[#allocation1 + $0x1] ss:$4 sm:$0xff] %v15631_v29  ;;  %7383 = vmatpush.bf16.msrb.mxu2 %v11638_v53  ;;  %7978 = vmatpush.bf16.msrb.mxu0 %v11693_v51  ;;  %v11705_v51 = vld [vmem:[%s16395_s19 + $0xd8] sm:$0xff] }
 0x539   : > { %7211 = vst [vmem:[#allocation1 + $0x2] ss:$4 sm:$0xff] %v15682_v36 }
 0x53a   : > { %7214 = vst [vmem:[#allocation1 + $0x3] ss:$4 sm:$0xff] %v15820_v39 }
 0x53c   : > { %7770 = vmatpush.bf16.msra.mxu2 %v11677_v61 }
 0x540   : > { %7771 = vmatpush.bf16.msra.mxu2 %v11676_v31 }
 0x541   : > { %v7215_v56 = vld.sshfl [vmem:[#allocation1] sm:$0xff pattern:$0x73625140] }
 0x542   : > { %7273 = vmatmul.bf16.vlgmr.msra.gmra.mxu1 %v7215_v56  ;;  %7318 = vst [vmem:[#allocation1] ss:$4 sm:$0xff] %v15699_v24  ;;  %v6812_v24 = vpack.c.bf16 %v6806_v44, %v6806_v44 }
 0x543   : > { %7320 = vst [vmem:[#allocation1 + $0x1] ss:$4 sm:$0xff] %v15721_v15 }
 0x544   : > { %7322 = vst [vmem:[#allocation1 + $0x2] ss:$4 sm:$0xff] %v15752_v27  ;;  %7772 = vmatpush.bf16.msra.mxu2 %v11675_v2  ;;  %v7580_v62 = vrot.slane %v6812_v24, 2 }
 0x545   : > { %7325 = vst [vmem:[#allocation1 + $0x3] ss:$4 sm:$0xff] %v7300_v49 }
 0x546   : > { %v7582_v63 = vsel %vm5805_vm8, %v6812_v24, %v7580_v62  ;;  %v7583_v9 = vsel %vm5809_vm5, %v6812_v24, %v7580_v62  ;;  %vm7875_vm5 = vsmask.f32 256  ;;  %vm7876_vm8 = vsmask.f32 1284 }
 0x547   : > { %v7586_v16 = vshrl.u32 %v7582_v63, 16  ;;  %v7589_v1 = vshll.u32 %v7582_v63, 16  ;;  %v7585_v22 = vrot.slane %v7583_v9, 2  ;;  %vm7877_vm14 = vmor %vm7875_vm5, %vm7876_vm8  ;;  %vm7888_vm5 = vsmask.f32 7452 }
 0x548   : > { %7773 = vmatpush.bf16.msra.mxu2 %v11674_v55  ;;  %vm7879_vm3 = vmor %vm7877_vm14, %vm7878_vm15 }
 0x549   : > { %v7588_v43 = vrot.slane %v7586_v16, 6  ;;  %v7591_v3 = vrot.slane %v7589_v1, 7  ;;  %v7595_v32 = vshll.u32 %v7585_v22, 16  ;;  %vm7881_vm0 = vmor %vm7879_vm3, %vm7880_vm4  ;;  %v7693_v48 = vrot.slane %v7585_v22, 7  ;;  %v11821_v16 = vld [vmem:[%s16394_s18] ss:$0 sm:$0xff] }
 0x54a   : > { %vm7883_vm7 = vmor %vm7881_vm0, %vm7882_vm6  ;;  %v6776_v22 = vld [vmem:[%s16872_s6] sm:$0xf] }
 0x54b   : > { %v7592_v26 = vor.u32 %v7591_v3, %v7588_v43  ;;  %v7597_v17 = vrot.slane %v7595_v32, 7  ;;  %vm7885_vm10 = vmor %vm7883_vm7, %vm7884_vm9  ;;  %v11692_v43 = vld [vmem:[%s16395_s19 + $0x70] sm:$0xff]  ;;  %v11685_v3 = vld [vmem:[%s16395_s19 + $0x38] sm:$0xff] }
 0x54c   : > { %v7326_v14 = vld.sshfl [vmem:[#allocation1] sm:$0xff pattern:$0x73625140]  ;;  %7774 = vmatpush.bf16.msra.mxu2 %v11673_v11  ;;  %7979 = vmatpush.bf16.msrb.mxu0 %v11692_v43  ;;  %v11700_v32 = vld [vmem:[%s16395_s19 + $0xb0] sm:$0xff] }
 0x54d   : > { %7384 = vmatmul.bf16.vlgmr.msrb.gmra.mxu2 %v7326_v14  ;;  %7414 = vst [vmem:[#allocation1] ss:$4 sm:$0xff] %v15840_v33  ;;  %v11671_v33 = vld [vmem:[%s16393_s17 + $0x208] sm:$0xff]  ;;  %v7593_v13 = vrot.slane %v7592_v26, 2  ;;  %8044 = vmatpush.bf16.msra.mxu1 %v11685_v3  ;;  %v11701_v26 = vld [vmem:[%s16395_s19 + $0xb8] sm:$0xff]  ;;  %v11740_v43 = vld [vmem:[%s16395_s19 + $0x1f0] sm:$0xff] }
 0x54e   : > { %7416 = vst [vmem:[#allocation1 + $0x1] ss:$4 sm:$0xff] %v15846_v57  ;;  %v11720_v3 = vld [vmem:[%s16395_s19 + $0x150] sm:$0xff] }
 0x54f   : > { %7418 = vst [vmem:[#allocation1 + $0x2] ss:$4 sm:$0xff] %v15855_v19  ;;  %v7598_v46 = vsel %vm13446_vm13, %v7593_v13, %v7597_v17  ;;  %vm7887_vm13 = vmor %vm7885_vm10, %vm7886_vm12  ;;  %v11690_v13 = vld [vmem:[%s16395_s19 + $0x60] sm:$0xff]  ;;  %v11683_v17 = vld [vmem:[%s16395_s19 + $0x28] sm:$0xff] }
 0x550   : > { %7421 = vst [vmem:[#allocation1 + $0x3] ss:$4 sm:$0xff] %v7396_v21  ;;  %7775 = vmatpush.bf16.msra.mxu2 %v11672_v37  ;;  %vm15983_vm8 = vmor %vm7887_vm13, %vm7888_vm5 }
 0x554   : > { %7776 = vmatpush.bf16.msra.mxu2 %v11671_v33 }
 0x557   : > { %v7422_v12 = vld.sshfl [vmem:[#allocation1] sm:$0xff pattern:$0x73625140] }
 0x558   : > { %7480 = vmatmul.bf16.vlgmr.msrb.gmra.mxu3 %v7422_v12  ;;  %7505 = vst [vmem:[#allocation1] ss:$4 sm:$0xff] %v15631_v29  ;;  %7777 = vmatpush.bf16.msra.mxu2 %v11670_v34  ;;  %v11691_v12 = vld [vmem:[%s16395_s19 + $0x68] sm:$0xff]  ;;  %v11684_v34 = vld [vmem:[%s16395_s19 + $0x30] sm:$0xff] }
 0x559   : > { %7507 = vst [vmem:[#allocation1 + $0x1] ss:$4 sm:$0xff] %v15682_v36  ;;  %v7861_v36 = vrot.slane %v15970_v7, 3  ;;  %7980 = vmatpush.bf16.msrb.mxu0 %v11691_v12  ;;  %8045 = vmatpush.bf16.msra.mxu1 %v11684_v34 }
 0x55a   : > { %7509 = vst [vmem:[#allocation1 + $0x2] ss:$4 sm:$0xff] %v15820_v39  ;;  %v10874_v39 = vrot.slane %v7582_v63, 9 }
 0x55b   : > { %7512 = vst [vmem:[#allocation1 + $0x3] ss:$4 sm:$0xff] %v6812_v24  ;;  %v7866_v20 = vsel %vm1123_vm2, %v15970_v7, %v7861_v36  ;;  %v7865_v25 = vsel %vm1121_vm1, %v15970_v7, %v7861_v36  ;;  %v11709_v36 = vld [vmem:[%s16395_s19 + $0xf8] sm:$0xff] }
 0x55c   : > { %v7694_v10 = vsel %vm12410_vm11, %v10874_v39, %v7693_v48  ;;  %v7890_v59 = vshrl.u32 %v7865_v25, 16  ;;  %vm7792_vm11 = vcmask 130048   ;;  %8133 = vmatpush.bf16.msrb.mxu2 %v11701_v26  ;;  %v11681_v25 = vld [vmem:[%s16395_s19 + $0x18] sm:$0xff] }
 0x55d   : > { %7981 = vmatpush.bf16.msrb.mxu0 %v11690_v13  ;;  %8046 = vmatpush.bf16.msra.mxu1 %v11683_v17  ;;  %v11739_v13 = vld [vmem:[%s16395_s19 + $0x1e8] sm:$0xff] }
 0x55e   : > { %v11719_v17 = vld [vmem:[%s16395_s19 + $0x148] sm:$0xff] }
 0x560   : > { %8134 = vmatpush.bf16.msrb.mxu2 %v11700_v32  ;;  %v11730_v32 = vld [vmem:[%s16395_s19 + $0x1a0] sm:$0xff] }
 0x561   : > { %7982 = vmatpush.bf16.msrb.mxu0 %v11689_v47 }
 0x562   : > { %v7513_v29 = vld.sshfl [vmem:[#allocation1] sm:$0xff pattern:$0x73625140] }
 0x563   : > { %7571 = vmatmul.bf16.vlgmr.msra.gmra.mxu0 %v7513_v29  ;;  %7616 = vst [vmem:[#allocation1] ss:$4 sm:$0xff] %v15721_v15  ;;  %v11682_v29 = vld [vmem:[%s16395_s19 + $0x20] sm:$0xff] }
 0x564   : > { %7618 = vst [vmem:[#allocation1 + $0x1] ss:$4 sm:$0xff] %v15752_v27  ;;  %v7868_v27 = vrot.slane %v7866_v20, 1  ;;  %v11708_v20 = vld [vmem:[%s16395_s19 + $0xf0] sm:$0xff]  ;;  %8047 = vmatpush.bf16.msra.mxu1 %v11682_v29  ;;  %v11729_v29 = vld [vmem:[%s16395_s19 + $0x198] sm:$0xff] }
 0x565   : > { %7620 = vst [vmem:[#allocation1 + $0x2] ss:$4 sm:$0xff] %v7300_v49 }
 0x566   : > { %7623 = vst [vmem:[#allocation1 + $0x3] ss:$4 sm:$0xff] %v7598_v46  ;;  %v7895_v28 = vshll.u32 %v7868_v27, 16  ;;  %v11699_v46 = vld [vmem:[%s16395_s19 + $0xa8] sm:$0xff]  ;;  %v11688_v27 = vld [vmem:[%s16395_s19 + $0x50] sm:$0xff] }
 0x567   : > { %8135 = vmatpush.bf16.msrb.mxu2 %v11699_v46  ;;  %7983 = vmatpush.bf16.msrb.mxu0 %v11688_v27  ;;  %v11738_v46 = vld [vmem:[%s16395_s19 + $0x1e0] sm:$0xff]  ;;  %v11727_v27 = vld [vmem:[%s16395_s19 + $0x188] sm:$0xff] }
 0x568   : > { %v7897_v41 = vsel %vm15983_vm8, %v7890_v59, %v7895_v28  ;;  %v11697_v59 = vld [vmem:[%s16395_s19 + $0x98] sm:$0xff]  ;;  %v11707_v28 = vld [vmem:[%s16395_s19 + $0xe8] sm:$0xff]  ;;  %8048 = vmatpush.bf16.msra.mxu1 %v11681_v25 }
 0x569   : > { %v11737_v25 = vld [vmem:[%s16395_s19 + $0x1d8] sm:$0xff] }
 0x56d   : > { %v7624_v15 = vld.sshfl [vmem:[#allocation1] sm:$0xff pattern:$0x73625140] }
 0x56e   : > { %7682 = vmatmul.bf16.vlgmr.msrb.gmra.mxu1 %v7624_v15  ;;  %7712 = vst [vmem:[#allocation1] ss:$4 sm:$0xff] %v15846_v57  ;;  %v11698_v15 = vld [vmem:[%s16395_s19 + $0xa0] sm:$0xff] }
 0x56f   : > { %7714 = vst [vmem:[#allocation1 + $0x1] ss:$4 sm:$0xff] %v15855_v19  ;;  %8136 = vmatpush.bf16.msrb.mxu2 %v11698_v15 }
 0x570   : > { %7716 = vst [vmem:[#allocation1 + $0x2] ss:$4 sm:$0xff] %v7396_v21 }
 0x571   : > { %7719 = vst [vmem:[#allocation1 + $0x3] ss:$4 sm:$0xff] %v7694_v10 }
 0x573   : > { %8137 = vmatpush.bf16.msrb.mxu2 %v11697_v59  ;;  %v11749_v59 = vld [vmem:[%s16395_s19 + $0x238] sm:$0xff] }
 0x578   : > { %v7720_v18 = vld.sshfl [vmem:[#allocation1] sm:$0xff pattern:$0x73625140] }
 0x579   : > { %7778 = vmatmul.bf16.vlgmr.msra.gmra.mxu2 %v7720_v18  ;;  %7924 = vst [vmem:[#allocation1] ss:$9 sm:$0xff] %v7897_v41  ;;  %v11687_v41 = vld [vmem:[%s16395_s19 + $0x48] sm:$0xff]  ;;  %v11680_v18 = vld [vmem:[%s16395_s19 + $0x10] sm:$0xff] }
 0x57a   : > { %7984 = vmatpush.bf16.msrb.mxu0 %v11687_v41  ;;  %8049 = vmatpush.bf16.msra.mxu1 %v11680_v18  ;;  %v11726_v41 = vld [vmem:[%s16395_s19 + $0x180] sm:$0xff]  ;;  %v11736_v18 = vld [vmem:[%s16395_s19 + $0x1d0] sm:$0xff] }
 0x5a4   : > { %v7000_v57 = vpop.f32.mrf.mxu2 }
 0x5ac   : > { %v7002_v35 = vpop.f32.mrf.mxu2 }
 0x5af   : > { %v7071_v60 = vpop.f32.mrf.mxu3 }
 0x5b0   : > { %v7072_v0 = vadd.f32 %v7071_v60, %v7000_v57  ;;  %v11706_v57 = vld [vmem:[%s16395_s19 + $0xe0] sm:$0xff] }
 0x5b4   : > { %v7183_v19 = vpop.f32.mrf.mxu0 }
 0x5b5   : > { %v7188_v31 = vadd.f32 %v7183_v19, %v7072_v0 }
 0x5b7   : > { %v7073_v8 = vpop.f32.mrf.mxu3 }
 0x5b8   : > { %v7074_v50 = vadd.f32 %v7073_v8, %v7002_v35  ;;  %v11696_v35 = vld [vmem:[%s16395_s19 + $0x90] sm:$0xff]  ;;  %v11679_v8 = vld [vmem:[%s16395_s19 + $0x8] sm:$0xff] }
 0x5b9   : > { %8138 = vmatpush.bf16.msrb.mxu2 %v11696_v35  ;;  %8050 = vmatpush.bf16.msra.mxu1 %v11679_v8 }
 0x5bc   : > { %v7185_v54 = vpop.f32.mrf.mxu0 }
 0x5bd   : > { %v7189_v56 = vadd.f32 %v7185_v54, %v7074_v50  ;;  %v11678_v50 = vld [vmem:[%s16395_s19] sm:$0xff] }
 0x5be   : > { %8051 = vmatpush.bf16.msra.mxu1 %v11678_v50 }
 0x5bf   : > { %v7274_v38 = vpop.f32.mrf.mxu1 }
 0x5c0   : > { %v7279_v45 = vadd.f32 %v7274_v38, %v7188_v31  ;;  %v11686_v38 = vld [vmem:[%s16395_s19 + $0x40] sm:$0xff] }
 0x5c1   : > { %7985 = vmatpush.bf16.msrb.mxu0 %v11686_v38 }
 0x5c7   : > { %v7276_v40 = vpop.f32.mrf.mxu1 }
 0x5c8   : > { %v7280_v49 = vadd.f32 %v7276_v40, %v7189_v56  ;;  %v11695_v40 = vld [vmem:[%s16395_s19 + $0x88] sm:$0xff] }
 0x5c9   : > { %8139 = vmatpush.bf16.msrb.mxu2 %v11695_v40 }
 0x5d0   : > { %v7385_v53 = vpop.f32.mrf.mxu2 }
 0x5d1   : > { %v7390_v44 = vadd.f32 %v7385_v53, %v7279_v45  ;;  %v11717_v53 = vld [vmem:[%s16395_s19 + $0x138] sm:$0xff]  ;;  %v11694_v45 = vld [vmem:[%s16395_s19 + $0x80] sm:$0xff] }
 0x5d2   : > { %8318 = vmatpush.bf16.msra.mxu0 %v11717_v53  ;;  %8140 = vmatpush.bf16.msrb.mxu2 %v11694_v45  ;;  %v7838_v53 = vld [vmem:[#allocation5 + $0xc] sm:$0xf] }
 0x5d3   : > { %v7842_v40 = vpack.c.bf16 %v7838_v53, %v7838_v53 }
 0x5d8   : > { %v7387_v30 = vpop.f32.mrf.mxu2 }
 0x5d9   : > { %v7391_v5 = vadd.f32 %v7387_v30, %v7280_v49 }
 0x5db   : > { %v7481_v61 = vpop.f32.mrf.mxu3 }
 0x5dc   : > { %v7486_v55 = vadd.f32 %v7481_v61, %v7390_v44  ;;  %v11714_v44 = vld [vmem:[%s16395_s19 + $0x120] sm:$0xff] }
 0x5e0   : > { %v7572_v6 = vpop.f32.mrf.mxu0 }
 0x5e1   : > { %v7577_v14 = vadd.f32 %v7572_v6, %v7486_v55  ;;  %v11716_v6 = vld [vmem:[%s16395_s19 + $0x130] sm:$0xff]  ;;  %v11702_v55 = vld [vmem:[%s16395_s19 + $0xc0] sm:$0xff] }
 0x5e2   : > { %8319 = vmatpush.bf16.msra.mxu0 %v11716_v6  ;;  %v11745_v6 = vld [vmem:[%s16395_s19 + $0x218] sm:$0xff] }
 0x5e3   : > { %v7483_v2 = vpop.f32.mrf.mxu3 }
 0x5e4   : > { %v7487_v42 = vadd.f32 %v7483_v2, %v7391_v5  ;;  %v11715_v2 = vld [vmem:[%s16395_s19 + $0x128] sm:$0xff] }
 0x5e5   : > { %v11703_v5 = vld [vmem:[%s16395_s19 + $0xc8] sm:$0xff] }
 0x5e6   : > { %8320 = vmatpush.bf16.msra.mxu0 %v11715_v2  ;;  %v11743_v2 = vld [vmem:[%s16395_s19 + $0x208] sm:$0xff] }
 0x5e8   : > { %v7574_v4 = vpop.f32.mrf.mxu0 }
 0x5e9   : > { %v7578_v11 = vadd.f32 %v7574_v4, %v7487_v42  ;;  %v11724_v42 = vld [vmem:[%s16395_s19 + $0x170] sm:$0xff] }
 0x5ea   : > { %8321 = vmatpush.bf16.msra.mxu0 %v11714_v44 }
 0x5eb   : > { %v7683_v23 = vpop.f32.mrf.mxu1 }
 0x5ec   : > { %v7688_v58 = vadd.f32 %v7683_v23, %v7577_v14  ;;  %v11704_v23 = vld [vmem:[%s16395_s19 + $0xd0] sm:$0xff] }
 0x5ed   : > { %v11712_v14 = vld [vmem:[%s16395_s19 + $0x110] sm:$0xff] }
 0x5f3   : > { %v7685_v62 = vpop.f32.mrf.mxu1 }
 0x5f4   : > { %v7689_v21 = vadd.f32 %v7685_v62, %v7578_v11  ;;  %v11713_v62 = vld [vmem:[%s16395_s19 + $0x118] sm:$0xff]  ;;  %v11723_v11 = vld [vmem:[%s16395_s19 + $0x168] sm:$0xff] }
 0x5f5   : > { %8322 = vmatpush.bf16.msra.mxu0 %v11713_v62 }
 0x5f9   : > { %8323 = vmatpush.bf16.msra.mxu0 %v11712_v14 }
 0x5fc   : > { %v7779_v24 = vpop.f32.mrf.mxu2 }
 0x5fd   : > { %v7784_v37 = vadd.f32 %v7779_v24, %v7688_v58  ;;  %v11725_v24 = vld [vmem:[%s16395_s19 + $0x178] sm:$0xff] }
 0x5fe   : > { %8408 = vmatpush.bf16.msrb.mxu1 %v11725_v24  ;;  %v11733_v58 = vld [vmem:[%s16395_s19 + $0x1b8] sm:$0xff]  ;;  %v11742_v24 = vld [vmem:[%s16395_s19 + $0x200] sm:$0xff] }
 0x5ff   : > { %v7790_v33 = vadd.f32 %v11821_v16, %v7784_v37  ;;  %8493 = vmatpush.bf16.msra.mxu2 %v11733_v58 }
 0x602   : > { %8409 = vmatpush.bf16.msrb.mxu1 %v11724_v42 }
 0x604   : > { %v7781_v63 = vpop.f32.mrf.mxu2 }
 0x605   : > { %v7785_v1 = vadd.f32 %v7781_v63, %v7689_v21  ;;  %v11711_v21 = vld [vmem:[%s16395_s19 + $0x108] sm:$0xff]  ;;  %v11722_v63 = vld [vmem:[%s16395_s19 + $0x160] sm:$0xff] }
 0x606   : > { %8410 = vmatpush.bf16.msrb.mxu1 %v11723_v11  ;;  %8324 = vmatpush.bf16.msra.mxu0 %v11711_v21 }
 0x607   : > { %v7791_v9 = vadd.f32 %v11821_v16, %v7785_v1  ;;  %v11732_v16 = vld [vmem:[%s16395_s19 + $0x1b0] sm:$0xff]  ;;  %v11710_v1 = vld [vmem:[%s16395_s19 + $0x100] sm:$0xff] }
 0x608   : > { %8494 = vmatpush.bf16.msra.mxu2 %v11732_v16 }
 0x609   : > { %7810 = vmatpush.msra.mxu3 %v7791_v9  ;;  %v11721_v9 = vld [vmem:[%s16395_s19 + $0x158] sm:$0xff] }
 0x60a   : > { %8411 = vmatpush.bf16.msrb.mxu1 %v11722_v63  ;;  %8325 = vmatpush.bf16.msra.mxu0 %v11710_v1 }
 0x60b   : > { %7811 = vmatpush.msra.mxu3 %v7790_v33  ;;  %v11731_v33 = vld [vmem:[%s16395_s19 + $0x1a8] sm:$0xff] }
 0x60c   : > { %10923 = vmatmul.msk.f32.vlgmr.msra.gmra.mxu3 %vm7792_vm11, %v6776_v22  ;;  %v11741_v22 = vld [vmem:[%s16395_s19 + $0x1f8] sm:$0xff]  ;;  %8495 = vmatpush.bf16.msra.mxu2 %v11731_v33 }
 0x60d   : > { %8218 = vmatpush.bf16.msrb.mxu3 %v11709_v36  ;;  %v11718_v36 = vld [vmem:[%s16395_s19 + $0x140] sm:$0xff] }
 0x60e   : > { %8412 = vmatpush.bf16.msrb.mxu1 %v11721_v9 }
 0x610   : > { %8496 = vmatpush.bf16.msra.mxu2 %v11730_v32 }
 0x611   : > { %8219 = vmatpush.bf16.msrb.mxu3 %v11708_v20 }
 0x612   : > { %8413 = vmatpush.bf16.msrb.mxu1 %v11720_v3 }
 0x614   : > { %8497 = vmatpush.bf16.msra.mxu2 %v11729_v29 }
 0x615   : > { %8220 = vmatpush.bf16.msrb.mxu3 %v11707_v28 }
 0x616   : > { %8414 = vmatpush.bf16.msrb.mxu1 %v11719_v17 }
 0x619   : > { %8221 = vmatpush.bf16.msrb.mxu3 %v11706_v57 }
 0x61a   : > { %8415 = vmatpush.bf16.msrb.mxu1 %v11718_v36 }
 0x61d   : > { %8222 = vmatpush.bf16.msrb.mxu3 %v11705_v51  ;;  %v11747_v51 = vld [vmem:[%s16395_s19 + $0x228] sm:$0xff] }
 0x621   : > { %8223 = vmatpush.bf16.msrb.mxu3 %v11704_v23 }
 0x625   : > { %8224 = vmatpush.bf16.msrb.mxu3 %v11703_v5 }
 0x629   : > { %8225 = vmatpush.bf16.msrb.mxu3 %v11702_v55 }
 0x62d   : > { %8593 = vmatpush.bf16.msra.mxu3 %v11741_v22 }
 0x631   : > { %8594 = vmatpush.bf16.msra.mxu3 %v11740_v43 }
 0x635   : > { %8595 = vmatpush.bf16.msra.mxu3 %v11739_v13 }
 0x639   : > { %8596 = vmatpush.bf16.msra.mxu3 %v11738_v46 }
 0x63d   : > { %8597 = vmatpush.bf16.msra.mxu3 %v11737_v25 }
 0x641   : > { %8598 = vmatpush.bf16.msra.mxu3 %v11736_v18 }
 0x68f   : > { %v7813_v39 = vpop.f32.mrf.mxu3 }
 0x690   : > { %v7817_v48 = vmax.f32 %v7813_v39, 0.0  ;;  %8772 = vst [vmem:[%s16035_s24] sm:$0xf] %v7813_v39 }
 0x692   : > { %v7830_v10 = vrot.slane %v7817_v48, 2  ;;  %7833 = vst [vmem:[#allocation5 + $0x5] sm:$0x3] %v7817_v48  ;;  %v11728_v48 = vld [vmem:[%s16395_s19 + $0x190] sm:$0xff] }
 0x693   : > { %8498 = vmatpush.bf16.msra.mxu2 %v11728_v48 }
 0x694   : > { %7834 = vst [vmem:[#allocation5 + $0x9] sm:$0x3] %v7830_v10 }
 0x697   : > { %8499 = vmatpush.bf16.msra.mxu2 %v11727_v27 }
 0x699   : > { %v7836_v60 = vld [vmem:[#allocation5 + $0x4] sm:$0xf] }
 0x69a   : > { %v16068_v19 = vpack.c.bf16 %v7836_v60, %v7836_v60  ;;  %v11748_v60 = vld [vmem:[%s16395_s19 + $0x230] sm:$0xff] }
 0x69b   : > { %8500 = vmatpush.bf16.msra.mxu2 %v11726_v41 }
 0x69c   : > { %v7862_v54 = vrot.slane %v16068_v19, 3 }
 0x69e   : > { %v7871_v61 = vsel %vm1121_vm1, %v16068_v19, %v7862_v54  ;;  %v7872_v0 = vsel %vm1123_vm2, %v16068_v19, %v7862_v54  ;;  %v11735_v54 = vld [vmem:[%s16395_s19 + $0x1c8] sm:$0xff] }
 0x69f   : > { %v7874_v30 = vrot.slane %v7872_v0, 1  ;;  %v7898_v31 = vshrl.u32 %v7871_v61, 16  ;;  %8599 = vmatpush.bf16.msra.mxu3 %v11735_v54  ;;  %v11734_v61 = vld [vmem:[%s16395_s19 + $0x1c0] sm:$0xff] }
 0x6a1   : > { %v7903_v56 = vshll.u32 %v7874_v30, 16  ;;  %v8508_v30 = vrot.slane %v7842_v40, 3 }
 0x6a3   : > { %v16104_v49 = vsel %vm15983_vm8, %v7898_v31, %v7903_v56  ;;  %8600 = vmatpush.bf16.msra.mxu3 %v11734_v61  ;;  %v8511_v23 = vsel %vm1123_vm2, %v7842_v40, %v8508_v30  ;;  %v11744_v31 = vld [vmem:[%s16395_s19 + $0x210] sm:$0xff] }
 0x6a4   : > { %7927 = vst [vmem:[#allocation1 + $0x1] ss:$9 sm:$0xff] %v16104_v49  ;;  %v8513_v45 = vrot.slane %v8511_v23, 1 }
 0x6a6   : > { %v8519_v5 = vshll.u32 %v8513_v45, 16 }
 0x6ab   : > { %v7928_v4 = vld [vmem:[#allocation1] sm:$0xff] }
 0x6ac   : > { %7986 = vmatmul.bf16.vlgmr.msrb.gmra.mxu0 %v7928_v4  ;;  %7991 = vst [vmem:[#allocation1] ss:$9 sm:$0xff] %v15970_v7 }
 0x6ad   : > { %7993 = vst [vmem:[#allocation1 + $0x1] ss:$9 sm:$0xff] %v16068_v19  ;;  %8683 = vmatpush.bf16.msrb.mxu0 %v11749_v59 }
 0x6ae   : > { %8060 = vst [vmem:[#allocation1 + $0x20] sm:$0xff] %v16068_v19 }
 0x6b1   : > { %8684 = vmatpush.bf16.msrb.mxu0 %v11748_v60 }
 0x6b4   : > { %v7994_v37 = vld [vmem:[#allocation1] sm:$0xff] }
 0x6b5   : > { %8052 = vmatmul.bf16.vlgmr.msra.gmra.mxu1 %v7994_v37  ;;  %8057 = vst [vmem:[#allocation1] sm:$0xff] %v15970_v7  ;;  %v7837_v7 = vld [vmem:[#allocation5 + $0x8] sm:$0xf]  ;;  %8685 = vmatpush.bf16.msrb.mxu0 %v11747_v51 }
 0x6b6   : > { %v16168_v12 = vpack.c.bf16 %v7837_v7, %v7837_v7  ;;  %v8062_v26 = vld [vmem:[#allocation1 + $0x21] ss:$4 sm:$0xff] }
 0x6b8   : > { %v8233_v47 = vrot.slane %v16168_v12, 3 }
 0x6ba   : > { %v8236_v39 = vsel %vm1123_vm2, %v16168_v12, %v8233_v47  ;;  %v8235_v10 = vsel %vm1121_vm1, %v16168_v12, %v8233_v47  ;;  %vm8702_vm2 = vcmask 31744  }
 0x6bb   : > { %v8238_v15 = vrot.slane %v8236_v39, 1  ;;  %v8239_v57 = vshrl.u32 %v8235_v10, 16  ;;  %v11822_v39 = vld [vmem:[%s16873_s9] ss:$0 sm:$0xff]  ;;  %s16876_s9 = sld [smem:[#allocation114_spill]] }
 0x6bc   : > { %v8059_v34 = vld [vmem:[#allocation1 + $0x1] ss:$4 sm:$0xff]  ;;  %v7816_v10 = vld [vmem:[%s16874_s23] sm:$0x1] }
 0x6bd   : > { %8080 = vst [vmem:[#allocation1] ss:$9 sm:$0xff] %v8059_v34  ;;  %v8244_v28 = vshll.u32 %v8238_v15, 16 }
 0x6be   : > { %8082 = vst [vmem:[#allocation1 + $0x1] ss:$9 sm:$0xff] %v8062_v26 }
 0x6bf   : > { %v8246_v38 = vsel %vm15983_vm8, %v8239_v57, %v8244_v28 }
 0x6c1   : > { %s8822_s0 = scalar_lea.hbm %s16876_s9, %s11751_s3  ;;  %s11847_s11 = scalar_lea.hbm %s16876_s9, 128 }
 0x6c2   : > { %s8825_s8 = sshll.u32 %s8822_s0, 4  ;;  %s8826_s8 = int_to_ptr.hbm [resolvable:$true] %s8825_s8 }
 0x6c3   : > { %s11841_s29 = sshra.s32 %s8826_s8, 4  ;;  %s11842_s29 = int_to_ptr.hbm [resolvable:$true] %s11841_s29 }
 0x6c4   : > { %s11843_s23 = scalar_lea.hbm %s11842_s29, 64  ;;  %p11848_p0 = scmp.lt.s32.totalorder %s11842_s29, %s16876_s9 }
 0x6c5   : > { %v8083_v20 = vld [vmem:[#allocation1] sm:$0xff]  ;;  %p11844_p11 = scmp.ne.s32.totalorder %s11842_s29, %s11843_s23  ;;  %p11849_p1 = scmp.lt.s32.totalorder %s11847_s11, %s11843_s23 }
 0x6c6   : > { %8141 = vmatmul.bf16.vlgmr.msrb.gmra.mxu2 %v8083_v20  ;;  %8164 = vst [vmem:[#allocation1] ss:$9 sm:$0xff] %v16068_v19 }
 0x6c7   : > { %8167 = vst [vmem:[#allocation1 + $0x1] ss:$9 sm:$0xff] %v16168_v12  ;;  %p11845_p12 = pnand %p11844_p11, %p12186_p5  ;;  %p11850_p2 = por %p11849_p1, %p11848_p0 }
 0x6c9   : > { %p11846_p13 = pneg %p11845_p12 }
 0x6cb   : > { %p11851_p3 = pnand %p11850_p2, %p11846_p13 }
 0x6ce   : > { %v8168_v35 = vld [vmem:[#allocation1] sm:$0xff] }
 0x6cf   : > { %8226 = vmatmul.bf16.vlgmr.msrb.gmra.mxu3 %v8168_v35  ;;  %8264 = vst [vmem:[#allocation1] ss:$9 sm:$0xff] %v16104_v49  ;;  %v8510_v49 = vsel %vm1121_vm1, %v7842_v40, %v8508_v30  ;;  %vm8706_vm1 = vcmask 1043456  }
 0x6d0   : > { %8267 = vst [vmem:[#allocation1 + $0x1] ss:$9 sm:$0xff] %v8246_v38  ;;  %v8514_v44 = vshrl.u32 %v8510_v49, 16 }
 0x6d1   : > { %8335 = vst [vmem:[#allocation1 + $0x20] sm:$0xff] %v16168_v12 }
 0x6d2   : > { %v8521_v55 = vsel %vm15983_vm8, %v8514_v44, %v8519_v5 }
 0x6d7   : > { %v8268_v8 = vld [vmem:[#allocation1] sm:$0xff] }
 0x6d8   : > { %8326 = vmatmul.bf16.vlgmr.msra.gmra.mxu0 %v8268_v8  ;;  %8332 = vst [vmem:[#allocation1] sm:$0xff] %v16068_v19  ;;  %v11746_v19 = vld [vmem:[%s16395_s19 + $0x220] sm:$0xff] }
 0x6d9   : > { %v8337_v50 = vld [vmem:[#allocation1 + $0x21] ss:$4 sm:$0xff]  ;;  %8686 = vmatpush.bf16.msrb.mxu0 %v11746_v19 }
 0x6dd   : > { %8687 = vmatpush.bf16.msrb.mxu0 %v11745_v6 }
 0x6df   : > { %v8334_v0 = vld [vmem:[#allocation1 + $0x1] ss:$4 sm:$0xff] }
 0x6e0   : > { %8355 = vst [vmem:[#allocation1] ss:$9 sm:$0xff] %v8334_v0 }
 0x6e1   : > { %8357 = vst [vmem:[#allocation1 + $0x1] ss:$9 sm:$0xff] %v8337_v50  ;;  %8688 = vmatpush.bf16.msrb.mxu0 %v11744_v31 }
 0x6e5   : > { %8689 = vmatpush.bf16.msrb.mxu0 %v11743_v2 }
 0x6e8   : > { %v8358_v56 = vld [vmem:[#allocation1] sm:$0xff] }
 0x6e9   : > { %8416 = vmatmul.bf16.vlgmr.msrb.gmra.mxu1 %v8358_v56  ;;  %8439 = vst [vmem:[#allocation1] ss:$9 sm:$0xff] %v16168_v12  ;;  %8690 = vmatpush.bf16.msrb.mxu0 %v11742_v24 }
 0x6ea   : > { %8442 = vst [vmem:[#allocation1 + $0x1] ss:$9 sm:$0xff] %v7842_v40 }
 0x6f1   : > { %v8443_v42 = vld [vmem:[#allocation1] sm:$0xff] }
 0x6f2   : > { %8501 = vmatmul.bf16.vlgmr.msra.gmra.mxu2 %v8443_v42  ;;  %8539 = vst [vmem:[#allocation1] ss:$9 sm:$0xff] %v8246_v38 }
 0x6f3   : > { %8542 = vst [vmem:[#allocation1 + $0x1] ss:$9 sm:$0xff] %v8521_v55 }
 0x6f4   : > { %8610 = vst [vmem:[#allocation1 + $0x20] sm:$0xff] %v7842_v40 }
 0x6fa   : > { %v8543_v4 = vld [vmem:[#allocation1] sm:$0xff] }
 0x6fb   : > { %8601 = vmatmul.bf16.vlgmr.msra.gmra.mxu3 %v8543_v4  ;;  %8607 = vst [vmem:[#allocation1] sm:$0xff] %v16168_v12  ;;  %v8612_v62 = vld [vmem:[#allocation1 + $0x21] ss:$4 sm:$0xff] }
 0x702   : > { %v8609_v14 = vld [vmem:[#allocation1 + $0x1] ss:$4 sm:$0xff] }
 0x703   : > { %8630 = vst [vmem:[#allocation1] ss:$9 sm:$0xff] %v8609_v14 }
 0x704   : > { %8632 = vst [vmem:[#allocation1 + $0x1] ss:$9 sm:$0xff] %v8612_v62 }
 0x70b   : > { %v8633_v11 = vld [vmem:[#allocation1] sm:$0xff] }
 0x70c   : > { %8691 = vmatmul.bf16.vlgmr.msrb.gmra.mxu0 %v8633_v11 }
 0x729   : > { %v7987_v58 = vpop.f32.mrf.mxu0 }
 0x731   : > { %v7989_v21 = vpop.f32.mrf.mxu0 }
 0x732   : > { %v8053_v52 = vpop.f32.mrf.mxu1 }
 0x733   : > { %v8054_v63 = vadd.f32 %v8053_v52, %v7987_v58 }
 0x73a   : > { %v8055_v37 = vpop.f32.mrf.mxu1 }
 0x749   : > { %v8142_v16 = vpop.f32.mrf.mxu2 }
 0x74a   : > { %v8146_v34 = vadd.f32 %v8142_v16, %v8054_v63 }
 0x751   : > { %v8144_v1 = vpop.f32.mrf.mxu2 }
 0x752   : > { %v8227_v9 = vpop.f32.mrf.mxu3 }
 0x753   : > { %v8231_v32 = vadd.f32 %v8227_v9, %v8146_v34 }
 0x755   : > { %v8327_v33 = vpop.f32.mrf.mxu0 }
 0x756   : > { %v8331_v17 = vadd.f32 %v8327_v33, %v8231_v32 }
 0x75a   : > { %v8229_v22 = vpop.f32.mrf.mxu3 }
 0x75d   : > { %v8329_v7 = vpop.f32.mrf.mxu0 }
 0x766   : > { %v8417_v43 = vpop.f32.mrf.mxu1 }
 0x767   : > { %v8421_v47 = vadd.f32 %v8417_v43, %v8331_v17 }
 0x76e   : > { %v8419_v3 = vpop.f32.mrf.mxu1 }
 0x775   : > { %v8502_v12 = vpop.f32.mrf.mxu2 }
 0x776   : > { %v8506_v29 = vadd.f32 %v8502_v12, %v8421_v47 }
 0x77d   : > { %v8504_v26 = vpop.f32.mrf.mxu2 }
 0x77e   : > { %v8602_v13 = vpop.f32.mrf.mxu3 }
 0x77f   : > { %v8606_v36 = vadd.f32 %v8602_v13, %v8506_v29 }
 0x786   : > { %v8604_v46 = vpop.f32.mrf.mxu3 }
 0x789   : > { %v8692_v48 = vpop.f32.mrf.mxu0 }
 0x78a   : > { %v8696_v20 = vadd.f32 %v8692_v48, %v8606_v36 }
 0x78c   : > { %v8701_v15 = vadd.f32 %v11822_v39, %v8696_v20 }
 0x78e   : > { %11344 = vmatpush.msk.msra.mxu1 %vm8706_vm1, %v8701_v15 }
 0x78f   : > { %11345 = vmatmul.msk.f32.vlgmr.msra.gmra.mxu1 %vm8702_vm2, %v7816_v10 }
 0x791   : > { %v8694_v27 = vpop.f32.mrf.mxu0 }
 0x792   : > { %11854 = shalt.err (!%p11851_p3)
}
 0x793   : > { %s16551_s0 = smov 128   ;;  %s16553_s6 = smov 8  }
 0x794   : > { %11754 = dma.vmem_to_hbm [thread:$0]  (%p12186_p5), %s8824_s4, 1024, %s8826_s8, %s16267_s27, %s16551_s0, %s16551_s0, %s16553_s6  }
 0x795   : > { %s16877_s29 = sld [smem:[#allocation116_spill]]  ;;  %s8857_s23 = sshll.u32 %s16035_s24, 4  ;;  %s8858_s23 = int_to_ptr.vmem [resolvable:$true] %s8857_s23 }
 0x796   : > { %s11750_s28 = sshll.u32 %s12167_s7, 8  ;;  %s16879_s9 = sand.u32 1, %s12167_s7  }
 0x797   : > { %s16290_s12 = scalar_lea.sflag [#allocation12], %s16879_s9 }
 0x79b   : > { %s16878_s22 = smov %s16877_s29  ;;  %s8855_s11 = scalar_lea.hbm %s16877_s29, %s11356_s10 }
 0x79c   : > { %s8859_s3 = sshll.u32 %s8855_s11, 4  ;;  %s11875_s20 = scalar_lea.hbm %s16878_s22, 8  ;;  %s8860_s3 = int_to_ptr.hbm [resolvable:$true] %s8859_s3 }
 0x79d   : > { %s11869_s13 = sshra.s32 %s8860_s3, 4  ;;  %s11870_s13 = int_to_ptr.hbm [resolvable:$true] %s11869_s13 }
 0x79e   : > { %s11871_s14 = scalar_lea.hbm %s11870_s13, 4  ;;  %p11876_p9 = scmp.lt.s32.totalorder %s11870_s13, %s16878_s22 }
 0x79f   : > { %p11872_p4 = scmp.ne.s32.totalorder %s11870_s13, %s11871_s14  ;;  %p11877_p10 = scmp.lt.s32.totalorder %s11875_s20, %s11871_s14 }
 0x7a1   : > { %p11873_p7 = pnand %p11872_p4, %p12186_p5  ;;  %p11878_p11 = por %p11877_p10, %p11876_p9 }
 0x7a3   : > { %p11874_p8 = pneg %p11873_p7 }
 0x7a5   : > { %p11879_p12 = pnand %p11878_p11, %p11874_p8 }
 0x7a7   : > { %11882 = shalt.err (!%p11879_p12)
}
 0x7a8   : > { %11756 = dma.vmem_to_hbm [thread:$0]  (%p12186_p5), %s8858_s23, 64, %s8860_s3, %s16290_s12  }
 0x7a9   : > { %s16880_s29 = sld [smem:[#allocation113_spill]]  ;;  %s8806_s4 = sshll.u32 %s15124_s21, 4  ;;  %s8807_s4 = int_to_ptr.vmem [resolvable:$true] %s8806_s4 }
 0x7aa   : > { %s11752_s13 = sshll.u32 %s12167_s7, 4  ;;  %s8775_s14 = scalar_lea.sflag [#allocation7], %s15102_s1 }
 0x7af   : > { %s16881_s11 = smov %s16880_s29  ;;  %s8805_s8 = scalar_lea.hbm %s16880_s29, %s11750_s28 }
 0x7b0   : > { %s8808_s10 = sshll.u32 %s8805_s8, 4  ;;  %s11903_s23 = scalar_lea.hbm %s16881_s11, 512  ;;  %s8809_s10 = int_to_ptr.hbm [resolvable:$true] %s8808_s10 }
 0x7b1   : > { %s11897_s20 = sshra.s32 %s8809_s10, 4  ;;  %s11898_s20 = int_to_ptr.hbm [resolvable:$true] %s11897_s20 }
 0x7b2   : > { %s11899_s24 = scalar_lea.hbm %s11898_s20, 256  ;;  %p11904_p2 = scmp.lt.s32.totalorder %s11898_s20, %s16881_s11 }
 0x7b3   : > { %p11900_p13 = scmp.ne.s32.totalorder %s11898_s20, %s11899_s24  ;;  %p11905_p3 = scmp.lt.s32.totalorder %s11903_s23, %s11899_s24 }
 0x7b5   : > { %p11901_p0 = pnand %p11900_p13, %p12186_p5  ;;  %p11906_p4 = por %p11905_p3, %p11904_p2 }
 0x7b7   : > { %p11902_p1 = pneg %p11901_p0 }
 0x7b9   : > { %p11907_p7 = pnand %p11906_p4, %p11902_p1 }
 0x7bb   : > { %11910 = shalt.err (!%p11907_p7)
}
 0x7bc   : > { %s16882_s21 = smov 8   ;;  %s16883_s28 = smov 128  }
 0x7bd   : > { %11753 = dma.vmem_to_hbm [thread:$0]  (%p12186_p5), %s8807_s4, 4096, %s8809_s10, %s8775_s14, %s16883_s28, %s16883_s28, %s16882_s21  }
 0x7be   : > { %s16884_s5 = sshll.u32 %s15625_s30, 4  ;;  %s16885_s29 = sld [smem:[#allocation115_spill]]  ;;  %s8841_s5 = int_to_ptr.vmem [resolvable:$true] %s16884_s5 }
 0x7c4   : > { %s16886_s8 = smov %s16885_s29  ;;  %s8839_s15 = scalar_lea.hbm %s16885_s29, %s11752_s13 }
 0x7c5   : > { %s8842_s3 = sshll.u32 %s8839_s15, 4  ;;  %s11931_s11 = scalar_lea.hbm %s16886_s8, 32  ;;  %s8843_s3 = int_to_ptr.hbm [resolvable:$true] %s8842_s3 }
 0x7c6   : > { %s11925_s20 = sshra.s32 %s8843_s3, 4  ;;  %s11926_s20 = int_to_ptr.hbm [resolvable:$true] %s11925_s20 }
 0x7c7   : > { %s11927_s24 = scalar_lea.hbm %s11926_s20, 16  ;;  %p11932_p11 = scmp.lt.s32.totalorder %s11926_s20, %s16886_s8 }
 0x7c8   : > { %p11928_p8 = scmp.ne.s32.totalorder %s11926_s20, %s11927_s24  ;;  %p11933_p12 = scmp.lt.s32.totalorder %s11931_s11, %s11927_s24 }
 0x7ca   : > { %p11929_p9 = pnand %p11928_p8, %p12186_p5  ;;  %p11934_p13 = por %p11933_p12, %p11932_p11 }
 0x7cc   : > { %p11930_p10 = pneg %p11929_p9 }
 0x7ce   : > { %p11935_p0 = pnand %p11934_p13, %p11930_p10 }
 0x7d0   : > { %11938 = shalt.err (!%p11935_p0)
}
 0x7d1   : > { %11755 = dma.vmem_to_hbm [thread:$0]  (%p12186_p5), %s8841_s5, 256, %s8843_s3, %s16267_s27, %s16883_s28, %s16883_s28, %s16882_s21  }
 0x7d2   : > { %s16887_s13 = sld [smem:[#allocation117_spill]]  ;;  %s821_s0 = scalar_lea.vmem [#allocation13], %s15102_s1 }
 0x7d3   : > { %s8870_s6 = sshll.u32 %s821_s0, 4  ;;  %s8871_s6 = int_to_ptr.vmem [resolvable:$true] %s8870_s6 }
 0x7d8   : > { %s8868_s14 = scalar_lea.hbm %s16887_s13, %s12167_s7  ;;  %s11959_s21 = scalar_lea.hbm %s16887_s13, 2 }
 0x7d9   : > { %s8872_s11 = sshll.u32 %s8868_s14, 4  ;;  %s8873_s11 = int_to_ptr.hbm [resolvable:$true] %s8872_s11 }
 0x7da   : > { %s11953_s29 = sshra.s32 %s8873_s11, 4  ;;  %s11954_s29 = int_to_ptr.hbm [resolvable:$true] %s11953_s29 }
 0x7db   : > { %s11955_s20 = scalar_lea.hbm %s11954_s29, 1  ;;  %p11960_p4 = scmp.lt.s32.totalorder %s11954_s29, %s16887_s13 }
 0x7dc   : > { %p11956_p1 = scmp.ne.s32.totalorder %s11954_s29, %s11955_s20  ;;  %p11961_p7 = scmp.lt.s32.totalorder %s11959_s21, %s11955_s20 }
 0x7de   : > { %p11957_p2 = pnand %p11956_p1, %p12186_p5  ;;  %p11962_p8 = por %p11961_p7, %p11960_p4 }
 0x7e0   : > { %p11958_p3 = pneg %p11957_p2 }
 0x7e2   : > { %p11963_p9 = pnand %p11962_p8, %p11958_p3 }
 0x80c   : > { %v8727_v25 = vpop.f32.mrf.mxu1 }
 0x80d   : > { %8773 = vst [vmem:[%s821_s0] sm:$0x1] %v8727_v25 }
 0x80e   : > { %11966 = shalt.err (!%p11963_p9)
}
 0x80f   : > { %11757 = dma.vmem_to_hbm [thread:$0]  (%p12186_p5), %s8871_s6, 16, %s8873_s11, %s16290_s12  }
 0x810 PF: > { %s16888_s1 = sld [smem:[#allocation19_spill]] }
 0x811   : > { %s16889_s5 = sld [smem:[#allocation17_spill]] }
 0x816   : > { %p11779_p10 = scmp.ge.s32.totalorder %s16888_s1, 2 }
 0x817   : > { %s8884_s23 = sand.u32 1, %s16889_s5  }
 0x818   : > { %p11764_p11 = pnand %p11779_p10, %p12190_p6  ;;  %s8885_s9 = scalar_lea.sflag [#allocation7], %s8884_s23 }
 0x81a   : > { %p11765_p12 = pneg %p11764_p11 }
 0x81c   : > { %11984 = dma.done.wait (%p11765_p12), %s8885_s9, 4096  }
 0x81d   : > { %11986 = vsyncadd (%p11765_p12), %s8885_s9, 4294963200  ;;  %s16891_s4 = sadd.s32 4294967294, %s16888_s1  }
 0x81e   : > { %s8894_s30 = sand.u32 1, %s16891_s4  }
 0x81f   : > { %s8895_s15 = scalar_lea.sflag [#allocation9], %s8894_s30 }
 0x820   : > { %11988 = dma.done.wait (%p11765_p12), %s8895_s15, 1280  }
 0x821   : > { %11990 = vsyncadd (%p11765_p12), %s8895_s15, 4294966016  ;;  %s8915_s25 = scalar_lea.sflag [#allocation12], %s8894_s30 }
 0x822   : > { %11992 = dma.done.wait (%p11765_p12), %s8915_s25, 80  }
 0x823   : > { %11994 = vsyncadd (%p11765_p12), %s8915_s25, 4294967216  ;;  %s16892_s30 = sld [smem:[#allocation20_spill]]  ;;  %s16895_s29 = smov %s12001_s2 }
 0x824   : > { %s16893_s12 = sld [smem:[#allocation18_spill]] }
 0x825   : > { %s16894_s6 = sld [smem:[#allocation21_spill]] }
 0x829   : > { %p42_p5 = scmp.ge.s32.totalorder %s16892_s30, 4  }
 0x82a   : > { %s16896_s2 = smov %s16893_s12 }
 0x82b   :  { %44 = sbr.rel (!%p42_p5) target bundleno = 30 (0x1e), region = 340 }
 0x830   :  { %8930 = vsyncpa [#allocation7], 1 }
 0x831   :  { %8932 = vsyncpa [#allocation7 + $0x1], 1 }
 0x832   :  { %8933 = vsyncpa [#allocation9], 1 }
 0x833   :  { %8935 = vsyncpa [#allocation9 + $0x1], 1 }
 0x834   :  { %8936 = vsyncpa [#allocation12], 1 }
 0x835   :  { %8938 = vsyncpa [#allocation12 + $0x1], 1 }

</bundles_post_ra>
